<compile_context>
chip_gen: v7x
topology: tpu7x:2x2x1
jax: 0.10.0
libtpu: 0.0.40
codegen_flags: <defaults>
</compile_context>

<pallas_src>
import numpy as np
import jax
import jax.numpy as jnp
from jax import lax
from jax.experimental import pallas as pl
from jax.experimental.pallas import tpu as pltpu

VMEM_LIMIT_BYTES = 48 * 1024 * 1024

C1P = 32                 # conv1 out-channels padded 20 -> 32
C2P = 64                 # conv2 out-channels padded 50 -> 64
HIDP = 512               # fc1 hidden padded 500 -> 512
NOUT = 128               # fc2 outputs padded 10 -> 128 (lane-dense store)
L1 = 4 * C1P * 12        # conv1 matmul lanes: (pool-corner, co, pooled col)
L2 = 4 * C2P * 4         # conv2 matmul lanes: (pool-corner, co, pooled col)
NEG = -1.0e9             # pad-logit bias (exp underflows to exactly 0)


def _round_up(x, m):
    return ((x + m - 1) // m) * m


# ------------------------- fused Pallas kernel -------------------------

def mnist_fused_kernel(x_ref, a1_ref, b1_ref, a2_ref, b2_ref,
                       w3_ref, b3_ref, w4_ref, b4_ref, o_ref):
    n = o_ref.shape[0]                       # images in this batch block
    xall = x_ref[...]                        # (4, 7, n, 28) bf16, rows grouped by (row mod 4)

    # ---- conv1 (5x5, Cin=1) + bias + ReLU + 2x2/2 max-pool ----
    # One matmul per input-row offset r against a banded weight matrix.
    # Rows of the result are (pooled-row j, image i); the pooled columns and
    # the 4 pool corners live on lanes, so pooling is 3 max's of lane quarters.
    h1 = []                                  # per output-row parity: (6n, 384) bf16
    for par in range(2):
        acc = None
        for r in range(6):
            q = 2 * par + r                  # input row = 4*j + q
            xs = xall[q % 4, q // 4:q // 4 + 6]          # (6, n, 28)
            xs = xs.reshape(6 * n, 28)
            d = jnp.dot(xs, a1_ref[r], preferred_element_type=jnp.float32)
            acc = d if acc is None else acc + d          # (6n, L1) f32
        act = jnp.maximum(acc + b1_ref[...], 0.0)
        qw = C1P * 12
        pooled = jnp.maximum(jnp.maximum(act[:, 0:qw], act[:, qw:2 * qw]),
                             jnp.maximum(act[:, 2 * qw:3 * qw], act[:, 3 * qw:4 * qw]))
        h1.append(pooled.astype(jnp.bfloat16))           # lanes = (co, pooled col)

    # ---- conv2 (5x5, 20->50) + bias + ReLU + 2x2/2 max-pool ----
    # Same banded-matmul scheme; the conv1-row offset r2 picks a parity and a
    # contiguous, 8-aligned row slice of h1.
    acc2 = None
    for r2 in range(6):
        src = h1[r2 % 2]
        j0 = r2 // 2
        lhs = src[j0 * n:(j0 + 4) * n, :]                # (4n, 384)
        d = jnp.dot(lhs, a2_ref[r2], preferred_element_type=jnp.float32)
        acc2 = d if acc2 is None else acc2 + d           # (4n, L2) f32
    act2 = jnp.maximum(acc2 + b2_ref[...], 0.0)
    qw = C2P * 4
    h2 = jnp.maximum(jnp.maximum(act2[:, 0:qw], act2[:, qw:2 * qw]),
                     jnp.maximum(act2[:, 2 * qw:3 * qw], act2[:, 3 * qw:4 * qw]))
    h2 = h2.astype(jnp.bfloat16)                         # (4n, 256), rows = (pooled row, image)

    # ---- fc1 + ReLU: sum of 4 matmuls, one per pooled conv2 row ----
    acc3 = None
    for ph2 in range(4):
        d = jnp.dot(h2[ph2 * n:(ph2 + 1) * n, :], w3_ref[ph2],
                    preferred_element_type=jnp.float32)  # (n, HIDP)
        acc3 = d if acc3 is None else acc3 + d
    a3 = jnp.maximum(acc3 + b3_ref[...], 0.0).astype(jnp.bfloat16)

    # ---- fc2 + log_softmax (pad lanes carry -1e9 bias -> exp == 0) ----
    logits = jnp.dot(a3, w4_ref[...], preferred_element_type=jnp.float32) + b4_ref[...]
    m = jnp.max(logits, axis=1, keepdims=True)
    s = logits - m
    lse = jnp.log(jnp.sum(jnp.exp(s), axis=1, keepdims=True))
    o_ref[...] = s - lse


# ------------------------- wrapper -------------------------

def mnist_exnet_forward(kp, x, *, imgs_per_block=64):
    """x: (B, 1, 28, 28) f32 NCHW.  Returns log_softmax logits (B, 10) f32."""
    B = x.shape[0]
    xi = x.reshape(B, 28, 28).astype(jnp.bfloat16)
    # Group image rows by (row mod 4) with the batch dim third, so every
    # row-offset slice inside the kernel is contiguous and 8-aligned:
    #   x_g[m, t, i, :] = x[i, 4*t + m, :]
    x_g = xi.reshape(B, 7, 4, 28).transpose(2, 1, 0, 3)          # (4, 7, B, 28)

    n = _round_up(min(imgs_per_block, pl.cdiv(B, 2)), 8)         # images per grid step
    grid = max(2, pl.cdiv(B, n))                                 # >= 2 steps (v7x megacore)
    Bp = grid * n
    if Bp != B:
        x_g = jnp.pad(x_g, ((0, 0), (0, 0), (0, Bp - B), (0, 0)))

    out = pl.pallas_call(
        mnist_fused_kernel,
        out_shape=jax.ShapeDtypeStruct((Bp, NOUT), jnp.float32),
        grid_spec=pltpu.PrefetchScalarGridSpec(
            num_scalar_prefetch=0,
            grid=(grid,),
            in_specs=[
                pl.BlockSpec((4, 7, n, 28), lambda i: (0, 0, i, 0)),   # images (streamed)
                pl.BlockSpec((6, 28, L1), lambda i: (0, 0, 0)),        # conv1 banded weights
                pl.BlockSpec((1, L1), lambda i: (0, 0)),               # conv1 bias (tiled)
                pl.BlockSpec((6, C1P * 12, L2), lambda i: (0, 0, 0)),  # conv2 banded weights
                pl.BlockSpec((1, L2), lambda i: (0, 0)),               # conv2 bias (tiled)
                pl.BlockSpec((4, C2P * 4, HIDP), lambda i: (0, 0, 0)), # fc1 weights (4 row-blocks)
                pl.BlockSpec((1, HIDP), lambda i: (0, 0)),             # fc1 bias
                pl.BlockSpec((HIDP, NOUT), lambda i: (0, 0)),          # fc2 weights
                pl.BlockSpec((1, NOUT), lambda i: (0, 0)),             # fc2 bias (-1e9 pads)
            ],
            out_specs=pl.BlockSpec((n, NOUT), lambda i: (i, 0)),
        ),
        compiler_params=pltpu.CompilerParams(
            dimension_semantics=("parallel",),
            vmem_limit_bytes=VMEM_LIMIT_BYTES,
        ),
    )(x_g, kp["a1"], kp["b1"], kp["a2"], kp["b2"],
      kp["w3"], kp["b3"], kp["w4"], kp["b4"])
    return out[:B, :10]


# ------------------------- params -------------------------

def init_params(key):
    """Random params in PyTorch layouts (Conv2d: (Cout,Cin,k,k); Linear: (out,in))."""
    ks = jax.random.split(key, 8)

    def nrm(k, shape, scale):
        return (scale * jax.random.normal(k, shape)).astype(jnp.float32)

    return dict(
        conv1_w=nrm(ks[0], (20, 1, 5, 5), 0.10),
        conv1_b=nrm(ks[1], (20,), 0.10),
        conv2_w=nrm(ks[2], (50, 20, 5, 5), 0.05),
        conv2_b=nrm(ks[3], (50,), 0.05),
        fc1_w=nrm(ks[4], (500, 4 * 4 * 50), 0.03),
        fc1_b=nrm(ks[5], (500,), 0.03),
        fc2_w=nrm(ks[6], (10, 500), 0.05),
        fc2_b=nrm(ks[7], (10,), 0.05),
    )


def prepare_params(p):
    """One-time expansion of PyTorch-layout weights into the banded / padded
    layouts the fused kernel consumes (done at init, outside the forward)."""
    w1 = np.asarray(p["conv1_w"], np.float32)   # (20, 1, 5, 5)
    b1 = np.asarray(p["conv1_b"], np.float32)
    w2 = np.asarray(p["conv2_w"], np.float32)   # (50, 20, 5, 5)
    b2 = np.asarray(p["conv2_b"], np.float32)
    fw1 = np.asarray(p["fc1_w"], np.float32)    # (500, 800)
    fb1 = np.asarray(p["fc1_b"], np.float32)
    fw2 = np.asarray(p["fc2_w"], np.float32)    # (10, 500)
    fb2 = np.asarray(p["fc2_b"], np.float32)

    # conv1 banded matrices A1[r]: (28, L1); lane = ((rh*2+rw)*C1P + co)*12 + pw.
    # A1[r, win, rh, rw, co, pw] = w1[co, 0, r-rh, win-(2*pw+rw)] when valid.
    A1 = np.zeros((6, 28, 4, C1P, 12), np.float32)
    for r in range(6):
        for rh in range(2):
            kh = r - rh
            if not (0 <= kh <= 4):
                continue
            for rw in range(2):
                c = rh * 2 + rw
                for pw in range(12):
                    for kw in range(5):
                        win = 2 * pw + rw + kw
                        A1[r, win, c, :20, pw] = w1[:, 0, kh, kw]
    A1 = A1.reshape(6, 28, L1)
    b1t = np.zeros((4, C1P, 12), np.float32)
    b1t[:, :20, :] = b1[None, :, None]
    b1t = b1t.reshape(1, L1)

    # conv2 banded matrices A2[r2]: (C1P*12, L2);
    # in-lane = co1*12 + pw1, out-lane = ((sh*2+sw)*C2P + co2)*4 + pw2,
    # value = w2[co2, co1, r2-sh, pw1-(2*pw2+sw)] when valid.
    A2 = np.zeros((6, C1P, 12, 4, C2P, 4), np.float32)
    for r2 in range(6):
        for sh in range(2):
            kh = r2 - sh
            if not (0 <= kh <= 4):
                continue
            for sw in range(2):
                c = sh * 2 + sw
                for pw2 in range(4):
                    for kw in range(5):
                        pw1 = 2 * pw2 + sw + kw
                        A2[r2, :20, pw1, c, :50, pw2] = w2[:, :, kh, kw].T
    A2 = A2.reshape(6, C1P * 12, L2)
    b2t = np.zeros((4, C2P, 4), np.float32)
    b2t[:, :50, :] = b2[None, :, None]
    b2t = b2t.reshape(1, L2)

    # fc1: PyTorch features are NCHW-flattened (ci, h, w); the kernel consumes
    # one (co2, pw2)-laned row block per pooled conv2 row ph2.
    w3 = np.zeros((4, C2P, 4, HIDP), np.float32)
    f = fw1.reshape(500, 50, 4, 4)                               # (hid, ci, h, w)
    w3[:, :50, :, :500] = np.transpose(f, (2, 1, 3, 0))          # (h, ci, w, hid)
    w3 = w3.reshape(4, C2P * 4, HIDP)
    b3 = np.zeros((1, HIDP), np.float32)
    b3[0, :500] = fb1

    # fc2: pad outputs 10 -> 128 with zero weights and -1e9 bias so the
    # in-kernel log_softmax over 128 lanes ignores the pads.
    w4 = np.zeros((HIDP, NOUT), np.float32)
    w4[:500, :10] = fw2.T
    b4 = np.full((1, NOUT), NEG, np.float32)
    b4[0, :10] = fb2

    bf = lambda a: jnp.asarray(a, jnp.bfloat16)
    return dict(a1=bf(A1), b1=jnp.asarray(b1t),
                a2=bf(A2), b2=jnp.asarray(b2t),
                w3=bf(w3), b3=jnp.asarray(b3),
                w4=bf(w4), b4=jnp.asarray(b4))


# ------------------------- pure-JAX reference (for the self-check) -------------------------

def reference_forward(p, x):
    """Reference with the same bf16 quantization points as the kernel."""
    bf = lambda a: a.astype(jnp.bfloat16).astype(jnp.float32)
    dn = ("NCHW", "OIHW", "NCHW")
    y = lax.conv_general_dilated(bf(x), bf(p["conv1_w"]), (1, 1), "VALID",
                                 dimension_numbers=dn)
    y = jnp.maximum(y + p["conv1_b"][None, :, None, None], 0.0)
    y = lax.reduce_window(y, -jnp.inf, lax.max, (1, 1, 2, 2), (1, 1, 2, 2), "VALID")
    y = lax.conv_general_dilated(bf(y), bf(p["conv2_w"]), (1, 1), "VALID",
                                 dimension_numbers=dn)
    y = jnp.maximum(y + p["conv2_b"][None, :, None, None], 0.0)
    y = lax.reduce_window(y, -jnp.inf, lax.max, (1, 1, 2, 2), (1, 1, 2, 2), "VALID")
    y = bf(y).reshape(x.shape[0], 4 * 4 * 50)
    y = jnp.maximum(y @ bf(p["fc1_w"]).T + p["fc1_b"], 0.0)
    logits = bf(y) @ bf(p["fc2_w"]).T + p["fc2_b"]
    return logits - jax.scipy.special.logsumexp(logits, axis=1, keepdims=True)


if __name__ == "__main__":
    key = jax.random.PRNGKey(0)
    kp_key, kx = jax.random.split(key)
    torch_params = init_params(kp_key)
    params = prepare_params(torch_params)

    # MNIST-hardcoded dims require 28x28 spatial; small batch of 2.
    x = jax.random.normal(kx, (2, 1, 28, 28), dtype=jnp.float32)

    out = jax.jit(mnist_exnet_forward)(params, x)
    out = jax.block_until_ready(out)
    assert out.shape == (2, 10)
    assert bool(jnp.all(jnp.isfinite(out)))
    assert bool(jnp.allclose(jnp.exp(out).sum(axis=-1), 1.0, atol=1e-3))

    ref = jax.jit(reference_forward)(torch_params, x)
    ref = jax.block_until_ready(ref)
    assert bool(jnp.allclose(out, ref, atol=5e-3)), float(jnp.max(jnp.abs(out - ref)))

    print("KERNEL_OK")
</pallas_src>

<mosaic_0001>
module attributes {stable_mosaic.version = 11 : i64} {
  func.func @mnist_fused_kernel(%arg0: i32, %arg1: memref<4x7x8x28xbf16, #tpu.memory_space<vmem>>, %arg2: memref<6x28x1536xbf16, #tpu.memory_space<vmem>>, %arg3: memref<1x1536xf32, #tpu.memory_space<vmem>>, %arg4: memref<6x384x1024xbf16, #tpu.memory_space<vmem>>, %arg5: memref<1x1024xf32, #tpu.memory_space<vmem>>, %arg6: memref<4x256x512xbf16, #tpu.memory_space<vmem>>, %arg7: memref<1x512xf32, #tpu.memory_space<vmem>>, %arg8: memref<512x128xbf16, #tpu.memory_space<vmem>>, %arg9: memref<1x128xf32, #tpu.memory_space<vmem>>, %arg10: memref<8x128xf32, #tpu.memory_space<vmem>>) attributes {dimension_semantics = [#tpu.dimension_semantics<parallel>], iteration_bounds = array<i64: 2>, scalar_prefetch = 0 : i64, scratch_operands = 0 : i64, tpu.core_type = #tpu.core_type<tc>, window_params = [{transform_indices = @transform_0, window_bounds = array<i64: 4, 7, 8, 28>}, {pipeline_mode = #tpu.pipeline_mode<synchronous>, transform_indices = @transform_1, window_bounds = array<i64: 6, 28, 1536>}, {pipeline_mode = #tpu.pipeline_mode<synchronous>, transform_indices = @transform_2, window_bounds = array<i64: 1, 1536>}, {pipeline_mode = #tpu.pipeline_mode<synchronous>, transform_indices = @transform_3, window_bounds = array<i64: 6, 384, 1024>}, {pipeline_mode = #tpu.pipeline_mode<synchronous>, transform_indices = @transform_4, window_bounds = array<i64: 1, 1024>}, {pipeline_mode = #tpu.pipeline_mode<synchronous>, transform_indices = @transform_5, window_bounds = array<i64: 4, 256, 512>}, {pipeline_mode = #tpu.pipeline_mode<synchronous>, transform_indices = @transform_6, window_bounds = array<i64: 1, 512>}, {pipeline_mode = #tpu.pipeline_mode<synchronous>, transform_indices = @transform_7, window_bounds = array<i64: 512, 128>}, {pipeline_mode = #tpu.pipeline_mode<synchronous>, transform_indices = @transform_8, window_bounds = array<i64: 1, 128>}, {transform_indices = @transform_9, window_bounds = array<i64: 8, 128>}]} {
    %c0 = arith.constant 0 : index
    %c0_0 = arith.constant 0 : index
    %c0_1 = arith.constant 0 : index
    %c0_2 = arith.constant 0 : index
    %0 = vector.load %arg1[%c0, %c0_0, %c0_1, %c0_2] : memref<4x7x8x28xbf16, #tpu.memory_space<vmem>>, vector<4x7x8x28xbf16>
    %1 = vector.extract_strided_slice %0 {offsets = [0, 0, 0, 0], sizes = [1, 6, 8, 28], strides = [1, 1, 1, 1]} : vector<4x7x8x28xbf16> to vector<1x6x8x28xbf16>
    %2 = vector.shape_cast %1 : vector<1x6x8x28xbf16> to vector<6x8x28xbf16>
    %3 = vector.shape_cast %2 : vector<6x8x28xbf16> to vector<48x28xbf16>
    %c0_3 = arith.constant 0 : index
    %c0_4 = arith.constant 0 : index
    %c0_5 = arith.constant 0 : index
    %4 = vector.load %arg2[%c0_3, %c0_4, %c0_5] : memref<6x28x1536xbf16, #tpu.memory_space<vmem>>, vector<1x28x1536xbf16>
    %5 = vector.shape_cast %4 : vector<1x28x1536xbf16> to vector<28x1536xbf16>
    %cst = arith.constant dense<0.000000e+00> : vector<48x1536xf32>
    %6 = tpu.matmul %3, %5, %cst {dimension_numbers = #tpu.dot_dimension_numbers<[1], [0], [0], [1], [0, 0, 1, 1], [], []>} : vector<48x28xbf16>, vector<28x1536xbf16>, vector<48x1536xf32> -> vector<48x1536xf32>
    %7 = vector.extract_strided_slice %0 {offsets = [1, 0, 0, 0], sizes = [1, 6, 8, 28], strides = [1, 1, 1, 1]} : vector<4x7x8x28xbf16> to vector<1x6x8x28xbf16>
    %8 = vector.shape_cast %7 : vector<1x6x8x28xbf16> to vector<6x8x28xbf16>
    %9 = vector.shape_cast %8 : vector<6x8x28xbf16> to vector<48x28xbf16>
    %c1 = arith.constant 1 : index
    %c0_6 = arith.constant 0 : index
    %c0_7 = arith.constant 0 : index
    %10 = vector.load %arg2[%c1, %c0_6, %c0_7] : memref<6x28x1536xbf16, #tpu.memory_space<vmem>>, vector<1x28x1536xbf16>
    %11 = vector.shape_cast %10 : vector<1x28x1536xbf16> to vector<28x1536xbf16>
    %cst_8 = arith.constant dense<0.000000e+00> : vector<48x1536xf32>
    %12 = tpu.matmul %9, %11, %cst_8 {dimension_numbers = #tpu.dot_dimension_numbers<[1], [0], [0], [1], [0, 0, 1, 1], [], []>} : vector<48x28xbf16>, vector<28x1536xbf16>, vector<48x1536xf32> -> vector<48x1536xf32>
    %13 = arith.addf %6, %12 : vector<48x1536xf32>
    %14 = vector.extract_strided_slice %0 {offsets = [2, 0, 0, 0], sizes = [1, 6, 8, 28], strides = [1, 1, 1, 1]} : vector<4x7x8x28xbf16> to vector<1x6x8x28xbf16>
    %15 = vector.shape_cast %14 : vector<1x6x8x28xbf16> to vector<6x8x28xbf16>
    %16 = vector.shape_cast %15 : vector<6x8x28xbf16> to vector<48x28xbf16>
    %c2 = arith.constant 2 : index
    %c0_9 = arith.constant 0 : index
    %c0_10 = arith.constant 0 : index
    %17 = vector.load %arg2[%c2, %c0_9, %c0_10] : memref<6x28x1536xbf16, #tpu.memory_space<vmem>>, vector<1x28x1536xbf16>
    %18 = vector.shape_cast %17 : vector<1x28x1536xbf16> to vector<28x1536xbf16>
    %cst_11 = arith.constant dense<0.000000e+00> : vector<48x1536xf32>
    %19 = tpu.matmul %16, %18, %cst_11 {dimension_numbers = #tpu.dot_dimension_numbers<[1], [0], [0], [1], [0, 0, 1, 1], [], []>} : vector<48x28xbf16>, vector<28x1536xbf16>, vector<48x1536xf32> -> vector<48x1536xf32>
    %20 = arith.addf %13, %19 : vector<48x1536xf32>
    %21 = vector.extract_strided_slice %0 {offsets = [3, 0, 0, 0], sizes = [1, 6, 8, 28], strides = [1, 1, 1, 1]} : vector<4x7x8x28xbf16> to vector<1x6x8x28xbf16>
    %22 = vector.shape_cast %21 : vector<1x6x8x28xbf16> to vector<6x8x28xbf16>
    %23 = vector.shape_cast %22 : vector<6x8x28xbf16> to vector<48x28xbf16>
    %c3 = arith.constant 3 : index
    %c0_12 = arith.constant 0 : index
    %c0_13 = arith.constant 0 : index
    %24 = vector.load %arg2[%c3, %c0_12, %c0_13] : memref<6x28x1536xbf16, #tpu.memory_space<vmem>>, vector<1x28x1536xbf16>
    %25 = vector.shape_cast %24 : vector<1x28x1536xbf16> to vector<28x1536xbf16>
    %cst_14 = arith.constant dense<0.000000e+00> : vector<48x1536xf32>
    %26 = tpu.matmul %23, %25, %cst_14 {dimension_numbers = #tpu.dot_dimension_numbers<[1], [0], [0], [1], [0, 0, 1, 1], [], []>} : vector<48x28xbf16>, vector<28x1536xbf16>, vector<48x1536xf32> -> vector<48x1536xf32>
    %27 = arith.addf %20, %26 : vector<48x1536xf32>
    %28 = vector.extract_strided_slice %0 {offsets = [0, 1, 0, 0], sizes = [1, 6, 8, 28], strides = [1, 1, 1, 1]} : vector<4x7x8x28xbf16> to vector<1x6x8x28xbf16>
    %29 = vector.shape_cast %28 : vector<1x6x8x28xbf16> to vector<6x8x28xbf16>
    %30 = vector.shape_cast %29 : vector<6x8x28xbf16> to vector<48x28xbf16>
    %c4 = arith.constant 4 : index
    %c0_15 = arith.constant 0 : index
    %c0_16 = arith.constant 0 : index
    %31 = vector.load %arg2[%c4, %c0_15, %c0_16] : memref<6x28x1536xbf16, #tpu.memory_space<vmem>>, vector<1x28x1536xbf16>
    %32 = vector.shape_cast %31 : vector<1x28x1536xbf16> to vector<28x1536xbf16>
    %cst_17 = arith.constant dense<0.000000e+00> : vector<48x1536xf32>
    %33 = tpu.matmul %30, %32, %cst_17 {dimension_numbers = #tpu.dot_dimension_numbers<[1], [0], [0], [1], [0, 0, 1, 1], [], []>} : vector<48x28xbf16>, vector<28x1536xbf16>, vector<48x1536xf32> -> vector<48x1536xf32>
    %34 = arith.addf %27, %33 : vector<48x1536xf32>
    %35 = vector.extract_strided_slice %0 {offsets = [1, 1, 0, 0], sizes = [1, 6, 8, 28], strides = [1, 1, 1, 1]} : vector<4x7x8x28xbf16> to vector<1x6x8x28xbf16>
    %36 = vector.shape_cast %35 : vector<1x6x8x28xbf16> to vector<6x8x28xbf16>
    %37 = vector.shape_cast %36 : vector<6x8x28xbf16> to vector<48x28xbf16>
    %c5 = arith.constant 5 : index
    %c0_18 = arith.constant 0 : index
    %c0_19 = arith.constant 0 : index
    %38 = vector.load %arg2[%c5, %c0_18, %c0_19] : memref<6x28x1536xbf16, #tpu.memory_space<vmem>>, vector<1x28x1536xbf16>
    %39 = vector.shape_cast %38 : vector<1x28x1536xbf16> to vector<28x1536xbf16>
    %cst_20 = arith.constant dense<0.000000e+00> : vector<48x1536xf32>
    %40 = tpu.matmul %37, %39, %cst_20 {dimension_numbers = #tpu.dot_dimension_numbers<[1], [0], [0], [1], [0, 0, 1, 1], [], []>} : vector<48x28xbf16>, vector<28x1536xbf16>, vector<48x1536xf32> -> vector<48x1536xf32>
    %41 = arith.addf %34, %40 : vector<48x1536xf32>
    %c0_21 = arith.constant 0 : index
    %c0_22 = arith.constant 0 : index
    %42 = vector.load %arg3[%c0_21, %c0_22] : memref<1x1536xf32, #tpu.memory_space<vmem>>, vector<1x1536xf32>
    %43 = vector.broadcast %42 : vector<1x1536xf32> to vector<48x1536xf32>
    %44 = arith.addf %41, %43 : vector<48x1536xf32>
    %cst_23 = arith.constant 0.000000e+00 : f32
    %45 = vector.broadcast %cst_23 : f32 to vector<48x1536xf32>
    %46 = arith.maximumf %44, %45 : vector<48x1536xf32>
    %47 = vector.extract_strided_slice %46 {offsets = [0, 0], sizes = [48, 384], strides = [1, 1]} : vector<48x1536xf32> to vector<48x384xf32>
    %48 = vector.extract_strided_slice %46 {offsets = [0, 384], sizes = [48, 384], strides = [1, 1]} : vector<48x1536xf32> to vector<48x384xf32>
    %49 = arith.maximumf %47, %48 : vector<48x384xf32>
    %50 = vector.extract_strided_slice %46 {offsets = [0, 768], sizes = [48, 384], strides = [1, 1]} : vector<48x1536xf32> to vector<48x384xf32>
    %51 = vector.extract_strided_slice %46 {offsets = [0, 1152], sizes = [48, 384], strides = [1, 1]} : vector<48x1536xf32> to vector<48x384xf32>
    %52 = arith.maximumf %50, %51 : vector<48x384xf32>
    %53 = arith.maximumf %49, %52 : vector<48x384xf32>
    %54 = arith.truncf %53 : vector<48x384xf32> to vector<48x384xbf16>
    %55 = vector.extract_strided_slice %0 {offsets = [2, 0, 0, 0], sizes = [1, 6, 8, 28], strides = [1, 1, 1, 1]} : vector<4x7x8x28xbf16> to vector<1x6x8x28xbf16>
    %56 = vector.shape_cast %55 : vector<1x6x8x28xbf16> to vector<6x8x28xbf16>
    %57 = vector.shape_cast %56 : vector<6x8x28xbf16> to vector<48x28xbf16>
    %c0_24 = arith.constant 0 : index
    %c0_25 = arith.constant 0 : index
    %c0_26 = arith.constant 0 : index
    %58 = vector.load %arg2[%c0_24, %c0_25, %c0_26] : memref<6x28x1536xbf16, #tpu.memory_space<vmem>>, vector<1x28x1536xbf16>
    %59 = vector.shape_cast %58 : vector<1x28x1536xbf16> to vector<28x1536xbf16>
    %cst_27 = arith.constant dense<0.000000e+00> : vector<48x1536xf32>
    %60 = tpu.matmul %57, %59, %cst_27 {dimension_numbers = #tpu.dot_dimension_numbers<[1], [0], [0], [1], [0, 0, 1, 1], [], []>} : vector<48x28xbf16>, vector<28x1536xbf16>, vector<48x1536xf32> -> vector<48x1536xf32>
    %61 = vector.extract_strided_slice %0 {offsets = [3, 0, 0, 0], sizes = [1, 6, 8, 28], strides = [1, 1, 1, 1]} : vector<4x7x8x28xbf16> to vector<1x6x8x28xbf16>
    %62 = vector.shape_cast %61 : vector<1x6x8x28xbf16> to vector<6x8x28xbf16>
    %63 = vector.shape_cast %62 : vector<6x8x28xbf16> to vector<48x28xbf16>
    %c1_28 = arith.constant 1 : index
    %c0_29 = arith.constant 0 : index
    %c0_30 = arith.constant 0 : index
    %64 = vector.load %arg2[%c1_28, %c0_29, %c0_30] : memref<6x28x1536xbf16, #tpu.memory_space<vmem>>, vector<1x28x1536xbf16>
    %65 = vector.shape_cast %64 : vector<1x28x1536xbf16> to vector<28x1536xbf16>
    %cst_31 = arith.constant dense<0.000000e+00> : vector<48x1536xf32>
    %66 = tpu.matmul %63, %65, %cst_31 {dimension_numbers = #tpu.dot_dimension_numbers<[1], [0], [0], [1], [0, 0, 1, 1], [], []>} : vector<48x28xbf16>, vector<28x1536xbf16>, vector<48x1536xf32> -> vector<48x1536xf32>
    %67 = arith.addf %60, %66 : vector<48x1536xf32>
    %68 = vector.extract_strided_slice %0 {offsets = [0, 1, 0, 0], sizes = [1, 6, 8, 28], strides = [1, 1, 1, 1]} : vector<4x7x8x28xbf16> to vector<1x6x8x28xbf16>
    %69 = vector.shape_cast %68 : vector<1x6x8x28xbf16> to vector<6x8x28xbf16>
    %70 = vector.shape_cast %69 : vector<6x8x28xbf16> to vector<48x28xbf16>
    %c2_32 = arith.constant 2 : index
    %c0_33 = arith.constant 0 : index
    %c0_34 = arith.constant 0 : index
    %71 = vector.load %arg2[%c2_32, %c0_33, %c0_34] : memref<6x28x1536xbf16, #tpu.memory_space<vmem>>, vector<1x28x1536xbf16>
    %72 = vector.shape_cast %71 : vector<1x28x1536xbf16> to vector<28x1536xbf16>
    %cst_35 = arith.constant dense<0.000000e+00> : vector<48x1536xf32>
    %73 = tpu.matmul %70, %72, %cst_35 {dimension_numbers = #tpu.dot_dimension_numbers<[1], [0], [0], [1], [0, 0, 1, 1], [], []>} : vector<48x28xbf16>, vector<28x1536xbf16>, vector<48x1536xf32> -> vector<48x1536xf32>
    %74 = arith.addf %67, %73 : vector<48x1536xf32>
    %75 = vector.extract_strided_slice %0 {offsets = [1, 1, 0, 0], sizes = [1, 6, 8, 28], strides = [1, 1, 1, 1]} : vector<4x7x8x28xbf16> to vector<1x6x8x28xbf16>
    %76 = vector.shape_cast %75 : vector<1x6x8x28xbf16> to vector<6x8x28xbf16>
    %77 = vector.shape_cast %76 : vector<6x8x28xbf16> to vector<48x28xbf16>
    %c3_36 = arith.constant 3 : index
    %c0_37 = arith.constant 0 : index
    %c0_38 = arith.constant 0 : index
    %78 = vector.load %arg2[%c3_36, %c0_37, %c0_38] : memref<6x28x1536xbf16, #tpu.memory_space<vmem>>, vector<1x28x1536xbf16>
    %79 = vector.shape_cast %78 : vector<1x28x1536xbf16> to vector<28x1536xbf16>
    %cst_39 = arith.constant dense<0.000000e+00> : vector<48x1536xf32>
    %80 = tpu.matmul %77, %79, %cst_39 {dimension_numbers = #tpu.dot_dimension_numbers<[1], [0], [0], [1], [0, 0, 1, 1], [], []>} : vector<48x28xbf16>, vector<28x1536xbf16>, vector<48x1536xf32> -> vector<48x1536xf32>
    %81 = arith.addf %74, %80 : vector<48x1536xf32>
    %82 = vector.extract_strided_slice %0 {offsets = [2, 1, 0, 0], sizes = [1, 6, 8, 28], strides = [1, 1, 1, 1]} : vector<4x7x8x28xbf16> to vector<1x6x8x28xbf16>
    %83 = vector.shape_cast %82 : vector<1x6x8x28xbf16> to vector<6x8x28xbf16>
    %84 = vector.shape_cast %83 : vector<6x8x28xbf16> to vector<48x28xbf16>
    %c4_40 = arith.constant 4 : index
    %c0_41 = arith.constant 0 : index
    %c0_42 = arith.constant 0 : index
    %85 = vector.load %arg2[%c4_40, %c0_41, %c0_42] : memref<6x28x1536xbf16, #tpu.memory_space<vmem>>, vector<1x28x1536xbf16>
    %86 = vector.shape_cast %85 : vector<1x28x1536xbf16> to vector<28x1536xbf16>
    %cst_43 = arith.constant dense<0.000000e+00> : vector<48x1536xf32>
    %87 = tpu.matmul %84, %86, %cst_43 {dimension_numbers = #tpu.dot_dimension_numbers<[1], [0], [0], [1], [0, 0, 1, 1], [], []>} : vector<48x28xbf16>, vector<28x1536xbf16>, vector<48x1536xf32> -> vector<48x1536xf32>
    %88 = arith.addf %81, %87 : vector<48x1536xf32>
    %89 = vector.extract_strided_slice %0 {offsets = [3, 1, 0, 0], sizes = [1, 6, 8, 28], strides = [1, 1, 1, 1]} : vector<4x7x8x28xbf16> to vector<1x6x8x28xbf16>
    %90 = vector.shape_cast %89 : vector<1x6x8x28xbf16> to vector<6x8x28xbf16>
    %91 = vector.shape_cast %90 : vector<6x8x28xbf16> to vector<48x28xbf16>
    %c5_44 = arith.constant 5 : index
    %c0_45 = arith.constant 0 : index
    %c0_46 = arith.constant 0 : index
    %92 = vector.load %arg2[%c5_44, %c0_45, %c0_46] : memref<6x28x1536xbf16, #tpu.memory_space<vmem>>, vector<1x28x1536xbf16>
    %93 = vector.shape_cast %92 : vector<1x28x1536xbf16> to vector<28x1536xbf16>
    %cst_47 = arith.constant dense<0.000000e+00> : vector<48x1536xf32>
    %94 = tpu.matmul %91, %93, %cst_47 {dimension_numbers = #tpu.dot_dimension_numbers<[1], [0], [0], [1], [0, 0, 1, 1], [], []>} : vector<48x28xbf16>, vector<28x1536xbf16>, vector<48x1536xf32> -> vector<48x1536xf32>
    %95 = arith.addf %88, %94 : vector<48x1536xf32>
    %c0_48 = arith.constant 0 : index
    %c0_49 = arith.constant 0 : index
    %96 = vector.load %arg3[%c0_48, %c0_49] : memref<1x1536xf32, #tpu.memory_space<vmem>>, vector<1x1536xf32>
    %97 = vector.broadcast %96 : vector<1x1536xf32> to vector<48x1536xf32>
    %98 = arith.addf %95, %97 : vector<48x1536xf32>
    %cst_50 = arith.constant 0.000000e+00 : f32
    %99 = vector.broadcast %cst_50 : f32 to vector<48x1536xf32>
    %100 = arith.maximumf %98, %99 : vector<48x1536xf32>
    %101 = vector.extract_strided_slice %100 {offsets = [0, 0], sizes = [48, 384], strides = [1, 1]} : vector<48x1536xf32> to vector<48x384xf32>
    %102 = vector.extract_strided_slice %100 {offsets = [0, 384], sizes = [48, 384], strides = [1, 1]} : vector<48x1536xf32> to vector<48x384xf32>
    %103 = arith.maximumf %101, %102 : vector<48x384xf32>
    %104 = vector.extract_strided_slice %100 {offsets = [0, 768], sizes = [48, 384], strides = [1, 1]} : vector<48x1536xf32> to vector<48x384xf32>
    %105 = vector.extract_strided_slice %100 {offsets = [0, 1152], sizes = [48, 384], strides = [1, 1]} : vector<48x1536xf32> to vector<48x384xf32>
    %106 = arith.maximumf %104, %105 : vector<48x384xf32>
    %107 = arith.maximumf %103, %106 : vector<48x384xf32>
    %108 = arith.truncf %107 : vector<48x384xf32> to vector<48x384xbf16>
    %109 = vector.extract_strided_slice %54 {offsets = [0, 0], sizes = [32, 384], strides = [1, 1]} : vector<48x384xbf16> to vector<32x384xbf16>
    %c0_51 = arith.constant 0 : index
    %c0_52 = arith.constant 0 : index
    %c0_53 = arith.constant 0 : index
    %110 = vector.load %arg4[%c0_51, %c0_52, %c0_53] : memref<6x384x1024xbf16, #tpu.memory_space<vmem>>, vector<1x384x1024xbf16>
    %111 = vector.shape_cast %110 : vector<1x384x1024xbf16> to vector<384x1024xbf16>
    %cst_54 = arith.constant dense<0.000000e+00> : vector<32x1024xf32>
    %112 = tpu.matmul %109, %111, %cst_54 {dimension_numbers = #tpu.dot_dimension_numbers<[1], [0], [0], [1], [0, 0, 1, 1], [], []>} : vector<32x384xbf16>, vector<384x1024xbf16>, vector<32x1024xf32> -> vector<32x1024xf32>
    %113 = vector.extract_strided_slice %108 {offsets = [0, 0], sizes = [32, 384], strides = [1, 1]} : vector<48x384xbf16> to vector<32x384xbf16>
    %c1_55 = arith.constant 1 : index
    %c0_56 = arith.constant 0 : index
    %c0_57 = arith.constant 0 : index
    %114 = vector.load %arg4[%c1_55, %c0_56, %c0_57] : memref<6x384x1024xbf16, #tpu.memory_space<vmem>>, vector<1x384x1024xbf16>
    %115 = vector.shape_cast %114 : vector<1x384x1024xbf16> to vector<384x1024xbf16>
    %cst_58 = arith.constant dense<0.000000e+00> : vector<32x1024xf32>
    %116 = tpu.matmul %113, %115, %cst_58 {dimension_numbers = #tpu.dot_dimension_numbers<[1], [0], [0], [1], [0, 0, 1, 1], [], []>} : vector<32x384xbf16>, vector<384x1024xbf16>, vector<32x1024xf32> -> vector<32x1024xf32>
    %117 = arith.addf %112, %116 : vector<32x1024xf32>
    %118 = vector.extract_strided_slice %54 {offsets = [8, 0], sizes = [32, 384], strides = [1, 1]} : vector<48x384xbf16> to vector<32x384xbf16>
    %c2_59 = arith.constant 2 : index
    %c0_60 = arith.constant 0 : index
    %c0_61 = arith.constant 0 : index
    %119 = vector.load %arg4[%c2_59, %c0_60, %c0_61] : memref<6x384x1024xbf16, #tpu.memory_space<vmem>>, vector<1x384x1024xbf16>
    %120 = vector.shape_cast %119 : vector<1x384x1024xbf16> to vector<384x1024xbf16>
    %cst_62 = arith.constant dense<0.000000e+00> : vector<32x1024xf32>
    %121 = tpu.matmul %118, %120, %cst_62 {dimension_numbers = #tpu.dot_dimension_numbers<[1], [0], [0], [1], [0, 0, 1, 1], [], []>} : vector<32x384xbf16>, vector<384x1024xbf16>, vector<32x1024xf32> -> vector<32x1024xf32>
    %122 = arith.addf %117, %121 : vector<32x1024xf32>
    %123 = vector.extract_strided_slice %108 {offsets = [8, 0], sizes = [32, 384], strides = [1, 1]} : vector<48x384xbf16> to vector<32x384xbf16>
    %c3_63 = arith.constant 3 : index
    %c0_64 = arith.constant 0 : index
    %c0_65 = arith.constant 0 : index
    %124 = vector.load %arg4[%c3_63, %c0_64, %c0_65] : memref<6x384x1024xbf16, #tpu.memory_space<vmem>>, vector<1x384x1024xbf16>
    %125 = vector.shape_cast %124 : vector<1x384x1024xbf16> to vector<384x1024xbf16>
    %cst_66 = arith.constant dense<0.000000e+00> : vector<32x1024xf32>
    %126 = tpu.matmul %123, %125, %cst_66 {dimension_numbers = #tpu.dot_dimension_numbers<[1], [0], [0], [1], [0, 0, 1, 1], [], []>} : vector<32x384xbf16>, vector<384x1024xbf16>, vector<32x1024xf32> -> vector<32x1024xf32>
    %127 = arith.addf %122, %126 : vector<32x1024xf32>
    %128 = vector.extract_strided_slice %54 {offsets = [16, 0], sizes = [32, 384], strides = [1, 1]} : vector<48x384xbf16> to vector<32x384xbf16>
    %c4_67 = arith.constant 4 : index
    %c0_68 = arith.constant 0 : index
    %c0_69 = arith.constant 0 : index
    %129 = vector.load %arg4[%c4_67, %c0_68, %c0_69] : memref<6x384x1024xbf16, #tpu.memory_space<vmem>>, vector<1x384x1024xbf16>
    %130 = vector.shape_cast %129 : vector<1x384x1024xbf16> to vector<384x1024xbf16>
    %cst_70 = arith.constant dense<0.000000e+00> : vector<32x1024xf32>
    %131 = tpu.matmul %128, %130, %cst_70 {dimension_numbers = #tpu.dot_dimension_numbers<[1], [0], [0], [1], [0, 0, 1, 1], [], []>} : vector<32x384xbf16>, vector<384x1024xbf16>, vector<32x1024xf32> -> vector<32x1024xf32>
    %132 = arith.addf %127, %131 : vector<32x1024xf32>
    %133 = vector.extract_strided_slice %108 {offsets = [16, 0], sizes = [32, 384], strides = [1, 1]} : vector<48x384xbf16> to vector<32x384xbf16>
    %c5_71 = arith.constant 5 : index
    %c0_72 = arith.constant 0 : index
    %c0_73 = arith.constant 0 : index
    %134 = vector.load %arg4[%c5_71, %c0_72, %c0_73] : memref<6x384x1024xbf16, #tpu.memory_space<vmem>>, vector<1x384x1024xbf16>
    %135 = vector.shape_cast %134 : vector<1x384x1024xbf16> to vector<384x1024xbf16>
    %cst_74 = arith.constant dense<0.000000e+00> : vector<32x1024xf32>
    %136 = tpu.matmul %133, %135, %cst_74 {dimension_numbers = #tpu.dot_dimension_numbers<[1], [0], [0], [1], [0, 0, 1, 1], [], []>} : vector<32x384xbf16>, vector<384x1024xbf16>, vector<32x1024xf32> -> vector<32x1024xf32>
    %137 = arith.addf %132, %136 : vector<32x1024xf32>
    %c0_75 = arith.constant 0 : index
    %c0_76 = arith.constant 0 : index
    %138 = vector.load %arg5[%c0_75, %c0_76] : memref<1x1024xf32, #tpu.memory_space<vmem>>, vector<1x1024xf32>
    %139 = vector.broadcast %138 : vector<1x1024xf32> to vector<32x1024xf32>
    %140 = arith.addf %137, %139 : vector<32x1024xf32>
    %cst_77 = arith.constant 0.000000e+00 : f32
    %141 = vector.broadcast %cst_77 : f32 to vector<32x1024xf32>
    %142 = arith.maximumf %140, %141 : vector<32x1024xf32>
    %143 = vector.extract_strided_slice %142 {offsets = [0, 0], sizes = [32, 256], strides = [1, 1]} : vector<32x1024xf32> to vector<32x256xf32>
    %144 = vector.extract_strided_slice %142 {offsets = [0, 256], sizes = [32, 256], strides = [1, 1]} : vector<32x1024xf32> to vector<32x256xf32>
    %145 = arith.maximumf %143, %144 : vector<32x256xf32>
    %146 = vector.extract_strided_slice %142 {offsets = [0, 512], sizes = [32, 256], strides = [1, 1]} : vector<32x1024xf32> to vector<32x256xf32>
    %147 = vector.extract_strided_slice %142 {offsets = [0, 768], sizes = [32, 256], strides = [1, 1]} : vector<32x1024xf32> to vector<32x256xf32>
    %148 = arith.maximumf %146, %147 : vector<32x256xf32>
    %149 = arith.maximumf %145, %148 : vector<32x256xf32>
    %150 = arith.truncf %149 : vector<32x256xf32> to vector<32x256xbf16>
    %151 = vector.extract_strided_slice %150 {offsets = [0, 0], sizes = [8, 256], strides = [1, 1]} : vector<32x256xbf16> to vector<8x256xbf16>
    %c0_78 = arith.constant 0 : index
    %c0_79 = arith.constant 0 : index
    %c0_80 = arith.constant 0 : index
    %152 = vector.load %arg6[%c0_78, %c0_79, %c0_80] : memref<4x256x512xbf16, #tpu.memory_space<vmem>>, vector<1x256x512xbf16>
    %153 = vector.shape_cast %152 : vector<1x256x512xbf16> to vector<256x512xbf16>
    %cst_81 = arith.constant dense<0.000000e+00> : vector<8x512xf32>
    %154 = tpu.matmul %151, %153, %cst_81 {dimension_numbers = #tpu.dot_dimension_numbers<[1], [0], [0], [1], [0, 0, 1, 1], [], []>} : vector<8x256xbf16>, vector<256x512xbf16>, vector<8x512xf32> -> vector<8x512xf32>
    %155 = vector.extract_strided_slice %150 {offsets = [8, 0], sizes = [8, 256], strides = [1, 1]} : vector<32x256xbf16> to vector<8x256xbf16>
    %c1_82 = arith.constant 1 : index
    %c0_83 = arith.constant 0 : index
    %c0_84 = arith.constant 0 : index
    %156 = vector.load %arg6[%c1_82, %c0_83, %c0_84] : memref<4x256x512xbf16, #tpu.memory_space<vmem>>, vector<1x256x512xbf16>
    %157 = vector.shape_cast %156 : vector<1x256x512xbf16> to vector<256x512xbf16>
    %cst_85 = arith.constant dense<0.000000e+00> : vector<8x512xf32>
    %158 = tpu.matmul %155, %157, %cst_85 {dimension_numbers = #tpu.dot_dimension_numbers<[1], [0], [0], [1], [0, 0, 1, 1], [], []>} : vector<8x256xbf16>, vector<256x512xbf16>, vector<8x512xf32> -> vector<8x512xf32>
    %159 = arith.addf %154, %158 : vector<8x512xf32>
    %160 = vector.extract_strided_slice %150 {offsets = [16, 0], sizes = [8, 256], strides = [1, 1]} : vector<32x256xbf16> to vector<8x256xbf16>
    %c2_86 = arith.constant 2 : index
    %c0_87 = arith.constant 0 : index
    %c0_88 = arith.constant 0 : index
    %161 = vector.load %arg6[%c2_86, %c0_87, %c0_88] : memref<4x256x512xbf16, #tpu.memory_space<vmem>>, vector<1x256x512xbf16>
    %162 = vector.shape_cast %161 : vector<1x256x512xbf16> to vector<256x512xbf16>
    %cst_89 = arith.constant dense<0.000000e+00> : vector<8x512xf32>
    %163 = tpu.matmul %160, %162, %cst_89 {dimension_numbers = #tpu.dot_dimension_numbers<[1], [0], [0], [1], [0, 0, 1, 1], [], []>} : vector<8x256xbf16>, vector<256x512xbf16>, vector<8x512xf32> -> vector<8x512xf32>
    %164 = arith.addf %159, %163 : vector<8x512xf32>
    %165 = vector.extract_strided_slice %150 {offsets = [24, 0], sizes = [8, 256], strides = [1, 1]} : vector<32x256xbf16> to vector<8x256xbf16>
    %c3_90 = arith.constant 3 : index
    %c0_91 = arith.constant 0 : index
    %c0_92 = arith.constant 0 : index
    %166 = vector.load %arg6[%c3_90, %c0_91, %c0_92] : memref<4x256x512xbf16, #tpu.memory_space<vmem>>, vector<1x256x512xbf16>
    %167 = vector.shape_cast %166 : vector<1x256x512xbf16> to vector<256x512xbf16>
    %cst_93 = arith.constant dense<0.000000e+00> : vector<8x512xf32>
    %168 = tpu.matmul %165, %167, %cst_93 {dimension_numbers = #tpu.dot_dimension_numbers<[1], [0], [0], [1], [0, 0, 1, 1], [], []>} : vector<8x256xbf16>, vector<256x512xbf16>, vector<8x512xf32> -> vector<8x512xf32>
    %169 = arith.addf %164, %168 : vector<8x512xf32>
    %c0_94 = arith.constant 0 : index
    %c0_95 = arith.constant 0 : index
    %170 = vector.load %arg7[%c0_94, %c0_95] : memref<1x512xf32, #tpu.memory_space<vmem>>, vector<1x512xf32>
    %171 = vector.broadcast %170 : vector<1x512xf32> to vector<8x512xf32>
    %172 = arith.addf %169, %171 : vector<8x512xf32>
    %cst_96 = arith.constant 0.000000e+00 : f32
    %173 = vector.broadcast %cst_96 : f32 to vector<8x512xf32>
    %174 = arith.maximumf %172, %173 : vector<8x512xf32>
    %175 = arith.truncf %174 : vector<8x512xf32> to vector<8x512xbf16>
    %c0_97 = arith.constant 0 : index
    %c0_98 = arith.constant 0 : index
    %176 = vector.load %arg8[%c0_97, %c0_98] : memref<512x128xbf16, #tpu.memory_space<vmem>>, vector<512x128xbf16>
    %cst_99 = arith.constant dense<0.000000e+00> : vector<8x128xf32>
    %177 = tpu.matmul %175, %176, %cst_99 {dimension_numbers = #tpu.dot_dimension_numbers<[1], [0], [0], [1], [0, 0, 1, 1], [], []>} : vector<8x512xbf16>, vector<512x128xbf16>, vector<8x128xf32> -> vector<8x128xf32>
    %c0_100 = arith.constant 0 : index
    %c0_101 = arith.constant 0 : index
    %178 = vector.load %arg9[%c0_100, %c0_101] : memref<1x128xf32, #tpu.memory_space<vmem>>, vector<1x128xf32>
    %179 = vector.broadcast %178 : vector<1x128xf32> to vector<8x128xf32>
    %180 = arith.addf %177, %179 : vector<8x128xf32>
    %cst_102 = arith.constant dense<0xFF800000> : vector<8xf32>
    %181 = vector.multi_reduction <maximumf>, %180, %cst_102 [1] : vector<8x128xf32> to vector<8xf32>
    %182 = vector.shape_cast %181 : vector<8xf32> to vector<8x1xf32>
    %183 = vector.broadcast %182 : vector<8x1xf32> to vector<8x128xf32>
    %184 = arith.subf %180, %183 : vector<8x128xf32>
    %185 = math.exp %184 : vector<8x128xf32>
    %cst_103 = arith.constant dense<0.000000e+00> : vector<8xf32>
    %186 = vector.multi_reduction <add>, %185, %cst_103 [1] : vector<8x128xf32> to vector<8xf32>
    %187 = vector.shape_cast %186 : vector<8xf32> to vector<8x1xf32>
    %188 = math.log %187 : vector<8x1xf32>
    %189 = vector.broadcast %188 : vector<8x1xf32> to vector<8x128xf32>
    %190 = arith.subf %184, %189 : vector<8x128xf32>
    %c0_104 = arith.constant 0 : index
    %c0_105 = arith.constant 0 : index
    %191 = vector.load %arg10[%c0_104, %c0_105] : memref<8x128xf32, #tpu.memory_space<vmem>>, vector<8x128xf32>
    tpu.vector_store %arg10[%c0_104, %c0_105], %190 {strides = array<i32>} : memref<8x128xf32, #tpu.memory_space<vmem>>, vector<8x128xf32>,
    return
  }
  func.func @transform_0(%arg0: i32) -> (i32, i32, i32, i32) {
    %c0_i32 = arith.constant 0 : i32
    %c0_i32_0 = arith.constant 0 : i32
    %c0_i32_1 = arith.constant 0 : i32
    %c0_i32_2 = arith.constant 0 : i32
    return %c0_i32, %c0_i32_0, %arg0, %c0_i32_1 : i32, i32, i32, i32
  }
  func.func @transform_1(%arg0: i32) -> (i32, i32, i32) {
    %c0_i32 = arith.constant 0 : i32
    %c0_i32_0 = arith.constant 0 : i32
    %c0_i32_1 = arith.constant 0 : i32
    %c0_i32_2 = arith.constant 0 : i32
    return %c0_i32, %c0_i32_0, %c0_i32_1 : i32, i32, i32
  }
  func.func @transform_2(%arg0: i32) -> (i32, i32) {
    %c0_i32 = arith.constant 0 : i32
    %c0_i32_0 = arith.constant 0 : i32
    %c0_i32_1 = arith.constant 0 : i32
    return %c0_i32, %c0_i32_0 : i32, i32
  }
  func.func @transform_3(%arg0: i32) -> (i32, i32, i32) {
    %c0_i32 = arith.constant 0 : i32
    %c0_i32_0 = arith.constant 0 : i32
    %c0_i32_1 = arith.constant 0 : i32
    %c0_i32_2 = arith.constant 0 : i32
    return %c0_i32, %c0_i32_0, %c0_i32_1 : i32, i32, i32
  }
  func.func @transform_4(%arg0: i32) -> (i32, i32) {
    %c0_i32 = arith.constant 0 : i32
    %c0_i32_0 = arith.constant 0 : i32
    %c0_i32_1 = arith.constant 0 : i32
    return %c0_i32, %c0_i32_0 : i32, i32
  }
  func.func @transform_5(%arg0: i32) -> (i32, i32, i32) {
    %c0_i32 = arith.constant 0 : i32
    %c0_i32_0 = arith.constant 0 : i32
    %c0_i32_1 = arith.constant 0 : i32
    %c0_i32_2 = arith.constant 0 : i32
    return %c0_i32, %c0_i32_0, %c0_i32_1 : i32, i32, i32
  }
  func.func @transform_6(%arg0: i32) -> (i32, i32) {
    %c0_i32 = arith.constant 0 : i32
    %c0_i32_0 = arith.constant 0 : i32
    %c0_i32_1 = arith.constant 0 : i32
    return %c0_i32, %c0_i32_0 : i32, i32
  }
  func.func @transform_7(%arg0: i32) -> (i32, i32) {
    %c0_i32 = arith.constant 0 : i32
    %c0_i32_0 = arith.constant 0 : i32
    %c0_i32_1 = arith.constant 0 : i32
    return %c0_i32, %c0_i32_0 : i32, i32
  }
  func.func @transform_8(%arg0: i32) -> (i32, i32) {
    %c0_i32 = arith.constant 0 : i32
    %c0_i32_0 = arith.constant 0 : i32
    %c0_i32_1 = arith.constant 0 : i32
    return %c0_i32, %c0_i32_0 : i32, i32
  }
  func.func @transform_9(%arg0: i32) -> (i32, i32) {
    %c0_i32 = arith.constant 0 : i32
    %c0_i32_0 = arith.constant 0 : i32
    return %arg0, %c0_i32 : i32, i32
  }
}

</mosaic_0001>

<bundles_post_ra>
// kernel: mnist_exnet_forward.1
= control target key start
LH: loop header
LB: loop body
LE: loop exit
PB: predicated region body
PF: predicated region fallthrough
CT: control target
= control target key end

     0   :  { %s26088_s0 = inlined_call_operand.vmem [shape: bf16[4,7,16,28], index: 0, kind: input, shape index: {}]   ;;  %s26089_s1 = inlined_call_operand.hbm [shape: bf16[6,28,1536], index: 1, kind: input, shape index: {}]   ;;  %s26090_s2 = inlined_call_operand.hbm [shape: f32[1,1536], index: 2, kind: input, shape index: {}]   ;;  %s26091_s3 = inlined_call_operand.hbm [shape: bf16[6,384,1024], index: 3, kind: input, shape index: {}]   ;;  %s26092_s4 = inlined_call_operand.hbm [shape: f32[1,1024], index: 4, kind: input, shape index: {}]   ;;  %s26093_s5 = inlined_call_operand.hbm [shape: bf16[4,256,512], index: 5, kind: input, shape index: {}]   ;;  %s26094_s6 = inlined_call_operand.hbm [shape: f32[1,512], index: 6, kind: input, shape index: {}]   ;;  %s26095_s7 = inlined_call_operand.hbm [shape: bf16[512,128], index: 7, kind: input, shape index: {}]   ;;  %s26096_s8 = inlined_call_operand.hbm [shape: f32[1,128], index: 8, kind: input, shape index: {}]   ;;  %s26097_s9 = inlined_call_operand.vmem [shape: f32[16,128], index: 9, kind: output, shape index: {}]  }
   0x1   :  { %26163 = sst [smem:[#allocation58_spill]] %s26090_s2 }
   0x2   :  { %26164 = sst [smem:[#allocation59_spill]] %s26092_s4 }
   0x3   :  { %14 = vsyncpa [#allocation4], 0 }
   0x4   :  { %15 = vsyncpa [#allocation6], 0 }
   0x5   :  { %16 = vsyncpa [#allocation9], 0 }
   0x6   :  { %17 = vsyncpa [#allocation12], 0 }
   0x7   :  { %18 = vsyncpa [#allocation15], 0  ;;  %s23841_s30 = smov 0   ;;  %s23843_s10 = smov 0  }
   0x8   :  { %s23845_s11 = smov 0  }
   0x9 LB: > { %s23857_s12 = sadd.s32 4294967295, %s23772_s11   ;;  %s23860_s13 = sadd.s32 1, %s23772_s11   ;;  %s23772_s11 = sphi %s23845_s11, %s26305_s11   ;;  %s23768_s10 = sphi %s23843_s10, %s26304_s10   ;;  %s23764_s30 = sphi %s23841_s30, %s26303_s30  }
   0xa   : > { %s28_s14 = ssub.s32 %s23772_s11, %s23860_s13  ;;  %s31_s15 = sadd.s32 1, %s23768_s10 }
   0xb   : > { %p29_p0 = scmp.eq.s32.totalorder %s28_s14, 0  ;;  %p38_p1 = scmp.ne.s32.totalorder %s23768_s10, %s23764_s30 }
   0xc   : > { %p39_p2 = scmp.eq.s32.totalorder %s23772_s11, 0  ;;  %p19574_p3 = scmp.ge.s32.totalorder %s23772_s11, 1 }
   0xd   : > { %s23870_s16 = scalar_select %p29_p0, %s23768_s10, %s31_s15  }
   0xe   : > { %p23872_p4 = por %p39_p2, %p38_p1  ;;  %p249_p5 = scmp.lt.s32.totalorder %s23772_s11, 3 }
   0xf   : > { %26165 = sst [smem:[#allocation21_spill]] %s23870_s16  ;;  %p26098_p6 = scmp.eq.s32.totalorder %s23857_s12, 0 }
  0x10   : > { %s26166_s17 = scalar_select %p23872_p4, 1, 0 }
  0x11   : > { %p23878_p7 = pnand %p19574_p3, %p249_p5  ;;  %s23774_s19 = smov [#allocation5]  }
  0x12   : > { %s275_s20 = sshll.u32 %s23774_s19, 4  ;;  %s23775_s21 = smov [#allocation8]   ;;  %s276_s20 = int_to_ptr.vmem [resolvable:$true] %s275_s20 }
  0x13   : > { %s26167_s18 = scalar_select %p23878_p7, 1, 0 }
  0x14   : > { %p22644_p8 = pneg %p23878_p7  ;;  %s299_s22 = sshll.u32 %s23775_s21, 4  ;;  %s23890_s22 = int_to_ptr.vmem [resolvable:$true] %s299_s22 }
  0x15   : > { %s23776_s24 = smov [#allocation11]   ;;  %s26169_s2 = sld [smem:[#allocation58_spill]] }
  0x16   : > { %p23886_p9 = pnand %p26098_p6, %p22644_p8  ;;  %s323_s25 = sshll.u32 %s23776_s24, 4  ;;  %s23892_s25 = int_to_ptr.vmem [resolvable:$true] %s323_s25 }
  0x18   : > { %p23902_p11 = pneg %p23886_p9 }
  0x1b   : > { %s23506_s28 = scalar_lea.hbm %s26169_s2, 192 }
  0x1c   : > { %p23507_p10 = scmp.ne.s32.totalorder %s26169_s2, %s23506_s28  ;;  %p23513_p0 = scmp.lt.u32.totalorder %s23506_s28, %s26169_s2 }
  0x1e   : > { %p23509_p12 = pnand %p23902_p11, %p23507_p10 }
  0x20   : > { %p23510_p13 = pneg %p23509_p12 }
  0x22   : > { %p23515_p1 = pnand %p23513_p0, %p23510_p13 }
  0x24   : > { %23518 = shalt.err (!%p23515_p1)
}
  0x25   : > { %s23519_s24 = scalar_lea.vmem %s276_s20, 192  ;;  %p23527_p8 = scmp.lt.s32.totalorder %s276_s20, %s276_s20 }
  0x26   : > { %p23520_p2 = scmp.ne.s32.totalorder %s276_s20, %s23519_s24  ;;  %p23528_p6 = scmp.lt.s32.totalorder %s23519_s24, %s23519_s24 }
  0x28   : > { %p23522_p3 = pnand %p23520_p2, %p23902_p11  ;;  %p23529_p7 = por %p23528_p6, %p23527_p8 }
  0x2a   : > { %p23523_p5 = pneg %p23522_p3 }
  0x2c   : > { %p23530_p4 = pnand %p23529_p7, %p23523_p5 }
  0x2e   : > { %23533 = shalt.err (!%p23530_p4)
}
  0x2f   : > { %22650 = dma.hbm_to_vmem [thread:$0]  (!%p23886_p9), %s26169_s2, 192, %s276_s20, [#allocation6]  }
  0x30   : > { %s26171_s4 = sld [smem:[#allocation59_spill]] }
  0x36   : > { %s23534_s14 = scalar_lea.hbm %s26171_s4, 128 }
  0x37   : > { %p23535_p10 = scmp.ne.s32.totalorder %s26171_s4, %s23534_s14  ;;  %p23541_p4 = scmp.lt.u32.totalorder %s23534_s14, %s26171_s4 }
  0x39   : > { %p23537_p12 = pnand %p23535_p10, %p23902_p11 }
  0x3b   : > { %p23538_p6 = pneg %p23537_p12 }
  0x3d   : > { %p23543_p7 = pnand %p23541_p4, %p23538_p6 }
  0x3f   : > { %23546 = shalt.err (!%p23543_p7)
}
  0x40   : > { %s23547_s20 = scalar_lea.vmem %s23890_s22, 128  ;;  %p23555_p2 = scmp.lt.s32.totalorder %s23890_s22, %s23890_s22 }
  0x41   : > { %p23548_p13 = scmp.ne.s32.totalorder %s23890_s22, %s23547_s20  ;;  %p23556_p3 = scmp.lt.s32.totalorder %s23547_s20, %s23547_s20 }
  0x43   : > { %p23550_p0 = pnand %p23548_p13, %p23902_p11  ;;  %p23557_p5 = por %p23556_p3, %p23555_p2 }
  0x45   : > { %p23551_p1 = pneg %p23550_p0 }
  0x47   : > { %p23558_p8 = pnand %p23557_p5, %p23551_p1 }
  0x49   : > { %23561 = shalt.err (!%p23558_p8)
}
  0x4a   : > { %22656 = dma.hbm_to_vmem [thread:$0]  (!%p23886_p9), %s26171_s4, 128, %s23890_s22, [#allocation9]  }
  0x4b   : > { %s23562_s29 = scalar_lea.hbm %s26094_s6, 64 }
  0x4c   : > { %p23563_p10 = scmp.ne.s32.totalorder %s26094_s6, %s23562_s29  ;;  %p23569_p4 = scmp.lt.u32.totalorder %s23562_s29, %s26094_s6 }
  0x4e   : > { %p23565_p12 = pnand %p23563_p10, %p23902_p11 }
  0x50   : > { %p23566_p6 = pneg %p23565_p12 }
  0x52   : > { %p23571_p7 = pnand %p23569_p4, %p23566_p6 }
  0x54   : > { %23574 = shalt.err (!%p23571_p7)
}
  0x55   : > { %s23575_s22 = scalar_lea.vmem %s23892_s25, 64  ;;  %p23583_p2 = scmp.lt.s32.totalorder %s23892_s25, %s23892_s25 }
  0x56   : > { %p23576_p13 = scmp.ne.s32.totalorder %s23892_s25, %s23575_s22  ;;  %p23584_p3 = scmp.lt.s32.totalorder %s23575_s22, %s23575_s22 }
  0x58   : > { %p23578_p0 = pnand %p23576_p13, %p23902_p11  ;;  %p23585_p5 = por %p23584_p3, %p23583_p2 }
  0x5a   : > { %p23579_p1 = pneg %p23578_p0 }
  0x5c   : > { %p23586_p8 = pnand %p23585_p5, %p23579_p1 }
  0x5e   : > { %23589 = shalt.err (!%p23586_p8)
}
  0x5f   : > { %22662 = dma.hbm_to_vmem [thread:$0]  (!%p23886_p9), %s26094_s6, 64, %s23892_s25, [#allocation12]  }
  0x60   : > { %s23777_s26 = smov [#allocation3]   ;;  %s23590_s14 = scalar_lea.hbm %s26089_s1, 18432 }
  0x61   : > { %s261_s27 = sshll.u32 %s23777_s26, 4  ;;  %p23591_p10 = scmp.ne.s32.totalorder %s26089_s1, %s23590_s14  ;;  %s262_s27 = int_to_ptr.vmem [resolvable:$true] %s261_s27 }
  0x62   : > { %p23597_p4 = scmp.lt.u32.totalorder %s23590_s14, %s26089_s1 }
  0x63   : > { %p23593_p12 = pnand %p23591_p10, %p23902_p11 }
  0x65   : > { %p23594_p6 = pneg %p23593_p12 }
  0x67   : > { %p23599_p7 = pnand %p23597_p4, %p23594_p6 }
  0x69   : > { %23602 = shalt.err (!%p23599_p7)
}
  0x6a   : > { %s23603_s25 = scalar_lea.vmem %s262_s27, 18432  ;;  %p23611_p2 = scmp.lt.s32.totalorder %s262_s27, %s262_s27 }
  0x6b   : > { %p23604_p13 = scmp.ne.s32.totalorder %s262_s27, %s23603_s25  ;;  %p23612_p3 = scmp.lt.s32.totalorder %s23603_s25, %s23603_s25 }
  0x6d   : > { %p23606_p0 = pnand %p23604_p13, %p23902_p11  ;;  %p23613_p5 = por %p23612_p3, %p23611_p2 }
  0x6f   : > { %p23607_p1 = pneg %p23606_p0 }
  0x71   : > { %p23614_p8 = pnand %p23613_p5, %p23607_p1 }
  0x73   : > { %23617 = shalt.err (!%p23614_p8)
}
  0x74   : > { %s23778_s20 = smov 768   ;;  %s23779_s16 = smov 48  }
  0x75   : > { %22647 = dma.hbm_to_vmem [thread:$0]  (!%p23886_p9), %s26089_s1, 18432, %s262_s27, [#allocation4], %s23778_s20, %s23778_s20, %s23779_s16  }
  0x76   : > { %s23780_s29 = smov [#allocation7]   ;;  %s23618_s24 = scalar_lea.hbm %s26091_s3, 147456 }
  0x77   : > { %s285_s14 = sshll.u32 %s23780_s29, 4  ;;  %p23619_p10 = scmp.ne.s32.totalorder %s26091_s3, %s23618_s24  ;;  %s286_s14 = int_to_ptr.vmem [resolvable:$true] %s285_s14 }
  0x78   : > { %p23625_p4 = scmp.lt.u32.totalorder %s23618_s24, %s26091_s3 }
  0x79   : > { %p23621_p12 = pnand %p23619_p10, %p23902_p11 }
  0x7b   : > { %p23622_p6 = pneg %p23621_p12 }
  0x7d   : > { %p23627_p7 = pnand %p23625_p4, %p23622_p6 }
  0x7f   : > { %23630 = shalt.err (!%p23627_p7)
}
  0x80   : > { %s23631_s27 = scalar_lea.vmem %s286_s14, 147456  ;;  %p23639_p2 = scmp.lt.s32.totalorder %s286_s14, %s286_s14 }
  0x81   : > { %p23632_p13 = scmp.ne.s32.totalorder %s286_s14, %s23631_s27  ;;  %p23640_p3 = scmp.lt.s32.totalorder %s23631_s27, %s23631_s27 }
  0x83   : > { %p23634_p0 = pnand %p23632_p13, %p23902_p11  ;;  %p23641_p5 = por %p23640_p3, %p23639_p2 }
  0x85   : > { %p23635_p1 = pneg %p23634_p0 }
  0x87   : > { %p23642_p8 = pnand %p23641_p5, %p23635_p1 }
  0x89   : > { %23645 = shalt.err (!%p23642_p8)
}
  0x8a   : > { %s23781_s20 = smov 512   ;;  %s23782_s16 = smov 32  }
  0x8b   : > { %22653 = dma.hbm_to_vmem [thread:$0]  (!%p23886_p9), %s26091_s3, 147456, %s286_s14, [#allocation6], %s23781_s20, %s23781_s20, %s23782_s16  }
  0x8c   : > { %s23783_s26 = smov [#allocation10]   ;;  %s23646_s21 = scalar_lea.hbm %s26093_s5, 32768 }
  0x8d   : > { %s309_s28 = sshll.u32 %s23783_s26, 4  ;;  %p23647_p10 = scmp.ne.s32.totalorder %s26093_s5, %s23646_s21  ;;  %s310_s28 = int_to_ptr.vmem [resolvable:$true] %s309_s28 }
  0x8e   : > { %p23653_p4 = scmp.lt.u32.totalorder %s23646_s21, %s26093_s5 }
  0x8f   : > { %p23649_p12 = pnand %p23647_p10, %p23902_p11 }
  0x91   : > { %p23650_p6 = pneg %p23649_p12 }
  0x93   : > { %p23655_p7 = pnand %p23653_p4, %p23650_p6 }
  0x95   : > { %23658 = shalt.err (!%p23655_p7)
}
  0x96   : > { %s23659_s14 = scalar_lea.vmem %s310_s28, 32768  ;;  %p23667_p2 = scmp.lt.s32.totalorder %s310_s28, %s310_s28 }
  0x97   : > { %p23660_p13 = scmp.ne.s32.totalorder %s310_s28, %s23659_s14  ;;  %p23668_p3 = scmp.lt.s32.totalorder %s23659_s14, %s23659_s14 }
  0x99   : > { %p23662_p0 = pnand %p23660_p13, %p23902_p11  ;;  %p23669_p5 = por %p23668_p3, %p23667_p2 }
  0x9b   : > { %p23663_p1 = pneg %p23662_p0 }
  0x9d   : > { %p23670_p8 = pnand %p23669_p5, %p23663_p1 }
  0x9f   : > { %23673 = shalt.err (!%p23670_p8)
}
  0xa0   : > { %s23784_s20 = smov 256   ;;  %s23785_s16 = smov 16  }
  0xa1   : > { %22659 = dma.hbm_to_vmem [thread:$0]  (!%p23886_p9), %s26093_s5, 32768, %s310_s28, [#allocation9], %s23784_s20, %s23784_s20, %s23785_s16  }
  0xa2   : > { %s23786_s26 = smov [#allocation13]   ;;  %s23674_s24 = scalar_lea.hbm %s26095_s7, 4096 }
  0xa3   : > { %s333_s29 = sshll.u32 %s23786_s26, 4  ;;  %p23675_p10 = scmp.ne.s32.totalorder %s26095_s7, %s23674_s24  ;;  %s334_s29 = int_to_ptr.vmem [resolvable:$true] %s333_s29 }
  0xa4   : > { %p23681_p4 = scmp.lt.u32.totalorder %s23674_s24, %s26095_s7 }
  0xa5   : > { %p23677_p12 = pnand %p23675_p10, %p23902_p11 }
  0xa7   : > { %p23678_p6 = pneg %p23677_p12 }
  0xa9   : > { %p23683_p7 = pnand %p23681_p4, %p23678_p6 }
  0xab   : > { %23686 = shalt.err (!%p23683_p7)
}
  0xac   : > { %s23687_s28 = scalar_lea.vmem %s334_s29, 4096  ;;  %p23695_p2 = scmp.lt.s32.totalorder %s334_s29, %s334_s29 }
  0xad   : > { %p23688_p13 = scmp.ne.s32.totalorder %s334_s29, %s23687_s28  ;;  %p23696_p3 = scmp.lt.s32.totalorder %s23687_s28, %s23687_s28 }
  0xaf   : > { %p23690_p0 = pnand %p23688_p13, %p23902_p11  ;;  %p23697_p5 = por %p23696_p3, %p23695_p2 }
  0xb1   : > { %p23691_p1 = pneg %p23690_p0 }
  0xb3   : > { %p23698_p8 = pnand %p23697_p5, %p23691_p1 }
  0xb5   : > { %23701 = shalt.err (!%p23698_p8)
}
  0xb6   : > { %s23787_s20 = smov 64   ;;  %s23788_s16 = smov 4  }
  0xb7   : > { %22665 = dma.hbm_to_vmem [thread:$0]  (!%p23886_p9), %s26095_s7, 4096, %s334_s29, [#allocation12], %s23787_s20, %s23787_s20, %s23788_s16  }
  0xb8   : > { %s23789_s26 = smov [#allocation14]   ;;  %s23702_s22 = scalar_lea.hbm %s26096_s8, 16 }
  0xb9   : > { %s347_s19 = sshll.u32 %s23789_s26, 4  ;;  %p23703_p10 = scmp.ne.s32.totalorder %s26096_s8, %s23702_s22  ;;  %s348_s19 = int_to_ptr.vmem [resolvable:$true] %s347_s19 }
  0xba   : > { %p23709_p4 = scmp.lt.u32.totalorder %s23702_s22, %s26096_s8 }
  0xbb   : > { %p23705_p12 = pnand %p23703_p10, %p23902_p11 }
  0xbd   : > { %p23706_p6 = pneg %p23705_p12 }
  0xbf   : > { %p23711_p7 = pnand %p23709_p4, %p23706_p6 }
  0xc1   : > { %23714 = shalt.err (!%p23711_p7)
}
  0xc2   : > { %s23715_s29 = scalar_lea.vmem %s348_s19, 16  ;;  %s23722_s20 = scalar_lea.vmem %s348_s19, 32 }
  0xc3   : > { %p23716_p13 = scmp.ne.s32.totalorder %s348_s19, %s23715_s29  ;;  %p23723_p2 = scmp.lt.s32.totalorder %s348_s19, %s348_s19 }
  0xc4   : > { %p23724_p3 = scmp.lt.s32.totalorder %s23722_s20, %s23715_s29 }
  0xc5   : > { %p23718_p0 = pnand %p23716_p13, %p23902_p11 }
  0xc6   : > { %p23725_p5 = por %p23724_p3, %p23723_p2 }
  0xc7   : > { %p23719_p1 = pneg %p23718_p0 }
  0xc9   : > { %p23726_p8 = pnand %p23725_p5, %p23719_p1 }
  0xcb   : > { %23729 = shalt.err (!%p23726_p8)
}
  0xcc   : > { %22668 = dma.hbm_to_vmem [thread:$0]  (!%p23886_p9), %s26096_s8, 16, %s348_s19, [#allocation15]  }
  0xcd   : > { %p19583_p10 = scmp.ge.s32.totalorder %s23772_s11, 2 }
  0xce   : > { %p26172_p12 = scmp.ne.s32.totalorder (!%p19583_p10), %s26166_s17, 0 }
  0xcf   : > { %354 = sbr.rel (%p19583_p10) target bundleno = 237 (0xed), region = 48 }
  0xd6   : > { %357 = sbr.rel (!%p26172_p12) target bundleno = 237 (0xed), region = 52  ;;  %s359_s15 = sand.u32 (%p26172_p12), 1, %s23768_s10  }
  0xd7   : > { %s19584_s4 = sshll.u32 (%p26172_p12), %s23772_s11, 2  ;;  %s22610_s26 = smul.u32 (%p26172_p12), 112, %s359_s15 }
  0xd8   : > { %s24062_s22 = scalar_lea.vmem (%p26172_p12), %s26088_s0, %s19584_s4 }
  0xd9   : > { %v379_v0 = vld [vmem:[%s24062_s22] sm:$0xf] (%p26172_p12)  ;;  %v381_v1 = vld [vmem:[%s24062_s22 + $0x8] sm:$0xf] (%p26172_p12)  ;;  %v383_v2 = vld [vmem:[%s24062_s22 + $0x10] sm:$0xf] (%p26172_p12) }
  0xda   : > { %v385_v3 = vld [vmem:[%s24062_s22 + $0x18] sm:$0xf] (%p26172_p12)  ;;  %v387_v4 = vld [vmem:[%s24062_s22 + $0x20] sm:$0xf] (%p26172_p12)  ;;  %s24069_s11 = scalar_lea.vmem (%p26172_p12), [#allocation2], %s22610_s26 }
  0xdb   : > { %380 = vst [vmem:[%s24069_s11] sm:$0xf] (%p26172_p12), %v379_v0  ;;  %382 = vst [vmem:[%s24069_s11 + $0x4] sm:$0xf] (%p26172_p12), %v381_v1  ;;  %v389_v5 = vld [vmem:[%s24062_s22 + $0x28] sm:$0xf] (%p26172_p12) }
  0xdc   : > { %384 = vst [vmem:[%s24069_s11 + $0x8] sm:$0xf] (%p26172_p12), %v383_v2  ;;  %386 = vst [vmem:[%s24069_s11 + $0xc] sm:$0xf] (%p26172_p12), %v385_v3  ;;  %v391_v6 = vld [vmem:[%s24062_s22 + $0x30] sm:$0xf] (%p26172_p12) }
  0xdd   : > { %388 = vst [vmem:[%s24069_s11 + $0x10] sm:$0xf] %v387_v4  ;;  %v393_v7 = vld [vmem:[%s24062_s22 + $0x38] sm:$0xf]  ;;  %390 = vst [vmem:[%s24069_s11 + $0x14] sm:$0xf] %v389_v5 }
  0xde   : > { %392 = vst [vmem:[%s24069_s11 + $0x18] sm:$0xf] %v391_v6  ;;  %394 = vst [vmem:[%s24069_s11 + $0x1c] sm:$0xf] %v393_v7  ;;  %v395_v8 = vld [vmem:[%s24062_s22 + $0x40] sm:$0xf] }
  0xdf   : > { %v397_v9 = vld [vmem:[%s24062_s22 + $0x48] sm:$0xf]  ;;  %v399_v10 = vld [vmem:[%s24062_s22 + $0x50] sm:$0xf]  ;;  %396 = vst [vmem:[%s24069_s11 + $0x20] sm:$0xf] %v395_v8 }
  0xe0   : > { %398 = vst [vmem:[%s24069_s11 + $0x24] sm:$0xf] %v397_v9  ;;  %400 = vst [vmem:[%s24069_s11 + $0x28] sm:$0xf] %v399_v10  ;;  %v401_v11 = vld [vmem:[%s24062_s22 + $0x58] sm:$0xf] }
  0xe1   : > { %v403_v12 = vld [vmem:[%s24062_s22 + $0x60] sm:$0xf]  ;;  %v405_v13 = vld [vmem:[%s24062_s22 + $0x68] sm:$0xf]  ;;  %402 = vst [vmem:[%s24069_s11 + $0x2c] sm:$0xf] %v401_v11 }
  0xe2   : > { %404 = vst [vmem:[%s24069_s11 + $0x30] sm:$0xf] %v403_v12  ;;  %406 = vst [vmem:[%s24069_s11 + $0x34] sm:$0xf] %v405_v13  ;;  %v407_v14 = vld [vmem:[%s24062_s22 + $0x70] sm:$0xf] }
  0xe3   : > { %v409_v15 = vld [vmem:[%s24062_s22 + $0x78] sm:$0xf]  ;;  %v411_v16 = vld [vmem:[%s24062_s22 + $0x80] sm:$0xf]  ;;  %408 = vst [vmem:[%s24069_s11 + $0x38] sm:$0xf] %v407_v14 }
  0xe4   : > { %410 = vst [vmem:[%s24069_s11 + $0x3c] sm:$0xf] %v409_v15  ;;  %412 = vst [vmem:[%s24069_s11 + $0x40] sm:$0xf] %v411_v16  ;;  %v413_v17 = vld [vmem:[%s24062_s22 + $0x88] sm:$0xf] }
  0xe5   : > { %v415_v18 = vld [vmem:[%s24062_s22 + $0x90] sm:$0xf]  ;;  %v417_v19 = vld [vmem:[%s24062_s22 + $0x98] sm:$0xf]  ;;  %414 = vst [vmem:[%s24069_s11 + $0x44] sm:$0xf] %v413_v17 }
  0xe6   : > { %416 = vst [vmem:[%s24069_s11 + $0x48] sm:$0xf] %v415_v18  ;;  %418 = vst [vmem:[%s24069_s11 + $0x4c] sm:$0xf] %v417_v19  ;;  %v419_v20 = vld [vmem:[%s24062_s22 + $0xa0] sm:$0xf] }
  0xe7   : > { %v421_v21 = vld [vmem:[%s24062_s22 + $0xa8] sm:$0xf]  ;;  %v423_v22 = vld [vmem:[%s24062_s22 + $0xb0] sm:$0xf]  ;;  %420 = vst [vmem:[%s24069_s11 + $0x50] sm:$0xf] %v419_v20 }
  0xe8   : > { %422 = vst [vmem:[%s24069_s11 + $0x54] sm:$0xf] %v421_v21  ;;  %424 = vst [vmem:[%s24069_s11 + $0x58] sm:$0xf] %v423_v22  ;;  %v425_v23 = vld [vmem:[%s24062_s22 + $0xb8] sm:$0xf] }
  0xe9   : > { %v427_v24 = vld [vmem:[%s24062_s22 + $0xc0] sm:$0xf]  ;;  %v429_v25 = vld [vmem:[%s24062_s22 + $0xc8] sm:$0xf]  ;;  %426 = vst [vmem:[%s24069_s11 + $0x5c] sm:$0xf] %v425_v23 }
  0xea   : > { %428 = vst [vmem:[%s24069_s11 + $0x60] sm:$0xf] %v427_v24  ;;  %430 = vst [vmem:[%s24069_s11 + $0x64] sm:$0xf] %v429_v25  ;;  %v431_v26 = vld [vmem:[%s24062_s22 + $0xd0] sm:$0xf] }
  0xeb   : > { %v433_v27 = vld [vmem:[%s24062_s22 + $0xd8] sm:$0xf]  ;;  %432 = vst [vmem:[%s24069_s11 + $0x68] sm:$0xf] %v431_v26 }
  0xec   : > { %434 = vst [vmem:[%s24069_s11 + $0x6c] sm:$0xf] %v433_v27 }
  0xed PF: > { %p26173_p9 = scmp.ne.s32.totalorder %s26167_s18, 0 }
  0xef   : > { %516 = sbr.rel (%p26173_p9) target bundleno = 3623 (0xe27), region = 93 }
  0xf6   : > { %s519_s17 = sand.u32 1, %s23764_s30   ;;  %p26174_p11 = scmp.eq.s32.totalorder %s23857_s12, 0 }
  0xf7   : > { %s22611_s23 = smul.u32 112, %s519_s17 }
  0xf9   : > { %s24125_s19 = scalar_lea.vmem [#allocation2], %s22611_s23 }
  0xfa   : > { %23743 = dma.done.wait (%p26174_p11), [#allocation4], 18432   ;;  %p26175_p6 = pmov %p26174_p11 }
  0xfc   : > { %23745 = vsyncadd (%p26175_p6), [#allocation4], 4294948864  ;;  %p26176_p4 = pmov %p26175_p6 }
  0xfe   : > { %23747 = dma.done.wait (%p26176_p4), [#allocation6], 147648   ;;  %p26177_p7 = pmov %p26176_p4 }
  0xff   : > { %p26178_p13 = pmov %p26176_p4 }
 0x100   : > { %23749 = vsyncadd (%p26177_p7), [#allocation6], 4294819648 }
 0x101   : > { %23751 = dma.done.wait (%p26178_p13), [#allocation9], 32896   ;;  %p26179_p0 = pmov %p26176_p4 }
 0x103   : > { %23753 = vsyncadd (%p26179_p0), [#allocation9], 4294934400  ;;  %p26180_p1 = pmov %p26179_p0 }
 0x104   : > { %p26181_p2 = pmov %p26179_p0 }
 0x105   : > { %23755 = dma.done.wait (%p26180_p1), [#allocation12], 4160  }
 0x106   : > { %23757 = vsyncadd (%p26181_p2), [#allocation12], 4294963136  ;;  %p26182_p3 = pmov %p26179_p0 }
 0x107   : > { %p26183_p5 = pmov %p26179_p0 }
 0x108   : > { %23759 = dma.done.wait (%p26182_p3), [#allocation15], 16  }
 0x109   : > { %23761 = vsyncadd (%p26183_p5), [#allocation15], 4294967280  ;;  %v26100_v28 = vmov 0   ;;  %v22726_v29 = vld [vmem:[#allocation3 + $0xc4] ss:$48 sps:$4 sm:$0xff]   ;;  %vm800_vm0 = vcmask 1045504  }
 0x10a   : > { %869 = vmatprep.mubr.bf16.mxu0 %v26100_v28  ;;  %932 = vmatprep.mubr.bf16.mxu1 %v26100_v28  ;;  %v22728_v30 = vld [vmem:[#allocation3 + $0xcc] ss:$48 sps:$4 sm:$0xff]   ;;  %v22730_v31 = vld [vmem:[#allocation3 + $0xc0] ss:$48 sps:$4 sm:$0xff]   ;;  %v22731_v32 = vld [vmem:[#allocation3 + $0xc8] ss:$48 sps:$4 sm:$0xff]  }
 0x10b   : > { %837 = vmatprep.subr.bf16.mxu0 %v22726_v29  ;;  %900 = vmatprep.subr.bf16.mxu1 %v22728_v30  ;;  %v22732_v33 = vld [vmem:[#allocation3 + $0x124] ss:$48 sps:$4 sm:$0x3f]   ;;  %v22734_v34 = vld [vmem:[#allocation3 + $0x12c] ss:$48 sps:$4 sm:$0x3f]  }
 0x10c   : > { %838 = vmatpush1.bf16.msra.mxu0 %v22730_v31  ;;  %901 = vmatpush1.bf16.msra.mxu1 %v22731_v32  ;;  %v22736_v35 = vld [vmem:[#allocation3 + $0x120] ss:$48 sps:$4 sm:$0x3f]   ;;  %v22737_v36 = vld [vmem:[#allocation3 + $0x128] ss:$48 sps:$4 sm:$0x3f]  }
 0x10d   : > { %19622 = vmatprep.subr.msk.bf16.mxu0 %vm800_vm0, %v22732_v33  ;;  %19626 = vmatprep.subr.msk.bf16.mxu1 %vm800_vm0, %v22734_v34  ;;  %v597_v37 = vld [vmem:[%s24125_s19 + $0x1c] sm:$0xf]  ;;  %v598_v38 = vld [vmem:[%s24125_s19 + $0x20] sm:$0xf]  ;;  %v24154_v39 = vsel %vm800_vm0, %v22736_v35, 0  ;;  %v24157_v40 = vsel %vm800_vm0, %v22737_v36, 0 }
 0x10e   : > { %v24159_v41 = vcombine.low %v597_v37, %v598_v38  ;;  %v22741_v42 = vld [vmem:[#allocation3 + $0xd4] ss:$48 sps:$4 sm:$0xff]   ;;  %vm790_vm1 = vcmask 228352   ;;  %v22739_v43 = vld [vmem:[#allocation3 + $0xd0] ss:$48 sps:$4 sm:$0xff]   ;;  %vm10730_vm2 = vcmask 1043456  }
 0x10f   : > { %v22742_v44 = vld [vmem:[#allocation3 + $0xd8] ss:$48 sps:$4 sm:$0xff]   ;;  %v22744_v45 = vld [vmem:[#allocation3 + $0xdc] ss:$48 sps:$4 sm:$0xff]   ;;  %v599_v46 = vld [vmem:[%s24125_s19 + $0x24] sm:$0xf] }
 0x110   : > { %840 = vmatpush1.bf16.msra.mxu0 %v24154_v39  ;;  %903 = vmatpush1.bf16.msra.mxu1 %v24157_v40  ;;  %v600_v47 = vld [vmem:[%s24125_s19 + $0x28] sm:$0xf]  ;;  %v24165_v48 = vcombine.low %v598_v38, %v599_v46  ;;  %v22747_v49 = vld [vmem:[#allocation3 + $0x134] ss:$48 sps:$4 sm:$0x3f]   ;;  %p585_p8 = scmp.lt.s32.totalorder %s23857_s12, 1 }
 0x111   : > { %963 = vmatprep.subr.bf16.mxu0 %v22741_v42  ;;  %v22749_v50 = vld [vmem:[#allocation3 + $0x13c] ss:$48 sps:$4 sm:$0x3f]   ;;  %1026 = vmatprep.subr.bf16.mxu1 %v22744_v45  ;;  %v22751_v51 = vld [vmem:[#allocation3 + $0x130] ss:$48 sps:$4 sm:$0x3f]   ;;  %v24183_v57 = vcombine.low %v599_v46, %v600_v47 }
 0x112   : > { %v22752_v52 = vld [vmem:[#allocation3 + $0x138] ss:$48 sps:$4 sm:$0x3f]   ;;  %v601_v53 = vld [vmem:[%s24125_s19 + $0x2c] sm:$0xf]  ;;  %v24176_v54 = vsel %vm800_vm0, %v22751_v51, 0 }
 0x113   : > { %19623 = vmatmul.mubr.msk.bf16.vlgmr.msra.gmra.mrb[0].mxu0 %vm790_vm1, %v24159_v41  ;;  %19627 = vmatmul.mubr.msk.bf16.vlgmr.msra.gmra.mrb[0].mxu1 %vm790_vm1, %v24159_v41  ;;  %v24179_v55 = vsel %vm800_vm0, %v22752_v52, 0  ;;  %v24181_v56 = vcombine.low %v600_v47, %v601_v53  ;;  %v22758_v58 = vld [vmem:[#allocation3 + $0xe4] ss:$48 sps:$4 sm:$0xff]   ;;  %v22761_v59 = vld [vmem:[#allocation3 + $0xec] ss:$48 sps:$4 sm:$0xff]   ;;  %s26307_s12 = smov (!%p585_p8, %s23857_s12), 1 }
 0x114   : > { %964 = vmatpush1.bf16.msra.mxu0 %v22739_v43  ;;  %1027 = vmatpush1.bf16.msra.mxu1 %v22742_v44  ;;  %v602_v60 = vld [vmem:[%s24125_s19 + $0x30] sm:$0xf]  ;;  %v24204_v62 = vld [vmem:[%s24125_s19 + $0x4] sm:$0xf]  ;;  %v24207_v63 = vld [vmem:[%s24125_s19 + $0x8] sm:$0xf] }
 0x115   : > { %879 = vmatprep.mubr.bf16.mxu0 %v26100_v28  ;;  %942 = vmatprep.mubr.bf16.mxu1 %v26100_v28  ;;  %26184 = vst [vmem:[#allocation22_spill] sm:$0xff] %v24181_v56  ;;  %v24195_v61 = vcombine.low %v601_v53, %v602_v60  ;;  %v24211_v0 = vcombine.low %v24204_v62, %v24207_v63  ;;  %v22756_v1 = vld [vmem:[#allocation3 + $0xe0] ss:$48 sps:$4 sm:$0xff]   ;;  %v22759_v2 = vld [vmem:[#allocation3 + $0xe8] ss:$48 sps:$4 sm:$0xff]   ;;  %s19594_s30 = sshll.u32 %s26307_s12, 3 }
 0x116   : > { %19630 = vmatprep.subr.msk.bf16.mxu0 %vm800_vm0, %v22747_v49  ;;  %19634 = vmatprep.subr.msk.bf16.mxu1 %vm800_vm0, %v22749_v50  ;;  %v22766_v3 = vld [vmem:[#allocation3 + $0x140] ss:$48 sps:$4 sm:$0x3f]   ;;  %v22762_v4 = vld [vmem:[#allocation3 + $0x144] ss:$48 sps:$4 sm:$0x3f]   ;;  %s588_s27 = scalar_lea.vmem %s26097_s9, %s19594_s30 }
 0x117   : > { %v24214_v5 = vld [vmem:[%s24125_s19 + $0xc] sm:$0xf]  ;;  %v24217_v6 = vld [vmem:[%s24125_s19 + $0x10] sm:$0xf]  ;;  %v24228_v10 = vsel %vm800_vm0, %v22766_v3, 0 }
 0x118   : > { %966 = vmatpush1.bf16.msra.mxu0 %v24176_v54  ;;  %1029 = vmatpush1.bf16.msra.mxu1 %v24179_v55  ;;  %v22767_v7 = vld [vmem:[#allocation3 + $0x148] ss:$48 sps:$4 sm:$0x3f]   ;;  %v24221_v8 = vcombine.low %v24214_v5, %v24217_v6  ;;  %v22764_v9 = vld [vmem:[#allocation3 + $0x14c] ss:$48 sps:$4 sm:$0x3f]   ;;  %v24299_v37 = vcombine.low %v24207_v63, %v24214_v5 }
 0x119   : > { %1089 = vmatprep.subr.bf16.mxu0 %v22758_v58  ;;  %1152 = vmatprep.subr.bf16.mxu1 %v22761_v59  ;;  %v22770_v11 = vld [vmem:[#allocation3 + $0x4] ss:$48 sps:$4 sm:$0xff]   ;;  %v24233_v12 = vsel %vm800_vm0, %v22767_v7, 0  ;;  %v22773_v13 = vld [vmem:[#allocation3 + $0xc] ss:$48 sps:$4 sm:$0xff]  }
 0x11a   : > { %v22768_v14 = vld [vmem:[#allocation3] ss:$48 sps:$4 sm:$0xff]   ;;  %v22771_v15 = vld [vmem:[#allocation3 + $0x8] ss:$48 sps:$4 sm:$0xff]   ;;  %v22783_v20 = vld [vmem:[#allocation3 + $0x14] ss:$48 sps:$4 sm:$0xff]  }
 0x11b   : > { %19624 = vmatmul.mubr.msk.bf16.gmra.mrb[4].mxu0 %vm790_vm1, %v24183_v57  ;;  %19628 = vmatmul.mubr.msk.bf16.gmra.mrb[4].mxu1 %vm790_vm1, %v24183_v57  ;;  %v22778_v16 = vld [vmem:[#allocation3 + $0x60] ss:$48 sps:$4 sm:$0x3f]   ;;  %v22779_v17 = vld [vmem:[#allocation3 + $0x68] ss:$48 sps:$4 sm:$0x3f]  }
 0x11c   : > { %889 = vmatprep.mubr.bf16.mxu0 %v26100_v28  ;;  %952 = vmatprep.mubr.bf16.mxu1 %v26100_v28  ;;  %v22774_v18 = vld [vmem:[#allocation3 + $0x64] ss:$48 sps:$4 sm:$0x3f]   ;;  %v22776_v19 = vld [vmem:[#allocation3 + $0x6c] ss:$48 sps:$4 sm:$0x3f]  }
 0x11d   : > { %v22786_v21 = vld [vmem:[#allocation3 + $0x1c] ss:$48 sps:$4 sm:$0xff]   ;;  %v24258_v22 = vsel %vm800_vm0, %v22778_v16, 0  ;;  %v24261_v23 = vsel %vm800_vm0, %v22779_v17, 0  ;;  %v590_v24 = vld [vmem:[%s24125_s19] sm:$0xf] }
 0x11e   : > { %v22781_v25 = vld [vmem:[#allocation3 + $0x10] ss:$48 sps:$4 sm:$0xff]   ;;  %v22784_v26 = vld [vmem:[#allocation3 + $0x18] ss:$48 sps:$4 sm:$0xff]   ;;  %v24281_v29 = vcombine.low %v590_v24, %v24204_v62  ;;  %v22800_v34 = vld [vmem:[#allocation3 + $0x24] ss:$48 sps:$4 sm:$0xff]  }
 0x11f   : > { %v22793_v27 = vld [vmem:[#allocation3 + $0x70] ss:$48 sps:$4 sm:$0x3f]   ;;  %v22794_v30 = vld [vmem:[#allocation3 + $0x78] ss:$48 sps:$4 sm:$0x3f]  }
 0x120   : > { %v22789_v31 = vld [vmem:[#allocation3 + $0x74] ss:$48 sps:$4 sm:$0x3f]   ;;  %v22791_v32 = vld [vmem:[#allocation3 + $0x7c] ss:$48 sps:$4 sm:$0x3f]  }
 0x121   : > { %v24288_v33 = vsel %vm800_vm0, %v22793_v27, 0  ;;  %v22803_v35 = vld [vmem:[#allocation3 + $0x2c] ss:$48 sps:$4 sm:$0xff]   ;;  %v24293_v36 = vsel %vm800_vm0, %v22794_v30, 0  ;;  %v595_v38 = vld [vmem:[%s24125_s19 + $0x14] sm:$0xf] }
 0x122   : > { %v22798_v42 = vld [vmem:[#allocation3 + $0x20] ss:$48 sps:$4 sm:$0xff]   ;;  %v22801_v43 = vld [vmem:[#allocation3 + $0x28] ss:$48 sps:$4 sm:$0xff]   ;;  %v22812_v51 = vld [vmem:[#allocation3 + $0x184] ss:$48 sps:$4 sm:$0xff]  }
 0x123   : > { %19625 = vmatmul.mubr.msk.bf16.gmra.mrb[8].mxu0 %vm790_vm1, %v24195_v61  ;;  %19629 = vmatmul.mubr.msk.bf16.gmra.mrb[8].mxu1 %vm790_vm1, %v24195_v61  ;;  %v22808_v44 = vld [vmem:[#allocation3 + $0x80] ss:$48 sps:$4 sm:$0x3f]   ;;  %v22809_v45 = vld [vmem:[#allocation3 + $0x88] ss:$48 sps:$4 sm:$0x3f]  }
 0x124   : > { %995 = vmatprep.mubr.bf16.mxu0 %v26100_v28  ;;  %1058 = vmatprep.mubr.bf16.mxu1 %v26100_v28  ;;  %v22804_v46 = vld [vmem:[#allocation3 + $0x84] ss:$48 sps:$4 sm:$0x3f]   ;;  %v22806_v47 = vld [vmem:[#allocation3 + $0x8c] ss:$48 sps:$4 sm:$0x3f]  }
 0x125   : > { %v24320_v49 = vsel %vm800_vm0, %v22808_v44, 0  ;;  %v24325_v50 = vsel %vm800_vm0, %v22809_v45, 0  ;;  %v22815_v52 = vld [vmem:[#allocation3 + $0x18c] ss:$48 sps:$4 sm:$0xff]   ;;  %v22810_v53 = vld [vmem:[#allocation3 + $0x180] ss:$48 sps:$4 sm:$0xff]  }
 0x126   : > { %v22820_v58 = vld [vmem:[#allocation3 + $0x1e0] ss:$48 sps:$4 sm:$0x3f]   ;;  %v22821_v59 = vld [vmem:[#allocation3 + $0x1e8] ss:$48 sps:$4 sm:$0x3f]  }
 0x127   : > { %v22816_v60 = vld [vmem:[#allocation3 + $0x1e4] ss:$48 sps:$4 sm:$0x3f]   ;;  %v22828_v63 = vld [vmem:[#allocation3 + $0x19c] ss:$48 sps:$4 sm:$0xff]  }
 0x128   : > { %v22825_v62 = vld [vmem:[#allocation3 + $0x194] ss:$48 sps:$4 sm:$0xff]   ;;  %v604_v3 = vld [vmem:[%s24125_s19 + $0x38] sm:$0xf]  ;;  %v22823_v5 = vld [vmem:[#allocation3 + $0x190] ss:$48 sps:$4 sm:$0xff]  }
 0x129   : > { %v607_v16 = vld [vmem:[%s24125_s19 + $0x44] sm:$0xf]  ;;  %v608_v24 = vld [vmem:[%s24125_s19 + $0x48] sm:$0xf]  ;;  %v22837_v27 = vld [vmem:[#allocation3 + $0x1a0] ss:$48 sps:$4 sm:$0xff]  }
 0x12a   : > { %v22839_v17 = vld [vmem:[#allocation3 + $0x1a4] ss:$48 sps:$4 sm:$0xff]   ;;  %v22847_v30 = vld [vmem:[#allocation3 + $0x200] ss:$48 sps:$4 sm:$0x3f]  }
 0x12b   : > { %19631 = vmatmul.mubr.msk.bf16.vlgmr.msra.gmra.mrb[12].mxu0 %vm790_vm1, %v24159_v41  ;;  %19635 = vmatmul.mubr.msk.bf16.vlgmr.msra.gmra.mrb[12].mxu1 %vm790_vm1, %v24159_v41  ;;  %v22859_v44 = vld [vmem:[#allocation3 + $0x2a0] ss:$48 sps:$4 sm:$0x3f]   ;;  %v22860_v45 = vld [vmem:[#allocation3 + $0x2a8] ss:$48 sps:$4 sm:$0x3f]  }
 0x12c   : > { %1090 = vmatpush1.bf16.msra.mxu0 %v22756_v1  ;;  %1153 = vmatpush1.bf16.msra.mxu1 %v22759_v2  ;;  %v24348_v1 = vsel %vm800_vm0, %v22820_v58, 0  ;;  %v24351_v2 = vsel %vm800_vm0, %v22821_v59, 0  ;;  %v611_v58 = vld [vmem:[%s24125_s19 + $0x54] sm:$0xf]  ;;  %v612_v59 = vld [vmem:[%s24125_s19 + $0x58] sm:$0xf] }
 0x12d   : > { %1005 = vmatprep.mubr.bf16.mxu0 %v26100_v28  ;;  %1068 = vmatprep.mubr.bf16.mxu1 %v26100_v28 }
 0x12e   : > { %19638 = vmatprep.subr.msk.bf16.mxu0 %vm800_vm0, %v22762_v4  ;;  %19642 = vmatprep.subr.msk.bf16.mxu1 %vm800_vm0, %v22764_v9  ;;  %v605_v4 = vld [vmem:[%s24125_s19 + $0x3c] sm:$0xf]  ;;  %v22834_v9 = vld [vmem:[#allocation3 + $0x1f0] ss:$48 sps:$4 sm:$0x3f]  }
 0x12f   : > { %v24369_v7 = vcombine.low %v604_v3, %v605_v4  ;;  %v22874_v3 = vld [vmem:[#allocation3 + $0x2b8] ss:$48 sps:$4 sm:$0x3f]   ;;  %v22869_v4 = vld [vmem:[#allocation3 + $0x2b4] ss:$48 sps:$4 sm:$0x3f]  }
 0x130   : > { %1092 = vmatpush1.bf16.msra.mxu0 %v24228_v10  ;;  %1155 = vmatpush1.bf16.msra.mxu1 %v24233_v12 }
 0x131   : > { %1383 = vmatprep.subr.bf16.mxu0 %v22770_v11  ;;  %1446 = vmatprep.subr.bf16.mxu1 %v22773_v13  ;;  %v22835_v11 = vld [vmem:[#allocation3 + $0x1f8] ss:$48 sps:$4 sm:$0x3f]   ;;  %v22830_v13 = vld [vmem:[#allocation3 + $0x1f4] ss:$48 sps:$4 sm:$0x3f]  }
 0x133   : > { %19632 = vmatmul.mubr.msk.bf16.gmra.mrb[16].mxu0 %vm790_vm1, %v24183_v57  ;;  %19636 = vmatmul.mubr.msk.bf16.gmra.mrb[16].mxu1 %vm790_vm1, %v24183_v57 }
 0x134   : > { %1015 = vmatprep.mubr.bf16.mxu0 %v26100_v28  ;;  %1078 = vmatprep.mubr.bf16.mxu1 %v26100_v28 }
 0x13b   : > { %19633 = vmatmul.mubr.msk.bf16.gmra.mrb[20].mxu0 %vm790_vm1, %v24195_v61  ;;  %19637 = vmatmul.mubr.msk.bf16.gmra.mrb[20].mxu1 %vm790_vm1, %v24195_v61 }
 0x13c   : > { %1121 = vmatprep.mubr.bf16.mxu0 %v26100_v28  ;;  %1184 = vmatprep.mubr.bf16.mxu1 %v26100_v28 }
 0x143   : > { %19639 = vmatmul.mubr.msk.bf16.vlgmr.msra.gmra.mrb[24].mxu0 %vm790_vm1, %v24159_v41  ;;  %19643 = vmatmul.mubr.msk.bf16.vlgmr.msra.gmra.mrb[24].mxu1 %vm790_vm1, %v24159_v41  ;;  %v19648_v41 = vcombine.low %v24217_v6, %v595_v38  ;;  %v22826_v6 = vld [vmem:[#allocation3 + $0x198] ss:$48 sps:$4 sm:$0xff]   ;;  %v24414_v38 = vsel %vm800_vm0, %v22847_v30, 0 }
 0x144   : > { %1384 = vmatpush1.bf16.msra.mxu0 %v22768_v14  ;;  %1447 = vmatpush1.bf16.msra.mxu1 %v22771_v15  ;;  %v22832_v14 = vld [vmem:[#allocation3 + $0x1fc] ss:$48 sps:$4 sm:$0x3f]   ;;  %v606_v15 = vld [vmem:[%s24125_s19 + $0x40] sm:$0xf] }
 0x145   : > { %1131 = vmatprep.mubr.bf16.mxu0 %v26100_v28  ;;  %1194 = vmatprep.mubr.bf16.mxu1 %v26100_v28  ;;  %v22887_v30 = vld [vmem:[#allocation3 + $0x2c8] ss:$48 sps:$4 sm:$0x3f]  }
 0x146   : > { %19673 = vmatprep.subr.msk.bf16.mxu0 %vm800_vm0, %v22774_v18  ;;  %19677 = vmatprep.subr.msk.bf16.mxu1 %vm800_vm0, %v22776_v19  ;;  %v22842_v18 = vld [vmem:[#allocation3 + $0x1ac] ss:$48 sps:$4 sm:$0xff]   ;;  %v24380_v19 = vsel %vm800_vm0, %v22834_v9, 0  ;;  %v614_v9 = vld [vmem:[%s24125_s19 + $0x60] sm:$0xf] }
 0x148   : > { %1386 = vmatpush1.bf16.msra.mxu0 %v24258_v22  ;;  %1449 = vmatpush1.bf16.msra.mxu1 %v24261_v23 }
 0x149   : > { %1509 = vmatprep.subr.bf16.mxu0 %v22783_v20  ;;  %1572 = vmatprep.subr.bf16.mxu1 %v22786_v21  ;;  %v24383_v20 = vsel %vm800_vm0, %v22835_v11, 0  ;;  %v24387_v21 = vcombine.low %v606_v15, %v607_v16  ;;  %v22881_v15 = vld [vmem:[#allocation3 + $0x26c] ss:$48 sps:$4 sm:$0xff]  }
 0x14b   : > { %19640 = vmatmul.mubr.msk.bf16.gmra.mrb[28].mxu0 %vm790_vm1, %v24183_v57  ;;  %19644 = vmatmul.mubr.msk.bf16.gmra.mrb[28].mxu1 %vm790_vm1, %v24183_v57  ;;  %v22813_v57 = vld [vmem:[#allocation3 + $0x188] ss:$48 sps:$4 sm:$0xff]  }
 0x14c   : > { %1141 = vmatprep.mubr.bf16.mxu0 %v26100_v28  ;;  %1204 = vmatprep.mubr.bf16.mxu1 %v26100_v28 }
 0x153   : > { %19641 = vmatmul.mubr.msk.bf16.gmra.mrb[32].mxu0 %vm790_vm1, %v24195_v61  ;;  %19645 = vmatmul.mubr.msk.bf16.gmra.mrb[32].mxu1 %vm790_vm1, %v24195_v61  ;;  %v22818_v61 = vld [vmem:[#allocation3 + $0x1ec] ss:$48 sps:$4 sm:$0x3f]  }
 0x154   : > { %1415 = vmatprep.mubr.bf16.mxu0 %v26100_v28  ;;  %1478 = vmatprep.mubr.bf16.mxu1 %v26100_v28 }
 0x15b   : > { %19674 = vmatmul.mubr.msk.bf16.vlgmr.msra.gmra.mrb[0].mxu0 %vm790_vm1, %v24281_v29  ;;  %19678 = vmatmul.mubr.msk.bf16.vlgmr.msra.gmra.mrb[0].mxu1 %vm790_vm1, %v24281_v29 }
 0x15c   : > { %1510 = vmatpush1.bf16.msra.mxu0 %v22781_v25  ;;  %1573 = vmatpush1.bf16.msra.mxu1 %v22784_v26  ;;  %v609_v25 = vld [vmem:[%s24125_s19 + $0x4c] sm:$0xf] }
 0x15d   : > { %1425 = vmatprep.mubr.bf16.mxu0 %v26100_v28  ;;  %1488 = vmatprep.mubr.bf16.mxu1 %v26100_v28  ;;  %v24399_v26 = vcombine.low %v608_v24, %v609_v25  ;;  %v22876_v25 = vld [vmem:[#allocation3 + $0x260] ss:$48 sps:$4 sm:$0xff]  }
 0x15e   : > { %19681 = vmatprep.subr.msk.bf16.mxu0 %vm800_vm0, %v22789_v31  ;;  %19685 = vmatprep.subr.msk.bf16.mxu1 %vm800_vm0, %v22791_v32  ;;  %v22848_v31 = vld [vmem:[#allocation3 + $0x208] ss:$48 sps:$4 sm:$0x3f]   ;;  %v22843_v32 = vld [vmem:[#allocation3 + $0x204] ss:$48 sps:$4 sm:$0x3f]  }
 0x160   : > { %1512 = vmatpush1.bf16.msra.mxu0 %v24288_v33  ;;  %1575 = vmatpush1.bf16.msra.mxu1 %v24293_v36 }
 0x161   : > { %1635 = vmatprep.subr.bf16.mxu0 %v22800_v34  ;;  %1698 = vmatprep.subr.bf16.mxu1 %v22803_v35  ;;  %v22845_v34 = vld [vmem:[#allocation3 + $0x20c] ss:$48 sps:$4 sm:$0x3f]   ;;  %v22851_v35 = vld [vmem:[#allocation3 + $0x244] ss:$48 sps:$4 sm:$0xff]  }
 0x163   : > { %19675 = vmatmul.mubr.msk.bf16.gmra.mrb[4].mxu0 %vm790_vm1, %v24299_v37  ;;  %19679 = vmatmul.mubr.msk.bf16.gmra.mrb[4].mxu1 %vm790_vm1, %v24299_v37 }
 0x164   : > { %1435 = vmatprep.mubr.bf16.mxu0 %v26100_v28  ;;  %1498 = vmatprep.mubr.bf16.mxu1 %v26100_v28 }
 0x16b   : > { %19676 = vmatmul.mubr.msk.bf16.gmra.mrb[8].mxu0 %vm790_vm1, %v19648_v41  ;;  %19680 = vmatmul.mubr.msk.bf16.gmra.mrb[8].mxu1 %vm790_vm1, %v19648_v41 }
 0x16c   : > { %1541 = vmatprep.mubr.bf16.mxu0 %v26100_v28  ;;  %1604 = vmatprep.mubr.bf16.mxu1 %v26100_v28 }
 0x173   : > { %19682 = vmatmul.mubr.msk.bf16.vlgmr.msra.gmra.mrb[12].mxu0 %vm790_vm1, %v24281_v29  ;;  %19686 = vmatmul.mubr.msk.bf16.vlgmr.msra.gmra.mrb[12].mxu1 %vm790_vm1, %v24281_v29 }
 0x174   : > { %1636 = vmatpush1.bf16.msra.mxu0 %v22798_v42  ;;  %1699 = vmatpush1.bf16.msra.mxu1 %v22801_v43  ;;  %v22849_v42 = vld [vmem:[#allocation3 + $0x240] ss:$48 sps:$4 sm:$0xff]   ;;  %v22852_v43 = vld [vmem:[#allocation3 + $0x248] ss:$48 sps:$4 sm:$0xff]  }
 0x175   : > { %1551 = vmatprep.mubr.bf16.mxu0 %v26100_v28  ;;  %1614 = vmatprep.mubr.bf16.mxu1 %v26100_v28 }
 0x176   : > { %19689 = vmatprep.subr.msk.bf16.mxu0 %vm800_vm0, %v22804_v46  ;;  %19693 = vmatprep.subr.msk.bf16.mxu1 %vm800_vm0, %v22806_v47  ;;  %v22855_v46 = vld [vmem:[#allocation3 + $0x2a4] ss:$48 sps:$4 sm:$0x3f]   ;;  %v22857_v47 = vld [vmem:[#allocation3 + $0x2ac] ss:$48 sps:$4 sm:$0x3f]  }
 0x178   : > { %1638 = vmatpush1.bf16.msra.mxu0 %v24320_v49  ;;  %1701 = vmatpush1.bf16.msra.mxu1 %v24325_v50 }
 0x179   : > { %1954 = vmatprep.subr.bf16.mxu0 %v22812_v51  ;;  %2017 = vmatprep.subr.bf16.mxu1 %v22815_v52  ;;  %v24440_v51 = vsel %vm800_vm0, %v22859_v44, 0  ;;  %v24443_v52 = vsel %vm800_vm0, %v22860_v45, 0  ;;  %v22891_v44 = vld [vmem:[#allocation3 + $0x308] ss:$48 sps:$4 sm:$0xff]  }
 0x17a   : > { %v22898_v45 = vld [vmem:[#allocation3 + $0x360] ss:$48 sps:$4 sm:$0x3f]  }
 0x17b   : > { %19683 = vmatmul.mubr.msk.bf16.gmra.mrb[16].mxu0 %vm790_vm1, %v24299_v37  ;;  %19687 = vmatmul.mubr.msk.bf16.gmra.mrb[16].mxu1 %vm790_vm1, %v24299_v37 }
 0x17c   : > { %1561 = vmatprep.mubr.bf16.mxu0 %v26100_v28  ;;  %1624 = vmatprep.mubr.bf16.mxu1 %v26100_v28 }
 0x183   : > { %19684 = vmatmul.mubr.msk.bf16.gmra.mrb[20].mxu0 %vm790_vm1, %v19648_v41  ;;  %19688 = vmatmul.mubr.msk.bf16.gmra.mrb[20].mxu1 %vm790_vm1, %v19648_v41 }
 0x184   : > { %1667 = vmatprep.mubr.bf16.mxu0 %v26100_v28  ;;  %1730 = vmatprep.mubr.bf16.mxu1 %v26100_v28 }
 0x18b   : > { %19690 = vmatmul.mubr.msk.bf16.vlgmr.msra.gmra.mrb[24].mxu0 %vm790_vm1, %v24281_v29  ;;  %19694 = vmatmul.mubr.msk.bf16.vlgmr.msra.gmra.mrb[24].mxu1 %vm790_vm1, %v24281_v29  ;;  %v22840_v29 = vld [vmem:[#allocation3 + $0x1a8] ss:$48 sps:$4 sm:$0xff]  }
 0x18c   : > { %1955 = vmatpush1.bf16.msra.mxu0 %v22810_v53  ;;  %2018 = vmatpush1.bf16.msra.mxu1 %v22813_v57  ;;  %v22864_v53 = vld [vmem:[#allocation3 + $0x254] ss:$48 sps:$4 sm:$0xff]   ;;  %v22867_v57 = vld [vmem:[#allocation3 + $0x25c] ss:$48 sps:$4 sm:$0xff]  }
 0x18d   : > { %1677 = vmatprep.mubr.bf16.mxu0 %v26100_v28  ;;  %1740 = vmatprep.mubr.bf16.mxu1 %v26100_v28 }
 0x18e   : > { %19724 = vmatprep.subr.msk.bf16.mxu0 %vm800_vm0, %v22816_v60  ;;  %19728 = vmatprep.subr.msk.bf16.mxu1 %vm800_vm0, %v22818_v61  ;;  %v24465_v60 = vcombine.low %v611_v58, %v612_v59  ;;  %v22862_v61 = vld [vmem:[#allocation3 + $0x250] ss:$48 sps:$4 sm:$0xff]   ;;  %v22902_v59 = vld [vmem:[#allocation3 + $0x314] ss:$48 sps:$4 sm:$0xff]  }
 0x190   : > { %1957 = vmatpush1.bf16.msra.mxu0 %v24348_v1  ;;  %2020 = vmatpush1.bf16.msra.mxu1 %v24351_v2 }
 0x191   : > { %2080 = vmatprep.subr.bf16.mxu0 %v22825_v62  ;;  %2143 = vmatprep.subr.bf16.mxu1 %v22828_v63  ;;  %v22865_v62 = vld [vmem:[#allocation3 + $0x258] ss:$48 sps:$4 sm:$0xff]   ;;  %v22873_v63 = vld [vmem:[#allocation3 + $0x2b0] ss:$48 sps:$4 sm:$0x3f]  }
 0x192   : > { %v24476_v11 = vsel %vm800_vm0, %v22873_v63, 0  ;;  %v22903_v63 = vld [vmem:[#allocation3 + $0x318] ss:$48 sps:$4 sm:$0xff]  }
 0x193   : > { %19691 = vmatmul.mubr.msk.bf16.gmra.mrb[28].mxu0 %vm790_vm1, %v24299_v37  ;;  %19695 = vmatmul.mubr.msk.bf16.gmra.mrb[28].mxu1 %vm790_vm1, %v24299_v37  ;;  %v22854_v37 = vld [vmem:[#allocation3 + $0x24c] ss:$48 sps:$4 sm:$0xff]  }
 0x194   : > { %1687 = vmatprep.mubr.bf16.mxu0 %v26100_v28  ;;  %1750 = vmatprep.mubr.bf16.mxu1 %v26100_v28 }
 0x19b   : > { %19692 = vmatmul.mubr.msk.bf16.gmra.mrb[32].mxu0 %vm790_vm1, %v19648_v41  ;;  %19696 = vmatmul.mubr.msk.bf16.gmra.mrb[32].mxu1 %vm790_vm1, %v19648_v41  ;;  %v24417_v41 = vsel %vm800_vm0, %v22848_v31, 0  ;;  %v22882_v31 = vld [vmem:[#allocation3 + $0x2c4] ss:$48 sps:$4 sm:$0x3f]  }
 0x19c   : > { %1986 = vmatprep.mubr.bf16.mxu0 %v26100_v28  ;;  %2049 = vmatprep.mubr.bf16.mxu1 %v26100_v28 }
 0x1a3   : > { %19725 = vmatmul.mubr.msk.bf16.vlgmr.msra.gmra.mrb[0].mxu0 %vm790_vm1, %v24369_v7  ;;  %19729 = vmatmul.mubr.msk.bf16.vlgmr.msra.gmra.mrb[0].mxu1 %vm790_vm1, %v24369_v7 }
 0x1a4   : > { %2081 = vmatpush1.bf16.msra.mxu0 %v22823_v5  ;;  %2144 = vmatpush1.bf16.msra.mxu1 %v22826_v6  ;;  %v22871_v5 = vld [vmem:[#allocation3 + $0x2bc] ss:$48 sps:$4 sm:$0x3f]  }
 0x1a5   : > { %1996 = vmatprep.mubr.bf16.mxu0 %v26100_v28  ;;  %2059 = vmatprep.mubr.bf16.mxu1 %v26100_v28  ;;  %v613_v6 = vld [vmem:[%s24125_s19 + $0x5c] sm:$0xf] }
 0x1a6   : > { %19732 = vmatprep.subr.msk.bf16.mxu0 %vm800_vm0, %v22830_v13  ;;  %19736 = vmatprep.subr.msk.bf16.mxu1 %vm800_vm0, %v22832_v14  ;;  %v24479_v13 = vsel %vm800_vm0, %v22874_v3, 0  ;;  %v22878_v14 = vld [vmem:[#allocation3 + $0x264] ss:$48 sps:$4 sm:$0xff]   ;;  %v24483_v16 = vcombine.low %v613_v6, %v614_v9  ;;  %v22910_v3 = vld [vmem:[#allocation3 + $0x370] ss:$48 sps:$4 sm:$0x3f]  }
 0x1a7   : > { %v22908_v6 = vld [vmem:[#allocation3 + $0x37c] ss:$48 sps:$4 sm:$0x3f]   ;;  %v24566_v9 = vsel %vm800_vm0, %v22910_v3, 0 }
 0x1a8   : > { %2083 = vmatpush1.bf16.msra.mxu0 %v24380_v19  ;;  %2146 = vmatpush1.bf16.msra.mxu1 %v24383_v20  ;;  %26189 = vst [vmem:[#allocation27_spill] sm:$0xff] %v24566_v9 }
 0x1a9   : > { %2206 = vmatprep.subr.bf16.mxu0 %v22839_v17  ;;  %2269 = vmatprep.subr.bf16.mxu1 %v22842_v18  ;;  %v615_v17 = vld [vmem:[%s24125_s19 + $0x64] sm:$0xf]  ;;  %v616_v18 = vld [vmem:[%s24125_s19 + $0x68] sm:$0xf] }
 0x1aa   : > { %v24495_v24 = vcombine.low %v615_v17, %v616_v18  ;;  %v22917_v17 = vld [vmem:[#allocation3 + $0x32c] ss:$48 sps:$4 sm:$0xff]   ;;  %v596_v18 = vld [vmem:[%s24125_s19 + $0x18] sm:$0xf] }
 0x1ab   : > { %19726 = vmatmul.mubr.msk.bf16.gmra.mrb[4].mxu0 %vm790_vm1, %v24387_v21  ;;  %19730 = vmatmul.mubr.msk.bf16.gmra.mrb[4].mxu1 %vm790_vm1, %v24387_v21 }
 0x1ac   : > { %2006 = vmatprep.mubr.bf16.mxu0 %v26100_v28  ;;  %2069 = vmatprep.mubr.bf16.mxu1 %v26100_v28 }
 0x1b3   : > { %19727 = vmatmul.mubr.msk.bf16.gmra.mrb[8].mxu0 %vm790_vm1, %v24399_v26  ;;  %19731 = vmatmul.mubr.msk.bf16.gmra.mrb[8].mxu1 %vm790_vm1, %v24399_v26 }
 0x1b4   : > { %2112 = vmatprep.mubr.bf16.mxu0 %v26100_v28  ;;  %2175 = vmatprep.mubr.bf16.mxu1 %v26100_v28 }
 0x1bb   : > { %19733 = vmatmul.mubr.msk.bf16.vlgmr.msra.gmra.mrb[12].mxu0 %vm790_vm1, %v24369_v7  ;;  %19737 = vmatmul.mubr.msk.bf16.vlgmr.msra.gmra.mrb[12].mxu1 %vm790_vm1, %v24369_v7 }
 0x1bc   : > { %2207 = vmatpush1.bf16.msra.mxu0 %v22837_v27  ;;  %2270 = vmatpush1.bf16.msra.mxu1 %v22840_v29  ;;  %v22879_v27 = vld [vmem:[#allocation3 + $0x268] ss:$48 sps:$4 sm:$0xff]   ;;  %v22886_v29 = vld [vmem:[#allocation3 + $0x2c0] ss:$48 sps:$4 sm:$0x3f]  }
 0x1bd   : > { %2122 = vmatprep.mubr.bf16.mxu0 %v26100_v28  ;;  %2185 = vmatprep.mubr.bf16.mxu1 %v26100_v28 }
 0x1be   : > { %19740 = vmatprep.subr.msk.bf16.mxu0 %vm800_vm0, %v22843_v32  ;;  %19744 = vmatprep.subr.msk.bf16.mxu1 %vm800_vm0, %v22845_v34  ;;  %v22884_v32 = vld [vmem:[#allocation3 + $0x2cc] ss:$48 sps:$4 sm:$0x3f]   ;;  %v24510_v34 = vsel %vm800_vm0, %v22886_v29, 0  ;;  %v22912_v29 = vld [vmem:[#allocation3 + $0x320] ss:$48 sps:$4 sm:$0xff]  }
 0x1bf   : > { %26185 = vst [vmem:[#allocation23_spill] sm:$0xff] %v24510_v34 }
 0x1c0   : > { %2209 = vmatpush1.bf16.msra.mxu0 %v24414_v38  ;;  %2272 = vmatpush1.bf16.msra.mxu1 %v24417_v41 }
 0x1c1   : > { %2597 = vmatprep.subr.bf16.mxu0 %v22851_v35  ;;  %2660 = vmatprep.subr.bf16.mxu1 %v22854_v37  ;;  %v24513_v35 = vsel %vm800_vm0, %v22887_v30, 0  ;;  %v22890_v37 = vld [vmem:[#allocation3 + $0x304] ss:$48 sps:$4 sm:$0xff]   ;;  %v22915_v30 = vld [vmem:[#allocation3 + $0x328] ss:$48 sps:$4 sm:$0xff]  }
 0x1c2   : > { %26186 = vst [vmem:[#allocation24_spill] sm:$0xff] %v24513_v35 }
 0x1c3   : > { %19734 = vmatmul.mubr.msk.bf16.gmra.mrb[16].mxu0 %vm790_vm1, %v24387_v21  ;;  %19738 = vmatmul.mubr.msk.bf16.gmra.mrb[16].mxu1 %vm790_vm1, %v24387_v21 }
 0x1c4   : > { %2132 = vmatprep.mubr.bf16.mxu0 %v26100_v28  ;;  %2195 = vmatprep.mubr.bf16.mxu1 %v26100_v28 }
 0x1cb   : > { %19735 = vmatmul.mubr.msk.bf16.gmra.mrb[20].mxu0 %vm790_vm1, %v24399_v26  ;;  %19739 = vmatmul.mubr.msk.bf16.gmra.mrb[20].mxu1 %vm790_vm1, %v24399_v26 }
 0x1cc   : > { %2238 = vmatprep.mubr.bf16.mxu0 %v26100_v28  ;;  %2301 = vmatprep.mubr.bf16.mxu1 %v26100_v28 }
 0x1d3   : > { %19741 = vmatmul.mubr.msk.bf16.vlgmr.msra.gmra.mrb[24].mxu0 %vm790_vm1, %v24369_v7  ;;  %19745 = vmatmul.mubr.msk.bf16.vlgmr.msra.gmra.mrb[24].mxu1 %vm790_vm1, %v24369_v7 }
 0x1d4   : > { %2598 = vmatpush1.bf16.msra.mxu0 %v22849_v42  ;;  %2661 = vmatpush1.bf16.msra.mxu1 %v22852_v43  ;;  %v22893_v42 = vld [vmem:[#allocation3 + $0x30c] ss:$48 sps:$4 sm:$0xff]   ;;  %v22888_v43 = vld [vmem:[#allocation3 + $0x300] ss:$48 sps:$4 sm:$0xff]  }
 0x1d5   : > { %2248 = vmatprep.mubr.bf16.mxu0 %v26100_v28  ;;  %2311 = vmatprep.mubr.bf16.mxu1 %v26100_v28 }
 0x1d6   : > { %19775 = vmatprep.subr.msk.bf16.mxu0 %vm800_vm0, %v22855_v46  ;;  %19779 = vmatprep.subr.msk.bf16.mxu1 %vm800_vm0, %v22857_v47  ;;  %v22899_v46 = vld [vmem:[#allocation3 + $0x368] ss:$48 sps:$4 sm:$0x3f]   ;;  %v22894_v47 = vld [vmem:[#allocation3 + $0x364] ss:$48 sps:$4 sm:$0x3f]  }
 0x1d7   : > { %v24541_v58 = vsel %vm800_vm0, %v22899_v46, 0  ;;  %v22929_v46 = vld [vmem:[#allocation3 + $0x3cc] ss:$48 sps:$4 sm:$0xff]  }
 0x1d8   : > { %2600 = vmatpush1.bf16.msra.mxu0 %v24440_v51  ;;  %2663 = vmatpush1.bf16.msra.mxu1 %v24443_v52  ;;  %26188 = vst [vmem:[#allocation26_spill] sm:$0xff] %v24541_v58 }
 0x1d9   : > { %2723 = vmatprep.subr.bf16.mxu0 %v22864_v53  ;;  %2786 = vmatprep.subr.bf16.mxu1 %v22867_v57  ;;  %v22896_v53 = vld [vmem:[#allocation3 + $0x36c] ss:$48 sps:$4 sm:$0x3f]   ;;  %v24538_v57 = vsel %vm800_vm0, %v22898_v45, 0  ;;  %v22926_v45 = vld [vmem:[#allocation3 + $0x3c4] ss:$48 sps:$4 sm:$0xff]  }
 0x1da   : > { %26187 = vst [vmem:[#allocation25_spill] sm:$0xff] %v24538_v57 }
 0x1db   : > { %19742 = vmatmul.mubr.msk.bf16.gmra.mrb[28].mxu0 %vm790_vm1, %v24387_v21  ;;  %19746 = vmatmul.mubr.msk.bf16.gmra.mrb[28].mxu1 %vm790_vm1, %v24387_v21 }
 0x1dc   : > { %2258 = vmatprep.mubr.bf16.mxu0 %v26100_v28  ;;  %2321 = vmatprep.mubr.bf16.mxu1 %v26100_v28 }
 0x1e3   : > { %19743 = vmatmul.mubr.msk.bf16.gmra.mrb[32].mxu0 %vm790_vm1, %v24399_v26  ;;  %19747 = vmatmul.mubr.msk.bf16.gmra.mrb[32].mxu1 %vm790_vm1, %v24399_v26 }
 0x1e4   : > { %2629 = vmatprep.mubr.bf16.mxu0 %v26100_v28  ;;  %2692 = vmatprep.mubr.bf16.mxu1 %v26100_v28 }
 0x1eb   : > { %19776 = vmatmul.mubr.msk.bf16.vlgmr.msra.gmra.mrb[0].mxu0 %vm790_vm1, %v24465_v60  ;;  %19780 = vmatmul.mubr.msk.bf16.vlgmr.msra.gmra.mrb[0].mxu1 %vm790_vm1, %v24465_v60 }
 0x1ec   : > { %2724 = vmatpush1.bf16.msra.mxu0 %v22862_v61  ;;  %2787 = vmatpush1.bf16.msra.mxu1 %v22865_v62  ;;  %v22905_v61 = vld [vmem:[#allocation3 + $0x31c] ss:$48 sps:$4 sm:$0xff]   ;;  %v22900_v62 = vld [vmem:[#allocation3 + $0x310] ss:$48 sps:$4 sm:$0xff]  }
 0x1ed   : > { %2639 = vmatprep.mubr.bf16.mxu0 %v26100_v28  ;;  %2702 = vmatprep.mubr.bf16.mxu1 %v26100_v28 }
 0x1ee   : > { %19783 = vmatprep.subr.msk.bf16.mxu0 %vm800_vm0, %v22869_v4  ;;  %19787 = vmatprep.subr.msk.bf16.mxu1 %vm800_vm0, %v22871_v5  ;;  %v22911_v4 = vld [vmem:[#allocation3 + $0x378] ss:$48 sps:$4 sm:$0x3f]   ;;  %v22906_v5 = vld [vmem:[#allocation3 + $0x374] ss:$48 sps:$4 sm:$0x3f]  }
 0x1f0   : > { %2726 = vmatpush1.bf16.msra.mxu0 %v24476_v11  ;;  %2789 = vmatpush1.bf16.msra.mxu1 %v24479_v13 }
 0x1f1   : > { %2849 = vmatprep.subr.bf16.mxu0 %v22878_v14  ;;  %2912 = vmatprep.subr.bf16.mxu1 %v22881_v15  ;;  %v24569_v14 = vsel %vm800_vm0, %v22911_v4, 0  ;;  %v22914_v15 = vld [vmem:[#allocation3 + $0x324] ss:$48 sps:$4 sm:$0xff]  }
 0x1f2   : > { %26190 = vst [vmem:[#allocation28_spill] sm:$0xff] %v24569_v14 }
 0x1f3   : > { %19777 = vmatmul.mubr.msk.bf16.gmra.mrb[4].mxu0 %vm790_vm1, %v24483_v16  ;;  %19781 = vmatmul.mubr.msk.bf16.gmra.mrb[4].mxu1 %vm790_vm1, %v24483_v16 }
 0x1f4   : > { %2649 = vmatprep.mubr.bf16.mxu0 %v26100_v28  ;;  %2712 = vmatprep.mubr.bf16.mxu1 %v26100_v28 }
 0x1fb   : > { %19778 = vmatmul.mubr.msk.bf16.gmra.mrb[8].mxu0 %vm790_vm1, %v24495_v24  ;;  %19782 = vmatmul.mubr.msk.bf16.gmra.mrb[8].mxu1 %vm790_vm1, %v24495_v24 }
 0x1fc   : > { %2755 = vmatprep.mubr.bf16.mxu0 %v26100_v28  ;;  %2818 = vmatprep.mubr.bf16.mxu1 %v26100_v28 }
 0x203   : > { %19784 = vmatmul.mubr.msk.bf16.vlgmr.msra.gmra.mrb[12].mxu0 %vm790_vm1, %v24465_v60  ;;  %19788 = vmatmul.mubr.msk.bf16.vlgmr.msra.gmra.mrb[12].mxu1 %vm790_vm1, %v24465_v60 }
 0x204   : > { %2850 = vmatpush1.bf16.msra.mxu0 %v22876_v25  ;;  %2913 = vmatpush1.bf16.msra.mxu1 %v22879_v27  ;;  %v23386_v25 = vld [vmem:[%s24125_s19 + $0x14] sm:$0xf] }
 0x205   : > { %2765 = vmatprep.mubr.bf16.mxu0 %v26100_v28  ;;  %2828 = vmatprep.mubr.bf16.mxu1 %v26100_v28  ;;  %v24583_v27 = vcombine.low %v23386_v25, %v596_v18  ;;  %v22946_v18 = vld [vmem:[#allocation3 + $0x430] ss:$48 sps:$4 sm:$0x3f]   ;;  %v22947_v25 = vld [vmem:[#allocation3 + $0x438] ss:$48 sps:$4 sm:$0x3f]  }
 0x206   : > { %19791 = vmatprep.subr.msk.bf16.mxu0 %vm800_vm0, %v22882_v31  ;;  %19795 = vmatprep.subr.msk.bf16.mxu1 %vm800_vm0, %v22884_v32  ;;  %v22922_v31 = vld [vmem:[#allocation3 + $0x380] ss:$48 sps:$4 sm:$0x3f]   ;;  %v22923_v32 = vld [vmem:[#allocation3 + $0x388] ss:$48 sps:$4 sm:$0x3f]  }
 0x208   : > { %2852 = vmatpush1.bf16.msra.mxu0 %v24510_v34  ;;  %2915 = vmatpush1.bf16.msra.mxu1 %v24513_v35 }
 0x209   : > { %3230 = vmatprep.subr.bf16.mxu0 %v22890_v37  ;;  %3293 = vmatprep.subr.bf16.mxu1 %v22893_v42  ;;  %v22918_v37 = vld [vmem:[#allocation3 + $0x384] ss:$48 sps:$4 sm:$0x3f]   ;;  %v22920_v42 = vld [vmem:[#allocation3 + $0x38c] ss:$48 sps:$4 sm:$0x3f]  }
 0x20b   : > { %19785 = vmatmul.mubr.msk.bf16.gmra.mrb[16].mxu0 %vm790_vm1, %v24483_v16  ;;  %19789 = vmatmul.mubr.msk.bf16.gmra.mrb[16].mxu1 %vm790_vm1, %v24483_v16 }
 0x20c   : > { %2775 = vmatprep.mubr.bf16.mxu0 %v26100_v28  ;;  %2838 = vmatprep.mubr.bf16.mxu1 %v26100_v28 }
 0x213   : > { %19786 = vmatmul.mubr.msk.bf16.gmra.mrb[20].mxu0 %vm790_vm1, %v24495_v24  ;;  %19790 = vmatmul.mubr.msk.bf16.gmra.mrb[20].mxu1 %vm790_vm1, %v24495_v24 }
 0x214   : > { %2881 = vmatprep.mubr.bf16.mxu0 %v26100_v28  ;;  %2944 = vmatprep.mubr.bf16.mxu1 %v26100_v28 }
 0x21b   : > { %19792 = vmatmul.mubr.msk.bf16.vlgmr.msra.gmra.mrb[24].mxu0 %vm790_vm1, %v24465_v60  ;;  %19796 = vmatmul.mubr.msk.bf16.vlgmr.msra.gmra.mrb[24].mxu1 %vm790_vm1, %v24465_v60 }
 0x21c   : > { %3231 = vmatpush1.bf16.msra.mxu0 %v22888_v43  ;;  %3294 = vmatpush1.bf16.msra.mxu1 %v22891_v44  ;;  %v24598_v43 = vsel %vm800_vm0, %v22922_v31, 0  ;;  %v24601_v44 = vsel %vm800_vm0, %v22923_v32, 0  ;;  %v24654_v31 = vsel %vm800_vm0, %v22946_v18, 0  ;;  %v24657_v32 = vsel %vm800_vm0, %v22947_v25, 0  ;;  %v23389_v18 = vld [vmem:[#allocation3 + $0xcc] ss:$48 sps:$4 sm:$0xff]  }
 0x21d   : > { %2891 = vmatprep.mubr.bf16.mxu0 %v26100_v28  ;;  %2954 = vmatprep.mubr.bf16.mxu1 %v26100_v28  ;;  %26191 = vst [vmem:[#allocation29_spill] sm:$0xff] %v24598_v43  ;;  %26192 = vst [vmem:[#allocation30_spill] sm:$0xff] %v24601_v44  ;;  %v23390_v25 = vld [vmem:[#allocation3 + $0xc0] ss:$48 sps:$4 sm:$0xff]  }
 0x21e   : > { %19826 = vmatprep.subr.msk.bf16.mxu0 %vm800_vm0, %v22894_v47  ;;  %19830 = vmatprep.subr.msk.bf16.mxu1 %vm800_vm0, %v22896_v53  ;;  %v22924_v47 = vld [vmem:[#allocation3 + $0x3c0] ss:$48 sps:$4 sm:$0xff]   ;;  %v22927_v53 = vld [vmem:[#allocation3 + $0x3c8] ss:$48 sps:$4 sm:$0xff]   ;;  %26195 = vst [vmem:[#allocation33_spill] sm:$0xff] %v24654_v31  ;;  %26196 = vst [vmem:[#allocation34_spill] sm:$0xff] %v24657_v32 }
 0x220   : > { %3233 = vmatpush1.bf16.msra.mxu0 %v24538_v57  ;;  %3296 = vmatpush1.bf16.msra.mxu1 %v24541_v58 }
 0x221   : > { %3356 = vmatprep.subr.bf16.mxu0 %v22902_v59  ;;  %3419 = vmatprep.subr.bf16.mxu1 %v22905_v61  ;;  %v22934_v59 = vld [vmem:[#allocation3 + $0x420] ss:$48 sps:$4 sm:$0x3f]   ;;  %v22935_v61 = vld [vmem:[#allocation3 + $0x428] ss:$48 sps:$4 sm:$0x3f]  }
 0x222   : > { %v24626_v3 = vsel %vm800_vm0, %v22934_v59, 0  ;;  %v24629_v4 = vsel %vm800_vm0, %v22935_v61, 0  ;;  %v22951_v59 = vld [vmem:[#allocation3 + $0x3e8] ss:$48 sps:$4 sm:$0xff]  }
 0x223   : > { %19793 = vmatmul.mubr.msk.bf16.gmra.mrb[28].mxu0 %vm790_vm1, %v24483_v16  ;;  %19797 = vmatmul.mubr.msk.bf16.gmra.mrb[28].mxu1 %vm790_vm1, %v24483_v16  ;;  %26193 = vst [vmem:[#allocation31_spill] sm:$0xff] %v24626_v3  ;;  %26194 = vst [vmem:[#allocation32_spill] sm:$0xff] %v24629_v4  ;;  %v22958_v61 = vld [vmem:[#allocation3 + $0x440] ss:$48 sps:$4 sm:$0x3f]  }
 0x224   : > { %2901 = vmatprep.mubr.bf16.mxu0 %v26100_v28  ;;  %2964 = vmatprep.mubr.bf16.mxu1 %v26100_v28 }
 0x22b   : > { %19794 = vmatmul.mubr.msk.bf16.gmra.mrb[32].mxu0 %vm790_vm1, %v24495_v24  ;;  %19798 = vmatmul.mubr.msk.bf16.gmra.mrb[32].mxu1 %vm790_vm1, %v24495_v24 }
 0x22c   : > { %3262 = vmatprep.mubr.bf16.mxu0 %v26100_v28  ;;  %3325 = vmatprep.mubr.bf16.mxu1 %v26100_v28 }
 0x233   : > { %19827 = vmatmul.mubr.msk.bf16.vlgmr.msra.gmra.mrb[0].mxu0 %vm790_vm1, %v24211_v0  ;;  %19831 = vmatmul.mubr.msk.bf16.vlgmr.msra.gmra.mrb[0].mxu1 %vm790_vm1, %v24211_v0 }
 0x234   : > { %3357 = vmatpush1.bf16.msra.mxu0 %v22900_v62  ;;  %3420 = vmatpush1.bf16.msra.mxu1 %v22903_v63  ;;  %v22930_v62 = vld [vmem:[#allocation3 + $0x424] ss:$48 sps:$4 sm:$0x3f]   ;;  %v22932_v63 = vld [vmem:[#allocation3 + $0x42c] ss:$48 sps:$4 sm:$0x3f]  }
 0x235   : > { %3272 = vmatprep.mubr.bf16.mxu0 %v26100_v28  ;;  %3335 = vmatprep.mubr.bf16.mxu1 %v26100_v28 }
 0x236   : > { %19834 = vmatprep.subr.msk.bf16.mxu0 %vm800_vm0, %v22906_v5  ;;  %19838 = vmatprep.subr.msk.bf16.mxu1 %vm800_vm0, %v22908_v6  ;;  %v22938_v5 = vld [vmem:[#allocation3 + $0x3d4] ss:$48 sps:$4 sm:$0xff]   ;;  %v22941_v6 = vld [vmem:[#allocation3 + $0x3dc] ss:$48 sps:$4 sm:$0xff]  }
 0x238   : > { %3359 = vmatpush1.bf16.msra.mxu0 %v24566_v9  ;;  %3422 = vmatpush1.bf16.msra.mxu1 %v24569_v14  ;;  %v23442_v9 = vld [vmem:[#allocation3 + $0x244] ss:$48 sps:$4 sm:$0xff]  }
 0x239   : > { %3482 = vmatprep.subr.bf16.mxu0 %v22914_v15  ;;  %3545 = vmatprep.subr.bf16.mxu1 %v22917_v17  ;;  %v22936_v15 = vld [vmem:[#allocation3 + $0x3d0] ss:$48 sps:$4 sm:$0xff]   ;;  %v22939_v17 = vld [vmem:[#allocation3 + $0x3d8] ss:$48 sps:$4 sm:$0xff]  }
 0x23b   : > { %19828 = vmatmul.mubr.msk.bf16.gmra.mrb[4].mxu0 %vm790_vm1, %v24221_v8  ;;  %19832 = vmatmul.mubr.msk.bf16.gmra.mrb[4].mxu1 %vm790_vm1, %v24221_v8 }
 0x23c   : > { %3282 = vmatprep.mubr.bf16.mxu0 %v26100_v28  ;;  %3345 = vmatprep.mubr.bf16.mxu1 %v26100_v28 }
 0x243   : > { %19829 = vmatmul.mubr.msk.bf16.gmra.mrb[8].mxu0 %vm790_vm1, %v24583_v27  ;;  %19833 = vmatmul.mubr.msk.bf16.gmra.mrb[8].mxu1 %vm790_vm1, %v24583_v27 }
 0x244   : > { %3388 = vmatprep.mubr.bf16.mxu0 %v26100_v28  ;;  %3451 = vmatprep.mubr.bf16.mxu1 %v26100_v28 }
 0x24b   : > { %19835 = vmatmul.mubr.msk.bf16.vlgmr.msra.gmra.mrb[12].mxu0 %vm790_vm1, %v24211_v0  ;;  %19839 = vmatmul.mubr.msk.bf16.vlgmr.msra.gmra.mrb[12].mxu1 %vm790_vm1, %v24211_v0 }
 0x24c   : > { %3483 = vmatpush1.bf16.msra.mxu0 %v22912_v29  ;;  %3546 = vmatpush1.bf16.msra.mxu1 %v22915_v30  ;;  %v22942_v29 = vld [vmem:[#allocation3 + $0x434] ss:$48 sps:$4 sm:$0x3f]   ;;  %v22944_v30 = vld [vmem:[#allocation3 + $0x43c] ss:$48 sps:$4 sm:$0x3f]  }
 0x24d   : > { %3398 = vmatprep.mubr.bf16.mxu0 %v26100_v28  ;;  %3461 = vmatprep.mubr.bf16.mxu1 %v26100_v28 }
 0x24e   : > { %19842 = vmatprep.subr.msk.bf16.mxu0 %vm800_vm0, %v22918_v37  ;;  %19846 = vmatprep.subr.msk.bf16.mxu1 %vm800_vm0, %v22920_v42  ;;  %v22950_v37 = vld [vmem:[#allocation3 + $0x3e4] ss:$48 sps:$4 sm:$0xff]   ;;  %v22953_v42 = vld [vmem:[#allocation3 + $0x3ec] ss:$48 sps:$4 sm:$0xff]  }
 0x250   : > { %3485 = vmatpush1.bf16.msra.mxu0 %v24598_v43  ;;  %3548 = vmatpush1.bf16.msra.mxu1 %v24601_v44 }
 0x251   : > { %3863 = vmatprep.subr.bf16.mxu0 %v22926_v45  ;;  %3926 = vmatprep.subr.bf16.mxu1 %v22929_v46  ;;  %v603_v45 = vld [vmem:[%s24125_s19 + $0x34] sm:$0xf]  ;;  %v23387_v46 = vld [vmem:[%s24125_s19 + $0x30] sm:$0xf] }
 0x253   : > { %19836 = vmatmul.mubr.msk.bf16.gmra.mrb[16].mxu0 %vm790_vm1, %v24221_v8  ;;  %19840 = vmatmul.mubr.msk.bf16.gmra.mrb[16].mxu1 %vm790_vm1, %v24221_v8 }
 0x254   : > { %3408 = vmatprep.mubr.bf16.mxu0 %v26100_v28  ;;  %3471 = vmatprep.mubr.bf16.mxu1 %v26100_v28 }
 0x25b   : > { %19837 = vmatmul.mubr.msk.bf16.gmra.mrb[20].mxu0 %vm790_vm1, %v24583_v27  ;;  %19841 = vmatmul.mubr.msk.bf16.gmra.mrb[20].mxu1 %vm790_vm1, %v24583_v27 }
 0x25c   : > { %3514 = vmatprep.mubr.bf16.mxu0 %v26100_v28  ;;  %3577 = vmatprep.mubr.bf16.mxu1 %v26100_v28 }
 0x263   : > { %19843 = vmatmul.mubr.msk.bf16.vlgmr.msra.gmra.mrb[24].mxu0 %vm790_vm1, %v24211_v0  ;;  %19847 = vmatmul.mubr.msk.bf16.vlgmr.msra.gmra.mrb[24].mxu1 %vm790_vm1, %v24211_v0 }
 0x264   : > { %3864 = vmatpush1.bf16.msra.mxu0 %v22924_v47  ;;  %3927 = vmatpush1.bf16.msra.mxu1 %v22927_v53  ;;  %v24671_v47 = vcombine.low %v23387_v46, %v603_v45  ;;  %v22948_v53 = vld [vmem:[#allocation3 + $0x3e0] ss:$48 sps:$4 sm:$0xff]   ;;  %v23395_v45 = vld [vmem:[#allocation3 + $0xdc] ss:$48 sps:$4 sm:$0xff]  }
 0x265   : > { %3524 = vmatprep.mubr.bf16.mxu0 %v26100_v28  ;;  %3587 = vmatprep.mubr.bf16.mxu1 %v26100_v28  ;;  %v23398_v46 = vld [vmem:[#allocation3 + $0x134] ss:$48 sps:$4 sm:$0x3f]  }
 0x266   : > { %19877 = vmatprep.subr.msk.bf16.mxu0 %vm800_vm0, %v22930_v62  ;;  %19881 = vmatprep.subr.msk.bf16.mxu1 %vm800_vm0, %v22932_v63  ;;  %26197 = vst [vmem:[#allocation35_spill] sm:$0xff] %v24671_v47  ;;  %v22959_v62 = vld [vmem:[#allocation3 + $0x448] ss:$48 sps:$4 sm:$0x3f]  }
 0x267   : > { %v22954_v63 = vld [vmem:[#allocation3 + $0x444] ss:$48 sps:$4 sm:$0x3f]  }
 0x268   : > { %3866 = vmatpush1.bf16.msra.mxu0 %v24626_v3  ;;  %3929 = vmatpush1.bf16.msra.mxu1 %v24629_v4 }
 0x269   : > { %3989 = vmatprep.subr.bf16.mxu0 %v22938_v5  ;;  %4052 = vmatprep.subr.bf16.mxu1 %v22941_v6  ;;  %v22956_v5 = vld [vmem:[#allocation3 + $0x44c] ss:$48 sps:$4 sm:$0x3f]   ;;  %v24686_v6 = vsel %vm800_vm0, %v22958_v61, 0 }
 0x26a   : > { %26198 = vst [vmem:[#allocation36_spill] sm:$0xff] %v24686_v6  ;;  %v23401_v61 = vld [vmem:[#allocation3 + $0xec] ss:$48 sps:$4 sm:$0xff]  }
 0x26b   : > { %19844 = vmatmul.mubr.msk.bf16.gmra.mrb[28].mxu0 %vm790_vm1, %v24221_v8  ;;  %19848 = vmatmul.mubr.msk.bf16.gmra.mrb[28].mxu1 %vm790_vm1, %v24221_v8 }
 0x26c   : > { %3534 = vmatprep.mubr.bf16.mxu0 %v26100_v28  ;;  %3597 = vmatprep.mubr.bf16.mxu1 %v26100_v28 }
 0x273   : > { %19845 = vmatmul.mubr.msk.bf16.gmra.mrb[32].mxu0 %vm790_vm1, %v24583_v27  ;;  %19849 = vmatmul.mubr.msk.bf16.gmra.mrb[32].mxu1 %vm790_vm1, %v24583_v27 }
 0x274   : > { %3895 = vmatprep.mubr.bf16.mxu0 %v26100_v28  ;;  %3958 = vmatprep.mubr.bf16.mxu1 %v26100_v28 }
 0x27b   : > { %19878 = vmatmul.mubr.msk.bf16.vlgmr.msra.gmra.mrb[0].mxu0 %vm790_vm1, %v24165_v48  ;;  %19882 = vmatmul.mubr.msk.bf16.vlgmr.msra.gmra.mrb[0].mxu1 %vm790_vm1, %v24165_v48 }
 0x27c   : > { %3990 = vmatpush1.bf16.msra.mxu0 %v22936_v15  ;;  %4053 = vmatpush1.bf16.msra.mxu1 %v22939_v17  ;;  %v24689_v15 = vsel %vm800_vm0, %v22959_v62, 0  ;;  %v23388_v17 = vld [vmem:[#allocation3 + $0xc4] ss:$48 sps:$4 sm:$0xff]  }
 0x27d   : > { %3905 = vmatprep.mubr.bf16.mxu0 %v26100_v28  ;;  %3968 = vmatprep.mubr.bf16.mxu1 %v26100_v28  ;;  %26199 = vst [vmem:[#allocation37_spill] sm:$0xff] %v24689_v15  ;;  %v23404_v62 = vld [vmem:[#allocation3 + $0x144] ss:$48 sps:$4 sm:$0x3f]  }
 0x27e   : > { %19885 = vmatprep.subr.msk.bf16.mxu0 %vm800_vm0, %v22942_v29  ;;  %19889 = vmatprep.subr.msk.bf16.mxu1 %vm800_vm0, %v22944_v30  ;;  %v23391_v29 = vld [vmem:[#allocation3 + $0xc8] ss:$48 sps:$4 sm:$0xff]   ;;  %v23392_v30 = vld [vmem:[#allocation3 + $0x124] ss:$48 sps:$4 sm:$0x3f]  }
 0x280   : > { %3992 = vmatpush1.bf16.msra.mxu0 %v24654_v31  ;;  %4055 = vmatpush1.bf16.msra.mxu1 %v24657_v32 }
 0x281   : > { %4115 = vmatprep.subr.bf16.mxu0 %v22950_v37  ;;  %4178 = vmatprep.subr.bf16.mxu1 %v22953_v42  ;;  %v23393_v37 = vld [vmem:[#allocation3 + $0x12c] ss:$48 sps:$4 sm:$0x3f]   ;;  %v23394_v42 = vld [vmem:[#allocation3 + $0xd4] ss:$48 sps:$4 sm:$0xff]  }
 0x283   : > { %19879 = vmatmul.mubr.msk.bf16.gmra.mrb[4].mxu0 %vm790_vm1, %v24181_v56  ;;  %19883 = vmatmul.mubr.msk.bf16.gmra.mrb[4].mxu1 %vm790_vm1, %v24181_v56 }
 0x284   : > { %3915 = vmatprep.mubr.bf16.mxu0 %v26100_v28  ;;  %3978 = vmatprep.mubr.bf16.mxu1 %v26100_v28 }
 0x28b   : > { %19880 = vmatmul.mubr.msk.bf16.gmra.mrb[8].mxu0 %vm790_vm1, %v24671_v47  ;;  %19884 = vmatmul.mubr.msk.bf16.gmra.mrb[8].mxu1 %vm790_vm1, %v24671_v47 }
 0x28c   : > { %4021 = vmatprep.mubr.bf16.mxu0 %v26100_v28  ;;  %4084 = vmatprep.mubr.bf16.mxu1 %v26100_v28 }
 0x293   : > { %19886 = vmatmul.mubr.msk.bf16.vlgmr.msra.gmra.mrb[12].mxu0 %vm790_vm1, %v24165_v48  ;;  %19890 = vmatmul.mubr.msk.bf16.vlgmr.msra.gmra.mrb[12].mxu1 %vm790_vm1, %v24165_v48 }
 0x294   : > { %4116 = vmatpush1.bf16.msra.mxu0 %v22948_v53  ;;  %4179 = vmatpush1.bf16.msra.mxu1 %v22951_v59  ;;  %v23399_v53 = vld [vmem:[#allocation3 + $0x13c] ss:$48 sps:$4 sm:$0x3f]   ;;  %v23400_v59 = vld [vmem:[#allocation3 + $0xe4] ss:$48 sps:$4 sm:$0xff]  }
 0x295   : > { %4031 = vmatprep.mubr.bf16.mxu0 %v26100_v28  ;;  %4094 = vmatprep.mubr.bf16.mxu1 %v26100_v28 }
 0x296   : > { %19893 = vmatprep.subr.msk.bf16.mxu0 %vm800_vm0, %v22954_v63  ;;  %19897 = vmatprep.subr.msk.bf16.mxu1 %vm800_vm0, %v22956_v5  ;;  %v23405_v63 = vld [vmem:[#allocation3 + $0x14c] ss:$48 sps:$4 sm:$0x3f]   ;;  %v23406_v5 = vld [vmem:[#allocation3 + $0x4] ss:$48 sps:$4 sm:$0xff]  }
 0x298   : > { %4118 = vmatpush1.bf16.msra.mxu0 %v24686_v6  ;;  %4181 = vmatpush1.bf16.msra.mxu1 %v24689_v15 }
 0x299   : > { %4584 = vmatprep.subr.bf16.mxu0 %v23388_v17  ;;  %4647 = vmatprep.subr.bf16.mxu1 %v23389_v18  ;;  %v23407_v17 = vld [vmem:[#allocation3 + $0xc] ss:$48 sps:$4 sm:$0xff]   ;;  %v23410_v18 = vld [vmem:[#allocation3 + $0x64] ss:$48 sps:$4 sm:$0x3f]  }
 0x29b   : > { %19887 = vmatmul.mubr.msk.bf16.gmra.mrb[16].mxu0 %vm790_vm1, %v24181_v56  ;;  %19891 = vmatmul.mubr.msk.bf16.gmra.mrb[16].mxu1 %vm790_vm1, %v24181_v56 }
 0x29c   : > { %4041 = vmatprep.mubr.bf16.mxu0 %v26100_v28  ;;  %4104 = vmatprep.mubr.bf16.mxu1 %v26100_v28 }
 0x2a3   : > { %19888 = vmatmul.mubr.msk.bf16.gmra.mrb[20].mxu0 %vm790_vm1, %v24671_v47  ;;  %19892 = vmatmul.mubr.msk.bf16.gmra.mrb[20].mxu1 %vm790_vm1, %v24671_v47 }
 0x2a4   : > { %4147 = vmatprep.mubr.bf16.mxu0 %v26100_v28  ;;  %4210 = vmatprep.mubr.bf16.mxu1 %v26100_v28 }
 0x2ab   : > { %19894 = vmatmul.mubr.msk.bf16.vlgmr.msra.gmra.mrb[24].mxu0 %vm790_vm1, %v24165_v48  ;;  %19898 = vmatmul.mubr.msk.bf16.vlgmr.msra.gmra.mrb[24].mxu1 %vm790_vm1, %v24165_v48 }
 0x2ac   : > { %4585 = vmatpush1.bf16.msra.mxu0 %v23390_v25  ;;  %4648 = vmatpush1.bf16.msra.mxu1 %v23391_v29  ;;  %v23411_v25 = vld [vmem:[#allocation3 + $0x6c] ss:$48 sps:$4 sm:$0x3f]   ;;  %v23412_v29 = vld [vmem:[#allocation3 + $0x14] ss:$48 sps:$4 sm:$0xff]  }
 0x2ad   : > { %4157 = vmatprep.mubr.bf16.mxu0 %v26100_v28  ;;  %4220 = vmatprep.mubr.bf16.mxu1 %v26100_v28 }
 0x2ae   : > { %19901 = vmatprep.subr.msk.bf16.mxu0 %vm800_vm0, %v23392_v30  ;;  %19905 = vmatprep.subr.msk.bf16.mxu1 %vm800_vm0, %v23393_v37  ;;  %v23418_v30 = vld [vmem:[#allocation3 + $0x24] ss:$48 sps:$4 sm:$0xff]   ;;  %v23419_v37 = vld [vmem:[#allocation3 + $0x2c] ss:$48 sps:$4 sm:$0xff]  }
 0x2b0   : > { %4587 = vmatpush1.bf16.msra.mxu0 %v24154_v39  ;;  %4650 = vmatpush1.bf16.msra.mxu1 %v24157_v40  ;;  %v23396_v39 = vld [vmem:[#allocation3 + $0xd0] ss:$48 sps:$4 sm:$0xff]   ;;  %v23397_v40 = vld [vmem:[#allocation3 + $0xd8] ss:$48 sps:$4 sm:$0xff]  }
 0x2b1   : > { %4710 = vmatprep.subr.bf16.mxu0 %v23394_v42  ;;  %4773 = vmatprep.subr.bf16.mxu1 %v23395_v45  ;;  %v23422_v42 = vld [vmem:[#allocation3 + $0x84] ss:$48 sps:$4 sm:$0x3f]   ;;  %v23423_v45 = vld [vmem:[#allocation3 + $0x8c] ss:$48 sps:$4 sm:$0x3f]  }
 0x2b3   : > { %19895 = vmatmul.mubr.msk.bf16.gmra.mrb[28].mxu0 %vm790_vm1, %v24181_v56  ;;  %19899 = vmatmul.mubr.msk.bf16.gmra.mrb[28].mxu1 %vm790_vm1, %v24181_v56 }
 0x2b4   : > { %4167 = vmatprep.mubr.bf16.mxu0 %v26100_v28  ;;  %4230 = vmatprep.mubr.bf16.mxu1 %v26100_v28 }
 0x2bb   : > { %19896 = vmatmul.mubr.msk.bf16.gmra.mrb[32].mxu0 %vm790_vm1, %v24671_v47  ;;  %19900 = vmatmul.mubr.msk.bf16.gmra.mrb[32].mxu1 %vm790_vm1, %v24671_v47 }
 0x2bc   : > { %4616 = vmatprep.mubr.bf16.mxu0 %v26100_v28  ;;  %4679 = vmatprep.mubr.bf16.mxu1 %v26100_v28 }
 0x2c3   : > { %19902 = vmatmul.mubr.msk.bf16.vlgmr.msra.gmra.mrb[36].mxu0 %vm790_vm1, %v24465_v60  ;;  %19906 = vmatmul.mubr.msk.bf16.vlgmr.msra.gmra.mrb[36].mxu1 %vm790_vm1, %v24465_v60 }
 0x2c4   : > { %4711 = vmatpush1.bf16.msra.mxu0 %v23396_v39  ;;  %4774 = vmatpush1.bf16.msra.mxu1 %v23397_v40  ;;  %v23424_v39 = vld [vmem:[#allocation3 + $0x184] ss:$48 sps:$4 sm:$0xff]   ;;  %v23425_v40 = vld [vmem:[#allocation3 + $0x18c] ss:$48 sps:$4 sm:$0xff]  }
 0x2c5   : > { %4626 = vmatprep.mubr.bf16.mxu0 %v26100_v28  ;;  %4689 = vmatprep.mubr.bf16.mxu1 %v26100_v28 }
 0x2c6   : > { %19909 = vmatprep.subr.msk.bf16.mxu0 %vm800_vm0, %v23398_v46  ;;  %19913 = vmatprep.subr.msk.bf16.mxu1 %vm800_vm0, %v23399_v53  ;;  %v23428_v46 = vld [vmem:[#allocation3 + $0x1e4] ss:$48 sps:$4 sm:$0x3f]   ;;  %v23429_v53 = vld [vmem:[#allocation3 + $0x1ec] ss:$48 sps:$4 sm:$0x3f]  }
 0x2c8   : > { %4713 = vmatpush1.bf16.msra.mxu0 %v24176_v54  ;;  %4776 = vmatpush1.bf16.msra.mxu1 %v24179_v55  ;;  %v23402_v54 = vld [vmem:[#allocation3 + $0xe0] ss:$48 sps:$4 sm:$0xff]   ;;  %v23403_v55 = vld [vmem:[#allocation3 + $0xe8] ss:$48 sps:$4 sm:$0xff]  }
 0x2c9   : > { %4836 = vmatprep.subr.bf16.mxu0 %v23400_v59  ;;  %4899 = vmatprep.subr.bf16.mxu1 %v23401_v61  ;;  %v4317_v59 = vlaneseq  ;;  %v23431_v61 = vld [vmem:[#allocation3 + $0x19c] ss:$48 sps:$4 sm:$0xff]  }
 0x2cb   : > { %19903 = vmatmul.mubr.msk.bf16.gmra.mrb[40].mxu0 %vm790_vm1, %v24483_v16  ;;  %19907 = vmatmul.mubr.msk.bf16.gmra.mrb[40].mxu1 %vm790_vm1, %v24483_v16 }
 0x2cc   : > { %4636 = vmatprep.mubr.bf16.mxu0 %v26100_v28  ;;  %4699 = vmatprep.mubr.bf16.mxu1 %v26100_v28 }
 0x2d3   : > { %19904 = vmatmul.mubr.msk.bf16.gmra.mrb[44].mxu0 %vm790_vm1, %v24495_v24  ;;  %19908 = vmatmul.mubr.msk.bf16.gmra.mrb[44].mxu1 %vm790_vm1, %v24495_v24 }
 0x2d4   : > { %4742 = vmatprep.mubr.bf16.mxu0 %v26100_v28  ;;  %4805 = vmatprep.mubr.bf16.mxu1 %v26100_v28 }
 0x2db   : > { %19910 = vmatmul.mubr.msk.bf16.vlgmr.msra.gmra.mrb[48].mxu0 %vm790_vm1, %v24465_v60  ;;  %19914 = vmatmul.mubr.msk.bf16.vlgmr.msra.gmra.mrb[48].mxu1 %vm790_vm1, %v24465_v60 }
 0x2dc   : > { %4837 = vmatpush1.bf16.msra.mxu0 %v23402_v54  ;;  %4900 = vmatpush1.bf16.msra.mxu1 %v23403_v55  ;;  %v24853_v54 = vshrl.u32 %v4317_v59, 7 }
 0x2dd   : > { %4752 = vmatprep.mubr.bf16.mxu0 %v26100_v28  ;;  %4815 = vmatprep.mubr.bf16.mxu1 %v26100_v28 }
 0x2de   : > { %19917 = vmatprep.subr.msk.bf16.mxu0 %vm800_vm0, %v23404_v62  ;;  %19921 = vmatprep.subr.msk.bf16.mxu1 %vm800_vm0, %v23405_v63  ;;  %26200 = vst [vmem:[#allocation38_spill] sm:$0xff] %v24853_v54  ;;  %v24863_v55 = vsub.s32 3, %v24853_v54 }
 0x2e0   : > { %4839 = vmatpush1.bf16.msra.mxu0 %v24228_v10  ;;  %4902 = vmatpush1.bf16.msra.mxu1 %v24233_v12  ;;  %v23408_v10 = vld [vmem:[#allocation3] ss:$48 sps:$4 sm:$0xff]   ;;  %v23409_v12 = vld [vmem:[#allocation3 + $0x8] ss:$48 sps:$4 sm:$0xff]   ;;  %26202 = vst [vmem:[#allocation40_spill] sm:$0xff] %v24863_v55 }
 0x2e1   : > { %4962 = vmatprep.subr.bf16.mxu0 %v23406_v5  ;;  %5025 = vmatprep.subr.bf16.mxu1 %v23407_v17 }
 0x2e3   : > { %19911 = vmatmul.mubr.msk.bf16.gmra.mrb[52].mxu0 %vm790_vm1, %v24483_v16  ;;  %19915 = vmatmul.mubr.msk.bf16.gmra.mrb[52].mxu1 %vm790_vm1, %v24483_v16 }
 0x2e4   : > { %4762 = vmatprep.mubr.bf16.mxu0 %v26100_v28  ;;  %4825 = vmatprep.mubr.bf16.mxu1 %v26100_v28 }
 0x2eb   : > { %19912 = vmatmul.mubr.msk.bf16.gmra.mrb[56].mxu0 %vm790_vm1, %v24495_v24  ;;  %19916 = vmatmul.mubr.msk.bf16.gmra.mrb[56].mxu1 %vm790_vm1, %v24495_v24 }
 0x2ec   : > { %4868 = vmatprep.mubr.bf16.mxu0 %v26100_v28  ;;  %4931 = vmatprep.mubr.bf16.mxu1 %v26100_v28 }
 0x2f3   : > { %19918 = vmatmul.mubr.msk.bf16.vlgmr.msra.gmra.mrb[60].mxu0 %vm790_vm1, %v24465_v60  ;;  %19922 = vmatmul.mubr.msk.bf16.vlgmr.msra.gmra.mrb[60].mxu1 %vm790_vm1, %v24465_v60  ;;  %v23413_v60 = vld [vmem:[#allocation3 + $0x1c] ss:$48 sps:$4 sm:$0xff]  }
 0x2f4   : > { %4963 = vmatpush1.bf16.msra.mxu0 %v23408_v10  ;;  %5026 = vmatpush1.bf16.msra.mxu1 %v23409_v12 }
 0x2f5   : > { %4878 = vmatprep.mubr.bf16.mxu0 %v26100_v28  ;;  %4941 = vmatprep.mubr.bf16.mxu1 %v26100_v28 }
 0x2f6   : > { %19925 = vmatprep.subr.msk.bf16.mxu0 %vm800_vm0, %v23410_v18  ;;  %19929 = vmatprep.subr.msk.bf16.mxu1 %vm800_vm0, %v23411_v25 }
 0x2f8   : > { %4965 = vmatpush1.bf16.msra.mxu0 %v24258_v22  ;;  %5028 = vmatpush1.bf16.msra.mxu1 %v24261_v23  ;;  %v23414_v22 = vld [vmem:[#allocation3 + $0x10] ss:$48 sps:$4 sm:$0xff]   ;;  %v23415_v23 = vld [vmem:[#allocation3 + $0x18] ss:$48 sps:$4 sm:$0xff]  }
 0x2f9   : > { %5088 = vmatprep.subr.bf16.mxu0 %v23412_v29  ;;  %5151 = vmatprep.subr.bf16.mxu1 %v23413_v60 }
 0x2fb   : > { %19919 = vmatmul.mubr.msk.bf16.gmra.mrb[64].mxu0 %vm790_vm1, %v24483_v16  ;;  %19923 = vmatmul.mubr.msk.bf16.gmra.mrb[64].mxu1 %vm790_vm1, %v24483_v16  ;;  %v23416_v16 = vld [vmem:[#allocation3 + $0x74] ss:$48 sps:$4 sm:$0x3f]  }
 0x2fc   : > { %4888 = vmatprep.mubr.bf16.mxu0 %v26100_v28  ;;  %4951 = vmatprep.mubr.bf16.mxu1 %v26100_v28 }
 0x303   : > { %19920 = vmatmul.mubr.msk.bf16.gmra.mrb[68].mxu0 %vm790_vm1, %v24495_v24  ;;  %19924 = vmatmul.mubr.msk.bf16.gmra.mrb[68].mxu1 %vm790_vm1, %v24495_v24  ;;  %v23417_v24 = vld [vmem:[#allocation3 + $0x7c] ss:$48 sps:$4 sm:$0x3f]  }
 0x304   : > { %4994 = vmatprep.mubr.bf16.mxu0 %v26100_v28  ;;  %5057 = vmatprep.mubr.bf16.mxu1 %v26100_v28 }
 0x30b   : > { %19926 = vmatmul.mubr.msk.bf16.vlgmr.msra.gmra.mrb[36].mxu0 %vm790_vm1, %v24369_v7  ;;  %19930 = vmatmul.mubr.msk.bf16.vlgmr.msra.gmra.mrb[36].mxu1 %vm790_vm1, %v24369_v7 }
 0x30c   : > { %5089 = vmatpush1.bf16.msra.mxu0 %v23414_v22  ;;  %5152 = vmatpush1.bf16.msra.mxu1 %v23415_v23 }
 0x30d   : > { %5004 = vmatprep.mubr.bf16.mxu0 %v26100_v28  ;;  %5067 = vmatprep.mubr.bf16.mxu1 %v26100_v28 }
 0x30e   : > { %19933 = vmatprep.subr.msk.bf16.mxu0 %vm800_vm0, %v23416_v16  ;;  %19937 = vmatprep.subr.msk.bf16.mxu1 %vm800_vm0, %v23417_v24 }
 0x310   : > { %5091 = vmatpush1.bf16.msra.mxu0 %v24288_v33  ;;  %5154 = vmatpush1.bf16.msra.mxu1 %v24293_v36  ;;  %v23420_v33 = vld [vmem:[#allocation3 + $0x20] ss:$48 sps:$4 sm:$0xff]   ;;  %v23421_v36 = vld [vmem:[#allocation3 + $0x28] ss:$48 sps:$4 sm:$0xff]  }
 0x311   : > { %5214 = vmatprep.subr.bf16.mxu0 %v23418_v30  ;;  %5277 = vmatprep.subr.bf16.mxu1 %v23419_v37 }
 0x313   : > { %19927 = vmatmul.mubr.msk.bf16.gmra.mrb[40].mxu0 %vm790_vm1, %v24387_v21  ;;  %19931 = vmatmul.mubr.msk.bf16.gmra.mrb[40].mxu1 %vm790_vm1, %v24387_v21 }
 0x314   : > { %5014 = vmatprep.mubr.bf16.mxu0 %v26100_v28  ;;  %5077 = vmatprep.mubr.bf16.mxu1 %v26100_v28 }
 0x31b   : > { %19928 = vmatmul.mubr.msk.bf16.gmra.mrb[44].mxu0 %vm790_vm1, %v24399_v26  ;;  %19932 = vmatmul.mubr.msk.bf16.gmra.mrb[44].mxu1 %vm790_vm1, %v24399_v26 }
 0x31c   : > { %5120 = vmatprep.mubr.bf16.mxu0 %v26100_v28  ;;  %5183 = vmatprep.mubr.bf16.mxu1 %v26100_v28 }
 0x323   : > { %19934 = vmatmul.mubr.msk.bf16.vlgmr.msra.gmra.mrb[48].mxu0 %vm790_vm1, %v24369_v7  ;;  %19938 = vmatmul.mubr.msk.bf16.vlgmr.msra.gmra.mrb[48].mxu1 %vm790_vm1, %v24369_v7 }
 0x324   : > { %5215 = vmatpush1.bf16.msra.mxu0 %v23420_v33  ;;  %5278 = vmatpush1.bf16.msra.mxu1 %v23421_v36  ;;  %v23432_v36 = vld [vmem:[#allocation3 + $0x190] ss:$48 sps:$4 sm:$0xff]  }
 0x325   : > { %5130 = vmatprep.mubr.bf16.mxu0 %v26100_v28  ;;  %5193 = vmatprep.mubr.bf16.mxu1 %v26100_v28 }
 0x326   : > { %19941 = vmatprep.subr.msk.bf16.mxu0 %vm800_vm0, %v23422_v42  ;;  %19945 = vmatprep.subr.msk.bf16.mxu1 %vm800_vm0, %v23423_v45  ;;  %v23433_v42 = vld [vmem:[#allocation3 + $0x198] ss:$48 sps:$4 sm:$0xff]  }
 0x328   : > { %5217 = vmatpush1.bf16.msra.mxu0 %v24320_v49  ;;  %5280 = vmatpush1.bf16.msra.mxu1 %v24325_v50  ;;  %v23426_v49 = vld [vmem:[#allocation3 + $0x180] ss:$48 sps:$4 sm:$0xff]   ;;  %v23427_v50 = vld [vmem:[#allocation3 + $0x188] ss:$48 sps:$4 sm:$0xff]  }
 0x329   : > { %5340 = vmatprep.subr.bf16.mxu0 %v23424_v39  ;;  %5403 = vmatprep.subr.bf16.mxu1 %v23425_v40 }
 0x32b   : > { %19935 = vmatmul.mubr.msk.bf16.gmra.mrb[52].mxu0 %vm790_vm1, %v24387_v21  ;;  %19939 = vmatmul.mubr.msk.bf16.gmra.mrb[52].mxu1 %vm790_vm1, %v24387_v21 }
 0x32c   : > { %5140 = vmatprep.mubr.bf16.mxu0 %v26100_v28  ;;  %5203 = vmatprep.mubr.bf16.mxu1 %v26100_v28 }
 0x333   : > { %19936 = vmatmul.mubr.msk.bf16.gmra.mrb[56].mxu0 %vm790_vm1, %v24399_v26  ;;  %19940 = vmatmul.mubr.msk.bf16.gmra.mrb[56].mxu1 %vm790_vm1, %v24399_v26 }
 0x334   : > { %5246 = vmatprep.mubr.bf16.mxu0 %v26100_v28  ;;  %5309 = vmatprep.mubr.bf16.mxu1 %v26100_v28 }
 0x33b   : > { %19942 = vmatmul.mubr.msk.bf16.vlgmr.msra.gmra.mrb[60].mxu0 %vm790_vm1, %v24369_v7  ;;  %19946 = vmatmul.mubr.msk.bf16.vlgmr.msra.gmra.mrb[60].mxu1 %vm790_vm1, %v24369_v7  ;;  %v23430_v7 = vld [vmem:[#allocation3 + $0x194] ss:$48 sps:$4 sm:$0xff]  }
 0x33c   : > { %5341 = vmatpush1.bf16.msra.mxu0 %v23426_v49  ;;  %5404 = vmatpush1.bf16.msra.mxu1 %v23427_v50  ;;  %v23434_v49 = vld [vmem:[#allocation3 + $0x1f4] ss:$48 sps:$4 sm:$0x3f]   ;;  %v23435_v50 = vld [vmem:[#allocation3 + $0x1fc] ss:$48 sps:$4 sm:$0x3f]  }
 0x33d   : > { %5256 = vmatprep.mubr.bf16.mxu0 %v26100_v28  ;;  %5319 = vmatprep.mubr.bf16.mxu1 %v26100_v28 }
 0x33e   : > { %19949 = vmatprep.subr.msk.bf16.mxu0 %vm800_vm0, %v23428_v46  ;;  %19953 = vmatprep.subr.msk.bf16.mxu1 %vm800_vm0, %v23429_v53 }
 0x340   : > { %5343 = vmatpush1.bf16.msra.mxu0 %v24348_v1  ;;  %5406 = vmatpush1.bf16.msra.mxu1 %v24351_v2  ;;  %v24858_v1 = vsub.s32 0, %v24853_v54  ;;  %v24860_v2 = vld [vmem:[#allocation5] sm:$0xff] }
 0x341   : > { %5466 = vmatprep.subr.bf16.mxu0 %v23430_v7  ;;  %5529 = vmatprep.subr.bf16.mxu1 %v23431_v61  ;;  %v24875_v62 = vrot.slane %v24860_v2, %v24863_v55 }
 0x342   : > { %26201 = vst [vmem:[#allocation39_spill] sm:$0xff] %v24858_v1 }
 0x343   : > { %19943 = vmatmul.mubr.msk.bf16.gmra.mrb[64].mxu0 %vm790_vm1, %v24387_v21  ;;  %19947 = vmatmul.mubr.msk.bf16.gmra.mrb[64].mxu1 %vm790_vm1, %v24387_v21  ;;  %v24871_v21 = vrot.slane %v24860_v2, %v24858_v1  ;;  %26204 = vst [vmem:[#allocation42_spill] sm:$0xff] %v24875_v62 }
 0x344   : > { %5266 = vmatprep.mubr.bf16.mxu0 %v26100_v28  ;;  %5329 = vmatprep.mubr.bf16.mxu1 %v26100_v28 }
 0x345   : > { %26203 = vst [vmem:[#allocation41_spill] sm:$0xff] %v24871_v21 }
 0x34b   : > { %19944 = vmatmul.mubr.msk.bf16.gmra.mrb[68].mxu0 %vm790_vm1, %v24399_v26  ;;  %19948 = vmatmul.mubr.msk.bf16.gmra.mrb[68].mxu1 %vm790_vm1, %v24399_v26 }
 0x34c   : > { %5372 = vmatprep.mubr.bf16.mxu0 %v26100_v28  ;;  %5435 = vmatprep.mubr.bf16.mxu1 %v26100_v28 }
 0x34e   : > { %v3897_v63 = vpop.f32.mrb[0].mxu0  ;;  %v24879_v5 = vpop.f32.mrb[0].mxu1 }
 0x34f   : > { %v4377_v17 = vadd.f32 %v24871_v21, %v3897_v63  ;;  %v24882_v10 = vpop.f32.mrb[1].mxu0  ;;  %v3962_v26 = vpop.f32.mrb[1].mxu1 }
 0x350   : > { %v4380_v12 = vadd.f32 %v24875_v62, %v3962_v26  ;;  %v3901_v18 = vpop.f32.mrb[2].mxu0  ;;  %v24885_v25 = vpop.f32.mrb[2].mxu1 }
 0x351   : > { %v4449_v29 = vmax.f32 %v4377_v17, 0.0  ;;  %v4389_v60 = vadd.f32 %v24871_v21, %v3901_v18  ;;  %v24888_v22 = vpop.f32.mrb[3].mxu0  ;;  %v3966_v23 = vpop.f32.mrb[3].mxu1 }
 0x352   : > { %v4452_v16 = vmax.f32 %v4380_v12, 0.0  ;;  %v4392_v24 = vadd.f32 %v24875_v62, %v3966_v23 }
 0x353   : > { %v4461_v30 = vmax.f32 %v4389_v60, 0.0  ;;  %19950 = vmatmul.mubr.msk.bf16.vlgmr.msra.gmra.mrb[36].mxu0 %vm790_vm1, %v24211_v0  ;;  %19954 = vmatmul.mubr.msk.bf16.vlgmr.msra.gmra.mrb[36].mxu1 %vm790_vm1, %v24211_v0  ;;  %v23437_v60 = vld [vmem:[#allocation3 + $0x1ac] ss:$48 sps:$4 sm:$0xff]  }
 0x354   : > { %v24895_v37 = vmax.f32 %v4449_v29, %v4452_v16  ;;  %v4464_v33 = vmax.f32 %v4392_v24, 0.0  ;;  %5467 = vmatpush1.bf16.msra.mxu0 %v23432_v36  ;;  %5530 = vmatpush1.bf16.msra.mxu1 %v23433_v42  ;;  %v23436_v29 = vld [vmem:[#allocation3 + $0x1a4] ss:$48 sps:$4 sm:$0xff]  }
 0x355   : > { %5382 = vmatprep.mubr.bf16.mxu0 %v26100_v28  ;;  %5445 = vmatprep.mubr.bf16.mxu1 %v26100_v28 }
 0x356   : > { %v24899_v45 = vmax.f32 %v4461_v30, %v4464_v33  ;;  %v3907_v39 = vpop.f32.mrb[4].mxu0  ;;  %v24901_v40 = vpop.f32.mrb[4].mxu1  ;;  %19957 = vmatprep.subr.msk.bf16.mxu0 %vm800_vm0, %v23434_v49  ;;  %19961 = vmatprep.subr.msk.bf16.mxu1 %vm800_vm0, %v23435_v50  ;;  %v24926_v30 = vsub.s32 1, %v24853_v54  ;;  %v24929_v33 = vsub.s32 2, %v24853_v54 }
 0x357   : > { %v4401_v46 = vadd.f32 %v24871_v21, %v3907_v39  ;;  %v24906_v53 = vpop.f32.mrb[5].mxu0  ;;  %v3972_v59 = vpop.f32.mrb[5].mxu1 }
 0x358   : > { %v4404_v7 = vadd.f32 %v24875_v62, %v3972_v59  ;;  %v3911_v61 = vpop.f32.mrb[6].mxu0  ;;  %v24909_v63 = vpop.f32.mrb[6].mxu1  ;;  %5469 = vmatpush1.bf16.msra.mxu0 %v24380_v19  ;;  %5532 = vmatpush1.bf16.msra.mxu1 %v24383_v20  ;;  %26205 = vst [vmem:[#allocation43_spill] sm:$0xff] %v24926_v30  ;;  %26206 = vst [vmem:[#allocation44_spill] sm:$0xff] %v24929_v33  ;;  %v26104_v59 = vsub.s32 4, %v24853_v54 }
 0x359   : > { %v4473_v17 = vmax.f32 %v4401_v46, 0.0  ;;  %v4413_v26 = vadd.f32 %v24871_v21, %v3911_v61  ;;  %v24914_v12 = vpop.f32.mrb[7].mxu0  ;;  %v3976_v18 = vpop.f32.mrb[7].mxu1  ;;  %5592 = vmatprep.subr.bf16.mxu0 %v23436_v29  ;;  %5655 = vmatprep.subr.bf16.mxu1 %v23437_v60 }
 0x35a   : > { %v4476_v23 = vmax.f32 %v4404_v7, 0.0  ;;  %v4416_v16 = vadd.f32 %v24875_v62, %v3976_v18  ;;  %v24945_v18 = vrot.slane %v24860_v2, %v24926_v30 }
 0x35b   : > { %v4485_v24 = vmax.f32 %v4413_v26, 0.0  ;;  %19951 = vmatmul.mubr.msk.bf16.gmra.mrb[40].mxu0 %vm790_vm1, %v24221_v8  ;;  %19955 = vmatmul.mubr.msk.bf16.gmra.mrb[40].mxu1 %vm790_vm1, %v24221_v8  ;;  %v26105_v26 = vsub.s32 5, %v24853_v54 }
 0x35c   : > { %v24921_v19 = vmax.f32 %v4473_v17, %v4476_v23  ;;  %v4488_v20 = vmax.f32 %v4416_v16, 0.0  ;;  %5392 = vmatprep.mubr.bf16.mxu0 %v26100_v28  ;;  %5455 = vmatprep.mubr.bf16.mxu1 %v26100_v28  ;;  %26207 = vst [vmem:[#allocation45_spill] sm:$0xff] %v24945_v18 }
 0x35e   : > { %v24931_v36 = vmax.f32 %v4485_v24, %v4488_v20  ;;  %v3917_v42 = vpop.f32.mrb[8].mxu0  ;;  %v24933_v39 = vpop.f32.mrb[8].mxu1  ;;  %v24952_v24 = vrot.slane %v24860_v2, %v24929_v33 }
 0x35f   : > { %v4425_v49 = vadd.f32 %v24871_v21, %v3917_v42  ;;  %v24936_v50 = vpop.f32.mrb[9].mxu0  ;;  %v3982_v46 = vpop.f32.mrb[9].mxu1 }
 0x360   : > { %v4428_v7 = vadd.f32 %v24875_v62, %v3982_v46  ;;  %v3921_v61 = vpop.f32.mrb[10].mxu0  ;;  %v24940_v17 = vpop.f32.mrb[10].mxu1  ;;  %26208 = vst [vmem:[#allocation46_spill] sm:$0xff] %v24952_v24  ;;  %v4391_v6 = vadd.f32 %v24952_v24, %v24885_v25 }
 0x361   : > { %v4497_v29 = vmax.f32 %v4425_v49, 0.0  ;;  %v4437_v60 = vadd.f32 %v24871_v21, %v3921_v61  ;;  %v24948_v23 = vpop.f32.mrb[11].mxu0  ;;  %v3986_v16 = vpop.f32.mrb[11].mxu1  ;;  %v24962_v49 = vrot.slane %v24860_v2, %v26104_v59 }
 0x362   : > { %v4500_v20 = vmax.f32 %v4428_v7, 0.0  ;;  %v4440_v42 = vadd.f32 %v24875_v62, %v3986_v16  ;;  %v24969_v7 = vrot.slane %v24860_v2, %v26105_v26  ;;  %v4378_v16 = vadd.f32 %v24945_v18, %v24882_v10 }
 0x363   : > { %v4509_v46 = vmax.f32 %v4437_v60, 0.0  ;;  %19952 = vmatmul.mubr.msk.bf16.gmra.mrb[44].mxu0 %vm790_vm1, %v24583_v27  ;;  %19956 = vmatmul.mubr.msk.bf16.gmra.mrb[44].mxu1 %vm790_vm1, %v24583_v27  ;;  %26209 = vst [vmem:[#allocation47_spill] sm:$0xff] %v24962_v49  ;;  %v26211_v60 = vmov 0   ;;  %v4379_v62 = vadd.f32 %v24952_v24, %v24879_v5 }
 0x364   : > { %v24964_v61 = vmax.f32 %v4497_v29, %v4500_v20  ;;  %v4512_v28 = vmax.f32 %v4440_v42, 0.0  ;;  %26210 = vst [vmem:[#allocation48_spill] sm:$0xff] %v24969_v7  ;;  %5498 = vmatprep.mubr.bf16.mxu0 %v26211_v60  ;;  %5561 = vmatprep.mubr.bf16.mxu1 %v26211_v60  ;;  %v4390_v42 = vadd.f32 %v24945_v18, %v24888_v22 }
 0x365   : > { %v4451_v22 = vmax.f32 %v4379_v62, 0.0  ;;  %v23439_v62 = vld [vmem:[#allocation3 + $0x1a8] ss:$48 sps:$4 sm:$0xff]  }
 0x366   : > { %v24977_v59 = vmax.f32 %v4509_v46, %v4512_v28  ;;  %v4023_v29 = vpop.f32.mrb[12].mxu0  ;;  %v24979_v20 = vpop.f32.mrb[12].mxu1  ;;  %v4450_v28 = vmax.f32 %v4378_v16, 0.0  ;;  %v4462_v43 = vmax.f32 %v4390_v42, 0.0  ;;  %v23438_v16 = vld [vmem:[#allocation3 + $0x1a0] ss:$48 sps:$4 sm:$0xff]  }
 0x367   : > { %v4381_v26 = vadd.f32 %v24962_v49, %v4023_v29  ;;  %v4025_v21 = vpop.f32.mrb[13].mxu0  ;;  %v24984_v15 = vpop.f32.mrb[13].mxu1 }
 0x368   : > { %v4382_v10 = vadd.f32 %v24969_v7, %v4025_v21  ;;  %v4027_v32 = vpop.f32.mrb[14].mxu0  ;;  %v24989_v5 = vpop.f32.mrb[14].mxu1  ;;  %v4463_v21 = vmax.f32 %v4391_v6, 0.0  ;;  %v4415_v6 = vadd.f32 %v24952_v24, %v24909_v63  ;;  %v23443_v63 = vld [vmem:[#allocation3 + $0x24c] ss:$48 sps:$4 sm:$0xff]  }
 0x369   : > { %v4453_v46 = vmax.f32 %v4381_v26, 0.0  ;;  %v4393_v31 = vadd.f32 %v24962_v49, %v4027_v32  ;;  %v4029_v4 = vpop.f32.mrb[15].mxu0  ;;  %v24992_v3 = vpop.f32.mrb[15].mxu1 }
 0x36a   : > { %v4454_v29 = vmax.f32 %v4382_v10, 0.0  ;;  %v4394_v44 = vadd.f32 %v24969_v7, %v4029_v4  ;;  %v4402_v4 = vadd.f32 %v24945_v18, %v24906_v53  ;;  %v4414_v53 = vadd.f32 %v24945_v18, %v24914_v12 }
 0x36b   : > { %v24995_v14 = vmax.f32 %v4450_v28, %v4453_v46  ;;  %v4465_v25 = vmax.f32 %v4393_v31, 0.0  ;;  %19958 = vmatmul.mubr.msk.bf16.vlgmr.msra.gmra.mrb[48].mxu0 %vm790_vm1, %v24211_v0  ;;  %19962 = vmatmul.mubr.msk.bf16.vlgmr.msra.gmra.mrb[48].mxu1 %vm790_vm1, %v24211_v0  ;;  %v4403_v31 = vadd.f32 %v24952_v24, %v24901_v40  ;;  %v23440_v46 = vld [vmem:[#allocation3 + $0x204] ss:$48 sps:$4 sm:$0x3f]   ;;  %v4487_v58 = vmax.f32 %v4415_v6, 0.0 }
 0x36c   : > { %v25001_v26 = vmax.f32 %v4451_v22, %v4454_v29  ;;  %v4466_v32 = vmax.f32 %v4394_v44, 0.0  ;;  %5593 = vmatpush1.bf16.msra.mxu0 %v23438_v16  ;;  %5656 = vmatpush1.bf16.msra.mxu1 %v23439_v62  ;;  %v4474_v16 = vmax.f32 %v4402_v4, 0.0  ;;  %v26121_v62 = vsub.s32 7, %v24853_v54 }
 0x36d   : > { %v25005_v42 = vmax.f32 %v4462_v43, %v4465_v25  ;;  %5508 = vmatprep.mubr.bf16.mxu0 %v26211_v60  ;;  %5571 = vmatprep.mubr.bf16.mxu1 %v26211_v60  ;;  %v23441_v43 = vld [vmem:[#allocation3 + $0x20c] ss:$48 sps:$4 sm:$0x3f]   ;;  %v4486_v35 = vmax.f32 %v4414_v53, 0.0  ;;  %v4438_v6 = vadd.f32 %v24945_v18, %v24948_v23 }
 0x36e   : > { %v25013_v44 = vmax.f32 %v4463_v21, %v4466_v32  ;;  %v4033_v10 = vpop.f32.mrb[16].mxu0  ;;  %v25015_v28 = vpop.f32.mrb[16].mxu1  ;;  %19965 = vmatprep.subr.msk.bf16.mxu0 %vm800_vm0, %v23440_v46  ;;  %19969 = vmatprep.subr.msk.bf16.mxu1 %vm800_vm0, %v23441_v43 }
 0x36f   : > { %v4405_v22 = vadd.f32 %v24962_v49, %v4033_v10  ;;  %v4035_v40 = vpop.f32.mrb[17].mxu0  ;;  %v25022_v29 = vpop.f32.mrb[17].mxu1 }
 0x370   : > { %v4406_v25 = vadd.f32 %v24969_v7, %v4035_v40  ;;  %v4037_v21 = vpop.f32.mrb[18].mxu0  ;;  %v25026_v32 = vpop.f32.mrb[18].mxu1  ;;  %5595 = vmatpush1.bf16.msra.mxu0 %v24414_v38  ;;  %5658 = vmatpush1.bf16.msra.mxu1 %v24417_v41  ;;  %v4475_v40 = vmax.f32 %v4403_v31, 0.0  ;;  %v4427_v41 = vadd.f32 %v24952_v24, %v24933_v39  ;;  %v4426_v31 = vadd.f32 %v24945_v18, %v24936_v50 }
 0x371   : > { %v4477_v12 = vmax.f32 %v4405_v22, 0.0  ;;  %v4417_v10 = vadd.f32 %v24962_v49, %v4037_v21  ;;  %v4039_v46 = vpop.f32.mrb[19].mxu0  ;;  %v25032_v43 = vpop.f32.mrb[19].mxu1  ;;  %5790 = vmatprep.subr.bf16.mxu0 %v23442_v9  ;;  %5853 = vmatprep.subr.bf16.mxu1 %v23443_v63  ;;  %v4314_v9 = vld [vmem:[#allocation5 + $0x8] sm:$0xf]  ;;  %v26212_v39 = vsub.s32 6, %v24853_v54  ;;  %v25059_v21 = vrot.slane %v24860_v2, %v26121_v62 }
 0x372   : > { %v4478_v57 = vmax.f32 %v4406_v25, 0.0  ;;  %v4418_v38 = vadd.f32 %v24969_v7, %v4039_v46  ;;  %v4499_v46 = vmax.f32 %v4427_v41, 0.0 }
 0x373   : > { %v25037_v4 = vmax.f32 %v4474_v16, %v4477_v12  ;;  %v4489_v22 = vmax.f32 %v4417_v10, 0.0  ;;  %19959 = vmatmul.mubr.msk.bf16.gmra.mrb[52].mxu0 %vm790_vm1, %v24221_v8  ;;  %19963 = vmatmul.mubr.msk.bf16.gmra.mrb[52].mxu1 %vm790_vm1, %v24221_v8  ;;  %v25054_v25 = vrot.slane %v24860_v2, %v26212_v39  ;;  %v25068_v12 = vrot.slane %v4314_v9, %v24858_v1 }
 0x374   : > { %v25047_v53 = vmax.f32 %v4475_v40, %v4478_v57  ;;  %v4490_v63 = vmax.f32 %v4418_v38, 0.0  ;;  %5518 = vmatprep.mubr.bf16.mxu0 %v26211_v60  ;;  %5581 = vmatprep.mubr.bf16.mxu1 %v26211_v60  ;;  %v25071_v10 = vrot.slane %v4314_v9, %v24929_v33  ;;  %v4498_v2 = vmax.f32 %v4426_v31, 0.0 }
 0x375   : > { %v25061_v50 = vmax.f32 %v4486_v35, %v4489_v22  ;;  %v25077_v35 = vrot.slane %v4314_v9, %v24926_v30  ;;  %v4439_v22 = vadd.f32 %v24952_v24, %v24940_v17  ;;  %v4384_v30 = vadd.f32 %v25059_v21, %v24984_v15 }
 0x376   : > { %v25063_v23 = vmax.f32 %v4487_v58, %v4490_v63  ;;  %v4043_v57 = vpop.f32.mrb[20].mxu0  ;;  %v25065_v16 = vpop.f32.mrb[20].mxu1  ;;  %v25080_v58 = vrot.slane %v4314_v9, %v24863_v55  ;;  %v4510_v63 = vmax.f32 %v4438_v6, 0.0  ;;  %v25096_v17 = vadd.f32 %v25054_v25, %v24989_v5 }
 0x377   : > { %v4429_v40 = vadd.f32 %v24962_v49, %v4043_v57  ;;  %v4045_v38 = vpop.f32.mrb[21].mxu0  ;;  %v25074_v39 = vpop.f32.mrb[21].mxu1  ;;  %v4383_v57 = vadd.f32 %v25054_v25, %v24979_v20  ;;  %v25100_v6 = vadd.f32 %v25059_v21, %v24992_v3  ;;  %v25105_v15 = vadd.f32 %v25054_v25, %v25015_v28 }
 0x378   : > { %v4430_v62 = vadd.f32 %v24969_v7, %v4045_v38  ;;  %v4047_v54 = vpop.f32.mrb[22].mxu0  ;;  %v25085_v41 = vpop.f32.mrb[22].mxu1  ;;  %v4511_v3 = vmax.f32 %v4439_v22, 0.0 }
 0x379   : > { %v4501_v33 = vmax.f32 %v4429_v40, 0.0  ;;  %v4441_v9 = vadd.f32 %v24962_v49, %v4047_v54  ;;  %v4049_v55 = vpop.f32.mrb[23].mxu0  ;;  %v25092_v31 = vpop.f32.mrb[23].mxu1  ;;  %v25109_v54 = vadd.f32 %v25059_v21, %v25022_v29 }
 0x37a   : > { %v4502_v38 = vmax.f32 %v4430_v62, 0.0  ;;  %v4442_v20 = vadd.f32 %v24969_v7, %v4049_v55  ;;  %v25119_v55 = vadd.f32 %v25054_v25, %v25026_v32  ;;  %v4456_v62 = vmax.f32 %v4384_v30, 0.0 }
 0x37b   : > { %v25111_v40 = vmax.f32 %v4498_v2, %v4501_v33  ;;  %v4513_v1 = vmax.f32 %v4441_v9, 0.0  ;;  %19960 = vmatmul.mubr.msk.bf16.gmra.mrb[56].mxu0 %vm790_vm1, %v24583_v27  ;;  %19964 = vmatmul.mubr.msk.bf16.gmra.mrb[56].mxu1 %vm790_vm1, %v24583_v27  ;;  %v4455_v33 = vmax.f32 %v4383_v57, 0.0  ;;  %v4467_v2 = vmax.f32 %v25096_v17, 0.0 }
 0x37c   : > { %v25121_v5 = vmax.f32 %v4499_v46, %v4502_v38  ;;  %v4514_v28 = vmax.f32 %v4442_v20, 0.0  ;;  %5624 = vmatprep.mubr.bf16.mxu0 %v26211_v60  ;;  %5687 = vmatprep.mubr.bf16.mxu1 %v26211_v60  ;;  %v4468_v9 = vmax.f32 %v25100_v6, 0.0 }
 0x37d   : > { %v25125_v29 = vmax.f32 %v4510_v63, %v4513_v1  ;;  %v25138_v63 = vadd.f32 %v25059_v21, %v25032_v43 }
 0x37e   : > { %v25129_v22 = vmax.f32 %v4511_v3, %v4514_v28  ;;  %v4149_v7 = vpop.f32.mrb[24].mxu0  ;;  %v4212_v32 = vpop.f32.mrb[24].mxu1 }
 0x37f   : > { %v4385_v20 = vadd.f32 %v25068_v12, %v4149_v7  ;;  %v4387_v49 = vadd.f32 %v25071_v10, %v4212_v32  ;;  %v4151_v57 = vpop.f32.mrb[25].mxu0  ;;  %v4214_v1 = vpop.f32.mrb[25].mxu1 }
 0x380   : > { %v4386_v17 = vadd.f32 %v25077_v35, %v4151_v57  ;;  %v4388_v6 = vadd.f32 %v25080_v58, %v4214_v1  ;;  %v4153_v3 = vpop.f32.mrb[26].mxu0  ;;  %v4216_v28 = vpop.f32.mrb[26].mxu1  ;;  %v25148_v57 = vadd.f32 %v25054_v25, %v25065_v16  ;;  %v4492_v16 = vmax.f32 %v25138_v63, 0.0 }
 0x381   : > { %v4457_v46 = vmax.f32 %v4385_v20, 0.0  ;;  %v4459_v38 = vmax.f32 %v4387_v49, 0.0  ;;  %v4397_v7 = vadd.f32 %v25068_v12, %v4153_v3  ;;  %v4399_v32 = vadd.f32 %v25071_v10, %v4216_v28  ;;  %v4155_v24 = vpop.f32.mrb[27].mxu0  ;;  %v4218_v18 = vpop.f32.mrb[27].mxu1 }
 0x382   : > { %v4458_v34 = vmax.f32 %v4386_v17, 0.0  ;;  %v4460_v30 = vmax.f32 %v4388_v6, 0.0  ;;  %v4398_v47 = vadd.f32 %v25077_v35, %v4155_v24  ;;  %v4400_v43 = vadd.f32 %v25080_v58, %v4218_v18  ;;  %v23444_v24 = vld [vmem:[#allocation3 + $0x240] ss:$48 sps:$4 sm:$0xff]   ;;  %v23445_v18 = vld [vmem:[#allocation3 + $0x248] ss:$48 sps:$4 sm:$0xff]  }
 0x383   : > { %v4540_v1 = vmax.f32 %v4456_v62, %v4459_v38  ;;  %v4469_v56 = vmax.f32 %v4397_v7, 0.0  ;;  %v4471_v20 = vmax.f32 %v4399_v32, 0.0  ;;  %19966 = vmatmul.mubr.msk.bf16.vlgmr.msra.gmra.mrb[60].mxu0 %vm790_vm1, %v24211_v0  ;;  %19970 = vmatmul.mubr.msk.bf16.vlgmr.msra.gmra.mrb[60].mxu1 %vm790_vm1, %v24211_v0  ;;  %v25157_v62 = vadd.f32 %v25059_v21, %v25074_v39  ;;  %v23446_v7 = vld [vmem:[#allocation3 + $0x2a4] ss:$48 sps:$4 sm:$0x3f]  }
 0x384   : > { %v4539_v49 = vmax.f32 %v4455_v33, %v4458_v34  ;;  %v4541_v17 = vmax.f32 %v4457_v46, %v4460_v30  ;;  %v4470_v6 = vmax.f32 %v4398_v47, 0.0  ;;  %v4472_v3 = vmax.f32 %v4400_v43, 0.0  ;;  %5791 = vmatpush1.bf16.msra.mxu0 %v23444_v24  ;;  %5854 = vmatpush1.bf16.msra.mxu1 %v23445_v18 }
 0x385   : > { %v4558_v38 = vmax.f32 %v24995_v14, %v4540_v1  ;;  %v4543_v28 = vmax.f32 %v4468_v9, %v4471_v20  ;;  %5634 = vmatprep.mubr.bf16.mxu0 %v26211_v60  ;;  %5697 = vmatprep.mubr.bf16.mxu1 %v26211_v60  ;;  %v25167_v39 = vadd.f32 %v25059_v21, %v25092_v31 }
 0x386   : > { %v4557_v0 = vmax.f32 %v24895_v37, %v4539_v49  ;;  %v4559_v34 = vmax.f32 %v25001_v26, %v4541_v17  ;;  %v4542_v47 = vmax.f32 %v4467_v2, %v4470_v6  ;;  %v4544_v33 = vmax.f32 %v4469_v56, %v4472_v3  ;;  %v4159_v46 = vpop.f32.mrb[28].mxu0  ;;  %v4222_v30 = vpop.f32.mrb[28].mxu1  ;;  %19973 = vmatprep.subr.msk.bf16.mxu0 %vm800_vm0, %v23446_v7  ;;  %v23447_v26 = vld [vmem:[#allocation3 + $0x2ac] ss:$48 sps:$4 sm:$0x3f]  }
 0x387   : > { %v4561_v14 = vmax.f32 %v25005_v42, %v4543_v28  ;;  %v4409_v9 = vadd.f32 %v25068_v12, %v4159_v46  ;;  %v4411_v32 = vadd.f32 %v25071_v10, %v4222_v30  ;;  %v4161_v37 = vpop.f32.mrb[29].mxu0  ;;  %v4224_v43 = vpop.f32.mrb[29].mxu1  ;;  %19977 = vmatprep.subr.msk.bf16.mxu1 %vm800_vm0, %v23447_v26  ;;  %v23449_v46 = vld [vmem:[#allocation3 + $0x25c] ss:$48 sps:$4 sm:$0xff]  }
 0x388   : > { %v4560_v56 = vmax.f32 %v24899_v45, %v4542_v47  ;;  %v4562_v2 = vmax.f32 %v25013_v44, %v4544_v33  ;;  %v4410_v1 = vadd.f32 %v25077_v35, %v4161_v37  ;;  %v4412_v31 = vadd.f32 %v25080_v58, %v4224_v43  ;;  %v4163_v20 = vpop.f32.mrb[30].mxu0  ;;  %v4226_v49 = vpop.f32.mrb[30].mxu1  ;;  %5793 = vmatpush1.bf16.msra.mxu0 %v24440_v51  ;;  %v23448_v45 = vld [vmem:[#allocation3 + $0x254] ss:$48 sps:$4 sm:$0xff]  }
 0x389   : > { %v25178_v42 = vpack.c.bf16 %v4561_v14, %v4558_v38  ;;  %v4481_v17 = vmax.f32 %v4409_v9, 0.0  ;;  %v4483_v6 = vmax.f32 %v4411_v32, 0.0  ;;  %v4421_v3 = vadd.f32 %v25068_v12, %v4163_v20  ;;  %v4165_v24 = vpop.f32.mrb[31].mxu0  ;;  %v4228_v18 = vpop.f32.mrb[31].mxu1  ;;  %5856 = vmatpush1.bf16.msra.mxu1 %v24443_v52  ;;  %5916 = vmatprep.subr.bf16.mxu0 %v23448_v45 }
 0x38a   : > { %v25182_v44 = vpack.c.bf16 %v4560_v56, %v4557_v0  ;;  %v25184_v28 = vpack.c.bf16 %v4562_v2, %v4559_v34  ;;  %v4482_v47 = vmax.f32 %v4410_v1, 0.0  ;;  %v4484_v33 = vmax.f32 %v4412_v31, 0.0  ;;  %5979 = vmatprep.subr.bf16.mxu1 %v23449_v46 }
 0x38b   : > { %26213 = vst [vmem:[#allocation49_spill] sm:$0xff] %v25178_v42  ;;  %v4503_v51 = vmax.f32 %v25148_v57, 0.0  ;;  %v26216_v38 = vmax.f32 %v25109_v54, 0.0  ;;  %v4423_v7 = vadd.f32 %v25071_v10, %v4226_v49  ;;  %v4422_v14 = vadd.f32 %v25077_v35, %v4165_v24  ;;  %19967 = vmatmul.mubr.msk.bf16.gmra.mrb[64].mxu0 %vm790_vm1, %v24221_v8  ;;  %19971 = vmatmul.mubr.msk.bf16.gmra.mrb[64].mxu1 %vm790_vm1, %v24221_v8  ;;  %v25575_v42 = vld [vmem:[#allocation7 + $0xac0] sm:$0xff] }
 0x38c   : > { %26214 = vst [vmem:[#allocation50_spill] sm:$0xff] %v25182_v44  ;;  %26215 = vst [vmem:[#allocation51_spill] sm:$0xff] %v25184_v28  ;;  %v26217_v52 = vmax.f32 %v25105_v15, 0.0  ;;  %v4547_v34 = vmax.f32 %v4481_v17, %v4484_v33  ;;  %v4493_v9 = vmax.f32 %v4421_v3, 0.0  ;;  %v4424_v57 = vadd.f32 %v25080_v58, %v4228_v18  ;;  %5644 = vmatprep.mubr.bf16.mxu0 %v26211_v60 }
 0x38d   : > { %v4546_v30 = vmax.f32 %v26216_v38, %v4483_v6  ;;  %5707 = vmatprep.mubr.bf16.mxu1 %v26211_v60  ;;  %v4443_v54 = vadd.f32 %v25054_v25, %v25085_v41  ;;  %v4495_v37 = vmax.f32 %v4423_v7, 0.0  ;;  %v4494_v43 = vmax.f32 %v4422_v14, 0.0 }
 0x38e   : > { %v4545_v0 = vmax.f32 %v26217_v52, %v4482_v47  ;;  %v4504_v8 = vmax.f32 %v25157_v62, 0.0  ;;  %v4565_v26 = vmax.f32 %v25047_v53, %v4547_v34  ;;  %v4496_v56 = vmax.f32 %v4424_v57, 0.0  ;;  %v4169_v2 = vpop.f32.mrb[32].mxu0  ;;  %v4232_v1 = vpop.f32.mrb[32].mxu1 }
 0x38f   : > { %v4564_v32 = vmax.f32 %v25037_v4, %v4546_v30  ;;  %v4549_v31 = vmax.f32 %v4492_v16, %v4495_v37  ;;  %v26218_v20 = vmax.f32 %v25119_v55, 0.0  ;;  %v4433_v41 = vadd.f32 %v25068_v12, %v4169_v2  ;;  %v4171_v17 = vpop.f32.mrb[33].mxu0  ;;  %v4234_v6 = vpop.f32.mrb[33].mxu1 }
 0x390   : > { %v4563_v15 = vmax.f32 %v24921_v19, %v4545_v0  ;;  %v4435_v4 = vadd.f32 %v25071_v10, %v4232_v1  ;;  %v4516_v62 = vmax.f32 %v25167_v39, 0.0  ;;  %v4550_v19 = vmax.f32 %v4493_v9, %v4496_v56  ;;  %v4173_v24 = vpop.f32.mrb[34].mxu0  ;;  %v4236_v18 = vpop.f32.mrb[34].mxu1 }
 0x391   : > { %v4548_v49 = vmax.f32 %v26218_v20, %v4494_v43  ;;  %v4434_v53 = vadd.f32 %v25077_v35, %v4171_v17  ;;  %v4436_v3 = vadd.f32 %v25080_v58, %v4234_v6  ;;  %v4567_v63 = vmax.f32 %v25061_v50, %v4549_v31  ;;  %v4175_v47 = vpop.f32.mrb[35].mxu0  ;;  %v4238_v33 = vpop.f32.mrb[35].mxu1  ;;  %v26226_v17 = vld [vmem:[#allocation35_spill] sm:$0xff] }
 0x392   : > { %v4505_v16 = vmax.f32 %v4433_v41, 0.0  ;;  %v4507_v45 = vmax.f32 %v4435_v4, 0.0  ;;  %v4568_v46 = vmax.f32 %v25063_v23, %v4550_v19  ;;  %v4445_v39 = vadd.f32 %v25068_v12, %v4173_v24  ;;  %v23455_v41 = vld [vmem:[#allocation3 + $0x26c] ss:$48 sps:$4 sm:$0xff]   ;;  %v26227_v19 = vld [vmem:[#allocation23_spill] sm:$0xff] }
 0x393   : > { %v4566_v55 = vmax.f32 %v24931_v36, %v4548_v49  ;;  %v4506_v38 = vmax.f32 %v4434_v53, 0.0  ;;  %v4508_v30 = vmax.f32 %v4436_v3, 0.0  ;;  %v25219_v7 = vpack.c.bf16 %v4567_v63, %v4564_v32  ;;  %19968 = vmatmul.mubr.msk.bf16.gmra.mrb[68].mxu0 %vm790_vm1, %v24583_v27  ;;  %19972 = vmatmul.mubr.msk.bf16.gmra.mrb[68].mxu1 %vm790_vm1, %v24583_v27  ;;  %v23454_v49 = vld [vmem:[#allocation3 + $0x264] ss:$48 sps:$4 sm:$0xff]   ;;  %v26225_v4 = vld [vmem:[#allocation22_spill] sm:$0xff]  ;;  %v26228_v53 = vld [vmem:[#allocation24_spill] sm:$0xff] }
 0x394   : > { %v4552_v52 = vmax.f32 %v4504_v8, %v4507_v45  ;;  %v4447_v0 = vadd.f32 %v25071_v10, %v4236_v18  ;;  %v25226_v36 = vpack.c.bf16 %v4568_v46, %v4565_v26  ;;  %v4517_v9 = vmax.f32 %v4445_v39, 0.0  ;;  %5822 = vmatprep.mubr.bf16.mxu0 %v26211_v60  ;;  %5885 = vmatprep.mubr.bf16.mxu1 %v26211_v60  ;;  %v23458_v6 = vld [vmem:[#allocation3 + $0x2c4] ss:$48 sps:$4 sm:$0x3f]   ;;  %v23461_v24 = vld [vmem:[#allocation3 + $0x30c] ss:$48 sps:$4 sm:$0xff]  }
 0x395   : > { %26219 = vst [vmem:[#allocation52_spill] sm:$0xff] %v25219_v7  ;;  %v25221_v14 = vpack.c.bf16 %v4566_v55, %v4563_v15  ;;  %v4551_v50 = vmax.f32 %v4503_v51, %v4506_v38  ;;  %v4553_v34 = vmax.f32 %v4505_v16, %v4508_v30  ;;  %v4446_v32 = vadd.f32 %v25077_v35, %v4175_v47  ;;  %v23460_v3 = vld [vmem:[#allocation3 + $0x304] ss:$48 sps:$4 sm:$0xff]   ;;  %v23462_v18 = vld [vmem:[#allocation3 + $0x300] ss:$48 sps:$4 sm:$0xff]  }
 0x396   : > { %26221 = vst [vmem:[#allocation54_spill] sm:$0xff] %v25226_v36  ;;  %v4570_v23 = vmax.f32 %v25111_v40, %v4552_v52  ;;  %v4519_v57 = vmax.f32 %v4447_v0, 0.0  ;;  %v4448_v37 = vadd.f32 %v25080_v58, %v4238_v33  ;;  %v4515_v8 = vmax.f32 %v4443_v54, 0.0  ;;  %v23463_v63 = vld [vmem:[#allocation3 + $0x308] ss:$48 sps:$4 sm:$0xff]   ;;  %26249 = vst [vmem:[#allocation23_spill] sm:$0xff] %v25575_v42 }
 0x397   : > { %26220 = vst [vmem:[#allocation53_spill] sm:$0xff] %v25221_v14  ;;  %v4569_v43 = vmax.f32 %v24964_v61, %v4551_v50  ;;  %v4571_v51 = vmax.f32 %v25121_v5, %v4553_v34  ;;  %v4518_v26 = vmax.f32 %v4446_v32, 0.0  ;;  %v23450_v61 = vld [vmem:[#allocation3 + $0x250] ss:$48 sps:$4 sm:$0xff]   ;;  %v23467_v33 = vld [vmem:[#allocation3 + $0x31c] ss:$48 sps:$4 sm:$0xff]  }
 0x398   : > { %v4555_v15 = vmax.f32 %v4516_v62, %v4519_v57  ;;  %v4520_v56 = vmax.f32 %v4448_v37, 0.0  ;;  %v23459_v62 = vld [vmem:[#allocation3 + $0x2cc] ss:$48 sps:$4 sm:$0x3f]   ;;  %v26229_v45 = vld [vmem:[#allocation25_spill] sm:$0xff]  ;;  %v26231_v57 = vld [vmem:[#allocation27_spill] sm:$0xff] }
 0x399   : > { %v4554_v2 = vmax.f32 %v4515_v8, %v4518_v26  ;;  %v23464_v55 = vld [vmem:[#allocation3 + $0x364] ss:$48 sps:$4 sm:$0x3f]   ;;  %v23465_v16 = vld [vmem:[#allocation3 + $0x36c] ss:$48 sps:$4 sm:$0x3f]  }
 0x39a   : > { %v4573_v27 = vmax.f32 %v25125_v29, %v4555_v15  ;;  %v4556_v1 = vmax.f32 %v4517_v9, %v4520_v56  ;;  %v23451_v29 = vld [vmem:[#allocation3 + $0x258] ss:$48 sps:$4 sm:$0xff]   ;;  %v23468_v46 = vld [vmem:[%s24125_s19 + $0x3c] sm:$0xf]  ;;  %v23469_v38 = vld [vmem:[%s24125_s19 + $0x40] sm:$0xf] }
 0x39b   : > { %v4572_v31 = vmax.f32 %v24977_v59, %v4554_v2  ;;  %19974 = vmatmul.mubr.msk.bf16.vlgmr.msra.gmra.mrb[36].mxu0 %vm790_vm1, %v24165_v48  ;;  %19978 = vmatmul.mubr.msk.bf16.vlgmr.msra.gmra.mrb[36].mxu1 %vm790_vm1, %v24165_v48  ;;  %v23452_v59 = vld [vmem:[#allocation3 + $0x2b4] ss:$48 sps:$4 sm:$0x3f]   ;;  %v26230_v47 = vld [vmem:[#allocation26_spill] sm:$0xff]  ;;  %v19997_v30 = vcombine.low %v23468_v46, %v23469_v38  ;;  %v26232_v32 = vld [vmem:[#allocation28_spill] sm:$0xff] }
 0x39c   : > { %v25238_v40 = vpack.c.bf16 %v4573_v27, %v4570_v23  ;;  %v4574_v20 = vmax.f32 %v25129_v22, %v4556_v1  ;;  %5917 = vmatpush1.bf16.msra.mxu0 %v23450_v61  ;;  %5980 = vmatpush1.bf16.msra.mxu1 %v23451_v29  ;;  %v23453_v22 = vld [vmem:[#allocation3 + $0x2bc] ss:$48 sps:$4 sm:$0x3f]   ;;  %v23470_v39 = vld [vmem:[#allocation3 + $0x310] ss:$48 sps:$4 sm:$0xff]   ;;  %v25540_v36 = vld [vmem:[#allocation7 + $0xa88] sm:$0xff] }
 0x39d   : > { %v25246_v5 = vpack.c.bf16 %v4572_v31, %v4569_v43  ;;  %5832 = vmatprep.mubr.bf16.mxu0 %v26211_v60  ;;  %5895 = vmatprep.mubr.bf16.mxu1 %v26211_v60  ;;  %v23471_v52 = vld [vmem:[#allocation3 + $0x318] ss:$48 sps:$4 sm:$0xff]   ;;  %v23472_v0 = vld [vmem:[#allocation3 + $0x374] ss:$48 sps:$4 sm:$0x3f]  }
 0x39e   : > { %26222 = vst [vmem:[#allocation55_spill] sm:$0xff] %v25238_v40  ;;  %v25248_v54 = vpack.c.bf16 %v4574_v20, %v4571_v51  ;;  %19981 = vmatprep.subr.msk.bf16.mxu0 %vm800_vm0, %v23452_v59  ;;  %19985 = vmatprep.subr.msk.bf16.mxu1 %vm800_vm0, %v23453_v22  ;;  %v23473_v50 = vld [vmem:[%s24125_s19 + $0x44] sm:$0xf]  ;;  %v23474_v34 = vld [vmem:[%s24125_s19 + $0x48] sm:$0xf] }
 0x39f   : > { %26223 = vst [vmem:[#allocation56_spill] sm:$0xff] %v25246_v5  ;;  %v25321_v9 = vcombine.low %v23473_v50, %v23474_v34  ;;  %v23475_v23 = vld [vmem:[#allocation3 + $0x37c] ss:$48 sps:$4 sm:$0x3f]   ;;  %v23476_v37 = vld [vmem:[#allocation3 + $0x324] ss:$48 sps:$4 sm:$0xff]  }
 0x3a0   : > { %26224 = vst [vmem:[#allocation57_spill] sm:$0xff] %v25248_v54  ;;  %5919 = vmatpush1.bf16.msra.mxu0 %v24476_v11  ;;  %5982 = vmatpush1.bf16.msra.mxu1 %v24479_v13  ;;  %v23456_v11 = vld [vmem:[#allocation3 + $0x260] ss:$48 sps:$4 sm:$0xff]   ;;  %v23457_v13 = vld [vmem:[#allocation3 + $0x268] ss:$48 sps:$4 sm:$0xff]  }
 0x3a1   : > { %6042 = vmatprep.subr.bf16.mxu0 %v23454_v49  ;;  %6105 = vmatprep.subr.bf16.mxu1 %v23455_v41  ;;  %v23477_v43 = vld [vmem:[#allocation3 + $0x32c] ss:$48 sps:$4 sm:$0xff]   ;;  %v610_v51 = vld [vmem:[%s24125_s19 + $0x50] sm:$0xf]  ;;  %v23480_v56 = vld [vmem:[#allocation3 + $0x328] ss:$48 sps:$4 sm:$0xff]  }
 0x3a2   : > { %v23478_v8 = vld [vmem:[%s24125_s19 + $0x4c] sm:$0xf]  ;;  %v23479_v26 = vld [vmem:[#allocation3 + $0x320] ss:$48 sps:$4 sm:$0xff]   ;;  %v23483_v20 = vld [vmem:[#allocation3 + $0x3c4] ss:$48 sps:$4 sm:$0xff]  }
 0x3a3   : > { %19975 = vmatmul.mubr.msk.bf16.gmra.mrb[40].mxu0 %vm790_vm1, %v26225_v4  ;;  %19979 = vmatmul.mubr.msk.bf16.gmra.mrb[40].mxu1 %vm790_vm1, %v26225_v4  ;;  %v19999_v15 = vcombine.low %v23478_v8, %v610_v51  ;;  %v23481_v27 = vld [vmem:[#allocation3 + $0x384] ss:$48 sps:$4 sm:$0x3f]   ;;  %v23482_v2 = vld [vmem:[#allocation3 + $0x38c] ss:$48 sps:$4 sm:$0x3f]  }
 0x3a4   : > { %5842 = vmatprep.mubr.bf16.mxu0 %v26211_v60  ;;  %5905 = vmatprep.mubr.bf16.mxu1 %v26211_v60  ;;  %v26233_v1 = vld [vmem:[#allocation29_spill] sm:$0xff]  ;;  %v26234_v31 = vld [vmem:[#allocation30_spill] sm:$0xff]  ;;  %v26235_v41 = vld [vmem:[#allocation31_spill] sm:$0xff] }
 0x3a5   : > { %v23484_v61 = vld [vmem:[#allocation3 + $0x3cc] ss:$48 sps:$4 sm:$0xff]   ;;  %v23485_v29 = vld [vmem:[#allocation3 + $0x3c0] ss:$48 sps:$4 sm:$0xff]   ;;  %v23486_v59 = vld [vmem:[#allocation3 + $0x3c8] ss:$48 sps:$4 sm:$0xff]  }
 0x3a6   : > { %v23487_v22 = vld [vmem:[#allocation3 + $0x424] ss:$48 sps:$4 sm:$0x3f]   ;;  %v23488_v49 = vld [vmem:[#allocation3 + $0x42c] ss:$48 sps:$4 sm:$0x3f]  }
 0x3a7   : > { %v23501_v46 = vld [vmem:[%s24125_s19 + $0x68] sm:$0xf]  ;;  %v23502_v50 = vld [vmem:[#allocation3 + $0x3e0] ss:$48 sps:$4 sm:$0xff]  }
 0x3a8   : > { %v23503_v34 = vld [vmem:[#allocation3 + $0x3e8] ss:$48 sps:$4 sm:$0xff]  }
 0x3a9   : > { %v25528_v5 = vld [vmem:[#allocation7 + $0xa68] sm:$0xff] }
 0x3ab   : > { %19976 = vmatmul.mubr.msk.bf16.gmra.mrb[44].mxu0 %vm790_vm1, %v26226_v17  ;;  %19980 = vmatmul.mubr.msk.bf16.gmra.mrb[44].mxu1 %vm790_vm1, %v26226_v17 }
 0x3ac   : > { %5948 = vmatprep.mubr.bf16.mxu0 %v26211_v60  ;;  %6011 = vmatprep.mubr.bf16.mxu1 %v26211_v60 }
 0x3b3   : > { %19982 = vmatmul.mubr.msk.bf16.vlgmr.msra.gmra.mrb[48].mxu0 %vm790_vm1, %v24165_v48  ;;  %19986 = vmatmul.mubr.msk.bf16.vlgmr.msra.gmra.mrb[48].mxu1 %vm790_vm1, %v24165_v48 }
 0x3b4   : > { %6043 = vmatpush1.bf16.msra.mxu0 %v23456_v11  ;;  %6106 = vmatpush1.bf16.msra.mxu1 %v23457_v13  ;;  %v23490_v11 = vld [vmem:[#allocation3 + $0x3dc] ss:$48 sps:$4 sm:$0xff]   ;;  %v23491_v13 = vld [vmem:[%s24125_s19 + $0x58] sm:$0xf] }
 0x3b5   : > { %5958 = vmatprep.mubr.bf16.mxu0 %v26211_v60  ;;  %6021 = vmatprep.mubr.bf16.mxu1 %v26211_v60 }
 0x3b6   : > { %19989 = vmatprep.subr.msk.bf16.mxu0 %vm800_vm0, %v23458_v6  ;;  %19993 = vmatprep.subr.msk.bf16.mxu1 %vm800_vm0, %v23459_v62  ;;  %v23492_v6 = vld [vmem:[%s24125_s19 + $0x5c] sm:$0xf] }
 0x3b7   : > { %v25376_v62 = vcombine.low %v23491_v13, %v23492_v6  ;;  %v7596_v13 = vld [vmem:[#allocation7 + $0x6e0] sm:$0xff]  ;;  %v7593_v6 = vld [vmem:[#allocation7 + $0x6c8] sm:$0xff] }
 0x3b8   : > { %6045 = vmatpush1.bf16.msra.mxu0 %v26227_v19  ;;  %6108 = vmatpush1.bf16.msra.mxu1 %v26228_v53  ;;  %v23493_v19 = vld [vmem:[#allocation3 + $0x3d0] ss:$48 sps:$4 sm:$0xff]   ;;  %v23494_v53 = vld [vmem:[#allocation3 + $0x3d8] ss:$48 sps:$4 sm:$0xff]  }
 0x3b9   : > { %6254 = vmatprep.subr.bf16.mxu0 %v23460_v3  ;;  %6317 = vmatprep.subr.bf16.mxu1 %v23461_v24  ;;  %v23495_v3 = vld [vmem:[#allocation3 + $0x434] ss:$48 sps:$4 sm:$0x3f]   ;;  %v23496_v24 = vld [vmem:[%s24125_s19 + $0x60] sm:$0xf] }
 0x3bb   : > { %19983 = vmatmul.mubr.msk.bf16.gmra.mrb[52].mxu0 %vm790_vm1, %v26225_v4  ;;  %19987 = vmatmul.mubr.msk.bf16.gmra.mrb[52].mxu1 %vm790_vm1, %v26225_v4 }
 0x3bc   : > { %5968 = vmatprep.mubr.bf16.mxu0 %v26211_v60  ;;  %6031 = vmatprep.mubr.bf16.mxu1 %v26211_v60 }
 0x3c3   : > { %19984 = vmatmul.mubr.msk.bf16.gmra.mrb[56].mxu0 %vm790_vm1, %v26226_v17  ;;  %19988 = vmatmul.mubr.msk.bf16.gmra.mrb[56].mxu1 %vm790_vm1, %v26226_v17 }
 0x3c4   : > { %6074 = vmatprep.mubr.bf16.mxu0 %v26211_v60  ;;  %6137 = vmatprep.mubr.bf16.mxu1 %v26211_v60 }
 0x3cb   : > { %19990 = vmatmul.mubr.msk.bf16.vlgmr.msra.gmra.mrb[60].mxu0 %vm790_vm1, %v24165_v48  ;;  %19994 = vmatmul.mubr.msk.bf16.vlgmr.msra.gmra.mrb[60].mxu1 %vm790_vm1, %v24165_v48  ;;  %v23466_v48 = vld [vmem:[#allocation3 + $0x314] ss:$48 sps:$4 sm:$0xff]  }
 0x3cc   : > { %6255 = vmatpush1.bf16.msra.mxu0 %v23462_v18  ;;  %6318 = vmatpush1.bf16.msra.mxu1 %v23463_v63  ;;  %v23497_v18 = vld [vmem:[%s24125_s19 + $0x64] sm:$0xf] }
 0x3cd   : > { %6084 = vmatprep.mubr.bf16.mxu0 %v26211_v60  ;;  %6147 = vmatprep.mubr.bf16.mxu1 %v26211_v60  ;;  %v20025_v63 = vcombine.low %v23496_v24, %v23497_v18  ;;  %v7600_v18 = vld [vmem:[#allocation7 + $0x700] sm:$0xff] }
 0x3ce   : > { %20000 = vmatprep.subr.msk.bf16.mxu0 %vm800_vm0, %v23464_v55  ;;  %20004 = vmatprep.subr.msk.bf16.mxu1 %vm800_vm0, %v23465_v16  ;;  %v23498_v55 = vld [vmem:[#allocation3 + $0x43c] ss:$48 sps:$4 sm:$0x3f]   ;;  %v26237_v16 = vld [vmem:[#allocation33_spill] sm:$0xff] }
 0x3d0   : > { %6257 = vmatpush1.bf16.msra.mxu0 %v26229_v45  ;;  %6320 = vmatpush1.bf16.msra.mxu1 %v26230_v47  ;;  %v26238_v45 = vld [vmem:[#allocation34_spill] sm:$0xff]  ;;  %v23499_v47 = vld [vmem:[#allocation3 + $0x3e4] ss:$48 sps:$4 sm:$0xff]  }
 0x3d1   : > { %6380 = vmatprep.subr.bf16.mxu0 %v23466_v48  ;;  %6443 = vmatprep.subr.bf16.mxu1 %v23467_v33  ;;  %v23500_v48 = vld [vmem:[#allocation3 + $0x3ec] ss:$48 sps:$4 sm:$0xff]  }
 0x3d2   : > { %v617_v33 = vld [vmem:[%s24125_s19 + $0x6c] sm:$0xf] }
 0x3d3   : > { %19991 = vmatmul.mubr.msk.bf16.gmra.mrb[64].mxu0 %vm790_vm1, %v26225_v4  ;;  %19995 = vmatmul.mubr.msk.bf16.gmra.mrb[64].mxu1 %vm790_vm1, %v26225_v4  ;;  %v26236_v4 = vld [vmem:[#allocation32_spill] sm:$0xff]  ;;  %v20026_v38 = vcombine.low %v23501_v46, %v617_v33 }
 0x3d4   : > { %6094 = vmatprep.mubr.bf16.mxu0 %v26211_v60  ;;  %6157 = vmatprep.mubr.bf16.mxu1 %v26211_v60  ;;  %v7608_v46 = vld [vmem:[#allocation7 + $0x740] sm:$0xff] }
 0x3db   : > { %19992 = vmatmul.mubr.msk.bf16.gmra.mrb[68].mxu0 %vm790_vm1, %v26226_v17  ;;  %19996 = vmatmul.mubr.msk.bf16.gmra.mrb[68].mxu1 %vm790_vm1, %v26226_v17  ;;  %v23489_v17 = vld [vmem:[#allocation3 + $0x3d4] ss:$48 sps:$4 sm:$0xff]  }
 0x3dc   : > { %6286 = vmatprep.mubr.bf16.mxu0 %v26211_v60  ;;  %6349 = vmatprep.mubr.bf16.mxu1 %v26211_v60 }
 0x3e3   : > { %20001 = vmatmul.mubr.msk.bf16.vlgmr.msra.gmra.mrb[36].mxu0 %vm790_vm1, %v19997_v30  ;;  %20005 = vmatmul.mubr.msk.bf16.vlgmr.msra.gmra.mrb[36].mxu1 %vm790_vm1, %v19997_v30 }
 0x3e4   : > { %6381 = vmatpush1.bf16.msra.mxu0 %v23470_v39  ;;  %6444 = vmatpush1.bf16.msra.mxu1 %v23471_v52  ;;  %v7572_v39 = vld [vmem:[#allocation7 + $0x620] sm:$0xff]  ;;  %v7569_v52 = vld [vmem:[#allocation7 + $0x608] sm:$0xff] }
 0x3e5   : > { %6296 = vmatprep.mubr.bf16.mxu0 %v26211_v60  ;;  %6359 = vmatprep.mubr.bf16.mxu1 %v26211_v60 }
 0x3e6   : > { %20008 = vmatprep.subr.msk.bf16.mxu0 %vm800_vm0, %v23472_v0  ;;  %20012 = vmatprep.subr.msk.bf16.mxu1 %vm800_vm0, %v23475_v23  ;;  %v7573_v0 = vld [vmem:[#allocation7 + $0x628] sm:$0xff] }
 0x3e7   : > { %v23504_v23 = vld [vmem:[#allocation3 + $0x444] ss:$48 sps:$4 sm:$0x3f]   ;;  %v20053_v8 = vcombine.low %v7569_v52, %v7573_v0 }
 0x3e8   : > { %6383 = vmatpush1.bf16.msra.mxu0 %v26231_v57  ;;  %6446 = vmatpush1.bf16.msra.mxu1 %v26232_v32  ;;  %v20054_v57 = vcombine.high %v7569_v52, %v7573_v0  ;;  %v23505_v32 = vld [vmem:[#allocation3 + $0x44c] ss:$48 sps:$4 sm:$0x3f]   ;;  %v7613_v52 = vld [vmem:[#allocation7 + $0x768] sm:$0xff] }
 0x3e9   : > { %6506 = vmatprep.subr.bf16.mxu0 %v23476_v37  ;;  %6569 = vmatprep.subr.bf16.mxu1 %v23477_v43  ;;  %v26239_v37 = vld [vmem:[#allocation36_spill] sm:$0xff]  ;;  %v26240_v43 = vld [vmem:[#allocation37_spill] sm:$0xff] }
 0x3eb   : > { %20002 = vmatmul.mubr.msk.bf16.gmra.mrb[40].mxu0 %vm790_vm1, %v25321_v9  ;;  %20006 = vmatmul.mubr.msk.bf16.gmra.mrb[40].mxu1 %vm790_vm1, %v25321_v9 }
 0x3ec   : > { %6306 = vmatprep.mubr.bf16.mxu0 %v26211_v60  ;;  %6369 = vmatprep.mubr.bf16.mxu1 %v26211_v60 }
 0x3f3   : > { %20003 = vmatmul.mubr.msk.bf16.gmra.mrb[44].mxu0 %vm790_vm1, %v19999_v15  ;;  %20007 = vmatmul.mubr.msk.bf16.gmra.mrb[44].mxu1 %vm790_vm1, %v19999_v15 }
 0x3f4   : > { %6412 = vmatprep.mubr.bf16.mxu0 %v26211_v60  ;;  %6475 = vmatprep.mubr.bf16.mxu1 %v26211_v60 }
 0x3fb   : > { %20009 = vmatmul.mubr.msk.bf16.vlgmr.msra.gmra.mrb[48].mxu0 %vm790_vm1, %v19997_v30  ;;  %20013 = vmatmul.mubr.msk.bf16.vlgmr.msra.gmra.mrb[48].mxu1 %vm790_vm1, %v19997_v30 }
 0x3fc   : > { %6507 = vmatpush1.bf16.msra.mxu0 %v23479_v26  ;;  %6570 = vmatpush1.bf16.msra.mxu1 %v23480_v56  ;;  %v7580_v26 = vld [vmem:[#allocation7 + $0x660] sm:$0xff]  ;;  %v7577_v56 = vld [vmem:[#allocation7 + $0x648] sm:$0xff] }
 0x3fd   : > { %6422 = vmatprep.mubr.bf16.mxu0 %v26211_v60  ;;  %6485 = vmatprep.mubr.bf16.mxu1 %v26211_v60 }
 0x3fe   : > { %20016 = vmatprep.subr.msk.bf16.mxu0 %vm800_vm0, %v23481_v27  ;;  %20020 = vmatprep.subr.msk.bf16.mxu1 %vm800_vm0, %v23482_v2  ;;  %v7581_v2 = vld [vmem:[#allocation7 + $0x668] sm:$0xff] }
 0x400   : > { %6509 = vmatpush1.bf16.msra.mxu0 %v26233_v1  ;;  %6572 = vmatpush1.bf16.msra.mxu1 %v26234_v31  ;;  %v20061_v31 = vcombine.low %v7577_v56, %v7581_v2 }
 0x401   : > { %6718 = vmatprep.subr.bf16.mxu0 %v23483_v20  ;;  %6781 = vmatprep.subr.bf16.mxu1 %v23484_v61  ;;  %v20062_v20 = vcombine.high %v7577_v56, %v7581_v2  ;;  %v7584_v61 = vld [vmem:[#allocation7 + $0x680] sm:$0xff]  ;;  %v7625_v56 = vld [vmem:[#allocation7 + $0x7c8] sm:$0xff] }
 0x402   : > { %v7629_v2 = vld [vmem:[#allocation7 + $0x7e8] sm:$0xff] }
 0x403   : > { %20010 = vmatmul.mubr.msk.bf16.gmra.mrb[52].mxu0 %vm790_vm1, %v25321_v9  ;;  %20014 = vmatmul.mubr.msk.bf16.gmra.mrb[52].mxu1 %vm790_vm1, %v25321_v9 }
 0x404   : > { %6432 = vmatprep.mubr.bf16.mxu0 %v26211_v60  ;;  %6495 = vmatprep.mubr.bf16.mxu1 %v26211_v60 }
 0x40b   : > { %20011 = vmatmul.mubr.msk.bf16.gmra.mrb[56].mxu0 %vm790_vm1, %v19999_v15  ;;  %20015 = vmatmul.mubr.msk.bf16.gmra.mrb[56].mxu1 %vm790_vm1, %v19999_v15 }
 0x40c   : > { %6538 = vmatprep.mubr.bf16.mxu0 %v26211_v60  ;;  %6601 = vmatprep.mubr.bf16.mxu1 %v26211_v60 }
 0x413   : > { %20017 = vmatmul.mubr.msk.bf16.vlgmr.msra.gmra.mrb[60].mxu0 %vm790_vm1, %v19997_v30  ;;  %20021 = vmatmul.mubr.msk.bf16.vlgmr.msra.gmra.mrb[60].mxu1 %vm790_vm1, %v19997_v30  ;;  %v7568_v30 = vld [vmem:[#allocation7 + $0x600] sm:$0xff] }
 0x414   : > { %6719 = vmatpush1.bf16.msra.mxu0 %v23485_v29  ;;  %6782 = vmatpush1.bf16.msra.mxu1 %v23486_v59  ;;  %v20051_v51 = vcombine.low %v7568_v30, %v7572_v39  ;;  %v7588_v29 = vld [vmem:[#allocation7 + $0x6a0] sm:$0xff]  ;;  %v7585_v59 = vld [vmem:[#allocation7 + $0x688] sm:$0xff] }
 0x415   : > { %6548 = vmatprep.mubr.bf16.mxu0 %v26211_v60  ;;  %6611 = vmatprep.mubr.bf16.mxu1 %v26211_v60 }
 0x416   : > { %20027 = vmatprep.subr.msk.bf16.mxu0 %vm800_vm0, %v23487_v22  ;;  %20031 = vmatprep.subr.msk.bf16.mxu1 %vm800_vm0, %v23488_v49  ;;  %v20068_v22 = vcombine.high %v7584_v61, %v7588_v29  ;;  %v7589_v49 = vld [vmem:[#allocation7 + $0x6a8] sm:$0xff] }
 0x418   : > { %6721 = vmatpush1.bf16.msra.mxu0 %v26235_v41  ;;  %6784 = vmatpush1.bf16.msra.mxu1 %v26236_v4  ;;  %v20067_v41 = vcombine.low %v7584_v61, %v7588_v29  ;;  %v20069_v4 = vcombine.low %v7585_v59, %v7589_v49  ;;  %v7632_v61 = vld [vmem:[#allocation7 + $0x800] sm:$0xff] }
 0x419   : > { %6844 = vmatprep.subr.bf16.mxu0 %v23489_v17  ;;  %6907 = vmatprep.subr.bf16.mxu1 %v23490_v11  ;;  %v20070_v17 = vcombine.high %v7585_v59, %v7589_v49  ;;  %v7592_v11 = vld [vmem:[#allocation7 + $0x6c0] sm:$0xff]  ;;  %v7633_v59 = vld [vmem:[#allocation7 + $0x808] sm:$0xff] }
 0x41a   : > { %v7636_v29 = vld [vmem:[#allocation7 + $0x820] sm:$0xff]  ;;  %v7637_v49 = vld [vmem:[#allocation7 + $0x828] sm:$0xff] }
 0x41b   : > { %20018 = vmatmul.mubr.msk.bf16.gmra.mrb[64].mxu0 %vm790_vm1, %v25321_v9  ;;  %20022 = vmatmul.mubr.msk.bf16.gmra.mrb[64].mxu1 %vm790_vm1, %v25321_v9  ;;  %v20052_v9 = vcombine.high %v7568_v30, %v7572_v39  ;;  %v7609_v30 = vld [vmem:[#allocation7 + $0x748] sm:$0xff] }
 0x41c   : > { %6558 = vmatprep.mubr.bf16.mxu0 %v26211_v60  ;;  %6621 = vmatprep.mubr.bf16.mxu1 %v26211_v60 }
 0x423   : > { %20019 = vmatmul.mubr.msk.bf16.gmra.mrb[68].mxu0 %vm790_vm1, %v19999_v15  ;;  %20023 = vmatmul.mubr.msk.bf16.gmra.mrb[68].mxu1 %vm790_vm1, %v19999_v15  ;;  %v7576_v15 = vld [vmem:[#allocation7 + $0x640] sm:$0xff] }
 0x424   : > { %6750 = vmatprep.mubr.bf16.mxu0 %v26211_v60  ;;  %6813 = vmatprep.mubr.bf16.mxu1 %v26211_v60  ;;  %v20060_v27 = vcombine.high %v7576_v15, %v7580_v26  ;;  %v20059_v1 = vcombine.low %v7576_v15, %v7580_v26  ;;  %v7624_v15 = vld [vmem:[#allocation7 + $0x7c0] sm:$0xff] }
 0x425   : > { %v7628_v26 = vld [vmem:[#allocation7 + $0x7e0] sm:$0xff] }
 0x42b   : > { %20028 = vmatmul.mubr.msk.bf16.vlgmr.msra.gmra.mrb[36].mxu0 %vm790_vm1, %v25376_v62  ;;  %20032 = vmatmul.mubr.msk.bf16.vlgmr.msra.gmra.mrb[36].mxu1 %vm790_vm1, %v25376_v62 }
 0x42c   : > { %6845 = vmatpush1.bf16.msra.mxu0 %v23493_v19  ;;  %6908 = vmatpush1.bf16.msra.mxu1 %v23494_v53  ;;  %v7597_v19 = vld [vmem:[#allocation7 + $0x6e8] sm:$0xff]  ;;  %v20075_v53 = vcombine.low %v7592_v11, %v7596_v13 }
 0x42d   : > { %6760 = vmatprep.mubr.bf16.mxu0 %v26211_v60  ;;  %6823 = vmatprep.mubr.bf16.mxu1 %v26211_v60  ;;  %v20078_v24 = vcombine.high %v7593_v6, %v7597_v19 }
 0x42e   : > { %20035 = vmatprep.subr.msk.bf16.mxu0 %vm800_vm0, %v23495_v3  ;;  %20039 = vmatprep.subr.msk.bf16.mxu1 %vm800_vm0, %v23498_v55  ;;  %v20077_v3 = vcombine.low %v7593_v6, %v7597_v19  ;;  %v7601_v55 = vld [vmem:[#allocation7 + $0x708] sm:$0xff] }
 0x42f   : > { %v7641_v6 = vld [vmem:[#allocation7 + $0x848] sm:$0xff] }
 0x430   : > { %6847 = vmatpush1.bf16.msra.mxu0 %v26237_v16  ;;  %6910 = vmatpush1.bf16.msra.mxu1 %v26238_v45  ;;  %v7605_v45 = vld [vmem:[#allocation7 + $0x728] sm:$0xff] }
 0x431   : > { %6970 = vmatprep.subr.bf16.mxu0 %v23499_v47  ;;  %7033 = vmatprep.subr.bf16.mxu1 %v23500_v48  ;;  %v20085_v48 = vcombine.low %v7601_v55, %v7605_v45  ;;  %v20086_v33 = vcombine.high %v7601_v55, %v7605_v45  ;;  %v7645_v19 = vld [vmem:[#allocation7 + $0x868] sm:$0xff] }
 0x432   : > { %v7649_v55 = vld [vmem:[#allocation7 + $0x888] sm:$0xff] }
 0x433   : > { %20029 = vmatmul.mubr.msk.bf16.gmra.mrb[40].mxu0 %vm790_vm1, %v20025_v63  ;;  %20033 = vmatmul.mubr.msk.bf16.gmra.mrb[40].mxu1 %vm790_vm1, %v20025_v63  ;;  %v7653_v45 = vld [vmem:[#allocation7 + $0x8a8] sm:$0xff] }
 0x434   : > { %6770 = vmatprep.mubr.bf16.mxu0 %v26211_v60  ;;  %6833 = vmatprep.mubr.bf16.mxu1 %v26211_v60 }
 0x43b   : > { %20030 = vmatmul.mubr.msk.bf16.gmra.mrb[44].mxu0 %vm790_vm1, %v20026_v38  ;;  %20034 = vmatmul.mubr.msk.bf16.gmra.mrb[44].mxu1 %vm790_vm1, %v20026_v38 }
 0x43c   : > { %6876 = vmatprep.mubr.bf16.mxu0 %v26211_v60  ;;  %6939 = vmatprep.mubr.bf16.mxu1 %v26211_v60 }
 0x443   : > { %20036 = vmatmul.mubr.msk.bf16.vlgmr.msra.gmra.mrb[48].mxu0 %vm790_vm1, %v25376_v62  ;;  %20040 = vmatmul.mubr.msk.bf16.vlgmr.msra.gmra.mrb[48].mxu1 %vm790_vm1, %v25376_v62 }
 0x444   : > { %6971 = vmatpush1.bf16.msra.mxu0 %v23502_v50  ;;  %7034 = vmatpush1.bf16.msra.mxu1 %v23503_v34  ;;  %v20093_v50 = vcombine.low %v7609_v30, %v7613_v52  ;;  %v20094_v34 = vcombine.high %v7609_v30, %v7613_v52  ;;  %v7657_v30 = vld [vmem:[#allocation7 + $0x8c8] sm:$0xff] }
 0x445   : > { %6886 = vmatprep.mubr.bf16.mxu0 %v26211_v60  ;;  %6949 = vmatprep.mubr.bf16.mxu1 %v26211_v60  ;;  %v7661_v52 = vld [vmem:[#allocation7 + $0x8e8] sm:$0xff] }
 0x446   : > { %20043 = vmatprep.subr.msk.bf16.mxu0 %vm800_vm0, %v23504_v23  ;;  %20047 = vmatprep.subr.msk.bf16.mxu1 %vm800_vm0, %v23505_v32  ;;  %v7620_v23 = vld [vmem:[#allocation7 + $0x7a0] sm:$0xff] }
 0x448   : > { %6973 = vmatpush1.bf16.msra.mxu0 %v26239_v37  ;;  %7036 = vmatpush1.bf16.msra.mxu1 %v26240_v43  ;;  %v7621_v37 = vld [vmem:[#allocation7 + $0x7a8] sm:$0xff] }
 0x449   : > { %8720 = vmatprep.subr.bf16.mxu0 %v20052_v9  ;;  %8826 = vmatprep.subr.bf16.mxu1 %v20054_v57  ;;  %v7616_v9 = vld [vmem:[#allocation7 + $0x780] sm:$0xff]  ;;  %v7617_v57 = vld [vmem:[#allocation7 + $0x788] sm:$0xff] }
 0x44a   : > { %v20100_v32 = vcombine.high %v7616_v9, %v7620_v23  ;;  %v20099_v43 = vcombine.low %v7616_v9, %v7620_v23  ;;  %v7664_v9 = vld [vmem:[#allocation7 + $0x900] sm:$0xff] }
 0x44b   : > { %20037 = vmatmul.mubr.msk.bf16.gmra.mrb[52].mxu0 %vm790_vm1, %v20025_v63  ;;  %20041 = vmatmul.mubr.msk.bf16.gmra.mrb[52].mxu1 %vm790_vm1, %v20025_v63  ;;  %v7668_v23 = vld [vmem:[#allocation7 + $0x920] sm:$0xff] }
 0x44c   : > { %6896 = vmatprep.mubr.bf16.mxu0 %v26211_v60  ;;  %6959 = vmatprep.mubr.bf16.mxu1 %v26211_v60 }
 0x453   : > { %20038 = vmatmul.mubr.msk.bf16.gmra.mrb[56].mxu0 %vm790_vm1, %v20026_v38  ;;  %20042 = vmatmul.mubr.msk.bf16.gmra.mrb[56].mxu1 %vm790_vm1, %v20026_v38 }
 0x454   : > { %7002 = vmatprep.mubr.bf16.mxu0 %v26211_v60  ;;  %7065 = vmatprep.mubr.bf16.mxu1 %v26211_v60 }
 0x45b   : > { %20044 = vmatmul.mubr.msk.bf16.vlgmr.msra.gmra.mrb[60].mxu0 %vm790_vm1, %v25376_v62  ;;  %20048 = vmatmul.mubr.msk.bf16.vlgmr.msra.gmra.mrb[60].mxu1 %vm790_vm1, %v25376_v62  ;;  %v20076_v62 = vcombine.high %v7592_v11, %v7596_v13  ;;  %v7640_v11 = vld [vmem:[#allocation7 + $0x840] sm:$0xff] }
 0x45c   : > { %7012 = vmatprep.mubr.bf16.mxu0 %v26211_v60  ;;  %7075 = vmatprep.mubr.bf16.mxu1 %v26211_v60  ;;  %v7644_v13 = vld [vmem:[#allocation7 + $0x860] sm:$0xff] }
 0x45d   : > { %8721 = vmatpush1.bf16.msra.mxu0 %v20051_v51  ;;  %8827 = vmatpush1.bf16.msra.mxu1 %v20053_v8  ;;  %v20101_v51 = vcombine.low %v7617_v57, %v7621_v37  ;;  %v20102_v8 = vcombine.high %v7617_v57, %v7621_v37  ;;  %v7665_v57 = vld [vmem:[#allocation7 + $0x908] sm:$0xff] }
 0x45e   : > { %8722 = vmatprep.subr.bf16.mxu0 %v20060_v27  ;;  %8828 = vmatprep.subr.bf16.mxu1 %v20062_v20  ;;  %v20108_v27 = vcombine.high %v7624_v15, %v7628_v26  ;;  %v20110_v20 = vcombine.high %v7625_v56, %v7629_v2  ;;  %v7669_v37 = vld [vmem:[#allocation7 + $0x928] sm:$0xff] }
 0x461   : > { %8723 = vmatpush1.bf16.msra.mxu0 %v20059_v1  ;;  %8829 = vmatpush1.bf16.msra.mxu1 %v20061_v31  ;;  %v20107_v1 = vcombine.low %v7624_v15, %v7628_v26  ;;  %v20109_v31 = vcombine.low %v7625_v56, %v7629_v2  ;;  %v7672_v15 = vld [vmem:[#allocation7 + $0x940] sm:$0xff]  ;;  %v7673_v56 = vld [vmem:[#allocation7 + $0x948] sm:$0xff] }
 0x462   : > { %8724 = vmatprep.subr.bf16.mxu0 %v20068_v22  ;;  %8830 = vmatprep.subr.bf16.mxu1 %v20070_v17  ;;  %v20116_v22 = vcombine.high %v7632_v61, %v7636_v29  ;;  %v20118_v17 = vcombine.high %v7633_v59, %v7637_v49  ;;  %v7676_v26 = vld [vmem:[#allocation7 + $0x960] sm:$0xff]  ;;  %v7677_v2 = vld [vmem:[#allocation7 + $0x968] sm:$0xff] }
 0x463   : > { %20045 = vmatmul.mubr.msk.bf16.gmra.mrb[64].mxu0 %vm790_vm1, %v20025_v63  ;;  %20049 = vmatmul.mubr.msk.bf16.gmra.mrb[64].mxu1 %vm790_vm1, %v20025_v63  ;;  %v7604_v63 = vld [vmem:[#allocation7 + $0x720] sm:$0xff] }
 0x464   : > { %7022 = vmatprep.mubr.bf16.mxu0 %v26211_v60  ;;  %7085 = vmatprep.mubr.bf16.mxu1 %v26211_v60  ;;  %v20084_v16 = vcombine.high %v7600_v18, %v7604_v63  ;;  %v20083_v47 = vcombine.low %v7600_v18, %v7604_v63  ;;  %v7648_v18 = vld [vmem:[#allocation7 + $0x880] sm:$0xff] }
 0x465   : > { %8725 = vmatpush1.bf16.msra.mxu0 %v20067_v41  ;;  %8831 = vmatpush1.bf16.msra.mxu1 %v20069_v4  ;;  %v20115_v41 = vcombine.low %v7632_v61, %v7636_v29  ;;  %v20117_v4 = vcombine.low %v7633_v59, %v7637_v49  ;;  %v7652_v63 = vld [vmem:[#allocation7 + $0x8a0] sm:$0xff]  ;;  %v7681_v59 = vld [vmem:[#allocation7 + $0x988] sm:$0xff] }
 0x466   : > { %8726 = vmatprep.subr.bf16.mxu0 %v20076_v62  ;;  %8832 = vmatprep.subr.bf16.mxu1 %v20078_v24  ;;  %v20124_v62 = vcombine.high %v7640_v11, %v7644_v13  ;;  %v20126_v24 = vcombine.high %v7641_v6, %v7645_v19  ;;  %v7680_v61 = vld [vmem:[#allocation7 + $0x980] sm:$0xff]  ;;  %v7685_v49 = vld [vmem:[#allocation7 + $0x9a8] sm:$0xff] }
 0x467   : > { %v7684_v29 = vld [vmem:[#allocation7 + $0x9a0] sm:$0xff] }
 0x469   : > { %8727 = vmatpush1.bf16.msra.mxu0 %v20075_v53  ;;  %8833 = vmatpush1.bf16.msra.mxu1 %v20077_v3  ;;  %v20123_v53 = vcombine.low %v7640_v11, %v7644_v13  ;;  %v20125_v3 = vcombine.low %v7641_v6, %v7645_v19  ;;  %v7688_v11 = vld [vmem:[#allocation7 + $0x9c0] sm:$0xff]  ;;  %v7689_v6 = vld [vmem:[#allocation7 + $0x9c8] sm:$0xff] }
 0x46a   : > { %8728 = vmatprep.subr.bf16.mxu0 %v20084_v16  ;;  %8834 = vmatprep.subr.bf16.mxu1 %v20086_v33  ;;  %v20132_v16 = vcombine.high %v7648_v18, %v7652_v63  ;;  %v20134_v33 = vcombine.high %v7649_v55, %v7653_v45  ;;  %v7692_v13 = vld [vmem:[#allocation7 + $0x9e0] sm:$0xff]  ;;  %v7693_v19 = vld [vmem:[#allocation7 + $0x9e8] sm:$0xff] }
 0x46b   : > { %20046 = vmatmul.mubr.msk.bf16.gmra.mrb[68].mxu0 %vm790_vm1, %v20026_v38  ;;  %20050 = vmatmul.mubr.msk.bf16.gmra.mrb[68].mxu1 %vm790_vm1, %v20026_v38  ;;  %v7612_v38 = vld [vmem:[#allocation7 + $0x760] sm:$0xff] }
 0x46c   : > { %v20092_v39 = vcombine.high %v7608_v46, %v7612_v38  ;;  %v20091_v0 = vcombine.low %v7608_v46, %v7612_v38  ;;  %v7656_v46 = vld [vmem:[#allocation7 + $0x8c0] sm:$0xff] }
 0x46d   : > { %8729 = vmatpush1.bf16.msra.mxu0 %v20083_v47  ;;  %8835 = vmatpush1.bf16.msra.mxu1 %v20085_v48  ;;  %v20131_v47 = vcombine.low %v7648_v18, %v7652_v63  ;;  %v20133_v48 = vcombine.low %v7649_v55, %v7653_v45  ;;  %v7660_v38 = vld [vmem:[#allocation7 + $0x8e0] sm:$0xff]  ;;  %v25434_v55 = vld [vmem:[#allocation7 + $0xa08] sm:$0xff] }
 0x46e   : > { %8730 = vmatprep.subr.bf16.mxu0 %v20092_v39  ;;  %8836 = vmatprep.subr.bf16.mxu1 %v20094_v34  ;;  %v20140_v39 = vcombine.high %v7656_v46, %v7660_v38  ;;  %v20142_v34 = vcombine.high %v7657_v30, %v7661_v52  ;;  %v25430_v18 = vld [vmem:[#allocation7 + $0xa00] sm:$0xff]  ;;  %v25438_v45 = vld [vmem:[#allocation7 + $0xa28] sm:$0xff] }
 0x46f   : > { %v25432_v63 = vld [vmem:[#allocation7 + $0xa20] sm:$0xff] }
 0x471   : > { %8731 = vmatpush1.bf16.msra.mxu0 %v20091_v0  ;;  %8837 = vmatpush1.bf16.msra.mxu1 %v20093_v50  ;;  %v20139_v0 = vcombine.low %v7656_v46, %v7660_v38  ;;  %v20141_v50 = vcombine.low %v7657_v30, %v7661_v52  ;;  %v26241_v38 = vld [vmem:[#allocation41_spill] sm:$0xff] }
 0x472   : > { %8732 = vmatprep.subr.bf16.mxu0 %v20100_v32  ;;  %8838 = vmatprep.subr.bf16.mxu1 %v20102_v8  ;;  %v20148_v32 = vcombine.high %v7664_v9, %v7668_v23  ;;  %v20150_v8 = vcombine.high %v7665_v57, %v7669_v37 }
 0x475   : > { %8733 = vmatpush1.bf16.msra.mxu0 %v20099_v43  ;;  %8839 = vmatpush1.bf16.msra.mxu1 %v20101_v51  ;;  %v20147_v43 = vcombine.low %v7664_v9, %v7668_v23  ;;  %v20149_v51 = vcombine.low %v7665_v57, %v7669_v37  ;;  %v26242_v9 = vld [vmem:[#allocation42_spill] sm:$0xff] }
 0x476   : > { %8734 = vmatprep.subr.bf16.mxu0 %v20108_v27  ;;  %8840 = vmatprep.subr.bf16.mxu1 %v20110_v20  ;;  %v20156_v27 = vcombine.high %v7672_v15, %v7676_v26  ;;  %v20158_v20 = vcombine.high %v7673_v56, %v7677_v2 }
 0x479   : > { %8735 = vmatpush1.bf16.msra.mxu0 %v20107_v1  ;;  %8841 = vmatpush1.bf16.msra.mxu1 %v20109_v31  ;;  %v20155_v1 = vcombine.low %v7672_v15, %v7676_v26  ;;  %v20157_v31 = vcombine.low %v7673_v56, %v7677_v2 }
 0x47a   : > { %8736 = vmatprep.subr.bf16.mxu0 %v20116_v22  ;;  %8842 = vmatprep.subr.bf16.mxu1 %v20118_v17  ;;  %v20164_v22 = vcombine.high %v7680_v61, %v7684_v29  ;;  %v20166_v17 = vcombine.high %v7681_v59, %v7685_v49 }
 0x47d   : > { %8737 = vmatpush1.bf16.msra.mxu0 %v20115_v41  ;;  %8843 = vmatpush1.bf16.msra.mxu1 %v20117_v4  ;;  %v20163_v41 = vcombine.low %v7680_v61, %v7684_v29  ;;  %v20165_v4 = vcombine.low %v7681_v59, %v7685_v49 }
 0x47e   : > { %8738 = vmatprep.subr.bf16.mxu0 %v20124_v62  ;;  %8844 = vmatprep.subr.bf16.mxu1 %v20126_v24  ;;  %v20172_v62 = vcombine.high %v7688_v11, %v7692_v13  ;;  %v20174_v24 = vcombine.high %v7689_v6, %v7693_v19 }
 0x481   : > { %8739 = vmatpush1.bf16.msra.mxu0 %v20123_v53  ;;  %8845 = vmatpush1.bf16.msra.mxu1 %v20125_v3  ;;  %v20171_v53 = vcombine.low %v7688_v11, %v7692_v13  ;;  %v20173_v3 = vcombine.low %v7689_v6, %v7693_v19 }
 0x482   : > { %8740 = vmatprep.subr.bf16.mxu0 %v20132_v16  ;;  %8846 = vmatprep.subr.bf16.mxu1 %v20134_v33  ;;  %v20180_v16 = vcombine.high %v25430_v18, %v25432_v63  ;;  %v20182_v33 = vcombine.high %v25434_v55, %v25438_v45 }
 0x485   : > { %8741 = vmatpush1.bf16.msra.mxu0 %v20131_v47  ;;  %8847 = vmatpush1.bf16.msra.mxu1 %v20133_v48  ;;  %v25522_v47 = vld [vmem:[#allocation7 + $0xa48] sm:$0xff] }
 0x486   : > { %8742 = vmatprep.subr.bf16.mxu0 %v20140_v39  ;;  %8848 = vmatprep.subr.bf16.mxu1 %v20142_v34 }
 0x489   : > { %8743 = vmatpush1.bf16.msra.mxu0 %v20139_v0  ;;  %8849 = vmatpush1.bf16.msra.mxu1 %v20141_v50 }
 0x48a   : > { %8744 = vmatprep.subr.bf16.mxu0 %v20148_v32  ;;  %8850 = vmatprep.subr.bf16.mxu1 %v20150_v8 }
 0x48d   : > { %8745 = vmatpush1.bf16.msra.mxu0 %v20147_v43  ;;  %8851 = vmatpush1.bf16.msra.mxu1 %v20149_v51 }
 0x48e   : > { %8746 = vmatprep.subr.bf16.mxu0 %v20156_v27  ;;  %8852 = vmatprep.subr.bf16.mxu1 %v20158_v20 }
 0x491   : > { %8747 = vmatpush1.bf16.msra.mxu0 %v20155_v1  ;;  %8853 = vmatpush1.bf16.msra.mxu1 %v20157_v31 }
 0x492   : > { %8748 = vmatprep.subr.bf16.mxu0 %v20164_v22  ;;  %8854 = vmatprep.subr.bf16.mxu1 %v20166_v17 }
 0x495   : > { %8749 = vmatpush1.bf16.msra.mxu0 %v20163_v41  ;;  %8855 = vmatpush1.bf16.msra.mxu1 %v20165_v4 }
 0x496   : > { %8750 = vmatprep.subr.bf16.mxu0 %v20172_v62  ;;  %8856 = vmatprep.subr.bf16.mxu1 %v20174_v24 }
 0x499   : > { %8751 = vmatpush1.bf16.msra.mxu0 %v20171_v53  ;;  %8857 = vmatpush1.bf16.msra.mxu1 %v20173_v3 }
 0x49a   : > { %8773 = vmatprep.subr.bf16.mxu0 %v20180_v16  ;;  %8879 = vmatprep.subr.bf16.mxu1 %v20182_v33 }
 0x4fe   : > { %v6752_v46 = vpop.f32.mrb[36].mxu0  ;;  %v6815_v39 = vpop.f32.mrb[36].mxu1 }
 0x4ff   : > { %v7168_v30 = vadd.f32 %v6752_v46, %v26241_v38  ;;  %v6754_v52 = vpop.f32.mrb[37].mxu0  ;;  %v6817_v0 = vpop.f32.mrb[37].mxu1 }
 0x500   : > { %v6756_v50 = vpop.f32.mrb[38].mxu0  ;;  %v7171_v23 = vadd.f32 %v6817_v0, %v26242_v9  ;;  %v6819_v32 = vpop.f32.mrb[38].mxu1 }
 0x501   : > { %v7240_v34 = vmax.f32 %v7168_v30, 0.0  ;;  %v7180_v57 = vadd.f32 %v6756_v50, %v26241_v38  ;;  %v6758_v37 = vpop.f32.mrb[39].mxu0  ;;  %v6821_v43 = vpop.f32.mrb[39].mxu1 }
 0x502   : > { %v7243_v51 = vmax.f32 %v7171_v23, 0.0  ;;  %v7183_v15 = vadd.f32 %v6821_v43, %v26242_v9 }
 0x503   : > { %v7252_v8 = vmax.f32 %v7180_v57, 0.0 }
 0x504   : > { %v25450_v26 = vmax.f32 %v7240_v34, %v7243_v51  ;;  %v7255_v56 = vmax.f32 %v7183_v15, 0.0 }
 0x506   : > { %v6762_v27 = vpop.f32.mrb[40].mxu0  ;;  %v25452_v2 = vmax.f32 %v7252_v8, %v7255_v56  ;;  %v6825_v31 = vpop.f32.mrb[40].mxu1  ;;  %v26243_v56 = vld [vmem:[#allocation45_spill] sm:$0xff] }
 0x507   : > { %v7192_v1 = vadd.f32 %v6762_v27, %v26241_v38  ;;  %v6764_v20 = vpop.f32.mrb[41].mxu0  ;;  %v6827_v61 = vpop.f32.mrb[41].mxu1  ;;  %v7169_v27 = vadd.f32 %v6754_v52, %v26243_v56 }
 0x508   : > { %v6766_v29 = vpop.f32.mrb[42].mxu0  ;;  %v7195_v22 = vadd.f32 %v6827_v61, %v26242_v9  ;;  %v6829_v41 = vpop.f32.mrb[42].mxu1 }
 0x509   : > { %v7264_v59 = vmax.f32 %v7192_v1, 0.0  ;;  %v7204_v49 = vadd.f32 %v6766_v29, %v26241_v38  ;;  %v6768_v4 = vpop.f32.mrb[43].mxu0  ;;  %v6831_v17 = vpop.f32.mrb[43].mxu1  ;;  %v26245_v29 = vld [vmem:[#allocation46_spill] sm:$0xff] }
 0x50a   : > { %v7267_v11 = vmax.f32 %v7195_v22, 0.0  ;;  %v7207_v6 = vadd.f32 %v6831_v17, %v26242_v9  ;;  %v26247_v17 = vld [vmem:[#allocation47_spill] sm:$0xff] }
 0x50b   : > { %v7276_v13 = vmax.f32 %v7204_v49, 0.0  ;;  %v7181_v49 = vadd.f32 %v6758_v37, %v26243_v56 }
 0x50c   : > { %v25458_v62 = vmax.f32 %v7264_v59, %v7267_v11  ;;  %v7279_v19 = vmax.f32 %v7207_v6, 0.0  ;;  %v7170_v59 = vadd.f32 %v6815_v39, %v26245_v29 }
 0x50e   : > { %v6772_v53 = vpop.f32.mrb[44].mxu0  ;;  %v25460_v3 = vmax.f32 %v7276_v13, %v7279_v19  ;;  %v25463_v16 = vpop.f32.mrb[44].mxu1  ;;  %v7182_v19 = vadd.f32 %v6819_v32, %v26245_v29 }
 0x50f   : > { %v7216_v24 = vadd.f32 %v6772_v53, %v26241_v38  ;;  %v25465_v33 = vpop.f32.mrb[45].mxu0  ;;  %v6837_v46 = vpop.f32.mrb[45].mxu1 }
 0x510   : > { %v6776_v30 = vpop.f32.mrb[46].mxu0  ;;  %v7219_v50 = vadd.f32 %v6837_v46, %v26242_v9  ;;  %v25469_v23 = vpop.f32.mrb[46].mxu1  ;;  %v7241_v46 = vmax.f32 %v7169_v27, 0.0 }
 0x511   : > { %v7288_v0 = vmax.f32 %v7216_v24, 0.0  ;;  %v7228_v34 = vadd.f32 %v6776_v30, %v26241_v38  ;;  %v25471_v57 = vpop.f32.mrb[47].mxu0  ;;  %v6841_v43 = vpop.f32.mrb[47].mxu1 }
 0x512   : > { %v7291_v51 = vmax.f32 %v7219_v50, 0.0  ;;  %v7231_v15 = vadd.f32 %v6841_v43, %v26242_v9  ;;  %v26248_v9 = vld [vmem:[#allocation48_spill] sm:$0xff]  ;;  %v7242_v50 = vmax.f32 %v7170_v59, 0.0  ;;  %v7206_v59 = vadd.f32 %v6829_v41, %v26245_v29 }
 0x513   : > { %v7300_v8 = vmax.f32 %v7228_v34, 0.0 }
 0x514   : > { %v25475_v1 = vmax.f32 %v7288_v0, %v7291_v51  ;;  %v7303_v61 = vmax.f32 %v7231_v15, 0.0 }
 0x516   : > { %26244 = vst [vmem:[#allocation22_spill] sm:$0xff] %v25475_v1  ;;  %v6878_v22 = vpop.f32.mrb[48].mxu0  ;;  %v25479_v38 = vmax.f32 %v7300_v8, %v7303_v61  ;;  %v25482_v13 = vpop.f32.mrb[48].mxu1  ;;  %v7253_v8 = vmax.f32 %v7181_v49, 0.0  ;;  %v7254_v61 = vmax.f32 %v7182_v19, 0.0  ;;  %v7205_v49 = vadd.f32 %v6768_v4, %v26243_v56 }
 0x517   : > { %v7172_v11 = vadd.f32 %v6878_v22, %v26247_v17  ;;  %v6880_v6 = vpop.f32.mrb[49].mxu0  ;;  %v25486_v52 = vpop.f32.mrb[49].mxu1  ;;  %v7174_v14 = vadd.f32 %v25482_v13, %v25054_v25  ;;  %v25584_v13 = vld [vmem:[#allocation7 + $0xae0] sm:$0xff] }
 0x518   : > { %26246 = vst [vmem:[#allocation35_spill] sm:$0xff] %v25479_v38  ;;  %v7173_v53 = vadd.f32 %v6880_v6, %v26248_v9  ;;  %v6882_v24 = vpop.f32.mrb[50].mxu0  ;;  %v25489_v0 = vpop.f32.mrb[50].mxu1  ;;  %26250 = vst [vmem:[#allocation24_spill] sm:$0xff] %v25584_v13 }
 0x519   : > { %v7244_v30 = vmax.f32 %v7172_v11, 0.0  ;;  %v7184_v39 = vadd.f32 %v6882_v24, %v26247_v17  ;;  %v6884_v37 = vpop.f32.mrb[51].mxu0  ;;  %v25492_v51 = vpop.f32.mrb[51].mxu1  ;;  %v7193_v11 = vadd.f32 %v6764_v20, %v26243_v56  ;;  %v7194_v24 = vadd.f32 %v6825_v31, %v26245_v29 }
 0x51a   : > { %v7245_v34 = vmax.f32 %v7173_v53, 0.0  ;;  %v7185_v43 = vadd.f32 %v6884_v37, %v26248_v9 }
 0x51b   : > { %v25494_v32 = vmax.f32 %v7241_v46, %v7244_v30  ;;  %v7256_v15 = vmax.f32 %v7184_v39, 0.0  ;;  %v7266_v4 = vmax.f32 %v7194_v24, 0.0  ;;  %v25530_v24 = vld [vmem:[#allocation7 + $0xa80] sm:$0xff] }
 0x51c   : > { %v25496_v22 = vmax.f32 %v7242_v50, %v7245_v34  ;;  %v7257_v27 = vmax.f32 %v7185_v43, 0.0  ;;  %v7265_v34 = vmax.f32 %v7193_v11, 0.0  ;;  %v7277_v11 = vmax.f32 %v7205_v49, 0.0 }
 0x51d   : > { %v25499_v6 = vmax.f32 %v7253_v8, %v7256_v15  ;;  %v25515_v15 = vld [vmem:[#allocation7 + $0xa40] sm:$0xff] }
 0x51e   : > { %v25503_v53 = vmax.f32 %v7254_v61, %v7257_v27  ;;  %v6888_v37 = vpop.f32.mrb[52].mxu0  ;;  %v25507_v30 = vpop.f32.mrb[52].mxu1  ;;  %v7278_v61 = vmax.f32 %v7206_v59, 0.0  ;;  %v25532_v59 = vld [vmem:[#allocation7 + $0xaa0] sm:$0xff] }
 0x51f   : > { %v7196_v46 = vadd.f32 %v6888_v37, %v26247_v17  ;;  %v6890_v19 = vpop.f32.mrb[53].mxu0  ;;  %v25510_v50 = vpop.f32.mrb[53].mxu1 }
 0x520   : > { %v7197_v39 = vadd.f32 %v6890_v19, %v26248_v9  ;;  %v6892_v20 = vpop.f32.mrb[54].mxu0  ;;  %v25513_v41 = vpop.f32.mrb[54].mxu1  ;;  %v25520_v19 = vld [vmem:[#allocation7 + $0xa60] sm:$0xff] }
 0x521   : > { %v7268_v43 = vmax.f32 %v7196_v46, 0.0  ;;  %v7208_v31 = vadd.f32 %v6892_v20, %v26247_v17  ;;  %v6894_v8 = vpop.f32.mrb[55].mxu0  ;;  %v25518_v48 = vpop.f32.mrb[55].mxu1  ;;  %v7218_v46 = vadd.f32 %v25463_v16, %v26245_v29  ;;  %v25542_v16 = vld [vmem:[#allocation7 + $0xaa8] sm:$0xff] }
 0x522   : > { %v7269_v27 = vmax.f32 %v7197_v39, 0.0  ;;  %v7209_v37 = vadd.f32 %v6894_v8, %v26248_v9  ;;  %v7217_v39 = vadd.f32 %v25465_v33, %v26243_v56  ;;  %v7230_v8 = vadd.f32 %v25469_v23, %v26245_v29 }
 0x523   : > { %v25526_v20 = vmax.f32 %v7265_v34, %v7268_v43  ;;  %v7280_v54 = vmax.f32 %v7208_v31, 0.0  ;;  %v7229_v34 = vadd.f32 %v25471_v57, %v26243_v56 }
 0x524   : > { %v25538_v40 = vmax.f32 %v7266_v4, %v7269_v27  ;;  %v7281_v49 = vmax.f32 %v7209_v37, 0.0  ;;  %v7289_v29 = vmax.f32 %v7217_v39, 0.0  ;;  %v7302_v31 = vmax.f32 %v7230_v8, 0.0 }
 0x525   : > { %v25546_v43 = vmax.f32 %v7277_v11, %v7280_v54  ;;  %v25581_v39 = vadd.f32 %v25489_v0, %v25054_v25 }
 0x526   : > { %v25552_v28 = vmax.f32 %v7278_v61, %v7281_v49  ;;  %v6898_v23 = vpop.f32.mrb[56].mxu0  ;;  %v6961_v56 = vpop.f32.mrb[56].mxu1  ;;  %v7290_v49 = vmax.f32 %v7218_v46, 0.0  ;;  %v7175_v46 = vadd.f32 %v25486_v52, %v25059_v21  ;;  %v25594_v52 = vadd.f32 %v25507_v30, %v25054_v25 }
 0x527   : > { %v7220_v54 = vadd.f32 %v6898_v23, %v26247_v17  ;;  %v6900_v27 = vpop.f32.mrb[57].mxu0  ;;  %v25568_v33 = vpop.f32.mrb[57].mxu1  ;;  %v7301_v23 = vmax.f32 %v7229_v34, 0.0 }
 0x528   : > { %v7221_v4 = vadd.f32 %v6900_v27, %v26248_v9  ;;  %v6902_v57 = vpop.f32.mrb[58].mxu0  ;;  %v25573_v44 = vpop.f32.mrb[58].mxu1 }
 0x529   : > { %v7292_v7 = vmax.f32 %v7220_v54, 0.0  ;;  %v7232_v37 = vadd.f32 %v6902_v57, %v26247_v17  ;;  %v6904_v61 = vpop.f32.mrb[59].mxu0  ;;  %v6967_v27 = vpop.f32.mrb[59].mxu1  ;;  %v25586_v54 = vld [vmem:[#allocation7 + $0xac8] sm:$0xff]  ;;  %v7187_v57 = vadd.f32 %v25492_v51, %v25059_v21 }
 0x52a   : > { %v7293_v8 = vmax.f32 %v7221_v4, 0.0  ;;  %v7233_v34 = vadd.f32 %v6904_v61, %v26248_v9  ;;  %26251 = vst [vmem:[#allocation25_spill] sm:$0xff] %v25586_v54  ;;  %v25588_v17 = vld [vmem:[#allocation7 + $0xae8] sm:$0xff]  ;;  %v25600_v9 = vadd.f32 %v25510_v50, %v25059_v21  ;;  %v25604_v4 = vadd.f32 %v25513_v41, %v25054_v25 }
 0x52b   : > { %26252 = vst [vmem:[#allocation26_spill] sm:$0xff] %v25588_v17  ;;  %v25596_v11 = vmax.f32 %v7289_v29, %v7292_v7  ;;  %v7304_v0 = vmax.f32 %v7232_v37, 0.0  ;;  %v7246_v50 = vmax.f32 %v7174_v14, 0.0  ;;  %v7247_v29 = vmax.f32 %v7175_v46, 0.0 }
 0x52c   : > { %v25606_v61 = vmax.f32 %v7290_v49, %v7293_v8  ;;  %v7305_v38 = vmax.f32 %v7233_v34, 0.0  ;;  %v7258_v37 = vmax.f32 %v25581_v39, 0.0  ;;  %v7259_v8 = vmax.f32 %v7187_v57, 0.0 }
 0x52d   : > { %26253 = vst [vmem:[#allocation27_spill] sm:$0xff] %v25596_v11  ;;  %v25608_v60 = vmax.f32 %v7301_v23, %v7304_v0  ;;  %v25622_v34 = vadd.f32 %v25518_v48, %v25059_v21  ;;  %v7271_v30 = vmax.f32 %v25600_v9, 0.0  ;;  %v25630_v57 = vadd.f32 %v6961_v56, %v25054_v25 }
 0x52e   : > { %26254 = vst [vmem:[#allocation28_spill] sm:$0xff] %v25606_v61  ;;  %v25617_v41 = vmax.f32 %v7302_v31, %v7305_v38  ;;  %v7004_v49 = vpop.f32.mrb[60].mxu0  ;;  %v7067_v51 = vpop.f32.mrb[60].mxu1 }
 0x52f   : > { %26255 = vst [vmem:[#allocation29_spill] sm:$0xff] %v25608_v60  ;;  %v7176_v0 = vadd.f32 %v7004_v49, %v25068_v12  ;;  %v7006_v7 = vpop.f32.mrb[61].mxu0  ;;  %v7178_v46 = vadd.f32 %v7067_v51, %v25071_v10  ;;  %v7069_v31 = vpop.f32.mrb[61].mxu1 }
 0x530   : > { %26256 = vst [vmem:[#allocation30_spill] sm:$0xff] %v25617_v41  ;;  %v7177_v38 = vadd.f32 %v7006_v7, %v25077_v35  ;;  %v7008_v39 = vpop.f32.mrb[62].mxu0  ;;  %v7179_v48 = vadd.f32 %v7069_v31, %v25080_v58  ;;  %v7071_v41 = vpop.f32.mrb[62].mxu1 }
 0x531   : > { %v7248_v23 = vmax.f32 %v7176_v0, 0.0  ;;  %v7188_v49 = vadd.f32 %v7008_v39, %v25068_v12  ;;  %v7010_v60 = vpop.f32.mrb[63].mxu0  ;;  %v7250_v13 = vmax.f32 %v7178_v46, 0.0  ;;  %v7190_v14 = vadd.f32 %v7071_v41, %v25071_v10  ;;  %v7073_v42 = vpop.f32.mrb[63].mxu1 }
 0x532   : > { %v7249_v9 = vmax.f32 %v7177_v38, 0.0  ;;  %v7189_v51 = vadd.f32 %v7010_v60, %v25077_v35  ;;  %v7251_v61 = vmax.f32 %v7179_v48, 0.0  ;;  %v7191_v56 = vadd.f32 %v7073_v42, %v25080_v58 }
 0x533   : > { %v7260_v54 = vmax.f32 %v7188_v49, 0.0  ;;  %v7331_v0 = vmax.f32 %v7247_v29, %v7250_v13  ;;  %v7262_v31 = vmax.f32 %v7190_v14, 0.0  ;;  %v7294_v39 = vmax.f32 %v25630_v57, 0.0 }
 0x534   : > { %v7330_v17 = vmax.f32 %v7246_v50, %v7249_v9  ;;  %v7261_v1 = vmax.f32 %v7189_v51, 0.0  ;;  %v25641_v46 = vadd.f32 %v25568_v33, %v25059_v21  ;;  %v7332_v41 = vmax.f32 %v7248_v23, %v7251_v61 }
 0x535   : > { %v7263_v38 = vmax.f32 %v7191_v56, 0.0  ;;  %v7349_v60 = vmax.f32 %v25494_v32, %v7331_v0  ;;  %v7334_v48 = vmax.f32 %v7259_v8, %v7262_v31  ;;  %v25646_v42 = vadd.f32 %v6967_v27, %v25059_v21 }
 0x536   : > { %v7348_v7 = vmax.f32 %v25450_v26, %v7330_v17  ;;  %v7333_v49 = vmax.f32 %v7258_v37, %v7261_v1  ;;  %v7014_v11 = vpop.f32.mrb[64].mxu0  ;;  %v7350_v13 = vmax.f32 %v25496_v22, %v7332_v41  ;;  %v7077_v14 = vpop.f32.mrb[64].mxu1 }
 0x537   : > { %v7335_v50 = vmax.f32 %v7260_v54, %v7263_v38  ;;  %v7200_v29 = vadd.f32 %v7014_v11, %v25068_v12  ;;  %v7016_v33 = vpop.f32.mrb[65].mxu0  ;;  %v7352_v61 = vmax.f32 %v25499_v6, %v7334_v48  ;;  %v7202_v32 = vadd.f32 %v7077_v14, %v25071_v10  ;;  %v7079_v1 = vpop.f32.mrb[65].mxu1 }
 0x538   : > { %v7351_v23 = vmax.f32 %v25452_v2, %v7333_v49  ;;  %v7201_v26 = vadd.f32 %v7016_v33, %v25077_v35  ;;  %v7018_v17 = vpop.f32.mrb[66].mxu0  ;;  %v7203_v22 = vadd.f32 %v7079_v1, %v25080_v58  ;;  %v7081_v11 = vpop.f32.mrb[66].mxu1  ;;  %v26257_v38 = vmax.f32 %v25594_v52, 0.0 }
 0x539   : > { %v7353_v21 = vmax.f32 %v25503_v53, %v7335_v50  ;;  %v7272_v27 = vmax.f32 %v7200_v29, 0.0  ;;  %v7212_v54 = vadd.f32 %v7018_v17, %v25068_v12  ;;  %v7020_v37 = vpop.f32.mrb[67].mxu0  ;;  %v25657_v8 = vpack.c.bf16 %v7352_v61, %v7349_v60  ;;  %v7083_v51 = vpop.f32.mrb[67].mxu1 }
 0x53a   : > { %v25659_v6 = vpack.c.bf16 %v7351_v23, %v7348_v7  ;;  %v7274_v2 = vmax.f32 %v7202_v32, 0.0  ;;  %v7273_v9 = vmax.f32 %v7201_v26, 0.0  ;;  %v7275_v0 = vmax.f32 %v7203_v22, 0.0 }
 0x53b   : > { %v25661_v56 = vpack.c.bf16 %v7353_v21, %v7350_v13  ;;  %v7284_v31 = vmax.f32 %v7212_v54, 0.0  ;;  %v7214_v53 = vadd.f32 %v7081_v11, %v25071_v10  ;;  %v7213_v49 = vadd.f32 %v7020_v37, %v25077_v35  ;;  %8752 = vmatprep.mubr.bf16.mxu0 %v25657_v8  ;;  %8858 = vmatprep.mubr.bf16.mxu1 %v25657_v8 }
 0x53c   : > { %v7337_v41 = vmax.f32 %v7271_v30, %v7274_v2  ;;  %v7336_v48 = vmax.f32 %v26257_v38, %v7273_v9  ;;  %v7215_v60 = vadd.f32 %v7083_v51, %v25080_v58  ;;  %v7295_v7 = vmax.f32 %v25641_v46, 0.0  ;;  %8753 = vmatmul.mubr.bf16.vlgmr.msra.gmra.mrb[72].mxu0 %v25659_v6  ;;  %8859 = vmatmul.mubr.bf16.vlgmr.msra.gmra.mrb[72].mxu1 %v25659_v6 }
 0x53d   : > { %v25672_v13 = vadd.f32 %v25573_v44, %v25054_v25  ;;  %v7338_v50 = vmax.f32 %v7272_v27, %v7275_v0  ;;  %v7286_v29 = vmax.f32 %v7214_v53, 0.0  ;;  %v7285_v14 = vmax.f32 %v7213_v49, 0.0 }
 0x53e   : > { %v7355_v52 = vmax.f32 %v25526_v20, %v7337_v41  ;;  %v7354_v30 = vmax.f32 %v25458_v62, %v7336_v48  ;;  %v7287_v33 = vmax.f32 %v7215_v60, 0.0  ;;  %v26258_v61 = vcombine.low %v25430_v18, %v25432_v63  ;;  %v7024_v25 = vpop.f32.mrb[68].mxu0  ;;  %v7087_v26 = vpop.f32.mrb[68].mxu1 }
 0x53f   : > { %v7307_v44 = vmax.f32 %v25646_v42, 0.0  ;;  %v7356_v46 = vmax.f32 %v25538_v40, %v7338_v50  ;;  %v26259_v23 = vmax.f32 %v25622_v34, 0.0  ;;  %v26260_v20 = vcombine.low %v25434_v55, %v25438_v45  ;;  %v7026_v1 = vpop.f32.mrb[69].mxu0  ;;  %v7089_v21 = vpop.f32.mrb[69].mxu1 }
 0x540   : > { %8774 = vmatpush1.bf16.msra.mxu0 %v26258_v61  ;;  %v7224_v62 = vadd.f32 %v7024_v25, %v25068_v12  ;;  %v26261_v18 = vcombine.high %v25515_v15, %v25520_v19  ;;  %v26262_v63 = vmax.f32 %v25604_v4, 0.0  ;;  %v7341_v17 = vmax.f32 %v7284_v31, %v7287_v33  ;;  %v7028_v45 = vpop.f32.mrb[70].mxu0  ;;  %v7091_v4 = vpop.f32.mrb[70].mxu1  ;;  %v26269_v33 = vld [vmem:[#allocation22_spill] sm:$0xff]  ;;  %v26271_v25 = vld [vmem:[#allocation25_spill] sm:$0xff] }
 0x541   : > { %v7340_v32 = vmax.f32 %v26259_v23, %v7286_v29  ;;  %8880 = vmatpush1.bf16.msra.mxu1 %v26260_v20  ;;  %v7226_v40 = vadd.f32 %v7087_v26, %v25071_v10  ;;  %v7225_v34 = vadd.f32 %v7026_v1, %v25077_v35  ;;  %v26263_v55 = vcombine.high %v25522_v47, %v25528_v5  ;;  %v7030_v37 = vpop.f32.mrb[71].mxu0  ;;  %v7093_v53 = vpop.f32.mrb[71].mxu1  ;;  %v26275_v1 = vld [vmem:[#allocation23_spill] sm:$0xff] }
 0x542   : > { %8775 = vmatprep.subr.bf16.mxu0 %v26261_v18  ;;  %v7339_v42 = vmax.f32 %v26262_v63, %v7285_v14  ;;  %v7296_v22 = vmax.f32 %v7224_v62, 0.0  ;;  %v7227_v54 = vadd.f32 %v7089_v21, %v25080_v58  ;;  %v7236_v11 = vadd.f32 %v7028_v45, %v25068_v12  ;;  %v26276_v18 = vld [vmem:[#allocation24_spill] sm:$0xff]  ;;  %v7737_v45 = vld [vmem:[#allocation7 + $0xb48] sm:$0xff] }
 0x543   : > { %8881 = vmatprep.subr.bf16.mxu1 %v26263_v55  ;;  %v7358_v27 = vmax.f32 %v25546_v43, %v7340_v32  ;;  %v7359_v9 = vmax.f32 %v25552_v28, %v7341_v17  ;;  %v7298_v51 = vmax.f32 %v7226_v40, 0.0  ;;  %v7297_v0 = vmax.f32 %v7225_v34, 0.0  ;;  %v7736_v40 = vld [vmem:[#allocation7 + $0xb40] sm:$0xff] }
 0x544   : > { %v7357_v2 = vmax.f32 %v25460_v3, %v7339_v42  ;;  %v26264_v31 = vcombine.low %v25515_v15, %v25520_v19  ;;  %v7299_v43 = vmax.f32 %v7227_v54, 0.0  ;;  %v7308_v38 = vmax.f32 %v7236_v11, 0.0  ;;  %v26279_v34 = vld [vmem:[#allocation29_spill] sm:$0xff]  ;;  %v26281_v11 = vld [vmem:[#allocation35_spill] sm:$0xff] }
 0x545   : > { %v25708_v41 = vpack.c.bf16 %v7358_v27, %v7355_v52  ;;  %v7238_v48 = vadd.f32 %v7091_v4, %v25071_v10  ;;  %v26265_v12 = vcombine.low %v25522_v47, %v25528_v5  ;;  %v26266_v28 = vcombine.high %v25530_v24, %v25532_v59  ;;  %v7728_v10 = vld [vmem:[#allocation7 + $0xb00] sm:$0xff]  ;;  %v7741_v27 = vld [vmem:[#allocation7 + $0xb68] sm:$0xff] }
 0x546   : > { %8776 = vmatpush1.bf16.msra.mxu0 %v26264_v31  ;;  %v25717_v3 = vpack.c.bf16 %v7357_v2, %v7354_v30  ;;  %v25719_v49 = vpack.c.bf16 %v7359_v9, %v7356_v46  ;;  %v7343_v15 = vmax.f32 %v7295_v7, %v7298_v51  ;;  %v7342_v19 = vmax.f32 %v7294_v39, %v7297_v0  ;;  %v7732_v52 = vld [vmem:[#allocation7 + $0xb20] sm:$0xff]  ;;  %v7729_v7 = vld [vmem:[#allocation7 + $0xb08] sm:$0xff]  ;;  %v26268_v39 = vld [vmem:[#allocation27_spill] sm:$0xff] }
 0x547   : > { %8882 = vmatpush1.bf16.msra.mxu1 %v26265_v12  ;;  %8777 = vmatprep.subr.bf16.mxu0 %v26266_v28  ;;  %v26267_v60 = vcombine.high %v25540_v36, %v25542_v16  ;;  %v7344_v50 = vmax.f32 %v7296_v22, %v7299_v43  ;;  %v7310_v5 = vmax.f32 %v7238_v48, 0.0  ;;  %v7237_v47 = vadd.f32 %v7030_v37, %v25077_v35  ;;  %v7733_v30 = vld [vmem:[#allocation7 + $0xb28] sm:$0xff]  ;;  %v26272_v46 = vld [vmem:[#allocation28_spill] sm:$0xff] }
 0x548   : > { %v7239_v29 = vadd.f32 %v7093_v53, %v25080_v58  ;;  %8762 = vmatprep.mubr.bf16.mxu0 %v25708_v41  ;;  %8868 = vmatprep.mubr.bf16.mxu1 %v25708_v41  ;;  %v7306_v57 = vmax.f32 %v25672_v13, 0.0  ;;  %v7361_v14 = vmax.f32 %v26268_v39, %v7343_v15  ;;  %v7360_v61 = vmax.f32 %v26269_v33, %v7342_v19  ;;  %v26270_v35 = vld [vmem:[#allocation26_spill] sm:$0xff]  ;;  %v7744_v31 = vld [vmem:[#allocation7 + $0xb80] sm:$0xff]  ;;  %v7575_v33 = vld [vmem:[#allocation7 + $0x638] sm:$0xff] }
 0x549   : > { %8883 = vmatprep.subr.bf16.mxu1 %v26267_v60  ;;  %8763 = vmatmul.mubr.bf16.gmra.mrb[76].mxu0 %v25717_v3  ;;  %v20205_v58 = vcombine.low %v26271_v25, %v26270_v35  ;;  %v7362_v23 = vmax.f32 %v26272_v46, %v7344_v50  ;;  %v7346_v32 = vmax.f32 %v7307_v44, %v7310_v5  ;;  %v7309_v20 = vmax.f32 %v7237_v47, 0.0  ;;  %v26282_v37 = vld [vmem:[#allocation30_spill] sm:$0xff]  ;;  %v7756_v50 = vld [vmem:[#allocation7 + $0xbe0] sm:$0xff] }
 0x54a   : > { %8869 = vmatmul.mubr.bf16.gmra.mrb[76].mxu1 %v25717_v3  ;;  %v7311_v62 = vmax.f32 %v7239_v29, 0.0  ;;  %v26273_v26 = vcombine.low %v25530_v24, %v25532_v59  ;;  %v26274_v13 = vcombine.low %v25540_v36, %v25542_v16  ;;  %v26277_v63 = vcombine.high %v26275_v1, %v26276_v18  ;;  %v7740_v59 = vld [vmem:[#allocation7 + $0xb60] sm:$0xff]  ;;  %v7745_v48 = vld [vmem:[#allocation7 + $0xb88] sm:$0xff]  ;;  %v7574_v39 = vld [vmem:[#allocation7 + $0x630] sm:$0xff] }
 0x54b   : > { %v26278_v42 = vcombine.high %v26271_v25, %v26270_v35  ;;  %v20212_v17 = vcombine.high %v7728_v10, %v7732_v52  ;;  %v20214_v44 = vcombine.high %v7729_v7, %v7733_v30  ;;  %v7364_v21 = vmax.f32 %v26279_v34, %v7346_v32  ;;  %v7749_v12 = vld [vmem:[#allocation7 + $0xba8] sm:$0xff]  ;;  %v7578_v46 = vld [vmem:[#allocation7 + $0x650] sm:$0xff]  ;;  %v7579_v32 = vld [vmem:[#allocation7 + $0x658] sm:$0xff] }
 0x54c   : > { %8778 = vmatpush1.bf16.msra.mxu0 %v26273_v26  ;;  %8884 = vmatpush1.bf16.msra.mxu1 %v26274_v13  ;;  %v7345_v55 = vmax.f32 %v7306_v57, %v7309_v20  ;;  %v7347_v24 = vmax.f32 %v7308_v38, %v7311_v62  ;;  %v26280_v36 = vmov 0   ;;  %v20211_v16 = vcombine.low %v7728_v10, %v7732_v52  ;;  %v7748_v38 = vld [vmem:[#allocation7 + $0xba0] sm:$0xff]  ;;  %v7753_v5 = vld [vmem:[#allocation7 + $0xbc8] sm:$0xff]  ;;  %v7570_v57 = vld [vmem:[#allocation7 + $0x610] sm:$0xff] }
 0x54d   : > { %8779 = vmatprep.subr.bf16.mxu0 %v26277_v63  ;;  %8885 = vmatprep.subr.bf16.mxu1 %v26278_v42  ;;  %v20213_v22 = vcombine.low %v7729_v7, %v7733_v30  ;;  %v25753_v54 = vpack.c.bf16 %v7364_v21, %v7361_v14  ;;  %v26283_v9 = vcombine.low %v26275_v1, %v26276_v18  ;;  %v7752_v10 = vld [vmem:[#allocation7 + $0xbc0] sm:$0xff]  ;;  %v7757_v47 = vld [vmem:[#allocation7 + $0xbe8] sm:$0xff]  ;;  %v7571_v14 = vld [vmem:[#allocation7 + $0x618] sm:$0xff] }
 0x54e   : > { %8805 = vmatprep.mubr.bf16.mxu0 %v26280_v36  ;;  %8911 = vmatprep.mubr.bf16.mxu1 %v26280_v36  ;;  %v7363_v4 = vmax.f32 %v26281_v11, %v7345_v55  ;;  %v7365_v2 = vmax.f32 %v26282_v37, %v7347_v24  ;;  %v20220_v51 = vcombine.high %v7736_v40, %v7740_v59  ;;  %v7583_v20 = vld [vmem:[#allocation7 + $0x678] sm:$0xff]  ;;  %v7586_v18 = vld [vmem:[#allocation7 + $0x690] sm:$0xff] }
 0x54f   : > { %v20222_v0 = vcombine.high %v7737_v45, %v7741_v27  ;;  %v20219_v28 = vcombine.low %v7736_v40, %v7740_v59  ;;  %v20221_v15 = vcombine.low %v7737_v45, %v7741_v27  ;;  %v20228_v19 = vcombine.high %v7744_v31, %v7748_v38  ;;  %v7590_v63 = vld [vmem:[#allocation7 + $0x6b0] sm:$0xff]  ;;  %v7587_v42 = vld [vmem:[#allocation7 + $0x698] sm:$0xff] }
 0x550   : > { %8780 = vmatpush1.bf16.msra.mxu0 %v26283_v9  ;;  %8886 = vmatpush1.bf16.msra.mxu1 %v20205_v58  ;;  %v25760_v53 = vpack.c.bf16 %v7363_v4, %v7360_v61  ;;  %v25762_v43 = vpack.c.bf16 %v7365_v2, %v7362_v23  ;;  %v20230_v60 = vcombine.high %v7745_v48, %v7749_v12  ;;  %v7582_v23 = vld [vmem:[#allocation7 + $0x670] sm:$0xff]  ;;  %v7595_v59 = vld [vmem:[#allocation7 + $0x6d8] sm:$0xff] }
 0x551   : > { %8781 = vmatprep.subr.bf16.mxu0 %v20212_v17  ;;  %8887 = vmatprep.subr.bf16.mxu1 %v20214_v44  ;;  %v20227_v29 = vcombine.low %v7744_v31, %v7748_v38  ;;  %v20229_v52 = vcombine.low %v7745_v48, %v7749_v12  ;;  %v20236_v7 = vcombine.high %v7752_v10, %v7756_v50  ;;  %v7591_v17 = vld [vmem:[#allocation7 + $0x6b8] sm:$0xff]  ;;  %v7594_v55 = vld [vmem:[#allocation7 + $0x6d0] sm:$0xff] }
 0x552   : > { %v20238_v30 = vcombine.high %v7753_v5, %v7757_v47  ;;  %v20235_v61 = vcombine.low %v7752_v10, %v7756_v50  ;;  %v20237_v35 = vcombine.low %v7753_v5, %v7757_v47  ;;  %v20056_v25 = vcombine.high %v7570_v57, %v7574_v39  ;;  %v7598_v24 = vld [vmem:[#allocation7 + $0x6f0] sm:$0xff]  ;;  %v7599_v45 = vld [vmem:[#allocation7 + $0x6f8] sm:$0xff] }
 0x553   : > { %v20058_v58 = vcombine.high %v7571_v14, %v7575_v33  ;;  %v20055_v62 = vcombine.low %v7570_v57, %v7574_v39  ;;  %v20057_v26 = vcombine.low %v7571_v14, %v7575_v33  ;;  %v20064_v13 = vcombine.high %v7578_v46, %v7582_v23  ;;  %v7602_v4 = vld [vmem:[#allocation7 + $0x710] sm:$0xff]  ;;  %v7603_v2 = vld [vmem:[#allocation7 + $0x718] sm:$0xff] }
 0x554   : > { %8782 = vmatpush1.bf16.msra.mxu0 %v20211_v16  ;;  %8888 = vmatpush1.bf16.msra.mxu1 %v20213_v22  ;;  %v20066_v1 = vcombine.high %v7579_v32, %v7583_v20  ;;  %v20063_v44 = vcombine.low %v7578_v46, %v7582_v23  ;;  %v20065_v40 = vcombine.low %v7579_v32, %v7583_v20  ;;  %v7606_v37 = vld [vmem:[#allocation7 + $0x730] sm:$0xff]  ;;  %v7607_v9 = vld [vmem:[#allocation7 + $0x738] sm:$0xff] }
 0x555   : > { %8783 = vmatprep.subr.bf16.mxu0 %v20220_v51  ;;  %8889 = vmatprep.subr.bf16.mxu1 %v20222_v0  ;;  %v20072_v34 = vcombine.high %v7586_v18, %v7590_v63  ;;  %v20074_v21 = vcombine.high %v7587_v42, %v7591_v17  ;;  %v20071_v27 = vcombine.low %v7586_v18, %v7590_v63  ;;  %v7610_v48 = vld [vmem:[#allocation7 + $0x750] sm:$0xff] }
 0x556   : > { %v20073_v16 = vcombine.low %v7587_v42, %v7591_v17  ;;  %v20080_v22 = vcombine.high %v7594_v55, %v7598_v24  ;;  %v20082_v11 = vcombine.high %v7595_v59, %v7599_v45  ;;  %v20079_v51 = vcombine.low %v7594_v55, %v7598_v24  ;;  %v7614_v12 = vld [vmem:[#allocation7 + $0x770] sm:$0xff] }
 0x557   : > { %v20081_v0 = vcombine.low %v7595_v59, %v7599_v45  ;;  %v20088_v31 = vcombine.high %v7602_v4, %v7606_v37  ;;  %v20090_v38 = vcombine.high %v7603_v2, %v7607_v9  ;;  %v20096_v10 = vcombine.high %v7610_v48, %v7614_v12  ;;  %v7618_v5 = vld [vmem:[#allocation7 + $0x790] sm:$0xff] }
 0x558   : > { %8784 = vmatpush1.bf16.msra.mxu0 %v20219_v28  ;;  %8890 = vmatpush1.bf16.msra.mxu1 %v20221_v15  ;;  %v7611_v28 = vld [vmem:[#allocation7 + $0x758] sm:$0xff]  ;;  %v7622_v47 = vld [vmem:[#allocation7 + $0x7b0] sm:$0xff] }
 0x559   : > { %8785 = vmatprep.subr.bf16.mxu0 %v20228_v19  ;;  %8891 = vmatprep.subr.bf16.mxu1 %v20230_v60  ;;  %v7615_v15 = vld [vmem:[#allocation7 + $0x778] sm:$0xff]  ;;  %v20087_v19 = vcombine.low %v7602_v4, %v7606_v37  ;;  %v20089_v60 = vcombine.low %v7603_v2, %v7607_v9  ;;  %v20104_v57 = vcombine.high %v7618_v5, %v7622_v47  ;;  %v7626_v14 = vld [vmem:[#allocation7 + $0x7d0] sm:$0xff] }
 0x55a   : > { %v20098_v50 = vcombine.high %v7611_v28, %v7615_v15  ;;  %v7630_v33 = vld [vmem:[#allocation7 + $0x7f0] sm:$0xff] }
 0x55b   : > { %v20112_v46 = vcombine.high %v7626_v14, %v7630_v33  ;;  %v7634_v32 = vld [vmem:[#allocation7 + $0x810] sm:$0xff] }
 0x55c   : > { %8786 = vmatpush1.bf16.msra.mxu0 %v20227_v29  ;;  %8892 = vmatpush1.bf16.msra.mxu1 %v20229_v52  ;;  %v7619_v29 = vld [vmem:[#allocation7 + $0x798] sm:$0xff]  ;;  %v7638_v20 = vld [vmem:[#allocation7 + $0x830] sm:$0xff] }
 0x55d   : > { %8787 = vmatprep.subr.bf16.mxu0 %v20236_v7  ;;  %8893 = vmatprep.subr.bf16.mxu1 %v20238_v30  ;;  %v7623_v52 = vld [vmem:[#allocation7 + $0x7b8] sm:$0xff]  ;;  %v20095_v7 = vcombine.low %v7610_v48, %v7614_v12  ;;  %v20097_v30 = vcombine.low %v7611_v28, %v7615_v15  ;;  %v20120_v18 = vcombine.high %v7634_v32, %v7638_v20  ;;  %v7642_v42 = vld [vmem:[#allocation7 + $0x850] sm:$0xff] }
 0x55e   : > { %v20106_v39 = vcombine.high %v7619_v29, %v7623_v52  ;;  %v7646_v17 = vld [vmem:[#allocation7 + $0x870] sm:$0xff] }
 0x55f   : > { %v20128_v55 = vcombine.high %v7642_v42, %v7646_v17  ;;  %v7650_v59 = vld [vmem:[#allocation7 + $0x890] sm:$0xff] }
 0x560   : > { %8788 = vmatpush1.bf16.msra.mxu0 %v20235_v61  ;;  %8894 = vmatpush1.bf16.msra.mxu1 %v20237_v35  ;;  %v7627_v61 = vld [vmem:[#allocation7 + $0x7d8] sm:$0xff]  ;;  %v7654_v45 = vld [vmem:[#allocation7 + $0x8b0] sm:$0xff] }
 0x561   : > { %8932 = vmatprep.subr.bf16.mxu0 %v20056_v25  ;;  %9038 = vmatprep.subr.bf16.mxu1 %v20058_v58  ;;  %v7631_v35 = vld [vmem:[#allocation7 + $0x7f8] sm:$0xff]  ;;  %v20103_v25 = vcombine.low %v7618_v5, %v7622_v47  ;;  %v20105_v58 = vcombine.low %v7619_v29, %v7623_v52  ;;  %v20136_v4 = vcombine.high %v7650_v59, %v7654_v45  ;;  %v7658_v2 = vld [vmem:[#allocation7 + $0x8d0] sm:$0xff] }
 0x562   : > { %v20114_v23 = vcombine.high %v7627_v61, %v7631_v35  ;;  %v7662_v9 = vld [vmem:[#allocation7 + $0x8f0] sm:$0xff] }
 0x563   : > { %8806 = vmatmul.mubr.bf16.vlgmr.msra.gmra.mrb[72].mxu0 %v25661_v56  ;;  %8912 = vmatmul.mubr.bf16.vlgmr.msra.gmra.mrb[72].mxu1 %v25661_v56  ;;  %v20144_v48 = vcombine.high %v7658_v2, %v7662_v9  ;;  %v7666_v28 = vld [vmem:[#allocation7 + $0x910] sm:$0xff] }
 0x564   : > { %8933 = vmatpush1.bf16.msra.mxu0 %v20055_v62  ;;  %9039 = vmatpush1.bf16.msra.mxu1 %v20057_v26  ;;  %v7635_v62 = vld [vmem:[#allocation7 + $0x818] sm:$0xff]  ;;  %v7670_v15 = vld [vmem:[#allocation7 + $0x930] sm:$0xff] }
 0x565   : > { %8934 = vmatprep.subr.bf16.mxu0 %v20064_v13  ;;  %9040 = vmatprep.subr.bf16.mxu1 %v20066_v1  ;;  %v7639_v26 = vld [vmem:[#allocation7 + $0x838] sm:$0xff]  ;;  %v20111_v13 = vcombine.low %v7626_v14, %v7630_v33  ;;  %v20113_v1 = vcombine.low %v7627_v61, %v7631_v35  ;;  %v20152_v5 = vcombine.high %v7666_v28, %v7670_v15  ;;  %v7674_v29 = vld [vmem:[#allocation7 + $0x950] sm:$0xff] }
 0x566   : > { %8815 = vmatprep.mubr.bf16.mxu0 %v26280_v36  ;;  %8921 = vmatprep.mubr.bf16.mxu1 %v26280_v36  ;;  %v20122_v63 = vcombine.high %v7635_v62, %v7639_v26  ;;  %v7678_v52 = vld [vmem:[#allocation7 + $0x970] sm:$0xff] }
 0x567   : > { %v20160_v14 = vcombine.high %v7674_v29, %v7678_v52  ;;  %v7682_v61 = vld [vmem:[#allocation7 + $0x990] sm:$0xff] }
 0x568   : > { %8935 = vmatpush1.bf16.msra.mxu0 %v20063_v44  ;;  %9041 = vmatpush1.bf16.msra.mxu1 %v20065_v40  ;;  %v7643_v44 = vld [vmem:[#allocation7 + $0x858] sm:$0xff]  ;;  %v7686_v35 = vld [vmem:[#allocation7 + $0x9b0] sm:$0xff] }
 0x569   : > { %8936 = vmatprep.subr.bf16.mxu0 %v20072_v34  ;;  %9042 = vmatprep.subr.bf16.mxu1 %v20074_v21  ;;  %v7647_v40 = vld [vmem:[#allocation7 + $0x878] sm:$0xff]  ;;  %v20119_v34 = vcombine.low %v7634_v32, %v7638_v20  ;;  %v20121_v21 = vcombine.low %v7635_v62, %v7639_v26  ;;  %v20168_v32 = vcombine.high %v7682_v61, %v7686_v35  ;;  %v7690_v62 = vld [vmem:[#allocation7 + $0x9d0] sm:$0xff] }
 0x56a   : > { %v20130_v24 = vcombine.high %v7643_v44, %v7647_v40  ;;  %v7694_v26 = vld [vmem:[#allocation7 + $0x9f0] sm:$0xff] }
 0x56b   : > { %8816 = vmatmul.mubr.bf16.gmra.mrb[76].mxu0 %v25719_v49  ;;  %8922 = vmatmul.mubr.bf16.gmra.mrb[76].mxu1 %v25719_v49 }
 0x56c   : > { %8937 = vmatpush1.bf16.msra.mxu0 %v20071_v27  ;;  %8964 = vmatprep.mubr.bf16.mxu0 %v25657_v8  ;;  %v7651_v27 = vld [vmem:[#allocation7 + $0x898] sm:$0xff] }
 0x56d   : > { %9043 = vmatpush1.bf16.msra.mxu1 %v20073_v16  ;;  %9070 = vmatprep.mubr.bf16.mxu1 %v25657_v8  ;;  %v7655_v16 = vld [vmem:[#allocation7 + $0x8b8] sm:$0xff] }
 0x56e   : > { %8938 = vmatprep.subr.bf16.mxu0 %v20080_v22  ;;  %9044 = vmatprep.subr.bf16.mxu1 %v20082_v11  ;;  %v20127_v22 = vcombine.low %v7642_v42, %v7646_v17  ;;  %v20129_v11 = vcombine.low %v7643_v44, %v7647_v40  ;;  %v20138_v37 = vcombine.high %v7651_v27, %v7655_v16  ;;  %v7698_v44 = vld [vmem:[#allocation7 + $0xa10] sm:$0xff] }
 0x56f   : > { %v20176_v42 = vcombine.high %v7690_v62, %v7694_v26  ;;  %v7702_v40 = vld [vmem:[#allocation7 + $0xa30] sm:$0xff] }
 0x570   : > { %8939 = vmatpush1.bf16.msra.mxu0 %v20079_v51  ;;  %v7659_v51 = vld [vmem:[#allocation7 + $0x8d8] sm:$0xff] }
 0x571   : > { %9045 = vmatpush1.bf16.msra.mxu1 %v20081_v0  ;;  %8940 = vmatprep.subr.bf16.mxu0 %v20088_v31  ;;  %v7663_v0 = vld [vmem:[#allocation7 + $0x8f8] sm:$0xff]  ;;  %v20135_v31 = vcombine.low %v7650_v59, %v7654_v45  ;;  %v20184_v59 = vcombine.high %v7698_v44, %v7702_v40 }
 0x572   : > { %9046 = vmatprep.subr.bf16.mxu1 %v20090_v38  ;;  %v20137_v38 = vcombine.low %v7651_v27, %v7655_v16  ;;  %v20146_v12 = vcombine.high %v7659_v51, %v7663_v0  ;;  %v7706_v27 = vld [vmem:[#allocation7 + $0xa50] sm:$0xff] }
 0x573   : > { %v7710_v16 = vld [vmem:[#allocation7 + $0xa70] sm:$0xff] }
 0x574   : > { %8941 = vmatpush1.bf16.msra.mxu0 %v20087_v19  ;;  %v7667_v19 = vld [vmem:[#allocation7 + $0x918] sm:$0xff] }
 0x575   : > { %9047 = vmatpush1.bf16.msra.mxu1 %v20089_v60  ;;  %8942 = vmatprep.subr.bf16.mxu0 %v20096_v10  ;;  %v7671_v60 = vld [vmem:[#allocation7 + $0x938] sm:$0xff]  ;;  %v20143_v10 = vcombine.low %v7658_v2, %v7662_v9  ;;  %v20192_v2 = vcombine.high %v7706_v27, %v7710_v16 }
 0x576   : > { %9048 = vmatprep.subr.bf16.mxu1 %v20098_v50  ;;  %v20145_v50 = vcombine.low %v7659_v51, %v7663_v0  ;;  %v20154_v47 = vcombine.high %v7667_v19, %v7671_v60  ;;  %v7714_v51 = vld [vmem:[#allocation7 + $0xa90] sm:$0xff] }
 0x577   : > { %v7718_v0 = vld [vmem:[#allocation7 + $0xab0] sm:$0xff] }
 0x578   : > { %8943 = vmatpush1.bf16.msra.mxu0 %v20095_v7  ;;  %v7675_v7 = vld [vmem:[#allocation7 + $0x958] sm:$0xff] }
 0x579   : > { %9049 = vmatpush1.bf16.msra.mxu1 %v20097_v30  ;;  %8944 = vmatprep.subr.bf16.mxu0 %v20104_v57  ;;  %v7679_v30 = vld [vmem:[#allocation7 + $0x978] sm:$0xff]  ;;  %v20151_v57 = vcombine.low %v7666_v28, %v7670_v15  ;;  %v20200_v28 = vcombine.high %v7714_v51, %v7718_v0 }
 0x57a   : > { %9050 = vmatprep.subr.bf16.mxu1 %v20106_v39  ;;  %v20153_v39 = vcombine.low %v7667_v19, %v7671_v60  ;;  %v20162_v33 = vcombine.high %v7675_v7, %v7679_v30  ;;  %v7722_v19 = vld [vmem:[#allocation7 + $0xad0] sm:$0xff] }
 0x57b   : > { %v7726_v60 = vld [vmem:[#allocation7 + $0xaf0] sm:$0xff] }
 0x57c   : > { %8945 = vmatpush1.bf16.msra.mxu0 %v20103_v25  ;;  %v7683_v25 = vld [vmem:[#allocation7 + $0x998] sm:$0xff] }
 0x57d   : > { %9051 = vmatpush1.bf16.msra.mxu1 %v20105_v58  ;;  %8946 = vmatprep.subr.bf16.mxu0 %v20112_v46  ;;  %v7687_v58 = vld [vmem:[#allocation7 + $0x9b8] sm:$0xff]  ;;  %v20159_v46 = vcombine.low %v7674_v29, %v7678_v52  ;;  %v20208_v29 = vcombine.high %v7722_v19, %v7726_v60 }
 0x57e   : > { %9052 = vmatprep.subr.bf16.mxu1 %v20114_v23  ;;  %v20161_v23 = vcombine.low %v7675_v7, %v7679_v30  ;;  %v20170_v20 = vcombine.high %v7683_v25, %v7687_v58  ;;  %v7730_v7 = vld [vmem:[#allocation7 + $0xb10] sm:$0xff] }
 0x57f   : > { %v7734_v30 = vld [vmem:[#allocation7 + $0xb30] sm:$0xff] }
 0x580   : > { %8947 = vmatpush1.bf16.msra.mxu0 %v20111_v13  ;;  %v7691_v13 = vld [vmem:[#allocation7 + $0x9d8] sm:$0xff] }
 0x581   : > { %9053 = vmatpush1.bf16.msra.mxu1 %v20113_v1  ;;  %8948 = vmatprep.subr.bf16.mxu0 %v20120_v18  ;;  %v7695_v1 = vld [vmem:[#allocation7 + $0x9f8] sm:$0xff]  ;;  %v20167_v18 = vcombine.low %v7682_v61, %v7686_v35  ;;  %v20216_v61 = vcombine.high %v7730_v7, %v7734_v30 }
 0x582   : > { %9054 = vmatprep.subr.bf16.mxu1 %v20122_v63  ;;  %v20169_v63 = vcombine.low %v7683_v25, %v7687_v58  ;;  %v20178_v17 = vcombine.high %v7691_v13, %v7695_v1  ;;  %v7738_v25 = vld [vmem:[#allocation7 + $0xb50] sm:$0xff] }
 0x583   : > { %v7742_v58 = vld [vmem:[#allocation7 + $0xb70] sm:$0xff] }
 0x584   : > { %8949 = vmatpush1.bf16.msra.mxu0 %v20119_v34  ;;  %v7699_v34 = vld [vmem:[#allocation7 + $0xa18] sm:$0xff] }
 0x585   : > { %9055 = vmatpush1.bf16.msra.mxu1 %v20121_v21  ;;  %8950 = vmatprep.subr.bf16.mxu0 %v20128_v55  ;;  %v7703_v21 = vld [vmem:[#allocation7 + $0xa38] sm:$0xff]  ;;  %v20175_v55 = vcombine.low %v7690_v62, %v7694_v26  ;;  %v20224_v62 = vcombine.high %v7738_v25, %v7742_v58 }
 0x586   : > { %9056 = vmatprep.subr.bf16.mxu1 %v20130_v24  ;;  %v20177_v24 = vcombine.low %v7691_v13, %v7695_v1  ;;  %v20186_v45 = vcombine.high %v7699_v34, %v7703_v21  ;;  %v7746_v13 = vld [vmem:[#allocation7 + $0xb90] sm:$0xff] }
 0x587   : > { %v7750_v1 = vld [vmem:[#allocation7 + $0xbb0] sm:$0xff] }
 0x588   : > { %8951 = vmatpush1.bf16.msra.mxu0 %v20127_v22  ;;  %v7707_v22 = vld [vmem:[#allocation7 + $0xa58] sm:$0xff] }
 0x589   : > { %9057 = vmatpush1.bf16.msra.mxu1 %v20129_v11  ;;  %8952 = vmatprep.subr.bf16.mxu0 %v20136_v4  ;;  %v7711_v11 = vld [vmem:[#allocation7 + $0xa78] sm:$0xff]  ;;  %v20183_v4 = vcombine.low %v7698_v44, %v7702_v40  ;;  %v20232_v44 = vcombine.high %v7746_v13, %v7750_v1 }
 0x58a   : > { %9058 = vmatprep.subr.bf16.mxu1 %v20138_v37  ;;  %v20185_v37 = vcombine.low %v7699_v34, %v7703_v21  ;;  %v20194_v9 = vcombine.high %v7707_v22, %v7711_v11  ;;  %v7754_v34 = vld [vmem:[#allocation7 + $0xbd0] sm:$0xff] }
 0x58b   : > { %v7758_v21 = vld [vmem:[#allocation7 + $0xbf0] sm:$0xff] }
 0x58c   : > { %8953 = vmatpush1.bf16.msra.mxu0 %v20135_v31  ;;  %v7715_v31 = vld [vmem:[#allocation7 + $0xa98] sm:$0xff] }
 0x58d   : > { %9059 = vmatpush1.bf16.msra.mxu1 %v20137_v38  ;;  %8954 = vmatprep.subr.bf16.mxu0 %v20144_v48  ;;  %v7719_v38 = vld [vmem:[#allocation7 + $0xab8] sm:$0xff]  ;;  %v20191_v48 = vcombine.low %v7706_v27, %v7710_v16  ;;  %v20240_v27 = vcombine.high %v7754_v34, %v7758_v21 }
 0x58e   : > { %9060 = vmatprep.subr.bf16.mxu1 %v20146_v12  ;;  %v20193_v12 = vcombine.low %v7707_v22, %v7711_v11  ;;  %v20202_v15 = vcombine.high %v7715_v31, %v7719_v38  ;;  %v7375_v22 = vld [vmem:[#allocation7] sm:$0xff] }
 0x58f   : > { %v7379_v11 = vld [vmem:[#allocation7 + $0x20] sm:$0xff] }
 0x590   : > { %8955 = vmatpush1.bf16.msra.mxu0 %v20143_v10  ;;  %v7723_v10 = vld [vmem:[#allocation7 + $0xad8] sm:$0xff] }
 0x591   : > { %9061 = vmatpush1.bf16.msra.mxu1 %v20145_v50  ;;  %8956 = vmatprep.subr.bf16.mxu0 %v20152_v5  ;;  %v7727_v50 = vld [vmem:[#allocation7 + $0xaf8] sm:$0xff]  ;;  %v20199_v5 = vcombine.low %v7714_v51, %v7718_v0  ;;  %v20244_v51 = vcombine.high %v7375_v22, %v7379_v11 }
 0x592   : > { %9062 = vmatprep.subr.bf16.mxu1 %v20154_v47  ;;  %v20201_v47 = vcombine.low %v7715_v31, %v7719_v38  ;;  %v20210_v52 = vcombine.high %v7723_v10, %v7727_v50  ;;  %v7383_v31 = vld [vmem:[#allocation7 + $0x40] sm:$0xff] }
 0x593   : > { %v7387_v38 = vld [vmem:[#allocation7 + $0x60] sm:$0xff] }
 0x594   : > { %8957 = vmatpush1.bf16.msra.mxu0 %v20151_v57  ;;  %v7731_v57 = vld [vmem:[#allocation7 + $0xb18] sm:$0xff] }
 0x595   : > { %9063 = vmatpush1.bf16.msra.mxu1 %v20153_v39  ;;  %8958 = vmatprep.subr.bf16.mxu0 %v20160_v14  ;;  %v7735_v39 = vld [vmem:[#allocation7 + $0xb38] sm:$0xff]  ;;  %v20207_v14 = vcombine.low %v7722_v19, %v7726_v60  ;;  %v20252_v19 = vcombine.high %v7383_v31, %v7387_v38 }
 0x596   : > { %9064 = vmatprep.subr.bf16.mxu1 %v20162_v33  ;;  %v20209_v33 = vcombine.low %v7723_v10, %v7727_v50  ;;  %v20218_v35 = vcombine.high %v7731_v57, %v7735_v39  ;;  %v7391_v10 = vld [vmem:[#allocation7 + $0x80] sm:$0xff] }
 0x597   : > { %v7395_v50 = vld [vmem:[#allocation7 + $0xa0] sm:$0xff] }
 0x598   : > { %8959 = vmatpush1.bf16.msra.mxu0 %v20159_v46  ;;  %v7739_v46 = vld [vmem:[#allocation7 + $0xb58] sm:$0xff] }
 0x599   : > { %9065 = vmatpush1.bf16.msra.mxu1 %v20161_v23  ;;  %8960 = vmatprep.subr.bf16.mxu0 %v20168_v32  ;;  %v7743_v23 = vld [vmem:[#allocation7 + $0xb78] sm:$0xff]  ;;  %v20215_v32 = vcombine.low %v7730_v7, %v7734_v30  ;;  %v20260_v7 = vcombine.high %v7391_v10, %v7395_v50 }
 0x59a   : > { %9066 = vmatprep.subr.bf16.mxu1 %v20170_v20  ;;  %v20217_v20 = vcombine.low %v7731_v57, %v7735_v39  ;;  %v20226_v26 = vcombine.high %v7739_v46, %v7743_v23  ;;  %v7399_v57 = vld [vmem:[#allocation7 + $0xc0] sm:$0xff] }
 0x59b   : > { %v7403_v39 = vld [vmem:[#allocation7 + $0xe0] sm:$0xff] }
 0x59c   : > { %8961 = vmatpush1.bf16.msra.mxu0 %v20167_v18  ;;  %v7747_v18 = vld [vmem:[#allocation7 + $0xb98] sm:$0xff] }
 0x59d   : > { %9067 = vmatpush1.bf16.msra.mxu1 %v20169_v63  ;;  %8962 = vmatprep.subr.bf16.mxu0 %v20176_v42  ;;  %v7751_v63 = vld [vmem:[#allocation7 + $0xbb8] sm:$0xff]  ;;  %v20223_v42 = vcombine.low %v7738_v25, %v7742_v58  ;;  %v20268_v25 = vcombine.high %v7399_v57, %v7403_v39  ;;  %v7407_v58 = vld [vmem:[#allocation7 + $0x100] sm:$0xff] }
 0x59e   : > { %9068 = vmatprep.subr.bf16.mxu1 %v20178_v17  ;;  %v20225_v17 = vcombine.low %v7739_v46, %v7743_v23  ;;  %v20234_v40 = vcombine.high %v7747_v18, %v7751_v63  ;;  %v7411_v46 = vld [vmem:[#allocation7 + $0x120] sm:$0xff] }
 0x5a0   : > { %8963 = vmatpush1.bf16.msra.mxu0 %v20175_v55  ;;  %v7755_v55 = vld [vmem:[#allocation7 + $0xbd8] sm:$0xff] }
 0x5a1   : > { %9069 = vmatpush1.bf16.msra.mxu1 %v20177_v24  ;;  %8985 = vmatprep.subr.bf16.mxu0 %v20184_v59  ;;  %v7759_v24 = vld [vmem:[#allocation7 + $0xbf8] sm:$0xff]  ;;  %v20231_v59 = vcombine.low %v7746_v13, %v7750_v1  ;;  %v20276_v1 = vcombine.high %v7407_v58, %v7411_v46 }
 0x5a2   : > { %9091 = vmatprep.subr.bf16.mxu1 %v20186_v45  ;;  %v20233_v45 = vcombine.low %v7747_v18, %v7751_v63  ;;  %v20242_v16 = vcombine.high %v7755_v55, %v7759_v24  ;;  %v7415_v63 = vld [vmem:[#allocation7 + $0x140] sm:$0xff] }
 0x5a3   : > { %8965 = vmatmul.mubr.bf16.vlgmr.msra.gmra.mrb[80].mxu0 %v25659_v6 }
 0x5a4   : > { %9071 = vmatmul.mubr.bf16.vlgmr.msra.gmra.mrb[80].mxu1 %v25659_v6  ;;  %8974 = vmatprep.mubr.bf16.mxu0 %v25708_v41 }
 0x5a5   : > { %8986 = vmatpush1.bf16.msra.mxu0 %v20183_v4  ;;  %9080 = vmatprep.mubr.bf16.mxu1 %v25708_v41  ;;  %v7376_v4 = vld [vmem:[#allocation7 + $0x8] sm:$0xff] }
 0x5a6   : > { %9092 = vmatpush1.bf16.msra.mxu1 %v20185_v37  ;;  %8987 = vmatprep.subr.bf16.mxu0 %v20192_v2  ;;  %v7380_v37 = vld [vmem:[#allocation7 + $0x28] sm:$0xff]  ;;  %v20239_v2 = vcombine.low %v7754_v34, %v7758_v21 }
 0x5a7   : > { %9093 = vmatprep.subr.bf16.mxu1 %v20194_v9  ;;  %v20241_v9 = vcombine.low %v7755_v55, %v7759_v24  ;;  %v20246_v0 = vcombine.high %v7376_v4, %v7380_v37  ;;  %v7423_v24 = vld [vmem:[#allocation7 + $0x180] sm:$0xff] }
 0x5a9   : > { %8988 = vmatpush1.bf16.msra.mxu0 %v20191_v48  ;;  %v7384_v48 = vld [vmem:[#allocation7 + $0x48] sm:$0xff] }
 0x5aa   : > { %9094 = vmatpush1.bf16.msra.mxu1 %v20193_v12  ;;  %8989 = vmatprep.subr.bf16.mxu0 %v20200_v28  ;;  %v7388_v12 = vld [vmem:[#allocation7 + $0x68] sm:$0xff]  ;;  %v20243_v28 = vcombine.low %v7375_v22, %v7379_v11 }
 0x5ab   : > { %8975 = vmatmul.mubr.bf16.gmra.mrb[84].mxu0 %v25717_v3  ;;  %9095 = vmatprep.subr.bf16.mxu1 %v20202_v15  ;;  %v20245_v15 = vcombine.low %v7376_v4, %v7380_v37  ;;  %v20254_v60 = vcombine.high %v7384_v48, %v7388_v12  ;;  %v7431_v37 = vld [vmem:[#allocation7 + $0x1c0] sm:$0xff] }
 0x5ac   : > { %9081 = vmatmul.mubr.bf16.gmra.mrb[84].mxu1 %v25717_v3  ;;  %9017 = vmatprep.mubr.bf16.mxu0 %v26280_v36 }
 0x5ad   : > { %8990 = vmatpush1.bf16.msra.mxu0 %v20199_v5  ;;  %9123 = vmatprep.mubr.bf16.mxu1 %v26280_v36  ;;  %v7392_v5 = vld [vmem:[#allocation7 + $0x88] sm:$0xff] }
 0x5ae   : > { %9096 = vmatpush1.bf16.msra.mxu1 %v20201_v47  ;;  %8991 = vmatprep.subr.bf16.mxu0 %v20208_v29  ;;  %v7396_v47 = vld [vmem:[#allocation7 + $0xa8] sm:$0xff]  ;;  %v20251_v29 = vcombine.low %v7383_v31, %v7387_v38 }
 0x5af   : > { %9097 = vmatprep.subr.bf16.mxu1 %v20210_v52  ;;  %v20253_v52 = vcombine.low %v7384_v48, %v7388_v12  ;;  %v20262_v30 = vcombine.high %v7392_v5, %v7396_v47  ;;  %v7439_v12 = vld [vmem:[#allocation7 + $0x200] sm:$0xff] }
 0x5b1   : > { %8992 = vmatpush1.bf16.msra.mxu0 %v20207_v14  ;;  %v20259_v14 = vcombine.low %v7391_v10, %v7395_v50 }
 0x5b2   : > { %9098 = vmatpush1.bf16.msra.mxu1 %v20209_v33  ;;  %8993 = vmatprep.subr.bf16.mxu0 %v20216_v61  ;;  %v7400_v33 = vld [vmem:[#allocation7 + $0xc8] sm:$0xff] }
 0x5b3   : > { %9099 = vmatprep.subr.bf16.mxu1 %v20218_v35  ;;  %v7404_v61 = vld [vmem:[#allocation7 + $0xe8] sm:$0xff]  ;;  %v20261_v35 = vcombine.low %v7392_v5, %v7396_v47  ;;  %v7447_v47 = vld [vmem:[#allocation7 + $0x240] sm:$0xff] }
 0x5b4   : > { %v20270_v23 = vcombine.high %v7400_v33, %v7404_v61  ;;  %v20269_v13 = vcombine.low %v7400_v33, %v7404_v61  ;;  %v7455_v33 = vld [vmem:[#allocation7 + $0x280] sm:$0xff] }
 0x5b5   : > { %8994 = vmatpush1.bf16.msra.mxu0 %v20215_v32  ;;  %v7408_v32 = vld [vmem:[#allocation7 + $0x108] sm:$0xff]  ;;  %v7459_v61 = vld [vmem:[#allocation7 + $0x2a0] sm:$0xff] }
 0x5b6   : > { %9100 = vmatpush1.bf16.msra.mxu1 %v20217_v20  ;;  %8995 = vmatprep.subr.bf16.mxu0 %v20224_v62  ;;  %v7412_v20 = vld [vmem:[#allocation7 + $0x128] sm:$0xff]  ;;  %v20267_v62 = vcombine.low %v7399_v57, %v7403_v39 }
 0x5b7   : > { %9101 = vmatprep.subr.bf16.mxu1 %v20226_v26  ;;  %v26284_v26 = vld [vmem:[#allocation49_spill] sm:$0xff]  ;;  %v20278_v18 = vcombine.high %v7408_v32, %v7412_v20  ;;  %v20277_v34 = vcombine.low %v7408_v32, %v7412_v20 }
 0x5b8   : > { %v7463_v20 = vld [vmem:[#allocation7 + $0x2c0] sm:$0xff] }
 0x5b9   : > { %8996 = vmatpush1.bf16.msra.mxu0 %v20223_v42  ;;  %v7419_v42 = vld [vmem:[#allocation7 + $0x160] sm:$0xff] }
 0x5ba   : > { %9102 = vmatpush1.bf16.msra.mxu1 %v20225_v17  ;;  %8997 = vmatprep.subr.bf16.mxu0 %v20232_v44  ;;  %v7416_v17 = vld [vmem:[#allocation7 + $0x148] sm:$0xff]  ;;  %v20284_v21 = vcombine.high %v7415_v63, %v7419_v42 }
 0x5bb   : > { %9103 = vmatprep.subr.bf16.mxu1 %v20234_v40  ;;  %v7420_v44 = vld [vmem:[#allocation7 + $0x168] sm:$0xff]  ;;  %v20275_v40 = vcombine.low %v7407_v58, %v7411_v46 }
 0x5bc   : > { %v20286_v55 = vcombine.high %v7416_v17, %v7420_v44  ;;  %v20285_v22 = vcombine.low %v7416_v17, %v7420_v44  ;;  %v7471_v44 = vld [vmem:[#allocation7 + $0x300] sm:$0xff] }
 0x5bd   : > { %8998 = vmatpush1.bf16.msra.mxu0 %v20231_v59  ;;  %v7427_v59 = vld [vmem:[#allocation7 + $0x1a0] sm:$0xff] }
 0x5be   : > { %9104 = vmatpush1.bf16.msra.mxu1 %v20233_v45  ;;  %8999 = vmatprep.subr.bf16.mxu0 %v20240_v27  ;;  %v7424_v45 = vld [vmem:[#allocation7 + $0x188] sm:$0xff]  ;;  %v20292_v11 = vcombine.high %v7423_v24, %v7427_v59 }
 0x5bf   : > { %9105 = vmatprep.subr.bf16.mxu1 %v20242_v16  ;;  %v7428_v27 = vld [vmem:[#allocation7 + $0x1a8] sm:$0xff]  ;;  %v20283_v16 = vcombine.low %v7415_v63, %v7419_v42 }
 0x5c0   : > { %v20294_v4 = vcombine.high %v7424_v45, %v7428_v27  ;;  %v20293_v31 = vcombine.low %v7424_v45, %v7428_v27  ;;  %v7479_v27 = vld [vmem:[#allocation7 + $0x340] sm:$0xff] }
 0x5c1   : > { %9000 = vmatpush1.bf16.msra.mxu0 %v20239_v2  ;;  %v7435_v2 = vld [vmem:[#allocation7 + $0x1e0] sm:$0xff] }
 0x5c2   : > { %9106 = vmatpush1.bf16.msra.mxu1 %v20241_v9  ;;  %10104 = vmatprep.subr.bf16.mxu0 %v20244_v51  ;;  %v7432_v9 = vld [vmem:[#allocation7 + $0x1c8] sm:$0xff]  ;;  %v20300_v38 = vcombine.high %v7431_v37, %v7435_v2 }
 0x5c3   : > { %10210 = vmatprep.subr.bf16.mxu1 %v20246_v0  ;;  %v7436_v51 = vld [vmem:[#allocation7 + $0x1e8] sm:$0xff]  ;;  %v20291_v0 = vcombine.low %v7423_v24, %v7427_v59 }
 0x5c4   : > { %9018 = vmatmul.mubr.bf16.vlgmr.msra.gmra.mrb[80].mxu0 %v25661_v56  ;;  %v20302_v48 = vcombine.high %v7432_v9, %v7436_v51  ;;  %v20301_v10 = vcombine.low %v7432_v9, %v7436_v51  ;;  %v7487_v51 = vld [vmem:[#allocation7 + $0x380] sm:$0xff] }
 0x5c5   : > { %9124 = vmatmul.mubr.bf16.vlgmr.msra.gmra.mrb[80].mxu1 %v25661_v56  ;;  %10105 = vmatpush1.bf16.msra.mxu0 %v20243_v28  ;;  %v7443_v28 = vld [vmem:[#allocation7 + $0x220] sm:$0xff] }
 0x5c6   : > { %10211 = vmatpush1.bf16.msra.mxu1 %v20245_v15  ;;  %10106 = vmatprep.subr.bf16.mxu0 %v20252_v19  ;;  %v7440_v15 = vld [vmem:[#allocation7 + $0x208] sm:$0xff]  ;;  %v20308_v50 = vcombine.high %v7439_v12, %v7443_v28 }
 0x5c7   : > { %10212 = vmatprep.subr.bf16.mxu1 %v20254_v60  ;;  %9027 = vmatprep.mubr.bf16.mxu0 %v26280_v36  ;;  %v7444_v19 = vld [vmem:[#allocation7 + $0x228] sm:$0xff]  ;;  %v20299_v60 = vcombine.low %v7431_v37, %v7435_v2 }
 0x5c8   : > { %9133 = vmatprep.mubr.bf16.mxu1 %v26280_v36  ;;  %v20310_v5 = vcombine.high %v7440_v15, %v7444_v19  ;;  %v20309_v57 = vcombine.low %v7440_v15, %v7444_v19  ;;  %v7495_v19 = vld [vmem:[#allocation7 + $0x3c0] sm:$0xff] }
 0x5c9   : > { %10107 = vmatpush1.bf16.msra.mxu0 %v20251_v29  ;;  %v7451_v29 = vld [vmem:[#allocation7 + $0x260] sm:$0xff] }
 0x5ca   : > { %10213 = vmatpush1.bf16.msra.mxu1 %v20253_v52  ;;  %10108 = vmatprep.subr.bf16.mxu0 %v20260_v7  ;;  %v7448_v52 = vld [vmem:[#allocation7 + $0x248] sm:$0xff]  ;;  %v20316_v39 = vcombine.high %v7447_v47, %v7451_v29  ;;  %v20315_v58 = vcombine.low %v7447_v47, %v7451_v29 }
 0x5cb   : > { %10214 = vmatprep.subr.bf16.mxu1 %v20262_v30  ;;  %v7452_v7 = vld [vmem:[#allocation7 + $0x268] sm:$0xff]  ;;  %v20307_v30 = vcombine.low %v7439_v12, %v7443_v28 }
 0x5cc   : > { %9028 = vmatmul.mubr.bf16.gmra.mrb[84].mxu0 %v25719_v49  ;;  %v20317_v46 = vcombine.low %v7448_v52, %v7452_v7 }
 0x5cd   : > { %9134 = vmatmul.mubr.bf16.gmra.mrb[84].mxu1 %v25719_v49  ;;  %10109 = vmatpush1.bf16.msra.mxu0 %v20259_v14  ;;  %v20318_v14 = vcombine.high %v7448_v52, %v7452_v7  ;;  %v7503_v7 = vld [vmem:[#allocation7 + $0x400] sm:$0xff] }
 0x5ce   : > { %10136 = vmatprep.mubr.bf16.mxu0 %v26284_v26  ;;  %10215 = vmatpush1.bf16.msra.mxu1 %v20261_v35  ;;  %v7456_v35 = vld [vmem:[#allocation7 + $0x288] sm:$0xff] }
 0x5cf   : > { %10242 = vmatprep.mubr.bf16.mxu1 %v26284_v26  ;;  %10110 = vmatprep.subr.bf16.mxu0 %v20268_v25  ;;  %v7460_v25 = vld [vmem:[#allocation7 + $0x2a8] sm:$0xff] }
 0x5d0   : > { %10216 = vmatprep.subr.bf16.mxu1 %v20270_v23  ;;  %v20324_v23 = vcombine.high %v7455_v33, %v7459_v61  ;;  %v20326_v32 = vcombine.high %v7456_v35, %v7460_v25  ;;  %v20325_v63 = vcombine.low %v7456_v35, %v7460_v25  ;;  %v7511_v25 = vld [vmem:[#allocation7 + $0x440] sm:$0xff] }
 0x5d1   : > { %10111 = vmatpush1.bf16.msra.mxu0 %v20267_v62  ;;  %v7467_v62 = vld [vmem:[#allocation7 + $0x2e0] sm:$0xff] }
 0x5d2   : > { %10217 = vmatpush1.bf16.msra.mxu1 %v20269_v13  ;;  %10112 = vmatprep.subr.bf16.mxu0 %v20276_v1  ;;  %v7464_v13 = vld [vmem:[#allocation7 + $0x2c8] sm:$0xff]  ;;  %v20332_v42 = vcombine.high %v7463_v20, %v7467_v62 }
 0x5d3   : > { %10218 = vmatprep.subr.bf16.mxu1 %v20278_v18  ;;  %v7468_v1 = vld [vmem:[#allocation7 + $0x2e8] sm:$0xff]  ;;  %v20323_v18 = vcombine.low %v7455_v33, %v7459_v61 }
 0x5d4   : > { %v20334_v17 = vcombine.high %v7464_v13, %v7468_v1  ;;  %v20333_v24 = vcombine.low %v7464_v13, %v7468_v1  ;;  %v26285_v13 = vld [vmem:[#allocation50_spill] sm:$0xff] }
 0x5d5   : > { %10113 = vmatpush1.bf16.msra.mxu0 %v20275_v40  ;;  %v7475_v40 = vld [vmem:[#allocation7 + $0x320] sm:$0xff] }
 0x5d6   : > { %10219 = vmatpush1.bf16.msra.mxu1 %v20277_v34  ;;  %10114 = vmatprep.subr.bf16.mxu0 %v20284_v21  ;;  %v7472_v34 = vld [vmem:[#allocation7 + $0x308] sm:$0xff]  ;;  %v20340_v59 = vcombine.high %v7471_v44, %v7475_v40 }
 0x5d7   : > { %10220 = vmatprep.subr.bf16.mxu1 %v20286_v55  ;;  %v7476_v21 = vld [vmem:[#allocation7 + $0x328] sm:$0xff]  ;;  %v20331_v55 = vcombine.low %v7463_v20, %v7467_v62 }
 0x5d8   : > { %v20342_v45 = vcombine.high %v7472_v34, %v7476_v21  ;;  %v20341_v37 = vcombine.low %v7472_v34, %v7476_v21 }
 0x5d9   : > { %10115 = vmatpush1.bf16.msra.mxu0 %v20283_v16  ;;  %v7483_v16 = vld [vmem:[#allocation7 + $0x360] sm:$0xff] }
 0x5da   : > { %10221 = vmatpush1.bf16.msra.mxu1 %v20285_v22  ;;  %10116 = vmatprep.subr.bf16.mxu0 %v20292_v11  ;;  %v7480_v22 = vld [vmem:[#allocation7 + $0x348] sm:$0xff]  ;;  %v20348_v2 = vcombine.high %v7479_v27, %v7483_v16 }
 0x5db   : > { %10222 = vmatprep.subr.bf16.mxu1 %v20294_v4  ;;  %v7484_v11 = vld [vmem:[#allocation7 + $0x368] sm:$0xff]  ;;  %v20339_v4 = vcombine.low %v7471_v44, %v7475_v40 }
 0x5dc   : > { %v20350_v9 = vcombine.high %v7480_v22, %v7484_v11  ;;  %v20349_v12 = vcombine.low %v7480_v22, %v7484_v11  ;;  %v7524_v44 = vld [vmem:[#allocation7 + $0x4a8] sm:$0xff] }
 0x5dd   : > { %10117 = vmatpush1.bf16.msra.mxu0 %v20291_v0  ;;  %v7491_v0 = vld [vmem:[#allocation7 + $0x3a0] sm:$0xff] }
 0x5de   : > { %10223 = vmatpush1.bf16.msra.mxu1 %v20293_v31  ;;  %10118 = vmatprep.subr.bf16.mxu0 %v20300_v38  ;;  %v7488_v31 = vld [vmem:[#allocation7 + $0x388] sm:$0xff]  ;;  %v20356_v28 = vcombine.high %v7487_v51, %v7491_v0 }
 0x5df   : > { %10224 = vmatprep.subr.bf16.mxu1 %v20302_v48  ;;  %v7492_v38 = vld [vmem:[#allocation7 + $0x3a8] sm:$0xff]  ;;  %v20347_v48 = vcombine.low %v7479_v27, %v7483_v16 }
 0x5e0   : > { %v20358_v15 = vcombine.high %v7488_v31, %v7492_v38  ;;  %v20357_v47 = vcombine.low %v7488_v31, %v7492_v38  ;;  %v7532_v27 = vld [vmem:[#allocation7 + $0x4e8] sm:$0xff] }
 0x5e1   : > { %10119 = vmatpush1.bf16.msra.mxu0 %v20299_v60  ;;  %v7499_v60 = vld [vmem:[#allocation7 + $0x3e0] sm:$0xff] }
 0x5e2   : > { %10225 = vmatpush1.bf16.msra.mxu1 %v20301_v10  ;;  %10120 = vmatprep.subr.bf16.mxu0 %v20308_v50  ;;  %v7496_v10 = vld [vmem:[#allocation7 + $0x3c8] sm:$0xff]  ;;  %v20364_v29 = vcombine.high %v7495_v19, %v7499_v60 }
 0x5e3   : > { %10226 = vmatprep.subr.bf16.mxu1 %v20310_v5  ;;  %v7500_v50 = vld [vmem:[#allocation7 + $0x3e8] sm:$0xff]  ;;  %v20355_v5 = vcombine.low %v7487_v51, %v7491_v0 }
 0x5e4   : > { %v20366_v52 = vcombine.high %v7496_v10, %v7500_v50  ;;  %v20365_v33 = vcombine.low %v7496_v10, %v7500_v50  ;;  %v7536_v51 = vld [vmem:[#allocation7 + $0x508] sm:$0xff] }
 0x5e5   : > { %10121 = vmatpush1.bf16.msra.mxu0 %v20307_v30  ;;  %v7507_v30 = vld [vmem:[#allocation7 + $0x420] sm:$0xff]  ;;  %v7540_v0 = vld [vmem:[#allocation7 + $0x528] sm:$0xff] }
 0x5e6   : > { %10227 = vmatpush1.bf16.msra.mxu1 %v20309_v57  ;;  %10122 = vmatprep.subr.bf16.mxu0 %v20316_v39  ;;  %v7504_v57 = vld [vmem:[#allocation7 + $0x408] sm:$0xff]  ;;  %v20372_v61 = vcombine.high %v7503_v7, %v7507_v30  ;;  %v20405_v50 = vcombine.low %v7536_v51, %v7540_v0 }
 0x5e7   : > { %10228 = vmatprep.subr.bf16.mxu1 %v20318_v14  ;;  %v7508_v39 = vld [vmem:[#allocation7 + $0x428] sm:$0xff]  ;;  %v20363_v14 = vcombine.low %v7495_v19, %v7499_v60 }
 0x5e8   : > { %v20374_v35 = vcombine.high %v7504_v57, %v7508_v39  ;;  %v20373_v20 = vcombine.low %v7504_v57, %v7508_v39  ;;  %v7544_v19 = vld [vmem:[#allocation7 + $0x548] sm:$0xff] }
 0x5e9   : > { %10123 = vmatpush1.bf16.msra.mxu0 %v20315_v58  ;;  %v7515_v58 = vld [vmem:[#allocation7 + $0x460] sm:$0xff]  ;;  %v7548_v60 = vld [vmem:[#allocation7 + $0x568] sm:$0xff] }
 0x5ea   : > { %10229 = vmatpush1.bf16.msra.mxu1 %v20317_v46  ;;  %10124 = vmatprep.subr.bf16.mxu0 %v20324_v23  ;;  %v7512_v46 = vld [vmem:[#allocation7 + $0x448] sm:$0xff]  ;;  %v20380_v62 = vcombine.high %v7511_v25, %v7515_v58  ;;  %v20379_v40 = vcombine.low %v7511_v25, %v7515_v58  ;;  %v20413_v39 = vcombine.low %v7544_v19, %v7548_v60 }
 0x5eb   : > { %10230 = vmatprep.subr.bf16.mxu1 %v20326_v32  ;;  %v7516_v23 = vld [vmem:[#allocation7 + $0x468] sm:$0xff]  ;;  %v20371_v32 = vcombine.low %v7503_v7, %v7507_v30 }
 0x5ec   : > { %v20382_v1 = vcombine.high %v7512_v46, %v7516_v23  ;;  %v20381_v34 = vcombine.low %v7512_v46, %v7516_v23  ;;  %v7552_v7 = vld [vmem:[#allocation7 + $0x588] sm:$0xff] }
 0x5ed   : > { %10125 = vmatpush1.bf16.msra.mxu0 %v20323_v18  ;;  %v7519_v18 = vld [vmem:[#allocation7 + $0x480] sm:$0xff]  ;;  %v7556_v30 = vld [vmem:[#allocation7 + $0x5a8] sm:$0xff] }
 0x5ee   : > { %10231 = vmatpush1.bf16.msra.mxu1 %v20325_v63  ;;  %10126 = vmatprep.subr.bf16.mxu0 %v20332_v42  ;;  %v7523_v63 = vld [vmem:[#allocation7 + $0x4a0] sm:$0xff]  ;;  %v7560_v25 = vld [vmem:[#allocation7 + $0x5c8] sm:$0xff]  ;;  %v20421_v23 = vcombine.low %v7552_v7, %v7556_v30 }
 0x5ef   : > { %10232 = vmatprep.subr.bf16.mxu1 %v20334_v17  ;;  %v26286_v42 = vld [vmem:[#allocation52_spill] sm:$0xff]  ;;  %v7520_v17 = vld [vmem:[#allocation7 + $0x488] sm:$0xff]  ;;  %v20388_v21 = vcombine.high %v7519_v18, %v7523_v63  ;;  %v20387_v16 = vcombine.low %v7519_v18, %v7523_v63 }
 0x5f0   : > { %v20389_v22 = vcombine.low %v7520_v17, %v7524_v44  ;;  %v7564_v58 = vld [vmem:[#allocation7 + $0x5e8] sm:$0xff]  ;;  %v7378_v18 = vld [vmem:[#allocation7 + $0x18] sm:$0xff] }
 0x5f1   : > { %10127 = vmatpush1.bf16.msra.mxu0 %v20331_v55  ;;  %v20390_v55 = vcombine.high %v7520_v17, %v7524_v44  ;;  %v7382_v63 = vld [vmem:[#allocation7 + $0x38] sm:$0xff]  ;;  %v20429_v44 = vcombine.low %v7560_v25, %v7564_v58 }
 0x5f2   : > { %10233 = vmatpush1.bf16.msra.mxu1 %v20333_v24  ;;  %10128 = vmatprep.subr.bf16.mxu0 %v20340_v59  ;;  %v7527_v24 = vld [vmem:[#allocation7 + $0x4c0] sm:$0xff] }
 0x5f3   : > { %10234 = vmatprep.subr.bf16.mxu1 %v20342_v45  ;;  %v7531_v59 = vld [vmem:[#allocation7 + $0x4e0] sm:$0xff]  ;;  %v7528_v45 = vld [vmem:[#allocation7 + $0x4c8] sm:$0xff] }
 0x5f4   : > { %v20396_v11 = vcombine.high %v7527_v24, %v7531_v59  ;;  %v20395_v31 = vcombine.low %v7527_v24, %v7531_v59  ;;  %v20397_v38 = vcombine.low %v7528_v45, %v7532_v27  ;;  %v7386_v24 = vld [vmem:[#allocation7 + $0x58] sm:$0xff] }
 0x5f5   : > { %10129 = vmatpush1.bf16.msra.mxu0 %v20339_v4  ;;  %v26287_v4 = vld [vmem:[#allocation53_spill] sm:$0xff]  ;;  %v7390_v59 = vld [vmem:[#allocation7 + $0x78] sm:$0xff] }
 0x5f6   : > { %10235 = vmatpush1.bf16.msra.mxu1 %v20341_v37  ;;  %10130 = vmatprep.subr.bf16.mxu0 %v20348_v2  ;;  %v20398_v37 = vcombine.high %v7528_v45, %v7532_v27  ;;  %v7535_v2 = vld [vmem:[#allocation7 + $0x500] sm:$0xff]  ;;  %v20249_v27 = vcombine.low %v7378_v18, %v7382_v63 }
 0x5f7   : > { %10236 = vmatprep.subr.bf16.mxu1 %v20350_v9  ;;  %v7539_v9 = vld [vmem:[#allocation7 + $0x520] sm:$0xff] }
 0x5f8   : > { %v20403_v10 = vcombine.low %v7535_v2, %v7539_v9 }
 0x5f9   : > { %10131 = vmatpush1.bf16.msra.mxu0 %v20347_v48  ;;  %v20404_v48 = vcombine.high %v7535_v2, %v7539_v9  ;;  %v26288_v2 = vld [vmem:[#allocation51_spill] sm:$0xff] }
 0x5fa   : > { %10237 = vmatpush1.bf16.msra.mxu1 %v20349_v12  ;;  %10132 = vmatprep.subr.bf16.mxu0 %v20356_v28  ;;  %v20406_v12 = vcombine.high %v7536_v51, %v7540_v0  ;;  %v7543_v28 = vld [vmem:[#allocation7 + $0x540] sm:$0xff]  ;;  %v7394_v9 = vld [vmem:[#allocation7 + $0x98] sm:$0xff] }
 0x5fb   : > { %10238 = vmatprep.subr.bf16.mxu1 %v20358_v15  ;;  %v7547_v15 = vld [vmem:[#allocation7 + $0x560] sm:$0xff]  ;;  %v7398_v51 = vld [vmem:[#allocation7 + $0xb8] sm:$0xff] }
 0x5fc   : > { %v20411_v57 = vcombine.low %v7543_v28, %v7547_v15 }
 0x5fd   : > { %10133 = vmatpush1.bf16.msra.mxu0 %v20355_v5  ;;  %v20412_v5 = vcombine.high %v7543_v28, %v7547_v15  ;;  %v7405_v28 = vld [vmem:[#allocation7 + $0xf0] sm:$0xff] }
 0x5fe   : > { %10239 = vmatpush1.bf16.msra.mxu1 %v20357_v47  ;;  %10134 = vmatprep.subr.bf16.mxu0 %v20364_v29  ;;  %v20414_v47 = vcombine.high %v7544_v19, %v7548_v60  ;;  %v7551_v29 = vld [vmem:[#allocation7 + $0x580] sm:$0xff]  ;;  %v7402_v19 = vld [vmem:[#allocation7 + $0xd8] sm:$0xff] }
 0x5ff   : > { %10240 = vmatprep.subr.bf16.mxu1 %v20366_v52  ;;  %v7555_v52 = vld [vmem:[#allocation7 + $0x5a0] sm:$0xff]  ;;  %v7406_v60 = vld [vmem:[#allocation7 + $0xf8] sm:$0xff] }
 0x600   : > { %v20419_v46 = vcombine.low %v7551_v29, %v7555_v52 }
 0x601   : > { %10135 = vmatpush1.bf16.msra.mxu0 %v20363_v14  ;;  %v20420_v14 = vcombine.high %v7551_v29, %v7555_v52  ;;  %v26289_v29 = vld [vmem:[#allocation54_spill] sm:$0xff]  ;;  %v20274_v52 = vcombine.high %v7402_v19, %v7406_v60 }
 0x602   : > { %10241 = vmatpush1.bf16.msra.mxu1 %v20365_v33  ;;  %10157 = vmatprep.subr.bf16.mxu0 %v20372_v61  ;;  %v20422_v33 = vcombine.high %v7552_v7, %v7556_v30  ;;  %v7559_v61 = vld [vmem:[#allocation7 + $0x5c0] sm:$0xff]  ;;  %v7410_v7 = vld [vmem:[#allocation7 + $0x118] sm:$0xff] }
 0x603   : > { %10263 = vmatprep.subr.bf16.mxu1 %v20374_v35  ;;  %v7563_v35 = vld [vmem:[#allocation7 + $0x5e0] sm:$0xff]  ;;  %v7414_v30 = vld [vmem:[#allocation7 + $0x138] sm:$0xff] }
 0x604   : > { %10137 = vmatmul.mubr.bf16.vlgmr.msra.gmra.mrb[72].mxu0 %v26285_v13  ;;  %v20427_v17 = vcombine.low %v7559_v61, %v7563_v35 }
 0x605   : > { %10243 = vmatmul.mubr.bf16.vlgmr.msra.gmra.mrb[72].mxu1 %v26285_v13  ;;  %10146 = vmatprep.mubr.bf16.mxu0 %v26286_v42 }
 0x606   : > { %10158 = vmatpush1.bf16.msra.mxu0 %v20371_v32  ;;  %10252 = vmatprep.mubr.bf16.mxu1 %v26286_v42  ;;  %v20428_v32 = vcombine.high %v7559_v61, %v7563_v35  ;;  %v7417_v61 = vld [vmem:[#allocation7 + $0x150] sm:$0xff] }
 0x607   : > { %10264 = vmatpush1.bf16.msra.mxu1 %v20373_v20  ;;  %10159 = vmatprep.subr.bf16.mxu0 %v20380_v62  ;;  %v20430_v20 = vcombine.high %v7560_v25, %v7564_v58  ;;  %v7377_v62 = vld [vmem:[#allocation7 + $0x10] sm:$0xff]  ;;  %v7418_v25 = vld [vmem:[#allocation7 + $0x158] sm:$0xff] }
 0x608   : > { %10265 = vmatprep.subr.bf16.mxu1 %v20382_v1  ;;  %v7381_v1 = vld [vmem:[#allocation7 + $0x30] sm:$0xff]  ;;  %v7422_v58 = vld [vmem:[#allocation7 + $0x178] sm:$0xff] }
 0x609   : > { %v20247_v45 = vcombine.low %v7377_v62, %v7381_v1  ;;  %v7421_v35 = vld [vmem:[#allocation7 + $0x170] sm:$0xff] }
 0x60a   : > { %10160 = vmatpush1.bf16.msra.mxu0 %v20379_v40  ;;  %v20248_v40 = vcombine.high %v7377_v62, %v7381_v1  ;;  %v7425_v62 = vld [vmem:[#allocation7 + $0x190] sm:$0xff] }
 0x60b   : > { %10266 = vmatpush1.bf16.msra.mxu1 %v20381_v34  ;;  %10161 = vmatprep.subr.bf16.mxu0 %v20388_v21  ;;  %v20250_v34 = vcombine.high %v7378_v18, %v7382_v63  ;;  %v7385_v21 = vld [vmem:[#allocation7 + $0x50] sm:$0xff]  ;;  %v7426_v18 = vld [vmem:[#allocation7 + $0x198] sm:$0xff] }
 0x60c   : > { %10147 = vmatmul.mubr.bf16.gmra.mrb[76].mxu0 %v26287_v4  ;;  %10267 = vmatprep.subr.bf16.mxu1 %v20390_v55  ;;  %v7389_v55 = vld [vmem:[#allocation7 + $0x70] sm:$0xff]  ;;  %v7430_v63 = vld [vmem:[#allocation7 + $0x1b8] sm:$0xff] }
 0x60d   : > { %10253 = vmatmul.mubr.bf16.gmra.mrb[76].mxu1 %v26287_v4  ;;  %10189 = vmatprep.mubr.bf16.mxu0 %v26280_v36  ;;  %v20255_v0 = vcombine.low %v7385_v21, %v7389_v55  ;;  %v7429_v1 = vld [vmem:[#allocation7 + $0x1b0] sm:$0xff] }
 0x60e   : > { %10162 = vmatpush1.bf16.msra.mxu0 %v20387_v16  ;;  %10295 = vmatprep.mubr.bf16.mxu1 %v26280_v36  ;;  %v20256_v16 = vcombine.high %v7385_v21, %v7389_v55  ;;  %v7433_v21 = vld [vmem:[#allocation7 + $0x1d0] sm:$0xff] }
 0x60f   : > { %10268 = vmatpush1.bf16.msra.mxu1 %v20389_v22  ;;  %10163 = vmatprep.subr.bf16.mxu0 %v20396_v11  ;;  %v20258_v22 = vcombine.high %v7386_v24, %v7390_v59  ;;  %v7393_v11 = vld [vmem:[#allocation7 + $0x90] sm:$0xff] }
 0x610   : > { %10269 = vmatprep.subr.bf16.mxu1 %v20398_v37  ;;  %v7397_v37 = vld [vmem:[#allocation7 + $0xb0] sm:$0xff] }
 0x611   : > { %v20263_v15 = vcombine.low %v7393_v11, %v7397_v37  ;;  %v7437_v55 = vld [vmem:[#allocation7 + $0x1f0] sm:$0xff] }
 0x612   : > { %10164 = vmatpush1.bf16.msra.mxu0 %v20395_v31  ;;  %v20257_v31 = vcombine.low %v7386_v24, %v7390_v59  ;;  %v7434_v24 = vld [vmem:[#allocation7 + $0x1d8] sm:$0xff] }
 0x613   : > { %10270 = vmatpush1.bf16.msra.mxu1 %v20397_v38  ;;  %10165 = vmatprep.subr.bf16.mxu0 %v20404_v48  ;;  %v20264_v38 = vcombine.high %v7393_v11, %v7397_v37  ;;  %v20266_v48 = vcombine.high %v7394_v9, %v7398_v51  ;;  %v7438_v59 = vld [vmem:[#allocation7 + $0x1f8] sm:$0xff]  ;;  %v7441_v11 = vld [vmem:[#allocation7 + $0x210] sm:$0xff] }
 0x614   : > { %10271 = vmatprep.subr.bf16.mxu1 %v20406_v12  ;;  %v7401_v12 = vld [vmem:[#allocation7 + $0xd0] sm:$0xff] }
 0x615   : > { %v7445_v37 = vld [vmem:[#allocation7 + $0x230] sm:$0xff] }
 0x616   : > { %10166 = vmatpush1.bf16.msra.mxu0 %v20403_v10  ;;  %v20265_v10 = vcombine.low %v7394_v9, %v7398_v51  ;;  %v7442_v9 = vld [vmem:[#allocation7 + $0x218] sm:$0xff] }
 0x617   : > { %10272 = vmatpush1.bf16.msra.mxu1 %v20405_v50  ;;  %10167 = vmatprep.subr.bf16.mxu0 %v20412_v5  ;;  %v20272_v50 = vcombine.high %v7401_v12, %v7405_v28  ;;  %v7409_v5 = vld [vmem:[#allocation7 + $0x110] sm:$0xff]  ;;  %v7446_v51 = vld [vmem:[#allocation7 + $0x238] sm:$0xff] }
 0x618   : > { %10273 = vmatprep.subr.bf16.mxu1 %v20414_v47  ;;  %v7413_v47 = vld [vmem:[#allocation7 + $0x130] sm:$0xff] }
 0x61a   : > { %10168 = vmatpush1.bf16.msra.mxu0 %v20411_v57  ;;  %v20271_v57 = vcombine.low %v7401_v12, %v7405_v28  ;;  %v7449_v12 = vld [vmem:[#allocation7 + $0x250] sm:$0xff] }
 0x61b   : > { %10274 = vmatpush1.bf16.msra.mxu1 %v20413_v39  ;;  %10169 = vmatprep.subr.bf16.mxu0 %v20420_v14  ;;  %v20273_v39 = vcombine.low %v7402_v19, %v7406_v60  ;;  %v20280_v14 = vcombine.high %v7409_v5, %v7413_v47  ;;  %v7453_v28 = vld [vmem:[#allocation7 + $0x270] sm:$0xff]  ;;  %v7454_v19 = vld [vmem:[#allocation7 + $0x278] sm:$0xff]  ;;  %v20311_v60 = vcombine.low %v7441_v11, %v7445_v37 }
 0x61c   : > { %10275 = vmatprep.subr.bf16.mxu1 %v20422_v33  ;;  %v20282_v33 = vcombine.high %v7410_v7, %v7414_v30 }
 0x61e   : > { %10170 = vmatpush1.bf16.msra.mxu0 %v20419_v46  ;;  %v20279_v46 = vcombine.low %v7409_v5, %v7413_v47  ;;  %v7457_v47 = vld [vmem:[#allocation7 + $0x290] sm:$0xff] }
 0x61f   : > { %10276 = vmatpush1.bf16.msra.mxu1 %v20421_v23  ;;  %10171 = vmatprep.subr.bf16.mxu0 %v20428_v32  ;;  %v20281_v23 = vcombine.low %v7410_v7, %v7414_v30  ;;  %v20288_v32 = vcombine.high %v7417_v61, %v7421_v35  ;;  %v7458_v7 = vld [vmem:[#allocation7 + $0x298] sm:$0xff] }
 0x620   : > { %10277 = vmatprep.subr.bf16.mxu1 %v20430_v20  ;;  %v20290_v20 = vcombine.high %v7418_v25, %v7422_v58  ;;  %v7462_v30 = vld [vmem:[#allocation7 + $0x2b8] sm:$0xff] }
 0x622   : > { %10172 = vmatpush1.bf16.msra.mxu0 %v20427_v17  ;;  %v20287_v17 = vcombine.low %v7417_v61, %v7421_v35  ;;  %v7465_v61 = vld [vmem:[#allocation7 + $0x2d0] sm:$0xff] }
 0x623   : > { %10278 = vmatpush1.bf16.msra.mxu1 %v20429_v44  ;;  %10316 = vmatprep.subr.bf16.mxu0 %v20248_v40  ;;  %v20289_v44 = vcombine.low %v7418_v25, %v7422_v58  ;;  %v20296_v40 = vcombine.high %v7425_v62, %v7429_v1  ;;  %v7469_v35 = vld [vmem:[#allocation7 + $0x2f0] sm:$0xff]  ;;  %v7466_v25 = vld [vmem:[#allocation7 + $0x2d8] sm:$0xff] }
 0x624   : > { %10422 = vmatprep.subr.bf16.mxu1 %v20250_v34  ;;  %v20298_v34 = vcombine.high %v7426_v18, %v7430_v63  ;;  %v7470_v58 = vld [vmem:[#allocation7 + $0x2f8] sm:$0xff] }
 0x625   : > { %10190 = vmatmul.mubr.bf16.vlgmr.msra.gmra.mrb[72].mxu0 %v26288_v2 }
 0x626   : > { %10296 = vmatmul.mubr.bf16.vlgmr.msra.gmra.mrb[72].mxu1 %v26288_v2  ;;  %10317 = vmatpush1.bf16.msra.mxu0 %v20247_v45  ;;  %v20295_v45 = vcombine.low %v7425_v62, %v7429_v1  ;;  %v7473_v62 = vld [vmem:[#allocation7 + $0x310] sm:$0xff] }
 0x627   : > { %10423 = vmatpush1.bf16.msra.mxu1 %v20249_v27  ;;  %10318 = vmatprep.subr.bf16.mxu0 %v20256_v16  ;;  %v20297_v27 = vcombine.low %v7426_v18, %v7430_v63  ;;  %v20304_v16 = vcombine.high %v7433_v21, %v7437_v55  ;;  %v7477_v1 = vld [vmem:[#allocation7 + $0x330] sm:$0xff]  ;;  %v7474_v18 = vld [vmem:[#allocation7 + $0x318] sm:$0xff] }
 0x628   : > { %10424 = vmatprep.subr.bf16.mxu1 %v20258_v22  ;;  %10199 = vmatprep.mubr.bf16.mxu0 %v26280_v36  ;;  %v20306_v22 = vcombine.high %v7434_v24, %v7438_v59  ;;  %v7478_v63 = vld [vmem:[#allocation7 + $0x338] sm:$0xff] }
 0x629   : > { %10305 = vmatprep.mubr.bf16.mxu1 %v26280_v36 }
 0x62a   : > { %10319 = vmatpush1.bf16.msra.mxu0 %v20255_v0  ;;  %v20303_v0 = vcombine.low %v7433_v21, %v7437_v55  ;;  %v7481_v21 = vld [vmem:[#allocation7 + $0x350] sm:$0xff] }
 0x62b   : > { %10425 = vmatpush1.bf16.msra.mxu1 %v20257_v31  ;;  %10320 = vmatprep.subr.bf16.mxu0 %v20264_v38  ;;  %v20305_v31 = vcombine.low %v7434_v24, %v7438_v59  ;;  %v20312_v38 = vcombine.high %v7441_v11, %v7445_v37  ;;  %v7485_v55 = vld [vmem:[#allocation7 + $0x370] sm:$0xff]  ;;  %v7482_v24 = vld [vmem:[#allocation7 + $0x358] sm:$0xff] }
 0x62c   : > { %10426 = vmatprep.subr.bf16.mxu1 %v20266_v48  ;;  %v20314_v48 = vcombine.high %v7442_v9, %v7446_v51  ;;  %v7486_v59 = vld [vmem:[#allocation7 + $0x378] sm:$0xff]  ;;  %v7489_v11 = vld [vmem:[#allocation7 + $0x390] sm:$0xff] }
 0x62d   : > { %10200 = vmatmul.mubr.bf16.gmra.mrb[76].mxu0 %v26289_v29  ;;  %v7493_v37 = vld [vmem:[#allocation7 + $0x3b0] sm:$0xff] }
 0x62e   : > { %10306 = vmatmul.mubr.bf16.gmra.mrb[76].mxu1 %v26289_v29  ;;  %10321 = vmatpush1.bf16.msra.mxu0 %v20263_v15  ;;  %v7450_v15 = vld [vmem:[#allocation7 + $0x258] sm:$0xff] }
 0x62f   : > { %10348 = vmatprep.mubr.bf16.mxu0 %v26284_v26  ;;  %10427 = vmatpush1.bf16.msra.mxu1 %v20265_v10  ;;  %v20313_v10 = vcombine.low %v7442_v9, %v7446_v51  ;;  %v20322_v5 = vcombine.high %v7450_v15, %v7454_v19  ;;  %v7490_v9 = vld [vmem:[#allocation7 + $0x398] sm:$0xff] }
 0x630   : > { %10454 = vmatprep.mubr.bf16.mxu1 %v26284_v26  ;;  %10322 = vmatprep.subr.bf16.mxu0 %v20272_v50  ;;  %v20320_v50 = vcombine.high %v7449_v12, %v7453_v28  ;;  %v7494_v51 = vld [vmem:[#allocation7 + $0x3b8] sm:$0xff] }
 0x631   : > { %10428 = vmatprep.subr.bf16.mxu1 %v20274_v52  ;;  %v7461_v52 = vld [vmem:[#allocation7 + $0x2b0] sm:$0xff] }
 0x632   : > { %10323 = vmatpush1.bf16.msra.mxu0 %v20271_v57  ;;  %v20319_v57 = vcombine.low %v7449_v12, %v7453_v28  ;;  %v7497_v12 = vld [vmem:[#allocation7 + $0x3d0] sm:$0xff] }
 0x633   : > { %10429 = vmatpush1.bf16.msra.mxu1 %v20273_v39  ;;  %10324 = vmatprep.subr.bf16.mxu0 %v20280_v14  ;;  %v20321_v39 = vcombine.low %v7450_v15, %v7454_v19  ;;  %v20328_v14 = vcombine.high %v7457_v47, %v7461_v52  ;;  %v7501_v28 = vld [vmem:[#allocation7 + $0x3f0] sm:$0xff]  ;;  %v7498_v15 = vld [vmem:[#allocation7 + $0x3d8] sm:$0xff] }
 0x634   : > { %10430 = vmatprep.subr.bf16.mxu1 %v20282_v33  ;;  %v20330_v33 = vcombine.high %v7458_v7, %v7462_v30  ;;  %v7502_v19 = vld [vmem:[#allocation7 + $0x3f8] sm:$0xff] }
 0x636   : > { %10325 = vmatpush1.bf16.msra.mxu0 %v20279_v46  ;;  %v20327_v46 = vcombine.low %v7457_v47, %v7461_v52  ;;  %v7505_v47 = vld [vmem:[#allocation7 + $0x410] sm:$0xff] }
 0x637   : > { %10431 = vmatpush1.bf16.msra.mxu1 %v20281_v23  ;;  %10326 = vmatprep.subr.bf16.mxu0 %v20288_v32  ;;  %v20329_v23 = vcombine.low %v7458_v7, %v7462_v30  ;;  %v20336_v32 = vcombine.high %v7465_v61, %v7469_v35  ;;  %v7509_v52 = vld [vmem:[#allocation7 + $0x430] sm:$0xff]  ;;  %v7506_v7 = vld [vmem:[#allocation7 + $0x418] sm:$0xff] }
 0x638   : > { %10432 = vmatprep.subr.bf16.mxu1 %v20290_v20  ;;  %v20338_v20 = vcombine.high %v7466_v25, %v7470_v58  ;;  %v7510_v30 = vld [vmem:[#allocation7 + $0x438] sm:$0xff] }
 0x63a   : > { %10327 = vmatpush1.bf16.msra.mxu0 %v20287_v17  ;;  %v20335_v17 = vcombine.low %v7465_v61, %v7469_v35  ;;  %v7513_v61 = vld [vmem:[#allocation7 + $0x450] sm:$0xff] }
 0x63b   : > { %10433 = vmatpush1.bf16.msra.mxu1 %v20289_v44  ;;  %10328 = vmatprep.subr.bf16.mxu0 %v20296_v40  ;;  %v20337_v44 = vcombine.low %v7466_v25, %v7470_v58  ;;  %v20344_v40 = vcombine.high %v7473_v62, %v7477_v1  ;;  %v7517_v35 = vld [vmem:[#allocation7 + $0x470] sm:$0xff]  ;;  %v7514_v25 = vld [vmem:[#allocation7 + $0x458] sm:$0xff] }
 0x63c   : > { %10434 = vmatprep.subr.bf16.mxu1 %v20298_v34  ;;  %v20346_v34 = vcombine.high %v7474_v18, %v7478_v63  ;;  %v7518_v58 = vld [vmem:[#allocation7 + $0x478] sm:$0xff] }
 0x63e   : > { %10329 = vmatpush1.bf16.msra.mxu0 %v20295_v45  ;;  %v20343_v45 = vcombine.low %v7473_v62, %v7477_v1  ;;  %v7521_v62 = vld [vmem:[#allocation7 + $0x490] sm:$0xff] }
 0x63f   : > { %10435 = vmatpush1.bf16.msra.mxu1 %v20297_v27  ;;  %10330 = vmatprep.subr.bf16.mxu0 %v20304_v16  ;;  %v20345_v27 = vcombine.low %v7474_v18, %v7478_v63  ;;  %v20352_v16 = vcombine.high %v7481_v21, %v7485_v55  ;;  %v7525_v1 = vld [vmem:[#allocation7 + $0x4b0] sm:$0xff]  ;;  %v7522_v18 = vld [vmem:[#allocation7 + $0x498] sm:$0xff] }
 0x640   : > { %10436 = vmatprep.subr.bf16.mxu1 %v20306_v22  ;;  %v20354_v22 = vcombine.high %v7482_v24, %v7486_v59  ;;  %v7526_v63 = vld [vmem:[#allocation7 + $0x4b8] sm:$0xff] }
 0x642   : > { %10331 = vmatpush1.bf16.msra.mxu0 %v20303_v0  ;;  %v20351_v0 = vcombine.low %v7481_v21, %v7485_v55  ;;  %v7529_v21 = vld [vmem:[#allocation7 + $0x4d0] sm:$0xff] }
 0x643   : > { %10437 = vmatpush1.bf16.msra.mxu1 %v20305_v31  ;;  %10332 = vmatprep.subr.bf16.mxu0 %v20312_v38  ;;  %v20353_v31 = vcombine.low %v7482_v24, %v7486_v59  ;;  %v20360_v38 = vcombine.high %v7489_v11, %v7493_v37  ;;  %v7533_v55 = vld [vmem:[#allocation7 + $0x4f0] sm:$0xff]  ;;  %v7530_v24 = vld [vmem:[#allocation7 + $0x4d8] sm:$0xff] }
 0x644   : > { %10438 = vmatprep.subr.bf16.mxu1 %v20314_v48  ;;  %v20362_v48 = vcombine.high %v7490_v9, %v7494_v51  ;;  %v7534_v59 = vld [vmem:[#allocation7 + $0x4f8] sm:$0xff] }
 0x646   : > { %10333 = vmatpush1.bf16.msra.mxu0 %v20311_v60  ;;  %v20359_v60 = vcombine.low %v7489_v11, %v7493_v37  ;;  %v7537_v11 = vld [vmem:[#allocation7 + $0x510] sm:$0xff] }
 0x647   : > { %10439 = vmatpush1.bf16.msra.mxu1 %v20313_v10  ;;  %10334 = vmatprep.subr.bf16.mxu0 %v20320_v50  ;;  %v20361_v10 = vcombine.low %v7490_v9, %v7494_v51  ;;  %v20368_v50 = vcombine.high %v7497_v12, %v7501_v28  ;;  %v7541_v37 = vld [vmem:[#allocation7 + $0x530] sm:$0xff]  ;;  %v7538_v9 = vld [vmem:[#allocation7 + $0x518] sm:$0xff] }
 0x648   : > { %10440 = vmatprep.subr.bf16.mxu1 %v20322_v5  ;;  %v20370_v5 = vcombine.high %v7498_v15, %v7502_v19  ;;  %v7542_v51 = vld [vmem:[#allocation7 + $0x538] sm:$0xff] }
 0x64a   : > { %10335 = vmatpush1.bf16.msra.mxu0 %v20319_v57  ;;  %v20367_v57 = vcombine.low %v7497_v12, %v7501_v28  ;;  %v7545_v12 = vld [vmem:[#allocation7 + $0x550] sm:$0xff] }
 0x64b   : > { %10441 = vmatpush1.bf16.msra.mxu1 %v20321_v39  ;;  %10336 = vmatprep.subr.bf16.mxu0 %v20328_v14  ;;  %v20369_v39 = vcombine.low %v7498_v15, %v7502_v19  ;;  %v20376_v14 = vcombine.high %v7505_v47, %v7509_v52  ;;  %v7549_v28 = vld [vmem:[#allocation7 + $0x570] sm:$0xff]  ;;  %v7546_v15 = vld [vmem:[#allocation7 + $0x558] sm:$0xff] }
 0x64c   : > { %10442 = vmatprep.subr.bf16.mxu1 %v20330_v33  ;;  %v20378_v33 = vcombine.high %v7506_v7, %v7510_v30  ;;  %v7550_v19 = vld [vmem:[#allocation7 + $0x578] sm:$0xff] }
 0x64e   : > { %10337 = vmatpush1.bf16.msra.mxu0 %v20327_v46  ;;  %v20375_v46 = vcombine.low %v7505_v47, %v7509_v52  ;;  %v7553_v47 = vld [vmem:[#allocation7 + $0x590] sm:$0xff] }
 0x64f   : > { %10443 = vmatpush1.bf16.msra.mxu1 %v20329_v23  ;;  %10338 = vmatprep.subr.bf16.mxu0 %v20336_v32  ;;  %v20377_v23 = vcombine.low %v7506_v7, %v7510_v30  ;;  %v20384_v32 = vcombine.high %v7513_v61, %v7517_v35  ;;  %v7557_v52 = vld [vmem:[#allocation7 + $0x5b0] sm:$0xff]  ;;  %v7554_v7 = vld [vmem:[#allocation7 + $0x598] sm:$0xff] }
 0x650   : > { %10444 = vmatprep.subr.bf16.mxu1 %v20338_v20  ;;  %v20386_v20 = vcombine.high %v7514_v25, %v7518_v58  ;;  %v7558_v30 = vld [vmem:[#allocation7 + $0x5b8] sm:$0xff] }
 0x652   : > { %10339 = vmatpush1.bf16.msra.mxu0 %v20335_v17  ;;  %v20383_v17 = vcombine.low %v7513_v61, %v7517_v35  ;;  %v7561_v61 = vld [vmem:[#allocation7 + $0x5d0] sm:$0xff] }
 0x653   : > { %10445 = vmatpush1.bf16.msra.mxu1 %v20337_v44  ;;  %10340 = vmatprep.subr.bf16.mxu0 %v20344_v40  ;;  %v20385_v44 = vcombine.low %v7514_v25, %v7518_v58  ;;  %v20392_v40 = vcombine.high %v7521_v62, %v7525_v1  ;;  %v7565_v35 = vld [vmem:[#allocation7 + $0x5f0] sm:$0xff]  ;;  %v7562_v25 = vld [vmem:[#allocation7 + $0x5d8] sm:$0xff] }
 0x654   : > { %10446 = vmatprep.subr.bf16.mxu1 %v20346_v34  ;;  %v20394_v34 = vcombine.high %v7522_v18, %v7526_v63  ;;  %v7566_v58 = vld [vmem:[#allocation7 + $0x5f8] sm:$0xff] }
 0x656   : > { %10341 = vmatpush1.bf16.msra.mxu0 %v20343_v45  ;;  %v20391_v45 = vcombine.low %v7521_v62, %v7525_v1  ;;  %v10529_v62 = vld [vmem:[#allocation7 + $0xc00] sm:$0xff] }
 0x657   : > { %10447 = vmatpush1.bf16.msra.mxu1 %v20345_v27  ;;  %10342 = vmatprep.subr.bf16.mxu0 %v20352_v16  ;;  %v20393_v27 = vcombine.low %v7522_v18, %v7526_v63  ;;  %v20400_v16 = vcombine.high %v7529_v21, %v7533_v55  ;;  %v10533_v1 = vld [vmem:[#allocation7 + $0xc20] sm:$0xff]  ;;  %v10530_v18 = vld [vmem:[#allocation7 + $0xc08] sm:$0xff] }
 0x658   : > { %10448 = vmatprep.subr.bf16.mxu1 %v20354_v22  ;;  %v20402_v22 = vcombine.high %v7530_v24, %v7534_v59  ;;  %v10534_v63 = vld [vmem:[#allocation7 + $0xc28] sm:$0xff] }
 0x65a   : > { %10343 = vmatpush1.bf16.msra.mxu0 %v20351_v0  ;;  %v20399_v0 = vcombine.low %v7529_v21, %v7533_v55  ;;  %v10537_v21 = vld [vmem:[#allocation7 + $0xc40] sm:$0xff] }
 0x65b   : > { %10449 = vmatpush1.bf16.msra.mxu1 %v20353_v31  ;;  %10344 = vmatprep.subr.bf16.mxu0 %v20360_v38  ;;  %v20401_v31 = vcombine.low %v7530_v24, %v7534_v59  ;;  %v20408_v38 = vcombine.high %v7537_v11, %v7541_v37  ;;  %v10541_v55 = vld [vmem:[#allocation7 + $0xc60] sm:$0xff]  ;;  %v10538_v24 = vld [vmem:[#allocation7 + $0xc48] sm:$0xff] }
 0x65c   : > { %10450 = vmatprep.subr.bf16.mxu1 %v20362_v48  ;;  %v20410_v48 = vcombine.high %v7538_v9, %v7542_v51  ;;  %v10542_v59 = vld [vmem:[#allocation7 + $0xc68] sm:$0xff] }
 0x65e   : > { %10345 = vmatpush1.bf16.msra.mxu0 %v20359_v60  ;;  %v20407_v60 = vcombine.low %v7537_v11, %v7541_v37  ;;  %v10545_v11 = vld [vmem:[#allocation7 + $0xc80] sm:$0xff] }
 0x65f   : > { %10451 = vmatpush1.bf16.msra.mxu1 %v20361_v10  ;;  %10346 = vmatprep.subr.bf16.mxu0 %v20368_v50  ;;  %v20409_v10 = vcombine.low %v7538_v9, %v7542_v51  ;;  %v20416_v50 = vcombine.high %v7545_v12, %v7549_v28  ;;  %v10549_v37 = vld [vmem:[#allocation7 + $0xca0] sm:$0xff]  ;;  %v10546_v9 = vld [vmem:[#allocation7 + $0xc88] sm:$0xff] }
 0x660   : > { %10452 = vmatprep.subr.bf16.mxu1 %v20370_v5  ;;  %v20418_v5 = vcombine.high %v7546_v15, %v7550_v19  ;;  %v10550_v51 = vld [vmem:[#allocation7 + $0xca8] sm:$0xff] }
 0x662   : > { %10347 = vmatpush1.bf16.msra.mxu0 %v20367_v57  ;;  %v20415_v57 = vcombine.low %v7545_v12, %v7549_v28  ;;  %v10553_v12 = vld [vmem:[#allocation7 + $0xcc0] sm:$0xff] }
 0x663   : > { %10453 = vmatpush1.bf16.msra.mxu1 %v20369_v39  ;;  %10369 = vmatprep.subr.bf16.mxu0 %v20376_v14  ;;  %v20417_v39 = vcombine.low %v7546_v15, %v7550_v19  ;;  %v20424_v14 = vcombine.high %v7553_v47, %v7557_v52  ;;  %v10557_v28 = vld [vmem:[#allocation7 + $0xce0] sm:$0xff]  ;;  %v20451_v15 = vcombine.low %v10545_v11, %v10549_v37  ;;  %v10735_v19 = vrot.slane %v26286_v42, 4 }
 0x664   : > { %10475 = vmatprep.subr.bf16.mxu1 %v20378_v33  ;;  %v20426_v33 = vcombine.high %v7554_v7, %v7558_v30 }
 0x665   : > { %10349 = vmatmul.mubr.bf16.vlgmr.msra.gmra.mrb[80].mxu0 %v26285_v13 }
 0x666   : > { %10455 = vmatmul.mubr.bf16.vlgmr.msra.gmra.mrb[80].mxu1 %v26285_v13  ;;  %10358 = vmatprep.mubr.bf16.mxu0 %v26286_v42 }
 0x667   : > { %10370 = vmatpush1.bf16.msra.mxu0 %v20375_v46  ;;  %10464 = vmatprep.mubr.bf16.mxu1 %v26286_v42  ;;  %v20423_v46 = vcombine.low %v7553_v47, %v7557_v52  ;;  %v20460_v47 = vcombine.high %v10553_v12, %v10557_v28  ;;  %v10561_v52 = vld [vmem:[#allocation7 + $0xd00] sm:$0xff] }
 0x668   : > { %10476 = vmatpush1.bf16.msra.mxu1 %v20377_v23  ;;  %10371 = vmatprep.subr.bf16.mxu0 %v20384_v32  ;;  %v20425_v23 = vcombine.low %v7554_v7, %v7558_v30  ;;  %v20432_v32 = vcombine.high %v7561_v61, %v7565_v35  ;;  %v10565_v7 = vld [vmem:[#allocation7 + $0xd20] sm:$0xff] }
 0x669   : > { %10477 = vmatprep.subr.bf16.mxu1 %v20386_v20  ;;  %v20434_v20 = vcombine.high %v7562_v25, %v7566_v58 }
 0x66b   : > { %10372 = vmatpush1.bf16.msra.mxu0 %v20383_v17  ;;  %v20431_v17 = vcombine.low %v7561_v61, %v7565_v35  ;;  %v20468_v61 = vcombine.high %v10561_v52, %v10565_v7 }
 0x66c   : > { %10478 = vmatpush1.bf16.msra.mxu1 %v20385_v44  ;;  %10373 = vmatprep.subr.bf16.mxu0 %v20392_v40  ;;  %v20433_v44 = vcombine.low %v7562_v25, %v7566_v58  ;;  %v20436_v40 = vcombine.high %v10529_v62, %v10533_v1  ;;  %v10569_v25 = vld [vmem:[#allocation7 + $0xd40] sm:$0xff] }
 0x66d   : > { %10359 = vmatmul.mubr.bf16.gmra.mrb[84].mxu0 %v26287_v4  ;;  %10479 = vmatprep.subr.bf16.mxu1 %v20394_v34  ;;  %v20438_v34 = vcombine.high %v10530_v18, %v10534_v63  ;;  %v10573_v58 = vld [vmem:[#allocation7 + $0xd60] sm:$0xff] }
 0x66e   : > { %10465 = vmatmul.mubr.bf16.gmra.mrb[84].mxu1 %v26287_v4  ;;  %10401 = vmatprep.mubr.bf16.mxu0 %v26280_v36 }
 0x66f   : > { %10374 = vmatpush1.bf16.msra.mxu0 %v20391_v45  ;;  %10507 = vmatprep.mubr.bf16.mxu1 %v26280_v36  ;;  %v20435_v45 = vcombine.low %v10529_v62, %v10533_v1  ;;  %v20476_v62 = vcombine.high %v10569_v25, %v10573_v58 }
 0x670   : > { %10480 = vmatpush1.bf16.msra.mxu1 %v20393_v27  ;;  %10375 = vmatprep.subr.bf16.mxu0 %v20400_v16  ;;  %v20437_v27 = vcombine.low %v10530_v18, %v10534_v63  ;;  %v20444_v16 = vcombine.high %v10537_v21, %v10541_v55  ;;  %v10577_v18 = vld [vmem:[#allocation7 + $0xd80] sm:$0xff] }
 0x671   : > { %10481 = vmatprep.subr.bf16.mxu1 %v20402_v22  ;;  %v20446_v22 = vcombine.high %v10538_v24, %v10542_v59  ;;  %v10581_v63 = vld [vmem:[#allocation7 + $0xda0] sm:$0xff] }
 0x673   : > { %10376 = vmatpush1.bf16.msra.mxu0 %v20399_v0  ;;  %v20443_v0 = vcombine.low %v10537_v21, %v10541_v55  ;;  %v20484_v21 = vcombine.high %v10577_v18, %v10581_v63 }
 0x674   : > { %10482 = vmatpush1.bf16.msra.mxu1 %v20401_v31  ;;  %10377 = vmatprep.subr.bf16.mxu0 %v20408_v38  ;;  %v20445_v31 = vcombine.low %v10538_v24, %v10542_v59  ;;  %v20452_v38 = vcombine.high %v10545_v11, %v10549_v37  ;;  %v10585_v24 = vld [vmem:[#allocation7 + $0xdc0] sm:$0xff] }
 0x675   : > { %10483 = vmatprep.subr.bf16.mxu1 %v20410_v48  ;;  %v20454_v48 = vcombine.high %v10546_v9, %v10550_v51  ;;  %v10589_v59 = vld [vmem:[#allocation7 + $0xde0] sm:$0xff] }
 0x676   : > { %v20492_v11 = vcombine.high %v10585_v24, %v10589_v59 }
 0x677   : > { %10378 = vmatpush1.bf16.msra.mxu0 %v20407_v60  ;;  %v10554_v60 = vld [vmem:[#allocation7 + $0xcc8] sm:$0xff] }
 0x678   : > { %10484 = vmatpush1.bf16.msra.mxu1 %v20409_v10  ;;  %10379 = vmatprep.subr.bf16.mxu0 %v20416_v50  ;;  %v10558_v10 = vld [vmem:[#allocation7 + $0xce8] sm:$0xff]  ;;  %v20453_v50 = vcombine.low %v10546_v9, %v10550_v51  ;;  %v10593_v9 = vld [vmem:[#allocation7 + $0xe00] sm:$0xff] }
 0x679   : > { %10485 = vmatprep.subr.bf16.mxu1 %v20418_v5  ;;  %v10734_v5 = vrot.slane %v26284_v26, 4  ;;  %v20462_v30 = vcombine.high %v10554_v60, %v10558_v10  ;;  %v20461_v26 = vcombine.low %v10554_v60, %v10558_v10  ;;  %v10597_v51 = vld [vmem:[#allocation7 + $0xe20] sm:$0xff]  ;;  %v10602_v10 = vld [vmem:[#allocation7 + $0xe48] sm:$0xff] }
 0x67a   : > { %v10605_v60 = vld [vmem:[#allocation7 + $0xe60] sm:$0xff] }
 0x67b   : > { %10380 = vmatpush1.bf16.msra.mxu0 %v20415_v57  ;;  %v10562_v57 = vld [vmem:[#allocation7 + $0xd08] sm:$0xff] }
 0x67c   : > { %10486 = vmatpush1.bf16.msra.mxu1 %v20417_v39  ;;  %10381 = vmatprep.subr.bf16.mxu0 %v20424_v14  ;;  %v10566_v39 = vld [vmem:[#allocation7 + $0xd28] sm:$0xff]  ;;  %v25823_v14 = vsel %vm10730_vm2, %v10734_v5, %v10735_v19  ;;  %v20499_v5 = vcombine.low %v10593_v9, %v10597_v51 }
 0x67d   : > { %10487 = vmatprep.subr.bf16.mxu1 %v20426_v33  ;;  %v20459_v33 = vcombine.low %v10553_v12, %v10557_v28  ;;  %v20470_v35 = vcombine.high %v10562_v57, %v10566_v39  ;;  %v20500_v12 = vcombine.high %v10593_v9, %v10597_v51  ;;  %v10641_v51 = vld [vmem:[#allocation7 + $0xf80] sm:$0xff] }
 0x67f   : > { %10382 = vmatpush1.bf16.msra.mxu0 %v20423_v46  ;;  %v10570_v46 = vld [vmem:[#allocation7 + $0xd48] sm:$0xff] }
 0x680   : > { %10488 = vmatpush1.bf16.msra.mxu1 %v20425_v23  ;;  %10383 = vmatprep.subr.bf16.mxu0 %v20432_v32  ;;  %v10574_v23 = vld [vmem:[#allocation7 + $0xd68] sm:$0xff]  ;;  %v20467_v32 = vcombine.low %v10561_v52, %v10565_v7 }
 0x681   : > { %10489 = vmatprep.subr.bf16.mxu1 %v20434_v20  ;;  %v20469_v20 = vcombine.low %v10562_v57, %v10566_v39  ;;  %v20478_v1 = vcombine.high %v10570_v46, %v10574_v23  ;;  %v10613_v57 = vld [vmem:[#allocation7 + $0xea0] sm:$0xff]  ;;  %v10610_v39 = vld [vmem:[#allocation7 + $0xe88] sm:$0xff] }
 0x683   : > { %10384 = vmatpush1.bf16.msra.mxu0 %v20431_v17  ;;  %v10578_v17 = vld [vmem:[#allocation7 + $0xd88] sm:$0xff] }
 0x684   : > { %10490 = vmatpush1.bf16.msra.mxu1 %v20433_v44  ;;  %11712 = vmatprep.subr.bf16.mxu0 %v20436_v40  ;;  %v10582_v44 = vld [vmem:[#allocation7 + $0xda8] sm:$0xff]  ;;  %v20475_v40 = vcombine.low %v10569_v25, %v10573_v58  ;;  %v10617_v58 = vld [vmem:[#allocation7 + $0xec0] sm:$0xff] }
 0x685   : > { %11818 = vmatprep.subr.bf16.mxu1 %v20438_v34  ;;  %v20477_v34 = vcombine.low %v10570_v46, %v10574_v23  ;;  %v20486_v55 = vcombine.high %v10578_v17, %v10582_v44  ;;  %v10621_v46 = vld [vmem:[#allocation7 + $0xee0] sm:$0xff]  ;;  %v10618_v23 = vld [vmem:[#allocation7 + $0xec8] sm:$0xff] }
 0x686   : > { %10402 = vmatmul.mubr.bf16.vlgmr.msra.gmra.mrb[80].mxu0 %v26288_v2 }
 0x687   : > { %10508 = vmatmul.mubr.bf16.vlgmr.msra.gmra.mrb[80].mxu1 %v26288_v2  ;;  %11713 = vmatpush1.bf16.msra.mxu0 %v20435_v45  ;;  %v10586_v45 = vld [vmem:[#allocation7 + $0xdc8] sm:$0xff] }
 0x688   : > { %11819 = vmatpush1.bf16.msra.mxu1 %v20437_v27  ;;  %11714 = vmatprep.subr.bf16.mxu0 %v20444_v16  ;;  %v10590_v27 = vld [vmem:[#allocation7 + $0xde8] sm:$0xff]  ;;  %v20483_v16 = vcombine.low %v10577_v18, %v10581_v63  ;;  %v10625_v63 = vld [vmem:[#allocation7 + $0xf00] sm:$0xff] }
 0x689   : > { %11820 = vmatprep.subr.bf16.mxu1 %v20446_v22  ;;  %10411 = vmatprep.mubr.bf16.mxu0 %v26280_v36  ;;  %v20485_v22 = vcombine.low %v10578_v17, %v10582_v44  ;;  %v20494_v37 = vcombine.high %v10586_v45, %v10590_v27  ;;  %v10629_v17 = vld [vmem:[#allocation7 + $0xf20] sm:$0xff]  ;;  %v10626_v44 = vld [vmem:[#allocation7 + $0xf08] sm:$0xff] }
 0x68a   : > { %10517 = vmatprep.mubr.bf16.mxu1 %v26280_v36 }
 0x68b   : > { %11715 = vmatpush1.bf16.msra.mxu0 %v20443_v0  ;;  %v10594_v0 = vld [vmem:[#allocation7 + $0xe08] sm:$0xff] }
 0x68c   : > { %11821 = vmatpush1.bf16.msra.mxu1 %v20445_v31  ;;  %11716 = vmatprep.subr.bf16.mxu0 %v20452_v38  ;;  %v10598_v31 = vld [vmem:[#allocation7 + $0xe28] sm:$0xff]  ;;  %v20491_v38 = vcombine.low %v10585_v24, %v10589_v59  ;;  %v10633_v59 = vld [vmem:[#allocation7 + $0xf40] sm:$0xff] }
 0x68d   : > { %11822 = vmatprep.subr.bf16.mxu1 %v20454_v48  ;;  %v20493_v48 = vcombine.low %v10586_v45, %v10590_v27  ;;  %v20502_v28 = vcombine.high %v10594_v0, %v10598_v31  ;;  %v10637_v45 = vld [vmem:[#allocation7 + $0xf60] sm:$0xff]  ;;  %v10634_v27 = vld [vmem:[#allocation7 + $0xf48] sm:$0xff] }
 0x68e   : > { %10412 = vmatmul.mubr.bf16.gmra.mrb[84].mxu0 %v26289_v29 }
 0x68f   : > { %10518 = vmatmul.mubr.bf16.gmra.mrb[84].mxu1 %v26289_v29  ;;  %11717 = vmatpush1.bf16.msra.mxu0 %v20451_v15  ;;  %v10601_v15 = vld [vmem:[#allocation7 + $0xe40] sm:$0xff] }
 0x690   : > { %11744 = vmatprep.mubr.bf16.mxu0 %v25823_v14  ;;  %11823 = vmatpush1.bf16.msra.mxu1 %v20453_v50  ;;  %v10606_v50 = vld [vmem:[#allocation7 + $0xe68] sm:$0xff]  ;;  %v20508_v52 = vcombine.high %v10601_v15, %v10605_v60 }
 0x691   : > { %11850 = vmatprep.mubr.bf16.mxu1 %v25823_v14  ;;  %11718 = vmatprep.subr.bf16.mxu0 %v20460_v47  ;;  %v20501_v47 = vcombine.low %v10594_v0, %v10598_v31  ;;  %v20510_v7 = vcombine.high %v10602_v10, %v10606_v50  ;;  %v10645_v0 = vld [vmem:[#allocation7 + $0xfa0] sm:$0xff]  ;;  %v10642_v31 = vld [vmem:[#allocation7 + $0xf88] sm:$0xff] }
 0x692   : > { %11824 = vmatprep.subr.bf16.mxu1 %v20462_v30  ;;  %v10609_v30 = vld [vmem:[#allocation7 + $0xe80] sm:$0xff] }
 0x693   : > { %11719 = vmatpush1.bf16.msra.mxu0 %v20459_v33  ;;  %v10614_v33 = vld [vmem:[#allocation7 + $0xea8] sm:$0xff] }
 0x694   : > { %11825 = vmatpush1.bf16.msra.mxu1 %v20461_v26  ;;  %11720 = vmatprep.subr.bf16.mxu0 %v20468_v61  ;;  %v20507_v26 = vcombine.low %v10601_v15, %v10605_v60  ;;  %v20509_v61 = vcombine.low %v10602_v10, %v10606_v50  ;;  %v20518_v25 = vcombine.high %v10610_v39, %v10614_v33  ;;  %v10649_v60 = vld [vmem:[#allocation7 + $0xfc0] sm:$0xff]  ;;  %v10650_v50 = vld [vmem:[#allocation7 + $0xfc8] sm:$0xff] }
 0x695   : > { %11826 = vmatprep.subr.bf16.mxu1 %v20470_v35  ;;  %v20516_v35 = vcombine.high %v10609_v30, %v10613_v57  ;;  %v10653_v10 = vld [vmem:[#allocation7 + $0xfe0] sm:$0xff] }
 0x697   : > { %11721 = vmatpush1.bf16.msra.mxu0 %v20467_v32  ;;  %v10622_v32 = vld [vmem:[#allocation7 + $0xee8] sm:$0xff] }
 0x698   : > { %11827 = vmatpush1.bf16.msra.mxu1 %v20469_v20  ;;  %11722 = vmatprep.subr.bf16.mxu0 %v20476_v62  ;;  %v20515_v20 = vcombine.low %v10609_v30, %v10613_v57  ;;  %v20517_v62 = vcombine.low %v10610_v39, %v10614_v33  ;;  %v20526_v18 = vcombine.high %v10618_v23, %v10622_v32  ;;  %v10657_v57 = vld [vmem:[#allocation7 + $0x1000] sm:$0xff]  ;;  %v10658_v33 = vld [vmem:[#allocation7 + $0x1008] sm:$0xff] }
 0x699   : > { %11828 = vmatprep.subr.bf16.mxu1 %v20478_v1  ;;  %v20524_v1 = vcombine.high %v10617_v58, %v10621_v46  ;;  %v10661_v39 = vld [vmem:[#allocation7 + $0x1020] sm:$0xff] }
 0x69b   : > { %11723 = vmatpush1.bf16.msra.mxu0 %v20475_v40  ;;  %v10630_v40 = vld [vmem:[#allocation7 + $0xf28] sm:$0xff] }
 0x69c   : > { %11829 = vmatpush1.bf16.msra.mxu1 %v20477_v34  ;;  %11724 = vmatprep.subr.bf16.mxu0 %v20484_v21  ;;  %v20523_v34 = vcombine.low %v10617_v58, %v10621_v46  ;;  %v20525_v21 = vcombine.low %v10618_v23, %v10622_v32  ;;  %v20534_v24 = vcombine.high %v10626_v44, %v10630_v40  ;;  %v10732_v58 = vrot.slane %v26287_v4, 4  ;;  %v26290_v23 = vld [vmem:[#allocation55_spill] sm:$0xff] }
 0x69d   : > { %11830 = vmatprep.subr.bf16.mxu1 %v20486_v55  ;;  %v20532_v55 = vcombine.high %v10625_v63, %v10629_v17  ;;  %v10742_v32 = vrot.slane %v26290_v23, 4 }
 0x69f   : > { %11725 = vmatpush1.bf16.msra.mxu0 %v20483_v16  ;;  %v10638_v16 = vld [vmem:[#allocation7 + $0xf68] sm:$0xff] }
 0x6a0   : > { %11831 = vmatpush1.bf16.msra.mxu1 %v20485_v22  ;;  %11726 = vmatprep.subr.bf16.mxu0 %v20492_v11  ;;  %v20531_v22 = vcombine.low %v10625_v63, %v10629_v17  ;;  %v20533_v11 = vcombine.low %v10626_v44, %v10630_v40  ;;  %v20542_v9 = vcombine.high %v10634_v27, %v10638_v16  ;;  %v10670_v63 = vld [vmem:[#allocation7 + $0x1068] sm:$0xff] }
 0x6a1   : > { %11832 = vmatprep.subr.bf16.mxu1 %v20494_v37  ;;  %v20540_v37 = vcombine.high %v10633_v59, %v10637_v45  ;;  %v20563_v17 = vcombine.low %v10657_v57, %v10661_v39 }
 0x6a3   : > { %11727 = vmatpush1.bf16.msra.mxu0 %v20491_v38  ;;  %v10646_v38 = vld [vmem:[#allocation7 + $0xfa8] sm:$0xff] }
 0x6a4   : > { %11833 = vmatpush1.bf16.msra.mxu1 %v20493_v48  ;;  %11728 = vmatprep.subr.bf16.mxu0 %v20500_v12  ;;  %v20539_v48 = vcombine.low %v10633_v59, %v10637_v45  ;;  %v20541_v12 = vcombine.low %v10634_v27, %v10638_v16  ;;  %v20550_v15 = vcombine.high %v10642_v31, %v10646_v38  ;;  %v10674_v59 = vld [vmem:[#allocation7 + $0x1088] sm:$0xff] }
 0x6a5   : > { %11834 = vmatprep.subr.bf16.mxu1 %v20502_v28  ;;  %v20548_v28 = vcombine.high %v10641_v51, %v10645_v0  ;;  %v10678_v45 = vld [vmem:[#allocation7 + $0x10a8] sm:$0xff] }
 0x6a7   : > { %11729 = vmatpush1.bf16.msra.mxu0 %v20499_v5  ;;  %v10654_v5 = vld [vmem:[#allocation7 + $0xfe8] sm:$0xff] }
 0x6a8   : > { %11835 = vmatpush1.bf16.msra.mxu1 %v20501_v47  ;;  %11730 = vmatprep.subr.bf16.mxu0 %v20508_v52  ;;  %v20547_v47 = vcombine.low %v10641_v51, %v10645_v0  ;;  %v20549_v52 = vcombine.low %v10642_v31, %v10646_v38  ;;  %v20558_v30 = vcombine.high %v10650_v50, %v10654_v5  ;;  %v10685_v51 = vld [vmem:[#allocation7 + $0x10e0] sm:$0xff]  ;;  %v10682_v0 = vld [vmem:[#allocation7 + $0x10c8] sm:$0xff] }
 0x6a9   : > { %11836 = vmatprep.subr.bf16.mxu1 %v20510_v7  ;;  %v20556_v7 = vcombine.high %v10649_v60, %v10653_v10  ;;  %v10686_v31 = vld [vmem:[#allocation7 + $0x10e8] sm:$0xff] }
 0x6ab   : > { %11731 = vmatpush1.bf16.msra.mxu0 %v20507_v26  ;;  %v10662_v26 = vld [vmem:[#allocation7 + $0x1028] sm:$0xff] }
 0x6ac   : > { %11837 = vmatpush1.bf16.msra.mxu1 %v20509_v61  ;;  %11732 = vmatprep.subr.bf16.mxu0 %v20516_v35  ;;  %v20555_v61 = vcombine.low %v10649_v60, %v10653_v10  ;;  %v20557_v35 = vcombine.low %v10650_v50, %v10654_v5  ;;  %v20566_v46 = vcombine.high %v10658_v33, %v10662_v26  ;;  %v10689_v60 = vld [vmem:[#allocation7 + $0x1100] sm:$0xff]  ;;  %v10690_v50 = vld [vmem:[#allocation7 + $0x1108] sm:$0xff] }
 0x6ad   : > { %11838 = vmatprep.subr.bf16.mxu1 %v20518_v25  ;;  %v20564_v25 = vcombine.high %v10657_v57, %v10661_v39  ;;  %v20565_v40 = vcombine.low %v10658_v33, %v10662_v26  ;;  %v10693_v10 = vld [vmem:[#allocation7 + $0x1120] sm:$0xff]  ;;  %v10694_v5 = vld [vmem:[#allocation7 + $0x1128] sm:$0xff] }
 0x6ae   : > { %v10697_v57 = vld [vmem:[#allocation7 + $0x1140] sm:$0xff]  ;;  %v10698_v33 = vld [vmem:[#allocation7 + $0x1148] sm:$0xff] }
 0x6af   : > { %11733 = vmatpush1.bf16.msra.mxu0 %v20515_v20  ;;  %v10665_v20 = vld [vmem:[#allocation7 + $0x1040] sm:$0xff]  ;;  %v10702_v26 = vld [vmem:[#allocation7 + $0x1168] sm:$0xff] }
 0x6b0   : > { %11839 = vmatpush1.bf16.msra.mxu1 %v20517_v62  ;;  %11734 = vmatprep.subr.bf16.mxu0 %v20524_v1  ;;  %v10669_v62 = vld [vmem:[#allocation7 + $0x1060] sm:$0xff]  ;;  %v10731_v1 = vrot.slane %v26285_v13, 4 }
 0x6b1   : > { %11840 = vmatprep.subr.bf16.mxu1 %v20526_v18  ;;  %v10666_v18 = vld [vmem:[#allocation7 + $0x1048] sm:$0xff]  ;;  %v10673_v13 = vld [vmem:[#allocation7 + $0x1080] sm:$0xff]  ;;  %v20571_v27 = vcombine.low %v10665_v20, %v10669_v62 }
 0x6b2   : > { %v25831_v44 = vsel %vm10730_vm2, %v10731_v1, %v10732_v58  ;;  %v20573_v16 = vcombine.low %v10666_v18, %v10670_v63  ;;  %v10701_v39 = vld [vmem:[#allocation7 + $0x1160] sm:$0xff] }
 0x6b3   : > { %11735 = vmatpush1.bf16.msra.mxu0 %v20523_v34  ;;  %v20572_v34 = vcombine.high %v10665_v20, %v10669_v62  ;;  %v10706_v20 = vld [vmem:[#allocation7 + $0x1188] sm:$0xff]  ;;  %v20603_v1 = vcombine.low %v10697_v57, %v10701_v39 }
 0x6b4   : > { %11841 = vmatpush1.bf16.msra.mxu1 %v20525_v21  ;;  %11736 = vmatprep.subr.bf16.mxu0 %v20532_v55  ;;  %v25837_v21 = vsel %vm10730_vm2, %v10735_v19, %v10742_v32  ;;  %v20574_v55 = vcombine.high %v10666_v18, %v10670_v63  ;;  %v10709_v32 = vld [vmem:[#allocation7 + $0x11a0] sm:$0xff]  ;;  %v10710_v62 = vld [vmem:[#allocation7 + $0x11a8] sm:$0xff]  ;;  %v20605_v18 = vcombine.low %v10698_v33, %v10702_v26 }
 0x6b5   : > { %11842 = vmatprep.subr.bf16.mxu1 %v20534_v24  ;;  %v10677_v24 = vld [vmem:[#allocation7 + $0x10a0] sm:$0xff] }
 0x6b6   : > { %v20580_v19 = vcombine.high %v10673_v13, %v10677_v24  ;;  %v20579_v38 = vcombine.low %v10673_v13, %v10677_v24  ;;  %v10718_v13 = vld [vmem:[#allocation7 + $0x11e8] sm:$0xff] }
 0x6b7   : > { %11737 = vmatpush1.bf16.msra.mxu0 %v20531_v22  ;;  %v26291_v22 = vld [vmem:[#allocation56_spill] sm:$0xff] }
 0x6b8   : > { %11843 = vmatpush1.bf16.msra.mxu1 %v20533_v11  ;;  %11738 = vmatprep.subr.bf16.mxu0 %v20540_v37  ;;  %v10740_v11 = vrot.slane %v26291_v22, 4  ;;  %v20582_v37 = vcombine.high %v10674_v59, %v10678_v45 }
 0x6b9   : > { %11844 = vmatprep.subr.bf16.mxu1 %v20542_v9  ;;  %v10681_v9 = vld [vmem:[#allocation7 + $0x10c0] sm:$0xff] }
 0x6bb   : > { %11739 = vmatpush1.bf16.msra.mxu0 %v20539_v48  ;;  %v25844_v48 = vsel %vm10730_vm2, %v10732_v58, %v10740_v11  ;;  %v20606_v58 = vcombine.high %v10698_v33, %v10702_v26  ;;  %v10535_v11 = vld [vmem:[#allocation7 + $0xc30] sm:$0xff]  ;;  %v10552_v33 = vld [vmem:[#allocation7 + $0xcb8] sm:$0xff] }
 0x6bc   : > { %11845 = vmatpush1.bf16.msra.mxu1 %v20541_v12  ;;  %11740 = vmatprep.subr.bf16.mxu0 %v20548_v28  ;;  %v20581_v12 = vcombine.low %v10674_v59, %v10678_v45  ;;  %v20588_v28 = vcombine.high %v10681_v9, %v10685_v51  ;;  %v20613_v59 = vcombine.low %v10706_v20, %v10710_v62 }
 0x6bd   : > { %11846 = vmatprep.subr.bf16.mxu1 %v20550_v15  ;;  %v20590_v15 = vcombine.high %v10682_v0, %v10686_v31 }
 0x6bf   : > { %11741 = vmatpush1.bf16.msra.mxu0 %v20547_v47  ;;  %v20587_v47 = vcombine.low %v10681_v9, %v10685_v51 }
 0x6c0   : > { %11847 = vmatpush1.bf16.msra.mxu1 %v20549_v52  ;;  %11742 = vmatprep.subr.bf16.mxu0 %v20556_v7  ;;  %v20589_v52 = vcombine.low %v10682_v0, %v10686_v31  ;;  %v20596_v7 = vcombine.high %v10689_v60, %v10693_v10  ;;  %v10738_v31 = vrot.slane %v26289_v29, 4 }
 0x6c1   : > { %11848 = vmatprep.subr.bf16.mxu1 %v20558_v30  ;;  %v20598_v30 = vcombine.high %v10690_v50, %v10694_v5 }
 0x6c3   : > { %11743 = vmatpush1.bf16.msra.mxu0 %v20555_v61  ;;  %v20595_v61 = vcombine.low %v10689_v60, %v10693_v10  ;;  %v10544_v60 = vld [vmem:[#allocation7 + $0xc78] sm:$0xff]  ;;  %v10737_v10 = vrot.slane %v26288_v2, 4 }
 0x6c4   : > { %11849 = vmatpush1.bf16.msra.mxu1 %v20557_v35  ;;  %11765 = vmatprep.subr.bf16.mxu0 %v20564_v25  ;;  %v20597_v35 = vcombine.low %v10690_v50, %v10694_v5  ;;  %v20604_v25 = vcombine.high %v10697_v57, %v10701_v39  ;;  %v10551_v57 = vld [vmem:[#allocation7 + $0xcb0] sm:$0xff]  ;;  %v10548_v39 = vld [vmem:[#allocation7 + $0xc98] sm:$0xff] }
 0x6c5   : > { %11871 = vmatprep.subr.bf16.mxu1 %v20566_v46  ;;  %v10705_v46 = vld [vmem:[#allocation7 + $0x1180] sm:$0xff] }
 0x6c6   : > { %11745 = vmatmul.mubr.bf16.vlgmr.msra.gmra.mrb[72].mxu0 %v25831_v44  ;;  %v20612_v63 = vcombine.high %v10705_v46, %v10709_v32  ;;  %v20611_v24 = vcombine.low %v10705_v46, %v10709_v32  ;;  %v10555_v46 = vld [vmem:[#allocation7 + $0xcd0] sm:$0xff] }
 0x6c7   : > { %11851 = vmatmul.mubr.bf16.vlgmr.msra.gmra.mrb[72].mxu1 %v25831_v44  ;;  %11754 = vmatprep.mubr.bf16.mxu0 %v25837_v21  ;;  %v10559_v32 = vld [vmem:[#allocation7 + $0xcf0] sm:$0xff] }
 0x6c8   : > { %11766 = vmatpush1.bf16.msra.mxu0 %v20563_v17  ;;  %11860 = vmatprep.mubr.bf16.mxu1 %v25837_v21  ;;  %v20614_v17 = vcombine.high %v10706_v20, %v10710_v62  ;;  %v10556_v62 = vld [vmem:[#allocation7 + $0xcd8] sm:$0xff] }
 0x6c9   : > { %11872 = vmatpush1.bf16.msra.mxu1 %v20565_v40  ;;  %11767 = vmatprep.subr.bf16.mxu0 %v20572_v34  ;;  %v10713_v40 = vld [vmem:[#allocation7 + $0x11c0] sm:$0xff] }
 0x6ca   : > { %11873 = vmatprep.subr.bf16.mxu1 %v20574_v55  ;;  %v10717_v34 = vld [vmem:[#allocation7 + $0x11e0] sm:$0xff]  ;;  %v10714_v55 = vld [vmem:[#allocation7 + $0x11c8] sm:$0xff] }
 0x6cb   : > { %v20620_v45 = vcombine.high %v10713_v40, %v10717_v34  ;;  %v20619_v9 = vcombine.low %v10713_v40, %v10717_v34  ;;  %v20621_v51 = vcombine.low %v10714_v55, %v10718_v13  ;;  %v10563_v40 = vld [vmem:[#allocation7 + $0xd10] sm:$0xff] }
 0x6cc   : > { %11768 = vmatpush1.bf16.msra.mxu0 %v20571_v27  ;;  %v20622_v27 = vcombine.high %v10714_v55, %v10718_v13  ;;  %v10567_v34 = vld [vmem:[#allocation7 + $0xd30] sm:$0xff]  ;;  %v10564_v13 = vld [vmem:[#allocation7 + $0xd18] sm:$0xff] }
 0x6cd   : > { %11874 = vmatpush1.bf16.msra.mxu1 %v20573_v16  ;;  %11769 = vmatprep.subr.bf16.mxu0 %v20580_v19  ;;  %v10531_v16 = vld [vmem:[#allocation7 + $0xc10] sm:$0xff]  ;;  %v10532_v19 = vld [vmem:[#allocation7 + $0xc18] sm:$0xff] }
 0x6ce   : > { %11755 = vmatmul.mubr.bf16.gmra.mrb[76].mxu0 %v25844_v48  ;;  %11875 = vmatprep.subr.bf16.mxu1 %v20582_v37  ;;  %v10536_v37 = vld [vmem:[#allocation7 + $0xc38] sm:$0xff]  ;;  %v20440_v0 = vcombine.high %v10531_v16, %v10535_v11  ;;  %v20439_v50 = vcombine.low %v10531_v16, %v10535_v11  ;;  %v10571_v11 = vld [vmem:[#allocation7 + $0xd50] sm:$0xff] }
 0x6cf   : > { %11861 = vmatmul.mubr.bf16.gmra.mrb[76].mxu1 %v25844_v48  ;;  %11797 = vmatprep.mubr.bf16.mxu0 %v26280_v36  ;;  %v20441_v5 = vcombine.low %v10532_v19, %v10536_v37 }
 0x6d0   : > { %11770 = vmatpush1.bf16.msra.mxu0 %v20579_v38  ;;  %11903 = vmatprep.mubr.bf16.mxu1 %v26280_v36  ;;  %v20442_v38 = vcombine.high %v10532_v19, %v10536_v37  ;;  %v10575_v19 = vld [vmem:[#allocation7 + $0xd70] sm:$0xff]  ;;  %v10572_v37 = vld [vmem:[#allocation7 + $0xd58] sm:$0xff] }
 0x6d1   : > { %11876 = vmatpush1.bf16.msra.mxu1 %v20581_v12  ;;  %11771 = vmatprep.subr.bf16.mxu0 %v20588_v28  ;;  %v10539_v12 = vld [vmem:[#allocation7 + $0xc50] sm:$0xff] }
 0x6d2   : > { %11877 = vmatprep.subr.bf16.mxu1 %v20590_v15  ;;  %v10543_v28 = vld [vmem:[#allocation7 + $0xc70] sm:$0xff]  ;;  %v10540_v15 = vld [vmem:[#allocation7 + $0xc58] sm:$0xff] }
 0x6d3   : > { %v20447_v2 = vcombine.low %v10539_v12, %v10543_v28  ;;  %v20449_v26 = vcombine.low %v10540_v15, %v10544_v60 }
 0x6d4   : > { %11772 = vmatpush1.bf16.msra.mxu0 %v20587_v47  ;;  %v20448_v47 = vcombine.high %v10539_v12, %v10543_v28  ;;  %v10579_v12 = vld [vmem:[#allocation7 + $0xd90] sm:$0xff] }
 0x6d5   : > { %11878 = vmatpush1.bf16.msra.mxu1 %v20589_v52  ;;  %11773 = vmatprep.subr.bf16.mxu0 %v20596_v7  ;;  %v25853_v52 = vsel %vm10730_vm2, %v10737_v10, %v10738_v31  ;;  %v20450_v7 = vcombine.high %v10540_v15, %v10544_v60  ;;  %v10583_v28 = vld [vmem:[#allocation7 + $0xdb0] sm:$0xff]  ;;  %v10580_v15 = vld [vmem:[#allocation7 + $0xd98] sm:$0xff] }
 0x6d6   : > { %11879 = vmatprep.subr.bf16.mxu1 %v20598_v30  ;;  %v10547_v30 = vld [vmem:[#allocation7 + $0xc90] sm:$0xff]  ;;  %v10584_v60 = vld [vmem:[#allocation7 + $0xdb8] sm:$0xff] }
 0x6d7   : > { %v20455_v20 = vcombine.low %v10547_v30, %v10551_v57 }
 0x6d8   : > { %11774 = vmatpush1.bf16.msra.mxu0 %v20595_v61  ;;  %v20456_v61 = vcombine.high %v10547_v30, %v10551_v57  ;;  %v10588_v30 = vld [vmem:[#allocation7 + $0xdd8] sm:$0xff] }
 0x6d9   : > { %11880 = vmatpush1.bf16.msra.mxu1 %v20597_v35  ;;  %11775 = vmatprep.subr.bf16.mxu0 %v20604_v25  ;;  %v26292_v35 = vld [vmem:[#allocation57_spill] sm:$0xff]  ;;  %v10592_v57 = vld [vmem:[#allocation7 + $0xdf8] sm:$0xff] }
 0x6da   : > { %11881 = vmatprep.subr.bf16.mxu1 %v20606_v58  ;;  %v10744_v25 = vrot.slane %v26292_v35, 4  ;;  %v20458_v58 = vcombine.high %v10548_v39, %v10552_v33 }
 0x6dc   : > { %11776 = vmatpush1.bf16.msra.mxu0 %v20603_v1  ;;  %v10560_v1 = vld [vmem:[#allocation7 + $0xcf8] sm:$0xff] }
 0x6dd   : > { %11882 = vmatpush1.bf16.msra.mxu1 %v20605_v18  ;;  %11777 = vmatprep.subr.bf16.mxu0 %v20612_v63  ;;  %v20457_v18 = vcombine.low %v10548_v39, %v10552_v33  ;;  %v25861_v63 = vsel %vm10730_vm2, %v10738_v31, %v10744_v25  ;;  %v20466_v55 = vcombine.high %v10556_v62, %v10560_v1  ;;  %v10599_v25 = vld [vmem:[#allocation7 + $0xe30] sm:$0xff] }
 0x6de   : > { %11883 = vmatprep.subr.bf16.mxu1 %v20614_v17  ;;  %v20464_v17 = vcombine.high %v10555_v46, %v10559_v32  ;;  %v20480_v31 = vcombine.high %v10571_v11, %v10575_v19  ;;  %v20487_v39 = vcombine.low %v10579_v12, %v10583_v28  ;;  %v20489_v33 = vcombine.low %v10580_v15, %v10584_v60 }
 0x6e0   : > { %11778 = vmatpush1.bf16.msra.mxu0 %v20611_v24  ;;  %v10568_v24 = vld [vmem:[#allocation7 + $0xd38] sm:$0xff] }
 0x6e1   : > { %11884 = vmatpush1.bf16.msra.mxu1 %v20613_v59  ;;  %11779 = vmatprep.subr.bf16.mxu0 %v20620_v45  ;;  %v20463_v59 = vcombine.low %v10555_v46, %v10559_v32  ;;  %v20465_v45 = vcombine.low %v10556_v62, %v10560_v1  ;;  %v20474_v16 = vcombine.high %v10564_v13, %v10568_v24  ;;  %v10600_v46 = vld [vmem:[#allocation7 + $0xe38] sm:$0xff] }
 0x6e2   : > { %11885 = vmatprep.subr.bf16.mxu1 %v20622_v27  ;;  %v20472_v27 = vcombine.high %v10563_v40, %v10567_v34 }
 0x6e4   : > { %11780 = vmatpush1.bf16.msra.mxu0 %v20619_v9  ;;  %v10576_v9 = vld [vmem:[#allocation7 + $0xd78] sm:$0xff] }
 0x6e5   : > { %11886 = vmatpush1.bf16.msra.mxu1 %v20621_v51  ;;  %11924 = vmatprep.subr.bf16.mxu0 %v20440_v0  ;;  %v20471_v51 = vcombine.low %v10563_v40, %v10567_v34  ;;  %v20473_v0 = vcombine.low %v10564_v13, %v10568_v24  ;;  %v20481_v10 = vcombine.low %v10572_v37, %v10576_v9  ;;  %v10604_v40 = vld [vmem:[#allocation7 + $0xe58] sm:$0xff] }
 0x6e6   : > { %12030 = vmatprep.subr.bf16.mxu1 %v20442_v38  ;;  %v20482_v38 = vcombine.high %v10572_v37, %v10576_v9  ;;  %v10608_v34 = vld [vmem:[#allocation7 + $0xe78] sm:$0xff] }
 0x6e7   : > { %11798 = vmatmul.mubr.bf16.vlgmr.msra.gmra.mrb[72].mxu0 %v25853_v52  ;;  %v20513_v37 = vcombine.low %v10604_v40, %v10608_v34 }
 0x6e8   : > { %11904 = vmatmul.mubr.bf16.vlgmr.msra.gmra.mrb[72].mxu1 %v25853_v52  ;;  %11925 = vmatpush1.bf16.msra.mxu0 %v20439_v50  ;;  %v20488_v50 = vcombine.high %v10579_v12, %v10583_v28  ;;  %v10624_v12 = vld [vmem:[#allocation7 + $0xef8] sm:$0xff] }
 0x6e9   : > { %12031 = vmatpush1.bf16.msra.mxu1 %v20441_v5  ;;  %11926 = vmatprep.subr.bf16.mxu0 %v20448_v47  ;;  %v20490_v5 = vcombine.high %v10580_v15, %v10584_v60  ;;  %v10587_v47 = vld [vmem:[#allocation7 + $0xdd0] sm:$0xff] }
 0x6ea   : > { %12032 = vmatprep.subr.bf16.mxu1 %v20450_v7  ;;  %11807 = vmatprep.mubr.bf16.mxu0 %v26280_v36  ;;  %v10591_v7 = vld [vmem:[#allocation7 + $0xdf0] sm:$0xff] }
 0x6eb   : > { %11913 = vmatprep.mubr.bf16.mxu1 %v26280_v36  ;;  %v20495_v32 = vcombine.low %v10587_v47, %v10591_v7 }
 0x6ec   : > { %11927 = vmatpush1.bf16.msra.mxu0 %v20447_v2  ;;  %v20496_v2 = vcombine.high %v10587_v47, %v10591_v7  ;;  %v10632_v47 = vld [vmem:[#allocation7 + $0xf38] sm:$0xff] }
 0x6ed   : > { %12033 = vmatpush1.bf16.msra.mxu1 %v20449_v26  ;;  %11928 = vmatprep.subr.bf16.mxu0 %v20456_v61  ;;  %v20498_v26 = vcombine.high %v10588_v30, %v10592_v57  ;;  %v10595_v61 = vld [vmem:[#allocation7 + $0xe10] sm:$0xff] }
 0x6ee   : > { %12034 = vmatprep.subr.bf16.mxu1 %v20458_v58  ;;  %v10596_v58 = vld [vmem:[#allocation7 + $0xe18] sm:$0xff]  ;;  %v20504_v62 = vcombine.high %v10595_v61, %v10599_v25 }
 0x6ef   : > { %11808 = vmatmul.mubr.bf16.gmra.mrb[76].mxu0 %v25861_v63  ;;  %v20506_v1 = vcombine.high %v10596_v58, %v10600_v46  ;;  %v20505_v13 = vcombine.low %v10596_v58, %v10600_v46 }
 0x6f0   : > { %11914 = vmatmul.mubr.bf16.gmra.mrb[76].mxu1 %v25861_v63  ;;  %11929 = vmatpush1.bf16.msra.mxu0 %v20455_v20  ;;  %v20497_v20 = vcombine.low %v10588_v30, %v10592_v57 }
 0x6f1   : > { %11956 = vmatprep.mubr.bf16.mxu0 %v25823_v14  ;;  %12035 = vmatpush1.bf16.msra.mxu1 %v20457_v18  ;;  %v10603_v18 = vld [vmem:[#allocation7 + $0xe50] sm:$0xff] }
 0x6f2   : > { %12062 = vmatprep.mubr.bf16.mxu1 %v25823_v14  ;;  %11930 = vmatprep.subr.bf16.mxu0 %v20464_v17  ;;  %v20479_v14 = vcombine.low %v10571_v11, %v10575_v19  ;;  %v10607_v17 = vld [vmem:[#allocation7 + $0xe70] sm:$0xff]  ;;  %v10616_v11 = vld [vmem:[#allocation7 + $0xeb8] sm:$0xff] }
 0x6f3   : > { %12036 = vmatprep.subr.bf16.mxu1 %v20466_v55  ;;  %v20503_v55 = vcombine.low %v10595_v61, %v10599_v25  ;;  %v20512_v24 = vcombine.high %v10603_v18, %v10607_v17  ;;  %v20511_v19 = vcombine.low %v10603_v18, %v10607_v17  ;;  %v10640_v61 = vld [vmem:[#allocation7 + $0xf78] sm:$0xff] }
 0x6f4   : > { %11931 = vmatpush1.bf16.msra.mxu0 %v20463_v59  ;;  %v20514_v59 = vcombine.high %v10604_v40, %v10608_v34  ;;  %v10648_v18 = vld [vmem:[#allocation7 + $0xfb8] sm:$0xff] }
 0x6f5   : > { %12037 = vmatpush1.bf16.msra.mxu1 %v20465_v45  ;;  %11932 = vmatprep.subr.bf16.mxu0 %v20472_v27  ;;  %v10611_v45 = vld [vmem:[#allocation7 + $0xe90] sm:$0xff] }
 0x6f6   : > { %12038 = vmatprep.subr.bf16.mxu1 %v20474_v16  ;;  %v10615_v27 = vld [vmem:[#allocation7 + $0xeb0] sm:$0xff]  ;;  %v10612_v16 = vld [vmem:[#allocation7 + $0xe98] sm:$0xff] }
 0x6f7   : > { %v20520_v9 = vcombine.high %v10611_v45, %v10615_v27  ;;  %v20519_v28 = vcombine.low %v10611_v45, %v10615_v27  ;;  %v20521_v15 = vcombine.low %v10612_v16, %v10616_v11  ;;  %v10656_v45 = vld [vmem:[#allocation7 + $0xff8] sm:$0xff] }
 0x6f8   : > { %11933 = vmatpush1.bf16.msra.mxu0 %v20471_v51  ;;  %v20522_v51 = vcombine.high %v10612_v16, %v10616_v11 }
 0x6f9   : > { %12039 = vmatpush1.bf16.msra.mxu1 %v20473_v0  ;;  %11934 = vmatprep.subr.bf16.mxu0 %v20480_v31  ;;  %v10619_v0 = vld [vmem:[#allocation7 + $0xed0] sm:$0xff] }
 0x6fa   : > { %12040 = vmatprep.subr.bf16.mxu1 %v20482_v38  ;;  %v10623_v31 = vld [vmem:[#allocation7 + $0xef0] sm:$0xff]  ;;  %v10620_v38 = vld [vmem:[#allocation7 + $0xed8] sm:$0xff] }
 0x6fb   : > { %v20528_v60 = vcombine.high %v10619_v0, %v10623_v31  ;;  %v20527_v7 = vcombine.low %v10619_v0, %v10623_v31  ;;  %v20529_v30 = vcombine.low %v10620_v38, %v10624_v12  ;;  %v10664_v0 = vld [vmem:[#allocation7 + $0x1038] sm:$0xff] }
 0x6fc   : > { %11935 = vmatpush1.bf16.msra.mxu0 %v20479_v14  ;;  %v20530_v14 = vcombine.high %v10620_v38, %v10624_v12 }
 0x6fd   : > { %12041 = vmatpush1.bf16.msra.mxu1 %v20481_v10  ;;  %11936 = vmatprep.subr.bf16.mxu0 %v20488_v50  ;;  %v10627_v10 = vld [vmem:[#allocation7 + $0xf10] sm:$0xff] }
 0x6fe   : > { %12042 = vmatprep.subr.bf16.mxu1 %v20490_v5  ;;  %v10631_v50 = vld [vmem:[#allocation7 + $0xf30] sm:$0xff]  ;;  %v10628_v5 = vld [vmem:[#allocation7 + $0xf18] sm:$0xff] }
 0x6ff   : > { %v20536_v57 = vcombine.high %v10627_v10, %v10631_v50  ;;  %v20535_v25 = vcombine.low %v10627_v10, %v10631_v50  ;;  %v20537_v58 = vcombine.low %v10628_v5, %v10632_v47  ;;  %v10672_v10 = vld [vmem:[#allocation7 + $0x1078] sm:$0xff] }
 0x700   : > { %11937 = vmatpush1.bf16.msra.mxu0 %v20487_v39  ;;  %v20538_v39 = vcombine.high %v10628_v5, %v10632_v47 }
 0x701   : > { %12043 = vmatpush1.bf16.msra.mxu1 %v20489_v33  ;;  %11938 = vmatprep.subr.bf16.mxu0 %v20496_v2  ;;  %v10635_v33 = vld [vmem:[#allocation7 + $0xf50] sm:$0xff] }
 0x702   : > { %12044 = vmatprep.subr.bf16.mxu1 %v20498_v26  ;;  %v10639_v2 = vld [vmem:[#allocation7 + $0xf70] sm:$0xff]  ;;  %v10636_v26 = vld [vmem:[#allocation7 + $0xf58] sm:$0xff] }
 0x703   : > { %v20544_v46 = vcombine.high %v10635_v33, %v10639_v2  ;;  %v20543_v17 = vcombine.low %v10635_v33, %v10639_v2  ;;  %v20545_v40 = vcombine.low %v10636_v26, %v10640_v61  ;;  %v10680_v33 = vld [vmem:[#allocation7 + $0x10b8] sm:$0xff] }
 0x704   : > { %11939 = vmatpush1.bf16.msra.mxu0 %v20495_v32  ;;  %v20546_v32 = vcombine.high %v10636_v26, %v10640_v61 }
 0x705   : > { %12045 = vmatpush1.bf16.msra.mxu1 %v20497_v20  ;;  %11940 = vmatprep.subr.bf16.mxu0 %v20504_v62  ;;  %v10643_v20 = vld [vmem:[#allocation7 + $0xf90] sm:$0xff] }
 0x706   : > { %12046 = vmatprep.subr.bf16.mxu1 %v20506_v1  ;;  %v10647_v62 = vld [vmem:[#allocation7 + $0xfb0] sm:$0xff]  ;;  %v10644_v1 = vld [vmem:[#allocation7 + $0xf98] sm:$0xff] }
 0x707   : > { %v20552_v34 = vcombine.high %v10643_v20, %v10647_v62  ;;  %v20551_v27 = vcombine.low %v10643_v20, %v10647_v62  ;;  %v20553_v16 = vcombine.low %v10644_v1, %v10648_v18  ;;  %v10688_v20 = vld [vmem:[#allocation7 + $0x10f8] sm:$0xff] }
 0x708   : > { %11941 = vmatpush1.bf16.msra.mxu0 %v20503_v55  ;;  %v20554_v55 = vcombine.high %v10644_v1, %v10648_v18  ;;  %v10691_v18 = vld [vmem:[#allocation7 + $0x1110] sm:$0xff] }
 0x709   : > { %12047 = vmatpush1.bf16.msra.mxu1 %v20505_v13  ;;  %11942 = vmatprep.subr.bf16.mxu0 %v20512_v24  ;;  %v10651_v13 = vld [vmem:[#allocation7 + $0xfd0] sm:$0xff] }
 0x70a   : > { %12048 = vmatprep.subr.bf16.mxu1 %v20514_v59  ;;  %v10655_v24 = vld [vmem:[#allocation7 + $0xff0] sm:$0xff]  ;;  %v10652_v59 = vld [vmem:[#allocation7 + $0xfd8] sm:$0xff] }
 0x70b   : > { %v20560_v11 = vcombine.high %v10651_v13, %v10655_v24  ;;  %v20559_v31 = vcombine.low %v10651_v13, %v10655_v24  ;;  %v20561_v38 = vcombine.low %v10652_v59, %v10656_v45 }
 0x70c   : > { %11943 = vmatpush1.bf16.msra.mxu0 %v20511_v19  ;;  %v20562_v19 = vcombine.high %v10652_v59, %v10656_v45  ;;  %v10699_v45 = vld [vmem:[#allocation7 + $0x1150] sm:$0xff] }
 0x70d   : > { %12049 = vmatpush1.bf16.msra.mxu1 %v20513_v37  ;;  %11944 = vmatprep.subr.bf16.mxu0 %v20520_v9  ;;  %v10659_v37 = vld [vmem:[#allocation7 + $0x1010] sm:$0xff] }
 0x70e   : > { %12050 = vmatprep.subr.bf16.mxu1 %v20522_v51  ;;  %v10663_v9 = vld [vmem:[#allocation7 + $0x1030] sm:$0xff]  ;;  %v10660_v51 = vld [vmem:[#allocation7 + $0x1018] sm:$0xff] }
 0x70f   : > { %v20568_v12 = vcombine.high %v10659_v37, %v10663_v9  ;;  %v20567_v50 = vcombine.low %v10659_v37, %v10663_v9  ;;  %v20569_v5 = vcombine.low %v10660_v51, %v10664_v0 }
 0x710   : > { %11945 = vmatpush1.bf16.msra.mxu0 %v20519_v28  ;;  %v20570_v28 = vcombine.high %v10660_v51, %v10664_v0  ;;  %v10707_v51 = vld [vmem:[#allocation7 + $0x1190] sm:$0xff] }
 0x711   : > { %12051 = vmatpush1.bf16.msra.mxu1 %v20521_v15  ;;  %11946 = vmatprep.subr.bf16.mxu0 %v20528_v60  ;;  %v10667_v15 = vld [vmem:[#allocation7 + $0x1050] sm:$0xff] }
 0x712   : > { %12052 = vmatprep.subr.bf16.mxu1 %v20530_v14  ;;  %v10671_v60 = vld [vmem:[#allocation7 + $0x1070] sm:$0xff]  ;;  %v10668_v14 = vld [vmem:[#allocation7 + $0x1058] sm:$0xff] }
 0x713   : > { %v20576_v47 = vcombine.high %v10667_v15, %v10671_v60  ;;  %v20575_v2 = vcombine.low %v10667_v15, %v10671_v60  ;;  %v20577_v26 = vcombine.low %v10668_v14, %v10672_v10  ;;  %v10711_v0 = vld [vmem:[#allocation7 + $0x11b0] sm:$0xff] }
 0x714   : > { %11947 = vmatpush1.bf16.msra.mxu0 %v20527_v7  ;;  %v20578_v7 = vcombine.high %v10668_v14, %v10672_v10  ;;  %v20616_v15 = vcombine.high %v10707_v51, %v10711_v0  ;;  %v10715_v14 = vld [vmem:[#allocation7 + $0x11d0] sm:$0xff] }
 0x715   : > { %12053 = vmatpush1.bf16.msra.mxu1 %v20529_v30  ;;  %11948 = vmatprep.subr.bf16.mxu0 %v20536_v57  ;;  %v10675_v30 = vld [vmem:[#allocation7 + $0x1090] sm:$0xff] }
 0x716   : > { %12054 = vmatprep.subr.bf16.mxu1 %v20538_v39  ;;  %v10679_v57 = vld [vmem:[#allocation7 + $0x10b0] sm:$0xff]  ;;  %v10676_v39 = vld [vmem:[#allocation7 + $0x1098] sm:$0xff] }
 0x717   : > { %v20584_v61 = vcombine.high %v10675_v30, %v10679_v57  ;;  %v20585_v62 = vcombine.low %v10676_v39, %v10680_v33  ;;  %v10719_v10 = vld [vmem:[#allocation7 + $0x11f0] sm:$0xff] }
 0x718   : > { %11949 = vmatpush1.bf16.msra.mxu0 %v20535_v25  ;;  %v20586_v25 = vcombine.high %v10676_v39, %v10680_v33  ;;  %v12169_v39 = vld [vmem:[#allocation7 + $0x1200] sm:$0xff] }
 0x719   : > { %12055 = vmatpush1.bf16.msra.mxu1 %v20537_v58  ;;  %11950 = vmatprep.subr.bf16.mxu0 %v20544_v46  ;;  %v10683_v58 = vld [vmem:[#allocation7 + $0x10d0] sm:$0xff]  ;;  %v12173_v33 = vld [vmem:[#allocation7 + $0x1220] sm:$0xff] }
 0x71a   : > { %12056 = vmatprep.subr.bf16.mxu1 %v20546_v32  ;;  %v10687_v46 = vld [vmem:[#allocation7 + $0x10f0] sm:$0xff]  ;;  %v10684_v32 = vld [vmem:[#allocation7 + $0x10d8] sm:$0xff] }
 0x71b   : > { %v20592_v1 = vcombine.high %v10683_v58, %v10687_v46  ;;  %v20593_v13 = vcombine.low %v10684_v32, %v10688_v20 }
 0x71c   : > { %11951 = vmatpush1.bf16.msra.mxu0 %v20543_v17  ;;  %v10695_v17 = vld [vmem:[#allocation7 + $0x1130] sm:$0xff] }
 0x71d   : > { %12057 = vmatpush1.bf16.msra.mxu1 %v20545_v40  ;;  %11952 = vmatprep.subr.bf16.mxu0 %v20552_v34  ;;  %v10692_v40 = vld [vmem:[#allocation7 + $0x1118] sm:$0xff]  ;;  %v20600_v24 = vcombine.high %v10691_v18, %v10695_v17 }
 0x71e   : > { %12058 = vmatprep.subr.bf16.mxu1 %v20554_v55  ;;  %v10696_v34 = vld [vmem:[#allocation7 + $0x1138] sm:$0xff]  ;;  %v20591_v55 = vcombine.low %v10683_v58, %v10687_v46  ;;  %v20628_v58 = vcombine.high %v12169_v39, %v12173_v33 }
 0x71f   : > { %v20602_v59 = vcombine.high %v10692_v40, %v10696_v34 }
 0x720   : > { %11953 = vmatpush1.bf16.msra.mxu0 %v20551_v27  ;;  %v10703_v27 = vld [vmem:[#allocation7 + $0x1170] sm:$0xff] }
 0x721   : > { %12059 = vmatpush1.bf16.msra.mxu1 %v20553_v16  ;;  %11954 = vmatprep.subr.bf16.mxu0 %v20560_v11  ;;  %v10700_v16 = vld [vmem:[#allocation7 + $0x1158] sm:$0xff]  ;;  %v20608_v37 = vcombine.high %v10699_v45, %v10703_v27 }
 0x722   : > { %12060 = vmatprep.subr.bf16.mxu1 %v20562_v19  ;;  %v10704_v11 = vld [vmem:[#allocation7 + $0x1178] sm:$0xff]  ;;  %v20601_v19 = vcombine.low %v10692_v40, %v10696_v34  ;;  %v12185_v40 = vld [vmem:[#allocation7 + $0x1280] sm:$0xff] }
 0x723   : > { %v20610_v9 = vcombine.high %v10700_v16, %v10704_v11  ;;  %v12189_v34 = vld [vmem:[#allocation7 + $0x12a0] sm:$0xff] }
 0x724   : > { %11955 = vmatpush1.bf16.msra.mxu0 %v20559_v31  ;;  %v10708_v31 = vld [vmem:[#allocation7 + $0x1198] sm:$0xff] }
 0x725   : > { %12061 = vmatpush1.bf16.msra.mxu1 %v20561_v38  ;;  %11977 = vmatprep.subr.bf16.mxu0 %v20568_v12  ;;  %v10712_v38 = vld [vmem:[#allocation7 + $0x11b8] sm:$0xff]  ;;  %v20607_v12 = vcombine.low %v10699_v45, %v10703_v27  ;;  %v20644_v45 = vcombine.high %v12185_v40, %v12189_v34 }
 0x726   : > { %12083 = vmatprep.subr.bf16.mxu1 %v20570_v28  ;;  %v20609_v28 = vcombine.low %v10700_v16, %v10704_v11  ;;  %v20618_v60 = vcombine.high %v10708_v31, %v10712_v38  ;;  %v12193_v16 = vld [vmem:[#allocation7 + $0x12c0] sm:$0xff] }
 0x727   : > { %11957 = vmatmul.mubr.bf16.vlgmr.msra.gmra.mrb[80].mxu0 %v25831_v44  ;;  %v12197_v11 = vld [vmem:[#allocation7 + $0x12e0] sm:$0xff] }
 0x728   : > { %12063 = vmatmul.mubr.bf16.vlgmr.msra.gmra.mrb[80].mxu1 %v25831_v44  ;;  %11966 = vmatprep.mubr.bf16.mxu0 %v25837_v21  ;;  %v20583_v44 = vcombine.low %v10675_v30, %v10679_v57  ;;  %v20624_v30 = vcombine.high %v10715_v14, %v10719_v10 }
 0x729   : > { %11978 = vmatpush1.bf16.msra.mxu0 %v20567_v50  ;;  %12072 = vmatprep.mubr.bf16.mxu1 %v25837_v21  ;;  %v20594_v21 = vcombine.high %v10684_v32, %v10688_v20  ;;  %v10716_v50 = vld [vmem:[#allocation7 + $0x11d8] sm:$0xff]  ;;  %v12177_v32 = vld [vmem:[#allocation7 + $0x1240] sm:$0xff] }
 0x72a   : > { %12084 = vmatpush1.bf16.msra.mxu1 %v20569_v5  ;;  %11979 = vmatprep.subr.bf16.mxu0 %v20576_v47  ;;  %v10720_v5 = vld [vmem:[#allocation7 + $0x11f8] sm:$0xff]  ;;  %v20615_v47 = vcombine.low %v10707_v51, %v10711_v0  ;;  %v12181_v20 = vld [vmem:[#allocation7 + $0x1260] sm:$0xff]  ;;  %v12373_v51 = vrot.slane %v25657_v8, 4  ;;  %v20652_v0 = vcombine.high %v12193_v16, %v12197_v11 }
 0x72b   : > { %12085 = vmatprep.subr.bf16.mxu1 %v20578_v7  ;;  %v20617_v7 = vcombine.low %v10708_v31, %v10712_v38  ;;  %v20626_v57 = vcombine.high %v10716_v50, %v10720_v5  ;;  %v12201_v31 = vld [vmem:[#allocation7 + $0x1300] sm:$0xff] }
 0x72c   : > { %v12205_v38 = vld [vmem:[#allocation7 + $0x1320] sm:$0xff] }
 0x72d   : > { %11980 = vmatpush1.bf16.msra.mxu0 %v20575_v2  ;;  %v12170_v2 = vld [vmem:[#allocation7 + $0x1208] sm:$0xff] }
 0x72e   : > { %12086 = vmatpush1.bf16.msra.mxu1 %v20577_v26  ;;  %11981 = vmatprep.subr.bf16.mxu0 %v20584_v61  ;;  %v12174_v26 = vld [vmem:[#allocation7 + $0x1228] sm:$0xff]  ;;  %v20623_v61 = vcombine.low %v10715_v14, %v10719_v10  ;;  %v20651_v14 = vcombine.low %v12193_v16, %v12197_v11  ;;  %v20660_v10 = vcombine.high %v12201_v31, %v12205_v38 }
 0x72f   : > { %11967 = vmatmul.mubr.bf16.gmra.mrb[84].mxu0 %v25844_v48  ;;  %12087 = vmatprep.subr.bf16.mxu1 %v20586_v25  ;;  %v20625_v25 = vcombine.low %v10716_v50, %v10720_v5  ;;  %v20630_v46 = vcombine.high %v12170_v2, %v12174_v26  ;;  %v12209_v5 = vld [vmem:[#allocation7 + $0x1340] sm:$0xff] }
 0x730   : > { %12073 = vmatmul.mubr.bf16.gmra.mrb[84].mxu1 %v25844_v48  ;;  %12009 = vmatprep.mubr.bf16.mxu0 %v26280_v36  ;;  %v20599_v48 = vcombine.low %v10691_v18, %v10695_v17  ;;  %v20636_v18 = vcombine.high %v12177_v32, %v12181_v20 }
 0x731   : > { %11982 = vmatpush1.bf16.msra.mxu0 %v20583_v44  ;;  %12115 = vmatprep.mubr.bf16.mxu1 %v26280_v36  ;;  %v12178_v44 = vld [vmem:[#allocation7 + $0x1248] sm:$0xff] }
 0x732   : > { %12088 = vmatpush1.bf16.msra.mxu1 %v20585_v62  ;;  %11983 = vmatprep.subr.bf16.mxu0 %v20592_v1  ;;  %v12182_v62 = vld [vmem:[#allocation7 + $0x1268] sm:$0xff]  ;;  %v20627_v1 = vcombine.low %v12169_v39, %v12173_v33 }
 0x733   : > { %12089 = vmatprep.subr.bf16.mxu1 %v20594_v21  ;;  %v20629_v21 = vcombine.low %v12170_v2, %v12174_v26  ;;  %v20638_v17 = vcombine.high %v12178_v44, %v12182_v62  ;;  %v12217_v2 = vld [vmem:[#allocation7 + $0x1380] sm:$0xff] }
 0x734   : > { %v12221_v26 = vld [vmem:[#allocation7 + $0x13a0] sm:$0xff] }
 0x735   : > { %11984 = vmatpush1.bf16.msra.mxu0 %v20591_v55  ;;  %v12186_v55 = vld [vmem:[#allocation7 + $0x1288] sm:$0xff] }
 0x736   : > { %12090 = vmatpush1.bf16.msra.mxu1 %v20593_v13  ;;  %11985 = vmatprep.subr.bf16.mxu0 %v20600_v24  ;;  %v12190_v13 = vld [vmem:[#allocation7 + $0x12a8] sm:$0xff]  ;;  %v20635_v24 = vcombine.low %v12177_v32, %v12181_v20  ;;  %v20676_v32 = vcombine.high %v12217_v2, %v12221_v26 }
 0x737   : > { %12091 = vmatprep.subr.bf16.mxu1 %v20602_v59  ;;  %v20637_v59 = vcombine.low %v12178_v44, %v12182_v62  ;;  %v20646_v27 = vcombine.high %v12186_v55, %v12190_v13  ;;  %v12225_v44 = vld [vmem:[#allocation7 + $0x13c0] sm:$0xff] }
 0x738   : > { %v12229_v62 = vld [vmem:[#allocation7 + $0x13e0] sm:$0xff] }
 0x739   : > { %11986 = vmatpush1.bf16.msra.mxu0 %v20599_v48  ;;  %v20643_v48 = vcombine.low %v12185_v40, %v12189_v34  ;;  %v20684_v40 = vcombine.high %v12225_v44, %v12229_v62 }
 0x73a   : > { %12092 = vmatpush1.bf16.msra.mxu1 %v20601_v19  ;;  %11987 = vmatprep.subr.bf16.mxu0 %v20608_v37  ;;  %v12374_v19 = vrot.slane %v25708_v41, 4  ;;  %v12194_v37 = vld [vmem:[#allocation7 + $0x12c8] sm:$0xff] }
 0x73b   : > { %12093 = vmatprep.subr.bf16.mxu1 %v20610_v9  ;;  %v20645_v9 = vcombine.low %v12186_v55, %v12190_v13  ;;  %v12233_v55 = vld [vmem:[#allocation7 + $0x1400] sm:$0xff] }
 0x73c   : > { %v12237_v13 = vld [vmem:[#allocation7 + $0x1420] sm:$0xff] }
 0x73d   : > { %11988 = vmatpush1.bf16.msra.mxu0 %v20607_v12  ;;  %v20692_v16 = vcombine.high %v12233_v55, %v12237_v13 }
 0x73e   : > { %12094 = vmatpush1.bf16.msra.mxu1 %v20609_v28  ;;  %11989 = vmatprep.subr.bf16.mxu0 %v20616_v15  ;;  %v12202_v28 = vld [vmem:[#allocation7 + $0x1308] sm:$0xff] }
 0x73f   : > { %12095 = vmatprep.subr.bf16.mxu1 %v20618_v60  ;;  %v12206_v15 = vld [vmem:[#allocation7 + $0x1328] sm:$0xff]  ;;  %v25886_v60 = vsel %vm10730_vm2, %v12373_v51, %v12374_v19  ;;  %v20691_v51 = vcombine.low %v12233_v55, %v12237_v13  ;;  %v12281_v13 = vld [vmem:[#allocation7 + $0x1580] sm:$0xff] }
 0x740   : > { %v20662_v50 = vcombine.high %v12202_v28, %v12206_v15 }
 0x741   : > { %11990 = vmatpush1.bf16.msra.mxu0 %v20615_v47  ;;  %v12213_v47 = vld [vmem:[#allocation7 + $0x1360] sm:$0xff] }
 0x742   : > { %12096 = vmatpush1.bf16.msra.mxu1 %v20617_v7  ;;  %11991 = vmatprep.subr.bf16.mxu0 %v20624_v30  ;;  %v12214_v7 = vld [vmem:[#allocation7 + $0x1368] sm:$0xff]  ;;  %v20659_v30 = vcombine.low %v12201_v31, %v12205_v38  ;;  %v20668_v39 = vcombine.high %v12209_v5, %v12213_v47 }
 0x743   : > { %12097 = vmatprep.subr.bf16.mxu1 %v20626_v57  ;;  %v20661_v57 = vcombine.low %v12202_v28, %v12206_v15  ;;  %v12253_v28 = vld [vmem:[#allocation7 + $0x14a0] sm:$0xff]  ;;  %v12250_v15 = vld [vmem:[#allocation7 + $0x1488] sm:$0xff] }
 0x745   : > { %11992 = vmatpush1.bf16.msra.mxu0 %v20623_v61  ;;  %v12218_v61 = vld [vmem:[#allocation7 + $0x1388] sm:$0xff] }
 0x746   : > { %12098 = vmatpush1.bf16.msra.mxu1 %v20625_v25  ;;  %13351 = vmatprep.subr.bf16.mxu0 %v20628_v58  ;;  %v12222_v25 = vld [vmem:[#allocation7 + $0x13a8] sm:$0xff]  ;;  %v20667_v58 = vcombine.low %v12209_v5, %v12213_v47  ;;  %v12257_v47 = vld [vmem:[#allocation7 + $0x14c0] sm:$0xff] }
 0x747   : > { %13457 = vmatprep.subr.bf16.mxu1 %v20630_v46  ;;  %v20678_v20 = vcombine.high %v12218_v61, %v12222_v25 }
 0x748   : > { %12010 = vmatmul.mubr.bf16.vlgmr.msra.gmra.mrb[80].mxu0 %v25853_v52 }
 0x749   : > { %12116 = vmatmul.mubr.bf16.vlgmr.msra.gmra.mrb[80].mxu1 %v25853_v52  ;;  %13352 = vmatpush1.bf16.msra.mxu0 %v20627_v1  ;;  %v12198_v52 = vld [vmem:[#allocation7 + $0x12e8] sm:$0xff] }
 0x74a   : > { %13458 = vmatpush1.bf16.msra.mxu1 %v20629_v21  ;;  %13353 = vmatprep.subr.bf16.mxu0 %v20636_v18  ;;  %v20654_v12 = vcombine.high %v12194_v37, %v12198_v52  ;;  %v20653_v8 = vcombine.low %v12194_v37, %v12198_v52  ;;  %v12226_v1 = vld [vmem:[#allocation7 + $0x13c8] sm:$0xff]  ;;  %v20675_v18 = vcombine.low %v12217_v2, %v12221_v26  ;;  %v12245_v37 = vld [vmem:[#allocation7 + $0x1460] sm:$0xff] }
 0x74b   : > { %13459 = vmatprep.subr.bf16.mxu1 %v20638_v17  ;;  %12019 = vmatprep.mubr.bf16.mxu0 %v26280_v36  ;;  %v12230_v21 = vld [vmem:[#allocation7 + $0x13e8] sm:$0xff]  ;;  %v20677_v17 = vcombine.low %v12218_v61, %v12222_v25  ;;  %v12265_v26 = vld [vmem:[#allocation7 + $0x1500] sm:$0xff] }
 0x74c   : > { %12125 = vmatprep.mubr.bf16.mxu1 %v26280_v36  ;;  %v20686_v34 = vcombine.high %v12226_v1, %v12230_v21  ;;  %v12242_v52 = vld [vmem:[#allocation7 + $0x1448] sm:$0xff]  ;;  %v12269_v61 = vld [vmem:[#allocation7 + $0x1520] sm:$0xff] }
 0x74d   : > { %13354 = vmatpush1.bf16.msra.mxu0 %v20635_v24  ;;  %v12234_v24 = vld [vmem:[#allocation7 + $0x1408] sm:$0xff] }
 0x74e   : > { %13460 = vmatpush1.bf16.msra.mxu1 %v20637_v59  ;;  %13355 = vmatprep.subr.bf16.mxu0 %v20644_v45  ;;  %v12238_v59 = vld [vmem:[#allocation7 + $0x1428] sm:$0xff]  ;;  %v20683_v45 = vcombine.low %v12225_v44, %v12229_v62  ;;  %v12273_v62 = vld [vmem:[#allocation7 + $0x1540] sm:$0xff] }
 0x74f   : > { %13461 = vmatprep.subr.bf16.mxu1 %v20646_v27  ;;  %v20685_v27 = vcombine.low %v12226_v1, %v12230_v21  ;;  %v20694_v11 = vcombine.high %v12234_v24, %v12238_v59  ;;  %v12266_v25 = vld [vmem:[#allocation7 + $0x1508] sm:$0xff]  ;;  %v12277_v1 = vld [vmem:[#allocation7 + $0x1560] sm:$0xff] }
 0x750   : > { %12020 = vmatmul.mubr.bf16.gmra.mrb[84].mxu0 %v25861_v63  ;;  %v12274_v21 = vld [vmem:[#allocation7 + $0x1548] sm:$0xff] }
 0x751   : > { %12126 = vmatmul.mubr.bf16.gmra.mrb[84].mxu1 %v25861_v63  ;;  %13356 = vmatpush1.bf16.msra.mxu0 %v20643_v48  ;;  %v12210_v63 = vld [vmem:[#allocation7 + $0x1348] sm:$0xff]  ;;  %v12241_v48 = vld [vmem:[#allocation7 + $0x1440] sm:$0xff] }
 0x752   : > { %13383 = vmatprep.mubr.bf16.mxu0 %v25886_v60  ;;  %13462 = vmatpush1.bf16.msra.mxu1 %v20645_v9  ;;  %v20670_v33 = vcombine.high %v12210_v63, %v12214_v7  ;;  %v20669_v46 = vcombine.low %v12210_v63, %v12214_v7  ;;  %v12246_v9 = vld [vmem:[#allocation7 + $0x1468] sm:$0xff]  ;;  %v20700_v31 = vcombine.high %v12241_v48, %v12245_v37  ;;  %v12261_v63 = vld [vmem:[#allocation7 + $0x14e0] sm:$0xff] }
 0x753   : > { %13489 = vmatprep.mubr.bf16.mxu1 %v25886_v60  ;;  %13357 = vmatprep.subr.bf16.mxu0 %v20652_v0  ;;  %v20693_v0 = vcombine.low %v12234_v24, %v12238_v59  ;;  %v20702_v38 = vcombine.high %v12242_v52, %v12246_v9  ;;  %v12258_v7 = vld [vmem:[#allocation7 + $0x14c8] sm:$0xff]  ;;  %v12285_v24 = vld [vmem:[#allocation7 + $0x15a0] sm:$0xff] }
 0x754   : > { %13463 = vmatprep.subr.bf16.mxu1 %v20654_v12  ;;  %v12249_v12 = vld [vmem:[#allocation7 + $0x1480] sm:$0xff]  ;;  %v12282_v59 = vld [vmem:[#allocation7 + $0x1588] sm:$0xff] }
 0x755   : > { %13358 = vmatpush1.bf16.msra.mxu0 %v20651_v14  ;;  %v12254_v14 = vld [vmem:[#allocation7 + $0x14a8] sm:$0xff] }
 0x756   : > { %13464 = vmatpush1.bf16.msra.mxu1 %v20653_v8  ;;  %13359 = vmatprep.subr.bf16.mxu0 %v20660_v10  ;;  %v20699_v8 = vcombine.low %v12241_v48, %v12245_v37  ;;  %v20701_v10 = vcombine.low %v12242_v52, %v12246_v9  ;;  %v20710_v5 = vcombine.high %v12250_v15, %v12254_v14  ;;  %v12289_v37 = vld [vmem:[#allocation7 + $0x15c0] sm:$0xff]  ;;  %v12290_v9 = vld [vmem:[#allocation7 + $0x15c8] sm:$0xff] }
 0x757   : > { %13465 = vmatprep.subr.bf16.mxu1 %v20662_v50  ;;  %v20708_v50 = vcombine.high %v12249_v12, %v12253_v28  ;;  %v12293_v52 = vld [vmem:[#allocation7 + $0x15e0] sm:$0xff] }
 0x759   : > { %13360 = vmatpush1.bf16.msra.mxu0 %v20659_v30  ;;  %v12262_v30 = vld [vmem:[#allocation7 + $0x14e8] sm:$0xff] }
 0x75a   : > { %13466 = vmatpush1.bf16.msra.mxu1 %v20661_v57  ;;  %13361 = vmatprep.subr.bf16.mxu0 %v20668_v39  ;;  %v20707_v57 = vcombine.low %v12249_v12, %v12253_v28  ;;  %v20709_v39 = vcombine.low %v12250_v15, %v12254_v14  ;;  %v20718_v2 = vcombine.high %v12258_v7, %v12262_v30  ;;  %v12297_v28 = vld [vmem:[#allocation7 + $0x1600] sm:$0xff]  ;;  %v12298_v14 = vld [vmem:[#allocation7 + $0x1608] sm:$0xff] }
 0x75b   : > { %13467 = vmatprep.subr.bf16.mxu1 %v20670_v33  ;;  %v20716_v33 = vcombine.high %v12257_v47, %v12261_v63  ;;  %v12301_v15 = vld [vmem:[#allocation7 + $0x1620] sm:$0xff] }
 0x75d   : > { %13362 = vmatpush1.bf16.msra.mxu0 %v20667_v58  ;;  %v12270_v58 = vld [vmem:[#allocation7 + $0x1528] sm:$0xff] }
 0x75e   : > { %13468 = vmatpush1.bf16.msra.mxu1 %v20669_v46  ;;  %13363 = vmatprep.subr.bf16.mxu0 %v20676_v32  ;;  %v20715_v46 = vcombine.low %v12257_v47, %v12261_v63  ;;  %v20717_v32 = vcombine.low %v12258_v7, %v12262_v30  ;;  %v20726_v44 = vcombine.high %v12266_v25, %v12270_v58  ;;  %v12371_v47 = vrot.slane %v25717_v3, 4  ;;  %v12305_v30 = vld [vmem:[#allocation7 + $0x1640] sm:$0xff] }
 0x75f   : > { %13469 = vmatprep.subr.bf16.mxu1 %v20678_v20  ;;  %v20724_v20 = vcombine.high %v12265_v26, %v12269_v61  ;;  %v12381_v7 = vrot.slane %v25753_v54, 4 }
 0x761   : > { %13364 = vmatpush1.bf16.msra.mxu0 %v20675_v18  ;;  %v12278_v18 = vld [vmem:[#allocation7 + $0x1568] sm:$0xff] }
 0x762   : > { %13470 = vmatpush1.bf16.msra.mxu1 %v20677_v17  ;;  %13365 = vmatprep.subr.bf16.mxu0 %v20684_v40  ;;  %v20723_v17 = vcombine.low %v12265_v26, %v12269_v61  ;;  %v20725_v40 = vcombine.low %v12266_v25, %v12270_v58  ;;  %v20734_v55 = vcombine.high %v12274_v21, %v12278_v18 }
 0x763   : > { %13471 = vmatprep.subr.bf16.mxu1 %v20686_v34  ;;  %v20732_v34 = vcombine.high %v12273_v62, %v12277_v1  ;;  %v20755_v26 = vcombine.low %v12297_v28, %v12301_v15 }
 0x765   : > { %13366 = vmatpush1.bf16.msra.mxu0 %v20683_v45  ;;  %v12286_v45 = vld [vmem:[#allocation7 + $0x15a8] sm:$0xff] }
 0x766   : > { %13472 = vmatpush1.bf16.msra.mxu1 %v20685_v27  ;;  %13367 = vmatprep.subr.bf16.mxu0 %v20692_v16  ;;  %v20731_v27 = vcombine.low %v12273_v62, %v12277_v1  ;;  %v20733_v16 = vcombine.low %v12274_v21, %v12278_v18  ;;  %v20742_v48 = vcombine.high %v12282_v59, %v12286_v45  ;;  %v12318_v62 = vld [vmem:[#allocation7 + $0x16a8] sm:$0xff]  ;;  %v12379_v18 = vrot.slane %v25760_v53, 4 }
 0x767   : > { %13473 = vmatprep.subr.bf16.mxu1 %v20694_v11  ;;  %v20740_v11 = vcombine.high %v12281_v13, %v12285_v24 }
 0x769   : > { %13368 = vmatpush1.bf16.msra.mxu0 %v20691_v51  ;;  %v12294_v51 = vld [vmem:[#allocation7 + $0x15e8] sm:$0xff] }
 0x76a   : > { %13474 = vmatpush1.bf16.msra.mxu1 %v20693_v0  ;;  %13369 = vmatprep.subr.bf16.mxu0 %v20700_v31  ;;  %v20739_v0 = vcombine.low %v12281_v13, %v12285_v24  ;;  %v20741_v31 = vcombine.low %v12282_v59, %v12286_v45  ;;  %v20750_v12 = vcombine.high %v12290_v9, %v12294_v51  ;;  %v12326_v13 = vld [vmem:[#allocation7 + $0x16e8] sm:$0xff] }
 0x76b   : > { %13475 = vmatprep.subr.bf16.mxu1 %v20702_v38  ;;  %v20748_v38 = vcombine.high %v12289_v37, %v12293_v52  ;;  %v25907_v59 = vsel %vm10730_vm2, %v12371_v47, %v12379_v18  ;;  %v12176_v18 = vld [vmem:[#allocation7 + $0x1238] sm:$0xff] }
 0x76d   : > { %13370 = vmatpush1.bf16.msra.mxu0 %v20699_v8  ;;  %v12302_v8 = vld [vmem:[#allocation7 + $0x1628] sm:$0xff] }
 0x76e   : > { %13476 = vmatpush1.bf16.msra.mxu1 %v20701_v10  ;;  %13371 = vmatprep.subr.bf16.mxu0 %v20708_v50  ;;  %v20747_v10 = vcombine.low %v12289_v37, %v12293_v52  ;;  %v20749_v50 = vcombine.low %v12290_v9, %v12294_v51  ;;  %v20758_v63 = vcombine.high %v12298_v14, %v12302_v8  ;;  %v12330_v37 = vld [vmem:[#allocation7 + $0x1708] sm:$0xff] }
 0x76f   : > { %13477 = vmatprep.subr.bf16.mxu1 %v20710_v5  ;;  %v20756_v5 = vcombine.high %v12297_v28, %v12301_v15  ;;  %v20757_v25 = vcombine.low %v12298_v14, %v12302_v8  ;;  %v12334_v52 = vld [vmem:[#allocation7 + $0x1728] sm:$0xff] }
 0x770   : > { %v12338_v28 = vld [vmem:[#allocation7 + $0x1748] sm:$0xff]  ;;  %v20789_v8 = vcombine.low %v12330_v37, %v12334_v52 }
 0x771   : > { %13372 = vmatpush1.bf16.msra.mxu0 %v20707_v57  ;;  %v12309_v57 = vld [vmem:[#allocation7 + $0x1660] sm:$0xff]  ;;  %v12342_v15 = vld [vmem:[#allocation7 + $0x1768] sm:$0xff] }
 0x772   : > { %13478 = vmatpush1.bf16.msra.mxu1 %v20709_v39  ;;  %13373 = vmatprep.subr.bf16.mxu0 %v20716_v33  ;;  %v12370_v39 = vrot.slane %v25659_v6, 4  ;;  %v12306_v33 = vld [vmem:[#allocation7 + $0x1648] sm:$0xff]  ;;  %v20764_v58 = vcombine.high %v12305_v30, %v12309_v57  ;;  %v12313_v6 = vld [vmem:[#allocation7 + $0x1680] sm:$0xff]  ;;  %v20763_v1 = vcombine.low %v12305_v30, %v12309_v57  ;;  %v20797_v57 = vcombine.low %v12338_v28, %v12342_v15 }
 0x773   : > { %13479 = vmatprep.subr.bf16.mxu1 %v20718_v2  ;;  %v12310_v2 = vld [vmem:[#allocation7 + $0x1668] sm:$0xff] }
 0x774   : > { %v25894_v61 = vsel %vm10730_vm2, %v12370_v39, %v12371_v47  ;;  %v20765_v21 = vcombine.low %v12306_v33, %v12310_v2  ;;  %v12349_v47 = vld [vmem:[#allocation7 + $0x17a0] sm:$0xff] }
 0x775   : > { %13374 = vmatpush1.bf16.msra.mxu0 %v20715_v46  ;;  %v25900_v46 = vsel %vm10730_vm2, %v12374_v19, %v12381_v7  ;;  %v12350_v7 = vld [vmem:[#allocation7 + $0x17a8] sm:$0xff] }
 0x776   : > { %13480 = vmatpush1.bf16.msra.mxu1 %v20717_v32  ;;  %13375 = vmatprep.subr.bf16.mxu0 %v20724_v20  ;;  %v20766_v32 = vcombine.high %v12306_v33, %v12310_v2  ;;  %v12317_v20 = vld [vmem:[#allocation7 + $0x16a0] sm:$0xff] }
 0x777   : > { %13481 = vmatprep.subr.bf16.mxu1 %v20726_v44  ;;  %v12314_v44 = vld [vmem:[#allocation7 + $0x1688] sm:$0xff]  ;;  %v20772_v19 = vcombine.high %v12313_v6, %v12317_v20  ;;  %v20771_v24 = vcombine.low %v12313_v6, %v12317_v20  ;;  %v12353_v2 = vld [vmem:[#allocation7 + $0x17c0] sm:$0xff] }
 0x778   : > { %v20773_v45 = vcombine.low %v12314_v44, %v12318_v62 }
 0x779   : > { %13376 = vmatpush1.bf16.msra.mxu0 %v20723_v17  ;;  %v20774_v17 = vcombine.high %v12314_v44, %v12318_v62  ;;  %v12171_v62 = vld [vmem:[#allocation7 + $0x1210] sm:$0xff] }
 0x77a   : > { %13482 = vmatpush1.bf16.msra.mxu1 %v20725_v40  ;;  %13377 = vmatprep.subr.bf16.mxu0 %v20732_v34  ;;  %v12321_v40 = vld [vmem:[#allocation7 + $0x16c0] sm:$0xff] }
 0x77b   : > { %13483 = vmatprep.subr.bf16.mxu1 %v20734_v55  ;;  %v12325_v34 = vld [vmem:[#allocation7 + $0x16e0] sm:$0xff]  ;;  %v12322_v55 = vld [vmem:[#allocation7 + $0x16c8] sm:$0xff] }
 0x77c   : > { %v20779_v9 = vcombine.low %v12321_v40, %v12325_v34  ;;  %v20781_v51 = vcombine.low %v12322_v55, %v12326_v13 }
 0x77d   : > { %13378 = vmatpush1.bf16.msra.mxu0 %v20731_v27  ;;  %v20780_v27 = vcombine.high %v12321_v40, %v12325_v34  ;;  %v12377_v34 = vrot.slane %v25719_v49, 4 }
 0x77e   : > { %13484 = vmatpush1.bf16.msra.mxu1 %v20733_v16  ;;  %13379 = vmatprep.subr.bf16.mxu0 %v20740_v11  ;;  %v20782_v16 = vcombine.high %v12322_v55, %v12326_v13  ;;  %v12329_v11 = vld [vmem:[#allocation7 + $0x1700] sm:$0xff]  ;;  %v12179_v13 = vld [vmem:[#allocation7 + $0x1250] sm:$0xff] }
 0x77f   : > { %13485 = vmatprep.subr.bf16.mxu1 %v20742_v48  ;;  %v12333_v48 = vld [vmem:[#allocation7 + $0x1720] sm:$0xff] }
 0x780   : > { %v20787_v14 = vcombine.low %v12329_v11, %v12333_v48 }
 0x781   : > { %13380 = vmatpush1.bf16.msra.mxu0 %v20739_v0  ;;  %v20788_v0 = vcombine.high %v12329_v11, %v12333_v48 }
 0x782   : > { %13486 = vmatpush1.bf16.msra.mxu1 %v20741_v31  ;;  %13381 = vmatprep.subr.bf16.mxu0 %v20748_v38  ;;  %v20790_v31 = vcombine.high %v12330_v37, %v12334_v52  ;;  %v12337_v38 = vld [vmem:[#allocation7 + $0x1740] sm:$0xff] }
 0x783   : > { %13487 = vmatprep.subr.bf16.mxu1 %v20750_v12  ;;  %v12341_v12 = vld [vmem:[#allocation7 + $0x1760] sm:$0xff] }
 0x784   : > { %v20795_v30 = vcombine.low %v12337_v38, %v12341_v12 }
 0x785   : > { %13382 = vmatpush1.bf16.msra.mxu0 %v20747_v10  ;;  %v20796_v10 = vcombine.high %v12337_v38, %v12341_v12  ;;  %v12192_v38 = vld [vmem:[#allocation7 + $0x12b8] sm:$0xff] }
 0x786   : > { %13488 = vmatpush1.bf16.msra.mxu1 %v20749_v50  ;;  %13404 = vmatprep.subr.bf16.mxu0 %v20756_v5  ;;  %v20798_v50 = vcombine.high %v12338_v28, %v12342_v15  ;;  %v12345_v5 = vld [vmem:[#allocation7 + $0x1780] sm:$0xff]  ;;  %v12383_v15 = vrot.slane %v25762_v43, 4 }
 0x787   : > { %13510 = vmatprep.subr.bf16.mxu1 %v20758_v63  ;;  %v12346_v63 = vld [vmem:[#allocation7 + $0x1788] sm:$0xff]  ;;  %v20804_v39 = vcombine.high %v12345_v5, %v12349_v47 }
 0x788   : > { %13384 = vmatmul.mubr.bf16.vlgmr.msra.gmra.mrb[72].mxu0 %v25894_v61  ;;  %v20806_v33 = vcombine.high %v12346_v63, %v12350_v7  ;;  %v20805_v6 = vcombine.low %v12346_v63, %v12350_v7  ;;  %v25924_v7 = vsel %vm10730_vm2, %v12377_v34, %v12383_v15 }
 0x789   : > { %13490 = vmatmul.mubr.bf16.vlgmr.msra.gmra.mrb[72].mxu1 %v25894_v61  ;;  %13393 = vmatprep.mubr.bf16.mxu0 %v25900_v46 }
 0x78a   : > { %13405 = vmatpush1.bf16.msra.mxu0 %v20755_v26  ;;  %13499 = vmatprep.mubr.bf16.mxu1 %v25900_v46  ;;  %v12357_v26 = vld [vmem:[#allocation7 + $0x17e0] sm:$0xff] }
 0x78b   : > { %13511 = vmatpush1.bf16.msra.mxu1 %v20757_v25  ;;  %13406 = vmatprep.subr.bf16.mxu0 %v20764_v58  ;;  %v12354_v25 = vld [vmem:[#allocation7 + $0x17c8] sm:$0xff]  ;;  %v20812_v20 = vcombine.high %v12353_v2, %v12357_v26 }
 0x78c   : > { %13512 = vmatprep.subr.bf16.mxu1 %v20766_v32  ;;  %v12358_v58 = vld [vmem:[#allocation7 + $0x17e8] sm:$0xff]  ;;  %v20803_v32 = vcombine.low %v12345_v5, %v12349_v47  ;;  %v12196_v5 = vld [vmem:[#allocation7 + $0x12d8] sm:$0xff] }
 0x78d   : > { %v20814_v44 = vcombine.high %v12354_v25, %v12358_v58  ;;  %v12200_v47 = vld [vmem:[#allocation7 + $0x12f8] sm:$0xff] }
 0x78e   : > { %13407 = vmatpush1.bf16.msra.mxu0 %v20763_v1  ;;  %v12175_v1 = vld [vmem:[#allocation7 + $0x1230] sm:$0xff] }
 0x78f   : > { %13513 = vmatpush1.bf16.msra.mxu1 %v20765_v21  ;;  %13408 = vmatprep.subr.bf16.mxu0 %v20772_v19  ;;  %v12172_v21 = vld [vmem:[#allocation7 + $0x1218] sm:$0xff]  ;;  %v20811_v19 = vcombine.low %v12353_v2, %v12357_v26  ;;  %v20632_v40 = vcombine.high %v12171_v62, %v12175_v1  ;;  %v20631_v11 = vcombine.low %v12171_v62, %v12175_v1 }
 0x790   : > { %13394 = vmatmul.mubr.bf16.gmra.mrb[76].mxu0 %v25907_v59  ;;  %13514 = vmatprep.subr.bf16.mxu1 %v20774_v17  ;;  %v20813_v17 = vcombine.low %v12354_v25, %v12358_v58  ;;  %v20634_v55 = vcombine.high %v12172_v21, %v12176_v18  ;;  %v20633_v48 = vcombine.low %v12172_v21, %v12176_v18  ;;  %v12204_v2 = vld [vmem:[#allocation7 + $0x1318] sm:$0xff] }
 0x791   : > { %13500 = vmatmul.mubr.bf16.gmra.mrb[76].mxu1 %v25907_v59  ;;  %13436 = vmatprep.mubr.bf16.mxu0 %v26280_v36  ;;  %v12208_v26 = vld [vmem:[#allocation7 + $0x1338] sm:$0xff]  ;;  %v20657_v58 = vcombine.low %v12196_v5, %v12200_v47 }
 0x792   : > { %13409 = vmatpush1.bf16.msra.mxu0 %v20771_v24  ;;  %13542 = vmatprep.mubr.bf16.mxu1 %v26280_v36  ;;  %v12183_v24 = vld [vmem:[#allocation7 + $0x1270] sm:$0xff]  ;;  %v12212_v62 = vld [vmem:[#allocation7 + $0x1358] sm:$0xff]  ;;  %v20665_v18 = vcombine.low %v12204_v2, %v12208_v26 }
 0x793   : > { %13515 = vmatpush1.bf16.msra.mxu1 %v20773_v45  ;;  %13410 = vmatprep.subr.bf16.mxu0 %v20780_v27  ;;  %v12180_v45 = vld [vmem:[#allocation7 + $0x1258] sm:$0xff]  ;;  %v20640_v37 = vcombine.high %v12179_v13, %v12183_v24 }
 0x794   : > { %13516 = vmatprep.subr.bf16.mxu1 %v20782_v16  ;;  %v12184_v27 = vld [vmem:[#allocation7 + $0x1278] sm:$0xff]  ;;  %v12376_v16 = vrot.slane %v25661_v56, 4  ;;  %v20639_v56 = vcombine.low %v12179_v13, %v12183_v24 }
 0x795   : > { %v20641_v12 = vcombine.low %v12180_v45, %v12184_v27  ;;  %v12216_v1 = vld [vmem:[#allocation7 + $0x1378] sm:$0xff] }
 0x796   : > { %13411 = vmatpush1.bf16.msra.mxu0 %v20779_v9  ;;  %v25916_v52 = vsel %vm10730_vm2, %v12376_v16, %v12377_v34  ;;  %v20642_v9 = vcombine.high %v12180_v45, %v12184_v27  ;;  %v12223_v34 = vld [vmem:[#allocation7 + $0x13b0] sm:$0xff]  ;;  %v12224_v13 = vld [vmem:[#allocation7 + $0x13b8] sm:$0xff]  ;;  %v20673_v24 = vcombine.low %v12212_v62, %v12216_v1 }
 0x797   : > { %13517 = vmatpush1.bf16.msra.mxu1 %v20781_v51  ;;  %13412 = vmatprep.subr.bf16.mxu0 %v20788_v0  ;;  %v12187_v51 = vld [vmem:[#allocation7 + $0x1290] sm:$0xff] }
 0x798   : > { %13518 = vmatprep.subr.bf16.mxu1 %v20790_v31  ;;  %v12191_v0 = vld [vmem:[#allocation7 + $0x12b0] sm:$0xff]  ;;  %v12188_v31 = vld [vmem:[#allocation7 + $0x1298] sm:$0xff] }
 0x799   : > { %v20648_v28 = vcombine.high %v12187_v51, %v12191_v0  ;;  %v20649_v63 = vcombine.low %v12188_v31, %v12192_v38  ;;  %v12227_v16 = vld [vmem:[#allocation7 + $0x13d0] sm:$0xff] }
 0x79a   : > { %13413 = vmatpush1.bf16.msra.mxu0 %v20787_v14  ;;  %v20650_v14 = vcombine.high %v12188_v31, %v12192_v38  ;;  %v12235_v38 = vld [vmem:[#allocation7 + $0x1410] sm:$0xff] }
 0x79b   : > { %13519 = vmatpush1.bf16.msra.mxu1 %v20789_v8  ;;  %13414 = vmatprep.subr.bf16.mxu0 %v20796_v10  ;;  %v12195_v8 = vld [vmem:[#allocation7 + $0x12d0] sm:$0xff] }
 0x79c   : > { %13520 = vmatprep.subr.bf16.mxu1 %v20798_v50  ;;  %v12199_v10 = vld [vmem:[#allocation7 + $0x12f0] sm:$0xff]  ;;  %v20647_v50 = vcombine.low %v12187_v51, %v12191_v0 }
 0x79d   : > { %v20655_v25 = vcombine.low %v12195_v8, %v12199_v10 }
 0x79e   : > { %13415 = vmatpush1.bf16.msra.mxu0 %v20795_v30  ;;  %v20656_v30 = vcombine.high %v12195_v8, %v12199_v10 }
 0x79f   : > { %13521 = vmatpush1.bf16.msra.mxu1 %v20797_v57  ;;  %13416 = vmatprep.subr.bf16.mxu0 %v20804_v39  ;;  %v12203_v57 = vld [vmem:[#allocation7 + $0x1310] sm:$0xff] }
 0x7a0   : > { %13522 = vmatprep.subr.bf16.mxu1 %v20806_v33  ;;  %v12207_v39 = vld [vmem:[#allocation7 + $0x1330] sm:$0xff]  ;;  %v20658_v33 = vcombine.high %v12196_v5, %v12200_v47  ;;  %v12244_v47 = vld [vmem:[#allocation7 + $0x1458] sm:$0xff] }
 0x7a1   : > { %v20663_v21 = vcombine.low %v12203_v57, %v12207_v39  ;;  %v12247_v5 = vld [vmem:[#allocation7 + $0x1470] sm:$0xff] }
 0x7a2   : > { %13417 = vmatpush1.bf16.msra.mxu0 %v20803_v32  ;;  %v20664_v32 = vcombine.high %v12203_v57, %v12207_v39 }
 0x7a3   : > { %13523 = vmatpush1.bf16.msra.mxu1 %v20805_v6  ;;  %13418 = vmatprep.subr.bf16.mxu0 %v20812_v20  ;;  %v20666_v6 = vcombine.high %v12204_v2, %v12208_v26  ;;  %v12211_v20 = vld [vmem:[#allocation7 + $0x1350] sm:$0xff] }
 0x7a4   : > { %13524 = vmatprep.subr.bf16.mxu1 %v20814_v44  ;;  %v12215_v44 = vld [vmem:[#allocation7 + $0x1370] sm:$0xff] }
 0x7a5   : > { %v12251_v2 = vld [vmem:[#allocation7 + $0x1490] sm:$0xff] }
 0x7a6   : > { %13419 = vmatpush1.bf16.msra.mxu0 %v20811_v19  ;;  %v20672_v19 = vcombine.high %v12211_v20, %v12215_v44  ;;  %v12255_v26 = vld [vmem:[#allocation7 + $0x14b0] sm:$0xff] }
 0x7a7   : > { %13525 = vmatpush1.bf16.msra.mxu1 %v20813_v17  ;;  %13563 = vmatprep.subr.bf16.mxu0 %v20632_v40  ;;  %v20674_v17 = vcombine.high %v12212_v62, %v12216_v1  ;;  %v12219_v40 = vld [vmem:[#allocation7 + $0x1390] sm:$0xff] }
 0x7a8   : > { %13669 = vmatprep.subr.bf16.mxu1 %v20634_v55  ;;  %v12220_v55 = vld [vmem:[#allocation7 + $0x1398] sm:$0xff]  ;;  %v20680_v45 = vcombine.high %v12219_v40, %v12223_v34  ;;  %v12259_v62 = vld [vmem:[#allocation7 + $0x14d0] sm:$0xff] }
 0x7a9   : > { %13437 = vmatmul.mubr.bf16.vlgmr.msra.gmra.mrb[72].mxu0 %v25916_v52  ;;  %v20682_v27 = vcombine.high %v12220_v55, %v12224_v13  ;;  %v20681_v51 = vcombine.low %v12220_v55, %v12224_v13  ;;  %v12263_v1 = vld [vmem:[#allocation7 + $0x14f0] sm:$0xff] }
 0x7aa   : > { %13543 = vmatmul.mubr.bf16.vlgmr.msra.gmra.mrb[72].mxu1 %v25916_v52  ;;  %13564 = vmatpush1.bf16.msra.mxu0 %v20631_v11  ;;  %v12231_v11 = vld [vmem:[#allocation7 + $0x13f0] sm:$0xff] }
 0x7ab   : > { %13670 = vmatpush1.bf16.msra.mxu1 %v20633_v48  ;;  %13565 = vmatprep.subr.bf16.mxu0 %v20640_v37  ;;  %v12228_v48 = vld [vmem:[#allocation7 + $0x13d8] sm:$0xff]  ;;  %v20688_v0 = vcombine.high %v12227_v16, %v12231_v11  ;;  %v20687_v15 = vcombine.low %v12227_v16, %v12231_v11  ;;  %v12267_v55 = vld [vmem:[#allocation7 + $0x1510] sm:$0xff] }
 0x7ac   : > { %13671 = vmatprep.subr.bf16.mxu1 %v20642_v9  ;;  %13446 = vmatprep.mubr.bf16.mxu0 %v26280_v36  ;;  %v12232_v37 = vld [vmem:[#allocation7 + $0x13f8] sm:$0xff]  ;;  %v20679_v9 = vcombine.low %v12219_v40, %v12223_v34  ;;  %v20720_v40 = vcombine.high %v12259_v62, %v12263_v1  ;;  %v12271_v13 = vld [vmem:[#allocation7 + $0x1530] sm:$0xff] }
 0x7ad   : > { %13552 = vmatprep.mubr.bf16.mxu1 %v26280_v36  ;;  %v20690_v31 = vcombine.high %v12228_v48, %v12232_v37  ;;  %v20728_v16 = vcombine.high %v12267_v55, %v12271_v13 }
 0x7ae   : > { %13566 = vmatpush1.bf16.msra.mxu0 %v20639_v56  ;;  %v12239_v56 = vld [vmem:[#allocation7 + $0x1430] sm:$0xff] }
 0x7af   : > { %13672 = vmatpush1.bf16.msra.mxu1 %v20641_v12  ;;  %13567 = vmatprep.subr.bf16.mxu0 %v20648_v28  ;;  %v12236_v12 = vld [vmem:[#allocation7 + $0x1418] sm:$0xff]  ;;  %v20696_v8 = vcombine.high %v12235_v38, %v12239_v56 }
 0x7b0   : > { %13673 = vmatprep.subr.bf16.mxu1 %v20650_v14  ;;  %v12240_v28 = vld [vmem:[#allocation7 + $0x1438] sm:$0xff]  ;;  %v20689_v14 = vcombine.low %v12228_v48, %v12232_v37  ;;  %v12275_v48 = vld [vmem:[#allocation7 + $0x1550] sm:$0xff] }
 0x7b1   : > { %13447 = vmatmul.mubr.bf16.gmra.mrb[76].mxu0 %v25924_v7  ;;  %v20698_v10 = vcombine.high %v12236_v12, %v12240_v28  ;;  %v20697_v57 = vcombine.low %v12236_v12, %v12240_v28  ;;  %v12279_v37 = vld [vmem:[#allocation7 + $0x1570] sm:$0xff] }
 0x7b2   : > { %13553 = vmatmul.mubr.bf16.gmra.mrb[76].mxu1 %v25924_v7  ;;  %13568 = vmatpush1.bf16.msra.mxu0 %v20647_v50  ;;  %v12243_v50 = vld [vmem:[#allocation7 + $0x1450] sm:$0xff] }
 0x7b3   : > { %13595 = vmatprep.mubr.bf16.mxu0 %v25886_v60  ;;  %13674 = vmatpush1.bf16.msra.mxu1 %v20649_v63  ;;  %v12248_v63 = vld [vmem:[#allocation7 + $0x1478] sm:$0xff]  ;;  %v20704_v39 = vcombine.high %v12243_v50, %v12247_v5  ;;  %v12283_v12 = vld [vmem:[#allocation7 + $0x1590] sm:$0xff] }
 0x7b4   : > { %13701 = vmatprep.mubr.bf16.mxu1 %v25886_v60  ;;  %13569 = vmatprep.subr.bf16.mxu0 %v20656_v30  ;;  %v20671_v60 = vcombine.low %v12211_v20, %v12215_v44  ;;  %v20695_v30 = vcombine.low %v12235_v38, %v12239_v56  ;;  %v20712_v20 = vcombine.high %v12251_v2, %v12255_v26  ;;  %v12287_v28 = vld [vmem:[#allocation7 + $0x15b0] sm:$0xff] }
 0x7b5   : > { %13675 = vmatprep.subr.bf16.mxu1 %v20658_v33  ;;  %v20706_v33 = vcombine.high %v12244_v47, %v12248_v63  ;;  %v20736_v38 = vcombine.high %v12275_v48, %v12279_v37 }
 0x7b6   : > { %13570 = vmatpush1.bf16.msra.mxu0 %v20655_v25  ;;  %v12252_v25 = vld [vmem:[#allocation7 + $0x1498] sm:$0xff] }
 0x7b7   : > { %13676 = vmatpush1.bf16.msra.mxu1 %v20657_v58  ;;  %13571 = vmatprep.subr.bf16.mxu0 %v20664_v32  ;;  %v12256_v58 = vld [vmem:[#allocation7 + $0x14b8] sm:$0xff]  ;;  %v20703_v32 = vcombine.low %v12243_v50, %v12247_v5  ;;  %v20744_v50 = vcombine.high %v12283_v12, %v12287_v28 }
 0x7b8   : > { %13677 = vmatprep.subr.bf16.mxu1 %v20666_v6  ;;  %v20705_v6 = vcombine.low %v12244_v47, %v12248_v63  ;;  %v20714_v44 = vcombine.high %v12252_v25, %v12256_v58  ;;  %v12291_v47 = vld [vmem:[#allocation7 + $0x15d0] sm:$0xff] }
 0x7b9   : > { %v12295_v63 = vld [vmem:[#allocation7 + $0x15f0] sm:$0xff] }
 0x7ba   : > { %13572 = vmatpush1.bf16.msra.mxu0 %v20663_v21  ;;  %v12260_v21 = vld [vmem:[#allocation7 + $0x14d8] sm:$0xff] }
 0x7bb   : > { %13678 = vmatpush1.bf16.msra.mxu1 %v20665_v18  ;;  %13573 = vmatprep.subr.bf16.mxu0 %v20672_v19  ;;  %v12264_v18 = vld [vmem:[#allocation7 + $0x14f8] sm:$0xff]  ;;  %v20711_v19 = vcombine.low %v12251_v2, %v12255_v26  ;;  %v20752_v2 = vcombine.high %v12291_v47, %v12295_v63 }
 0x7bc   : > { %13679 = vmatprep.subr.bf16.mxu1 %v20674_v17  ;;  %v20713_v17 = vcombine.low %v12252_v25, %v12256_v58  ;;  %v20722_v34 = vcombine.high %v12260_v21, %v12264_v18  ;;  %v12299_v25 = vld [vmem:[#allocation7 + $0x1610] sm:$0xff] }
 0x7bd   : > { %v12303_v58 = vld [vmem:[#allocation7 + $0x1630] sm:$0xff] }
 0x7be   : > { %13574 = vmatpush1.bf16.msra.mxu0 %v20671_v60  ;;  %v12268_v60 = vld [vmem:[#allocation7 + $0x1518] sm:$0xff] }
 0x7bf   : > { %13680 = vmatpush1.bf16.msra.mxu1 %v20673_v24  ;;  %13575 = vmatprep.subr.bf16.mxu0 %v20680_v45  ;;  %v12272_v24 = vld [vmem:[#allocation7 + $0x1538] sm:$0xff]  ;;  %v20719_v45 = vcombine.low %v12259_v62, %v12263_v1  ;;  %v20760_v62 = vcombine.high %v12299_v25, %v12303_v58 }
 0x7c0   : > { %13681 = vmatprep.subr.bf16.mxu1 %v20682_v27  ;;  %v20721_v27 = vcombine.low %v12260_v21, %v12264_v18  ;;  %v20730_v11 = vcombine.high %v12268_v60, %v12272_v24  ;;  %v12307_v21 = vld [vmem:[#allocation7 + $0x1650] sm:$0xff] }
 0x7c1   : > { %v12311_v18 = vld [vmem:[#allocation7 + $0x1670] sm:$0xff] }
 0x7c2   : > { %13576 = vmatpush1.bf16.msra.mxu0 %v20679_v9  ;;  %v12276_v9 = vld [vmem:[#allocation7 + $0x1558] sm:$0xff] }
 0x7c3   : > { %13682 = vmatpush1.bf16.msra.mxu1 %v20681_v51  ;;  %13577 = vmatprep.subr.bf16.mxu0 %v20688_v0  ;;  %v12280_v51 = vld [vmem:[#allocation7 + $0x1578] sm:$0xff]  ;;  %v20727_v0 = vcombine.low %v12267_v55, %v12271_v13  ;;  %v20768_v55 = vcombine.high %v12307_v21, %v12311_v18 }
 0x7c4   : > { %13683 = vmatprep.subr.bf16.mxu1 %v20690_v31  ;;  %v20729_v31 = vcombine.low %v12268_v60, %v12272_v24  ;;  %v20738_v56 = vcombine.high %v12276_v9, %v12280_v51  ;;  %v12315_v60 = vld [vmem:[#allocation7 + $0x1690] sm:$0xff] }
 0x7c5   : > { %v12319_v24 = vld [vmem:[#allocation7 + $0x16b0] sm:$0xff] }
 0x7c6   : > { %13578 = vmatpush1.bf16.msra.mxu0 %v20687_v15  ;;  %v12284_v15 = vld [vmem:[#allocation7 + $0x1598] sm:$0xff] }
 0x7c7   : > { %13684 = vmatpush1.bf16.msra.mxu1 %v20689_v14  ;;  %13579 = vmatprep.subr.bf16.mxu0 %v20696_v8  ;;  %v12288_v14 = vld [vmem:[#allocation7 + $0x15b8] sm:$0xff]  ;;  %v20735_v8 = vcombine.low %v12275_v48, %v12279_v37  ;;  %v20776_v48 = vcombine.high %v12315_v60, %v12319_v24 }
 0x7c8   : > { %13685 = vmatprep.subr.bf16.mxu1 %v20698_v10  ;;  %v20737_v10 = vcombine.low %v12276_v9, %v12280_v51  ;;  %v20746_v5 = vcombine.high %v12284_v15, %v12288_v14  ;;  %v12323_v9 = vld [vmem:[#allocation7 + $0x16d0] sm:$0xff] }
 0x7c9   : > { %v12327_v51 = vld [vmem:[#allocation7 + $0x16f0] sm:$0xff] }
 0x7ca   : > { %13580 = vmatpush1.bf16.msra.mxu0 %v20695_v30  ;;  %v12292_v30 = vld [vmem:[#allocation7 + $0x15d8] sm:$0xff] }
 0x7cb   : > { %13686 = vmatpush1.bf16.msra.mxu1 %v20697_v57  ;;  %13581 = vmatprep.subr.bf16.mxu0 %v20704_v39  ;;  %v12296_v57 = vld [vmem:[#allocation7 + $0x15f8] sm:$0xff]  ;;  %v20743_v39 = vcombine.low %v12283_v12, %v12287_v28  ;;  %v12331_v12 = vld [vmem:[#allocation7 + $0x1710] sm:$0xff] }
 0x7cc   : > { %13687 = vmatprep.subr.bf16.mxu1 %v20706_v33  ;;  %v20745_v33 = vcombine.low %v12284_v15, %v12288_v14  ;;  %v20754_v26 = vcombine.high %v12292_v30, %v12296_v57  ;;  %v12335_v28 = vld [vmem:[#allocation7 + $0x1730] sm:$0xff]  ;;  %v12332_v15 = vld [vmem:[#allocation7 + $0x1718] sm:$0xff] }
 0x7cd   : > { %v12336_v14 = vld [vmem:[#allocation7 + $0x1738] sm:$0xff] }
 0x7ce   : > { %13582 = vmatpush1.bf16.msra.mxu0 %v20703_v32  ;;  %v12300_v32 = vld [vmem:[#allocation7 + $0x1618] sm:$0xff] }
 0x7cf   : > { %13688 = vmatpush1.bf16.msra.mxu1 %v20705_v6  ;;  %13583 = vmatprep.subr.bf16.mxu0 %v20712_v20  ;;  %v12304_v6 = vld [vmem:[#allocation7 + $0x1638] sm:$0xff]  ;;  %v20751_v20 = vcombine.low %v12291_v47, %v12295_v63  ;;  %v12339_v47 = vld [vmem:[#allocation7 + $0x1750] sm:$0xff] }
 0x7d0   : > { %13689 = vmatprep.subr.bf16.mxu1 %v20714_v44  ;;  %v20753_v44 = vcombine.low %v12292_v30, %v12296_v57  ;;  %v20762_v1 = vcombine.high %v12300_v32, %v12304_v6  ;;  %v12343_v63 = vld [vmem:[#allocation7 + $0x1770] sm:$0xff]  ;;  %v12340_v30 = vld [vmem:[#allocation7 + $0x1758] sm:$0xff] }
 0x7d1   : > { %v12344_v57 = vld [vmem:[#allocation7 + $0x1778] sm:$0xff] }
 0x7d2   : > { %13584 = vmatpush1.bf16.msra.mxu0 %v20711_v19  ;;  %v12308_v19 = vld [vmem:[#allocation7 + $0x1658] sm:$0xff] }
 0x7d3   : > { %13690 = vmatpush1.bf16.msra.mxu1 %v20713_v17  ;;  %13585 = vmatprep.subr.bf16.mxu0 %v20720_v40  ;;  %v12312_v17 = vld [vmem:[#allocation7 + $0x1678] sm:$0xff]  ;;  %v20759_v40 = vcombine.low %v12299_v25, %v12303_v58  ;;  %v12351_v25 = vld [vmem:[#allocation7 + $0x17b0] sm:$0xff] }
 0x7d4   : > { %13691 = vmatprep.subr.bf16.mxu1 %v20722_v34  ;;  %v20761_v34 = vcombine.low %v12300_v32, %v12304_v6  ;;  %v20770_v13 = vcombine.high %v12308_v19, %v12312_v17  ;;  %v12348_v58 = vld [vmem:[#allocation7 + $0x1798] sm:$0xff]  ;;  %v20799_v6 = vcombine.low %v12339_v47, %v12343_v63 }
 0x7d5   : > { %v12352_v32 = vld [vmem:[#allocation7 + $0x17b8] sm:$0xff] }
 0x7d6   : > { %13586 = vmatpush1.bf16.msra.mxu0 %v20719_v45  ;;  %v12316_v45 = vld [vmem:[#allocation7 + $0x1698] sm:$0xff] }
 0x7d7   : > { %13692 = vmatpush1.bf16.msra.mxu1 %v20721_v27  ;;  %13587 = vmatprep.subr.bf16.mxu0 %v20728_v16  ;;  %v12320_v27 = vld [vmem:[#allocation7 + $0x16b8] sm:$0xff]  ;;  %v20767_v16 = vcombine.low %v12307_v21, %v12311_v18  ;;  %v12359_v21 = vld [vmem:[#allocation7 + $0x17f0] sm:$0xff] }
 0x7d8   : > { %13693 = vmatprep.subr.bf16.mxu1 %v20730_v11  ;;  %v20769_v11 = vcombine.low %v12308_v19, %v12312_v17  ;;  %v20778_v37 = vcombine.high %v12316_v45, %v12320_v27  ;;  %v12356_v18 = vld [vmem:[#allocation7 + $0x17d8] sm:$0xff] }
 0x7d9   : > { %v12360_v19 = vld [vmem:[#allocation7 + $0x17f8] sm:$0xff] }
 0x7da   : > { %13588 = vmatpush1.bf16.msra.mxu0 %v20727_v0  ;;  %v12324_v0 = vld [vmem:[#allocation7 + $0x16d8] sm:$0xff] }
 0x7db   : > { %13694 = vmatpush1.bf16.msra.mxu1 %v20729_v31  ;;  %13589 = vmatprep.subr.bf16.mxu0 %v20736_v38  ;;  %v12328_v31 = vld [vmem:[#allocation7 + $0x16f8] sm:$0xff]  ;;  %v20777_v38 = vcombine.low %v12316_v45, %v12320_v27  ;;  %v13813_v45 = vld [vmem:[#allocation7 + $0x1828] sm:$0xff] }
 0x7dc   : > { %13695 = vmatprep.subr.bf16.mxu1 %v20738_v56  ;;  %v20784_v56 = vcombine.high %v12323_v9, %v12327_v51 }
 0x7de   : > { %13590 = vmatpush1.bf16.msra.mxu0 %v20735_v8  ;;  %v20783_v8 = vcombine.low %v12323_v9, %v12327_v51  ;;  %v13820_v9 = vld [vmem:[#allocation7 + $0x1860] sm:$0xff]  ;;  %v13817_v51 = vld [vmem:[#allocation7 + $0x1848] sm:$0xff] }
 0x7df   : > { %13696 = vmatpush1.bf16.msra.mxu1 %v20737_v10  ;;  %13591 = vmatprep.subr.bf16.mxu0 %v20744_v50  ;;  %v20785_v10 = vcombine.low %v12324_v0, %v12328_v31  ;;  %v20792_v50 = vcombine.high %v12331_v12, %v12335_v28 }
 0x7e0   : > { %13697 = vmatprep.subr.bf16.mxu1 %v20746_v5  ;;  %v20794_v5 = vcombine.high %v12332_v15, %v12336_v14 }
 0x7e2   : > { %13592 = vmatpush1.bf16.msra.mxu0 %v20743_v39  ;;  %v20793_v39 = vcombine.low %v12332_v15, %v12336_v14  ;;  %v13829_v15 = vld [vmem:[#allocation7 + $0x18a8] sm:$0xff] }
 0x7e3   : > { %13698 = vmatpush1.bf16.msra.mxu1 %v20745_v33  ;;  %13593 = vmatprep.subr.bf16.mxu0 %v20752_v2  ;;  %v20800_v33 = vcombine.high %v12339_v47, %v12343_v63  ;;  %v20802_v2 = vcombine.high %v12340_v30, %v12344_v57  ;;  %v13836_v47 = vld [vmem:[#allocation7 + $0x18e0] sm:$0xff] }
 0x7e4   : > { %13699 = vmatprep.subr.bf16.mxu1 %v20754_v26  ;;  %v12347_v26 = vld [vmem:[#allocation7 + $0x1790] sm:$0xff] }
 0x7e5   : > { %v20807_v17 = vcombine.low %v12347_v26, %v12351_v25 }
 0x7e6   : > { %13594 = vmatpush1.bf16.msra.mxu0 %v20751_v20  ;;  %v20801_v20 = vcombine.low %v12340_v30, %v12344_v57  ;;  %v13833_v30 = vld [vmem:[#allocation7 + $0x18c8] sm:$0xff] }
 0x7e7   : > { %13700 = vmatpush1.bf16.msra.mxu1 %v20753_v44  ;;  %13616 = vmatprep.subr.bf16.mxu0 %v20760_v62  ;;  %v20808_v44 = vcombine.high %v12347_v26, %v12351_v25  ;;  %v20810_v62 = vcombine.high %v12348_v58, %v12352_v32  ;;  %v13837_v57 = vld [vmem:[#allocation7 + $0x18e8] sm:$0xff] }
 0x7e8   : > { %13722 = vmatprep.subr.bf16.mxu1 %v20762_v1  ;;  %v12355_v1 = vld [vmem:[#allocation7 + $0x17d0] sm:$0xff]  ;;  %v13841_v26 = vld [vmem:[#allocation7 + $0x1908] sm:$0xff] }
 0x7e9   : > { %13596 = vmatmul.mubr.bf16.vlgmr.msra.gmra.mrb[80].mxu0 %v25894_v61  ;;  %v20815_v27 = vcombine.low %v12355_v1, %v12359_v21  ;;  %v13845_v25 = vld [vmem:[#allocation7 + $0x1928] sm:$0xff] }
 0x7ea   : > { %13702 = vmatmul.mubr.bf16.vlgmr.msra.gmra.mrb[80].mxu1 %v25894_v61  ;;  %13605 = vmatprep.mubr.bf16.mxu0 %v25900_v46  ;;  %v20775_v61 = vcombine.low %v12315_v60, %v12319_v24  ;;  %v13812_v60 = vld [vmem:[#allocation7 + $0x1820] sm:$0xff]  ;;  %v13809_v24 = vld [vmem:[#allocation7 + $0x1808] sm:$0xff] }
 0x7eb   : > { %13617 = vmatpush1.bf16.msra.mxu0 %v20759_v40  ;;  %13711 = vmatprep.mubr.bf16.mxu1 %v25900_v46  ;;  %v20786_v46 = vcombine.high %v12324_v0, %v12328_v31  ;;  %v20809_v40 = vcombine.low %v12348_v58, %v12352_v32  ;;  %v13821_v0 = vld [vmem:[#allocation7 + $0x1868] sm:$0xff]  ;;  %v20845_v32 = vcombine.low %v13833_v30, %v13837_v57 }
 0x7ec   : > { %13723 = vmatpush1.bf16.msra.mxu1 %v20761_v34  ;;  %13618 = vmatprep.subr.bf16.mxu0 %v20768_v55  ;;  %v20816_v34 = vcombine.high %v12355_v1, %v12359_v21  ;;  %v20818_v55 = vcombine.high %v12356_v18, %v12360_v19  ;;  %v13849_v1 = vld [vmem:[#allocation7 + $0x1948] sm:$0xff] }
 0x7ed   : > { %13724 = vmatprep.subr.bf16.mxu1 %v20770_v13  ;;  %v13808_v13 = vld [vmem:[#allocation7 + $0x1800] sm:$0xff]  ;;  %v13853_v21 = vld [vmem:[#allocation7 + $0x1968] sm:$0xff] }
 0x7ee   : > { %v20819_v31 = vcombine.low %v13808_v13, %v13812_v60 }
 0x7ef   : > { %13619 = vmatpush1.bf16.msra.mxu0 %v20767_v16  ;;  %v20817_v16 = vcombine.low %v12356_v18, %v12360_v19 }
 0x7f0   : > { %13725 = vmatpush1.bf16.msra.mxu1 %v20769_v11  ;;  %13620 = vmatprep.subr.bf16.mxu0 %v20776_v48  ;;  %v20820_v11 = vcombine.high %v13808_v13, %v13812_v60  ;;  %v20822_v48 = vcombine.high %v13809_v24, %v13813_v45  ;;  %v13861_v13 = vld [vmem:[#allocation7 + $0x19a8] sm:$0xff] }
 0x7f1   : > { %13606 = vmatmul.mubr.bf16.gmra.mrb[84].mxu0 %v25907_v59  ;;  %13726 = vmatprep.subr.bf16.mxu1 %v20778_v37  ;;  %v13816_v37 = vld [vmem:[#allocation7 + $0x1840] sm:$0xff] }
 0x7f2   : > { %13712 = vmatmul.mubr.bf16.gmra.mrb[84].mxu1 %v25907_v59  ;;  %13648 = vmatprep.mubr.bf16.mxu0 %v26280_v36  ;;  %v20791_v59 = vcombine.low %v12331_v12, %v12335_v28  ;;  %v13828_v12 = vld [vmem:[#allocation7 + $0x18a0] sm:$0xff]  ;;  %v13825_v28 = vld [vmem:[#allocation7 + $0x1888] sm:$0xff]  ;;  %v20827_v14 = vcombine.low %v13816_v37, %v13820_v9 }
 0x7f3   : > { %13621 = vmatpush1.bf16.msra.mxu0 %v20775_v61  ;;  %13754 = vmatprep.mubr.bf16.mxu1 %v26280_v36  ;;  %v20821_v61 = vcombine.low %v13809_v24, %v13813_v45  ;;  %v20861_v24 = vcombine.low %v13849_v1, %v13853_v21 }
 0x7f4   : > { %13727 = vmatpush1.bf16.msra.mxu1 %v20777_v38  ;;  %13622 = vmatprep.subr.bf16.mxu0 %v20784_v56  ;;  %v20828_v38 = vcombine.high %v13816_v37, %v13820_v9  ;;  %v20830_v56 = vcombine.high %v13817_v51, %v13821_v0  ;;  %v13869_v37 = vld [vmem:[#allocation7 + $0x19e8] sm:$0xff] }
 0x7f5   : > { %13728 = vmatprep.subr.bf16.mxu1 %v20786_v46  ;;  %v13824_v46 = vld [vmem:[#allocation7 + $0x1880] sm:$0xff] }
 0x7f6   : > { %v20835_v63 = vcombine.low %v13824_v46, %v13828_v12 }
 0x7f7   : > { %13623 = vmatpush1.bf16.msra.mxu0 %v20783_v8  ;;  %v20829_v8 = vcombine.low %v13817_v51, %v13821_v0 }
 0x7f8   : > { %13729 = vmatpush1.bf16.msra.mxu1 %v20785_v10  ;;  %13624 = vmatprep.subr.bf16.mxu0 %v20792_v50  ;;  %v20836_v10 = vcombine.high %v13824_v46, %v13828_v12  ;;  %v20838_v50 = vcombine.high %v13825_v28, %v13829_v15  ;;  %v13877_v46 = vld [vmem:[#allocation7 + $0x1a28] sm:$0xff] }
 0x7f9   : > { %13730 = vmatprep.subr.bf16.mxu1 %v20794_v5  ;;  %v13832_v5 = vld [vmem:[#allocation7 + $0x18c0] sm:$0xff] }
 0x7fa   : > { %v20843_v58 = vcombine.low %v13832_v5, %v13836_v47 }
 0x7fb   : > { %13625 = vmatpush1.bf16.msra.mxu0 %v20791_v59  ;;  %v20844_v59 = vcombine.high %v13832_v5, %v13836_v47  ;;  %v13885_v5 = vld [vmem:[#allocation7 + $0x1a68] sm:$0xff] }
 0x7fc   : > { %13731 = vmatpush1.bf16.msra.mxu1 %v20793_v39  ;;  %13626 = vmatprep.subr.bf16.mxu0 %v20800_v33  ;;  %v13840_v39 = vld [vmem:[#allocation7 + $0x1900] sm:$0xff] }
 0x7fd   : > { %13732 = vmatprep.subr.bf16.mxu1 %v20802_v2  ;;  %v13844_v33 = vld [vmem:[#allocation7 + $0x1920] sm:$0xff]  ;;  %v20846_v2 = vcombine.high %v13833_v30, %v13837_v57 }
 0x7fe   : > { %v20851_v18 = vcombine.low %v13840_v39, %v13844_v33 }
 0x7ff   : > { %13627 = vmatpush1.bf16.msra.mxu0 %v20799_v6  ;;  %v20852_v6 = vcombine.high %v13840_v39, %v13844_v33  ;;  %v13889_v39 = vld [vmem:[#allocation7 + $0x1a88] sm:$0xff] }
 0x800   : > { %13733 = vmatpush1.bf16.msra.mxu1 %v20801_v20  ;;  %13628 = vmatprep.subr.bf16.mxu0 %v20808_v44  ;;  %v20854_v20 = vcombine.high %v13841_v26, %v13845_v25  ;;  %v13848_v44 = vld [vmem:[#allocation7 + $0x1940] sm:$0xff]  ;;  %v13893_v33 = vld [vmem:[#allocation7 + $0x1aa8] sm:$0xff] }
 0x801   : > { %13734 = vmatprep.subr.bf16.mxu1 %v20810_v62  ;;  %v13852_v62 = vld [vmem:[#allocation7 + $0x1960] sm:$0xff] }
 0x802   : > { %v20860_v19 = vcombine.high %v13848_v44, %v13852_v62  ;;  %v20859_v60 = vcombine.low %v13848_v44, %v13852_v62  ;;  %v13901_v44 = vld [vmem:[#allocation7 + $0x1ae8] sm:$0xff] }
 0x803   : > { %13629 = vmatpush1.bf16.msra.mxu0 %v20807_v17  ;;  %v20862_v17 = vcombine.high %v13849_v1, %v13853_v21  ;;  %v20901_v1 = vcombine.low %v13889_v39, %v13893_v33 }
 0x804   : > { %13735 = vmatpush1.bf16.msra.mxu1 %v20809_v40  ;;  %13630 = vmatprep.subr.bf16.mxu0 %v20816_v34  ;;  %v13856_v40 = vld [vmem:[#allocation7 + $0x1980] sm:$0xff] }
 0x805   : > { %13736 = vmatprep.subr.bf16.mxu1 %v20818_v55  ;;  %v13860_v34 = vld [vmem:[#allocation7 + $0x19a0] sm:$0xff]  ;;  %v13857_v55 = vld [vmem:[#allocation7 + $0x1988] sm:$0xff] }
 0x806   : > { %v20868_v45 = vcombine.high %v13856_v40, %v13860_v34  ;;  %v20867_v9 = vcombine.low %v13856_v40, %v13860_v34  ;;  %v20869_v51 = vcombine.low %v13857_v55, %v13861_v13  ;;  %v13909_v40 = vld [vmem:[#allocation7 + $0x1b28] sm:$0xff] }
 0x807   : > { %13631 = vmatpush1.bf16.msra.mxu0 %v20815_v27  ;;  %v20870_v27 = vcombine.high %v13857_v55, %v13861_v13 }
 0x808   : > { %13737 = vmatpush1.bf16.msra.mxu1 %v20817_v16  ;;  %14960 = vmatprep.subr.bf16.mxu0 %v20820_v11  ;;  %v13864_v16 = vld [vmem:[#allocation7 + $0x19c0] sm:$0xff] }
 0x809   : > { %15066 = vmatprep.subr.bf16.mxu1 %v20822_v48  ;;  %v13868_v11 = vld [vmem:[#allocation7 + $0x19e0] sm:$0xff]  ;;  %v13865_v48 = vld [vmem:[#allocation7 + $0x19c8] sm:$0xff] }
 0x80a   : > { %13649 = vmatmul.mubr.bf16.vlgmr.msra.gmra.mrb[80].mxu0 %v25916_v52  ;;  %v20876_v0 = vcombine.high %v13864_v16, %v13868_v11  ;;  %v20875_v12 = vcombine.low %v13864_v16, %v13868_v11  ;;  %v13917_v16 = vld [vmem:[#allocation7 + $0x1b68] sm:$0xff] }
 0x80b   : > { %13755 = vmatmul.mubr.bf16.vlgmr.msra.gmra.mrb[80].mxu1 %v25916_v52  ;;  %14961 = vmatpush1.bf16.msra.mxu0 %v20819_v31  ;;  %v20837_v52 = vcombine.low %v13825_v28, %v13829_v15  ;;  %v20878_v31 = vcombine.high %v13865_v48, %v13869_v37  ;;  %v20877_v28 = vcombine.low %v13865_v48, %v13869_v37 }
 0x80c   : > { %15067 = vmatpush1.bf16.msra.mxu1 %v20821_v61  ;;  %14962 = vmatprep.subr.bf16.mxu0 %v20828_v38  ;;  %v13872_v61 = vld [vmem:[#allocation7 + $0x1a00] sm:$0xff] }
 0x80d   : > { %15068 = vmatprep.subr.bf16.mxu1 %v20830_v56  ;;  %13658 = vmatprep.mubr.bf16.mxu0 %v26280_v36  ;;  %v13876_v38 = vld [vmem:[#allocation7 + $0x1a20] sm:$0xff]  ;;  %v13873_v56 = vld [vmem:[#allocation7 + $0x1a08] sm:$0xff] }
 0x80e   : > { %13764 = vmatprep.mubr.bf16.mxu1 %v26280_v36  ;;  %v20884_v15 = vcombine.high %v13872_v61, %v13876_v38  ;;  %v20883_v47 = vcombine.low %v13872_v61, %v13876_v38  ;;  %v13925_v61 = vld [vmem:[#allocation7 + $0x1ba8] sm:$0xff] }
 0x80f   : > { %14963 = vmatpush1.bf16.msra.mxu0 %v20827_v14  ;;  %v20886_v14 = vcombine.high %v13873_v56, %v13877_v46 }
 0x810   : > { %15069 = vmatpush1.bf16.msra.mxu1 %v20829_v8  ;;  %14964 = vmatprep.subr.bf16.mxu0 %v20836_v10  ;;  %v13880_v8 = vld [vmem:[#allocation7 + $0x1a40] sm:$0xff] }
 0x811   : > { %15070 = vmatprep.subr.bf16.mxu1 %v20838_v50  ;;  %v13884_v10 = vld [vmem:[#allocation7 + $0x1a60] sm:$0xff]  ;;  %v13881_v50 = vld [vmem:[#allocation7 + $0x1a48] sm:$0xff] }
 0x812   : > { %13659 = vmatmul.mubr.bf16.gmra.mrb[84].mxu0 %v25924_v7  ;;  %v20892_v30 = vcombine.high %v13880_v8, %v13884_v10  ;;  %v20894_v57 = vcombine.high %v13881_v50, %v13885_v5 }
 0x813   : > { %13765 = vmatmul.mubr.bf16.gmra.mrb[84].mxu1 %v25924_v7  ;;  %14965 = vmatpush1.bf16.msra.mxu0 %v20835_v63  ;;  %v20853_v7 = vcombine.low %v13841_v26, %v13845_v25  ;;  %v20885_v63 = vcombine.low %v13873_v56, %v13877_v46  ;;  %v20893_v26 = vcombine.low %v13881_v50, %v13885_v5 }
 0x814   : > { %14992 = vmatprep.mubr.bf16.mxu0 %v26286_v42  ;;  %15071 = vmatpush1.bf16.msra.mxu1 %v20837_v52  ;;  %v13888_v52 = vld [vmem:[#allocation7 + $0x1a80] sm:$0xff] }
 0x815   : > { %15098 = vmatprep.mubr.bf16.mxu1 %v26286_v42  ;;  %14966 = vmatprep.subr.bf16.mxu0 %v20844_v59  ;;  %v13892_v59 = vld [vmem:[#allocation7 + $0x1aa0] sm:$0xff] }
 0x816   : > { %15072 = vmatprep.subr.bf16.mxu1 %v20846_v2  ;;  %v20891_v2 = vcombine.low %v13880_v8, %v13884_v10  ;;  %v20900_v25 = vcombine.high %v13888_v52, %v13892_v59  ;;  %v20899_v62 = vcombine.low %v13888_v52, %v13892_v59  ;;  %v13933_v8 = vld [vmem:[#allocation7 + $0x1be8] sm:$0xff] }
 0x817   : > { %14967 = vmatpush1.bf16.msra.mxu0 %v20843_v58  ;;  %v20902_v58 = vcombine.high %v13889_v39, %v13893_v33  ;;  %v13941_v52 = vld [vmem:[#allocation7 + $0x1c28] sm:$0xff] }
 0x818   : > { %15073 = vmatpush1.bf16.msra.mxu1 %v20845_v32  ;;  %14968 = vmatprep.subr.bf16.mxu0 %v20852_v6  ;;  %v13896_v32 = vld [vmem:[#allocation7 + $0x1ac0] sm:$0xff] }
 0x819   : > { %15074 = vmatprep.subr.bf16.mxu1 %v20854_v20  ;;  %v13900_v6 = vld [vmem:[#allocation7 + $0x1ae0] sm:$0xff]  ;;  %v13897_v20 = vld [vmem:[#allocation7 + $0x1ac8] sm:$0xff] }
 0x81a   : > { %v20908_v21 = vcombine.high %v13896_v32, %v13900_v6  ;;  %v20907_v34 = vcombine.low %v13896_v32, %v13900_v6  ;;  %v20909_v55 = vcombine.low %v13897_v20, %v13901_v44  ;;  %v13949_v32 = vld [vmem:[#allocation7 + $0x1c68] sm:$0xff] }
 0x81b   : > { %14969 = vmatpush1.bf16.msra.mxu0 %v20851_v18  ;;  %v20910_v18 = vcombine.high %v13897_v20, %v13901_v44 }
 0x81c   : > { %15075 = vmatpush1.bf16.msra.mxu1 %v20853_v7  ;;  %14970 = vmatprep.subr.bf16.mxu0 %v20860_v19  ;;  %v13904_v7 = vld [vmem:[#allocation7 + $0x1b00] sm:$0xff] }
 0x81d   : > { %15076 = vmatprep.subr.bf16.mxu1 %v20862_v17  ;;  %v13908_v19 = vld [vmem:[#allocation7 + $0x1b20] sm:$0xff]  ;;  %v13905_v17 = vld [vmem:[#allocation7 + $0x1b08] sm:$0xff] }
 0x81e   : > { %v20916_v13 = vcombine.high %v13904_v7, %v13908_v19  ;;  %v20915_v11 = vcombine.low %v13904_v7, %v13908_v19  ;;  %v20917_v48 = vcombine.low %v13905_v17, %v13909_v40  ;;  %v13957_v7 = vld [vmem:[#allocation7 + $0x1ca8] sm:$0xff] }
 0x81f   : > { %14971 = vmatpush1.bf16.msra.mxu0 %v20859_v60  ;;  %v20918_v60 = vcombine.high %v13905_v17, %v13909_v40 }
 0x820   : > { %15077 = vmatpush1.bf16.msra.mxu1 %v20861_v24  ;;  %14972 = vmatprep.subr.bf16.mxu0 %v20868_v45  ;;  %v13912_v24 = vld [vmem:[#allocation7 + $0x1b40] sm:$0xff] }
 0x821   : > { %15078 = vmatprep.subr.bf16.mxu1 %v20870_v27  ;;  %v13916_v45 = vld [vmem:[#allocation7 + $0x1b60] sm:$0xff]  ;;  %v13913_v27 = vld [vmem:[#allocation7 + $0x1b48] sm:$0xff] }
 0x822   : > { %v20924_v37 = vcombine.high %v13912_v24, %v13916_v45  ;;  %v20923_v38 = vcombine.low %v13912_v24, %v13916_v45  ;;  %v20925_v56 = vcombine.low %v13913_v27, %v13917_v16  ;;  %v13965_v24 = vld [vmem:[#allocation7 + $0x1ce8] sm:$0xff] }
 0x823   : > { %14973 = vmatpush1.bf16.msra.mxu0 %v20867_v9  ;;  %v20926_v9 = vcombine.high %v13913_v27, %v13917_v16 }
 0x824   : > { %15079 = vmatpush1.bf16.msra.mxu1 %v20869_v51  ;;  %14974 = vmatprep.subr.bf16.mxu0 %v20876_v0  ;;  %v13920_v51 = vld [vmem:[#allocation7 + $0x1b80] sm:$0xff] }
 0x825   : > { %15080 = vmatprep.subr.bf16.mxu1 %v20878_v31  ;;  %v13924_v0 = vld [vmem:[#allocation7 + $0x1ba0] sm:$0xff]  ;;  %v13921_v31 = vld [vmem:[#allocation7 + $0x1b88] sm:$0xff] }
 0x826   : > { %v20932_v46 = vcombine.high %v13920_v51, %v13924_v0  ;;  %v20931_v10 = vcombine.low %v13920_v51, %v13924_v0  ;;  %v20933_v50 = vcombine.low %v13921_v31, %v13925_v61  ;;  %v13973_v51 = vld [vmem:[#allocation7 + $0x1d28] sm:$0xff] }
 0x827   : > { %14975 = vmatpush1.bf16.msra.mxu0 %v20875_v12  ;;  %v20934_v12 = vcombine.high %v13921_v31, %v13925_v61 }
 0x828   : > { %15081 = vmatpush1.bf16.msra.mxu1 %v20877_v28  ;;  %14976 = vmatprep.subr.bf16.mxu0 %v20884_v15  ;;  %v13928_v28 = vld [vmem:[#allocation7 + $0x1bc0] sm:$0xff] }
 0x829   : > { %15082 = vmatprep.subr.bf16.mxu1 %v20886_v14  ;;  %v13932_v15 = vld [vmem:[#allocation7 + $0x1be0] sm:$0xff]  ;;  %v13929_v14 = vld [vmem:[#allocation7 + $0x1bc8] sm:$0xff] }
 0x82a   : > { %v20940_v5 = vcombine.high %v13928_v28, %v13932_v15  ;;  %v20939_v59 = vcombine.low %v13928_v28, %v13932_v15  ;;  %v20941_v39 = vcombine.low %v13929_v14, %v13933_v8  ;;  %v13981_v28 = vld [vmem:[#allocation7 + $0x1d68] sm:$0xff] }
 0x82b   : > { %14977 = vmatpush1.bf16.msra.mxu0 %v20883_v47  ;;  %v20942_v47 = vcombine.high %v13929_v14, %v13933_v8 }
 0x82c   : > { %15083 = vmatpush1.bf16.msra.mxu1 %v20885_v63  ;;  %14978 = vmatprep.subr.bf16.mxu0 %v20892_v30  ;;  %v13936_v63 = vld [vmem:[#allocation7 + $0x1c00] sm:$0xff] }
 0x82d   : > { %15084 = vmatprep.subr.bf16.mxu1 %v20894_v57  ;;  %v13940_v30 = vld [vmem:[#allocation7 + $0x1c20] sm:$0xff]  ;;  %v13937_v57 = vld [vmem:[#allocation7 + $0x1c08] sm:$0xff] }
 0x82e   : > { %v20948_v33 = vcombine.high %v13936_v63, %v13940_v30  ;;  %v20947_v6 = vcombine.low %v13936_v63, %v13940_v30  ;;  %v20949_v20 = vcombine.low %v13937_v57, %v13941_v52  ;;  %v13989_v63 = vld [vmem:[#allocation7 + $0x1da8] sm:$0xff] }
 0x82f   : > { %14979 = vmatpush1.bf16.msra.mxu0 %v20891_v2  ;;  %v20950_v2 = vcombine.high %v13937_v57, %v13941_v52 }
 0x830   : > { %15085 = vmatpush1.bf16.msra.mxu1 %v20893_v26  ;;  %14980 = vmatprep.subr.bf16.mxu0 %v20900_v25  ;;  %v13944_v26 = vld [vmem:[#allocation7 + $0x1c40] sm:$0xff] }
 0x831   : > { %15086 = vmatprep.subr.bf16.mxu1 %v20902_v58  ;;  %v13948_v25 = vld [vmem:[#allocation7 + $0x1c60] sm:$0xff]  ;;  %v13945_v58 = vld [vmem:[#allocation7 + $0x1c48] sm:$0xff] }
 0x832   : > { %v20956_v44 = vcombine.high %v13944_v26, %v13948_v25  ;;  %v20955_v19 = vcombine.low %v13944_v26, %v13948_v25  ;;  %v20957_v17 = vcombine.low %v13945_v58, %v13949_v32  ;;  %v13997_v26 = vld [vmem:[#allocation7 + $0x1de8] sm:$0xff] }
 0x833   : > { %14981 = vmatpush1.bf16.msra.mxu0 %v20899_v62  ;;  %v20958_v62 = vcombine.high %v13945_v58, %v13949_v32 }
 0x834   : > { %15087 = vmatpush1.bf16.msra.mxu1 %v20901_v1  ;;  %14982 = vmatprep.subr.bf16.mxu0 %v20908_v21  ;;  %v13952_v1 = vld [vmem:[#allocation7 + $0x1c80] sm:$0xff] }
 0x835   : > { %15088 = vmatprep.subr.bf16.mxu1 %v20910_v18  ;;  %v13956_v21 = vld [vmem:[#allocation7 + $0x1ca0] sm:$0xff]  ;;  %v13953_v18 = vld [vmem:[#allocation7 + $0x1c88] sm:$0xff] }
 0x836   : > { %v20964_v40 = vcombine.high %v13952_v1, %v13956_v21  ;;  %v20963_v45 = vcombine.low %v13952_v1, %v13956_v21  ;;  %v20965_v27 = vcombine.low %v13953_v18, %v13957_v7  ;;  %v13815_v1 = vld [vmem:[#allocation7 + $0x1838] sm:$0xff] }
 0x837   : > { %14983 = vmatpush1.bf16.msra.mxu0 %v20907_v34  ;;  %v20966_v34 = vcombine.high %v13953_v18, %v13957_v7 }
 0x838   : > { %15089 = vmatpush1.bf16.msra.mxu1 %v20909_v55  ;;  %14984 = vmatprep.subr.bf16.mxu0 %v20916_v13  ;;  %v13960_v55 = vld [vmem:[#allocation7 + $0x1cc0] sm:$0xff] }
 0x839   : > { %15090 = vmatprep.subr.bf16.mxu1 %v20918_v60  ;;  %v13964_v13 = vld [vmem:[#allocation7 + $0x1ce0] sm:$0xff]  ;;  %v13961_v60 = vld [vmem:[#allocation7 + $0x1cc8] sm:$0xff] }
 0x83a   : > { %v20972_v16 = vcombine.high %v13960_v55, %v13964_v13  ;;  %v20971_v0 = vcombine.low %v13960_v55, %v13964_v13  ;;  %v20973_v31 = vcombine.low %v13961_v60, %v13965_v24  ;;  %v13823_v55 = vld [vmem:[#allocation7 + $0x1878] sm:$0xff] }
 0x83b   : > { %14985 = vmatpush1.bf16.msra.mxu0 %v20915_v11  ;;  %v20974_v11 = vcombine.high %v13961_v60, %v13965_v24 }
 0x83c   : > { %15091 = vmatpush1.bf16.msra.mxu1 %v20917_v48  ;;  %14986 = vmatprep.subr.bf16.mxu0 %v20924_v37  ;;  %v13968_v48 = vld [vmem:[#allocation7 + $0x1d00] sm:$0xff] }
 0x83d   : > { %15092 = vmatprep.subr.bf16.mxu1 %v20926_v9  ;;  %v13972_v37 = vld [vmem:[#allocation7 + $0x1d20] sm:$0xff]  ;;  %v13969_v9 = vld [vmem:[#allocation7 + $0x1d08] sm:$0xff] }
 0x83e   : > { %v20980_v61 = vcombine.high %v13968_v48, %v13972_v37  ;;  %v20979_v15 = vcombine.low %v13968_v48, %v13972_v37  ;;  %v20981_v14 = vcombine.low %v13969_v9, %v13973_v51  ;;  %v13831_v48 = vld [vmem:[#allocation7 + $0x18b8] sm:$0xff] }
 0x83f   : > { %14987 = vmatpush1.bf16.msra.mxu0 %v20923_v38  ;;  %v20982_v38 = vcombine.high %v13969_v9, %v13973_v51 }
 0x840   : > { %15093 = vmatpush1.bf16.msra.mxu1 %v20925_v56  ;;  %14988 = vmatprep.subr.bf16.mxu0 %v20932_v46  ;;  %v13976_v56 = vld [vmem:[#allocation7 + $0x1d40] sm:$0xff] }
 0x841   : > { %15094 = vmatprep.subr.bf16.mxu1 %v20934_v12  ;;  %v13980_v46 = vld [vmem:[#allocation7 + $0x1d60] sm:$0xff]  ;;  %v13977_v12 = vld [vmem:[#allocation7 + $0x1d48] sm:$0xff] }
 0x842   : > { %v20988_v8 = vcombine.high %v13976_v56, %v13980_v46  ;;  %v20987_v30 = vcombine.low %v13976_v56, %v13980_v46  ;;  %v20989_v57 = vcombine.low %v13977_v12, %v13981_v28  ;;  %v13835_v56 = vld [vmem:[#allocation7 + $0x18d8] sm:$0xff] }
 0x843   : > { %14989 = vmatpush1.bf16.msra.mxu0 %v20931_v10  ;;  %v20990_v10 = vcombine.high %v13977_v12, %v13981_v28  ;;  %v13839_v46 = vld [vmem:[#allocation7 + $0x18f8] sm:$0xff] }
 0x844   : > { %15095 = vmatpush1.bf16.msra.mxu1 %v20933_v50  ;;  %14990 = vmatprep.subr.bf16.mxu0 %v20940_v5  ;;  %v13984_v50 = vld [vmem:[#allocation7 + $0x1d80] sm:$0xff] }
 0x845   : > { %15096 = vmatprep.subr.bf16.mxu1 %v20942_v47  ;;  %v13988_v5 = vld [vmem:[#allocation7 + $0x1da0] sm:$0xff]  ;;  %v13985_v47 = vld [vmem:[#allocation7 + $0x1d88] sm:$0xff] }
 0x846   : > { %v20996_v52 = vcombine.high %v13984_v50, %v13988_v5  ;;  %v20995_v25 = vcombine.low %v13984_v50, %v13988_v5  ;;  %v20997_v58 = vcombine.low %v13985_v47, %v13989_v63  ;;  %v13847_v50 = vld [vmem:[#allocation7 + $0x1938] sm:$0xff] }
 0x847   : > { %14991 = vmatpush1.bf16.msra.mxu0 %v20939_v59  ;;  %v20998_v59 = vcombine.high %v13985_v47, %v13989_v63  ;;  %v20849_v47 = vcombine.low %v13835_v56, %v13839_v46 }
 0x848   : > { %15097 = vmatpush1.bf16.msra.mxu1 %v20941_v39  ;;  %15013 = vmatprep.subr.bf16.mxu0 %v20948_v33  ;;  %v13992_v39 = vld [vmem:[#allocation7 + $0x1dc0] sm:$0xff] }
 0x849   : > { %15119 = vmatprep.subr.bf16.mxu1 %v20950_v2  ;;  %v13996_v33 = vld [vmem:[#allocation7 + $0x1de0] sm:$0xff]  ;;  %v13993_v2 = vld [vmem:[#allocation7 + $0x1dc8] sm:$0xff] }
 0x84a   : > { %14993 = vmatmul.mubr.bf16.vlgmr.msra.gmra.mrb[72].mxu0 %v26287_v4  ;;  %v21004_v32 = vcombine.high %v13992_v39, %v13996_v33  ;;  %v21003_v21 = vcombine.low %v13992_v39, %v13996_v33  ;;  %v21005_v18 = vcombine.low %v13993_v2, %v13997_v26  ;;  %v13855_v39 = vld [vmem:[#allocation7 + $0x1978] sm:$0xff] }
 0x84b   : > { %15099 = vmatmul.mubr.bf16.vlgmr.msra.gmra.mrb[72].mxu1 %v26287_v4  ;;  %15002 = vmatprep.mubr.bf16.mxu0 %v26290_v23 }
 0x84c   : > { %15014 = vmatpush1.bf16.msra.mxu0 %v20947_v6  ;;  %15108 = vmatprep.mubr.bf16.mxu1 %v26290_v23  ;;  %v21006_v6 = vcombine.high %v13993_v2, %v13997_v26 }
 0x84d   : > { %15120 = vmatpush1.bf16.msra.mxu1 %v20949_v20  ;;  %15015 = vmatprep.subr.bf16.mxu0 %v20956_v44  ;;  %v13810_v20 = vld [vmem:[#allocation7 + $0x1810] sm:$0xff] }
 0x84e   : > { %15121 = vmatprep.subr.bf16.mxu1 %v20958_v62  ;;  %v13814_v44 = vld [vmem:[#allocation7 + $0x1830] sm:$0xff]  ;;  %v13811_v62 = vld [vmem:[#allocation7 + $0x1818] sm:$0xff] }
 0x84f   : > { %v20824_v7 = vcombine.high %v13810_v20, %v13814_v44  ;;  %v20823_v13 = vcombine.low %v13810_v20, %v13814_v44  ;;  %v20825_v60 = vcombine.low %v13811_v62, %v13815_v1  ;;  %v13863_v20 = vld [vmem:[#allocation7 + $0x19b8] sm:$0xff] }
 0x850   : > { %15016 = vmatpush1.bf16.msra.mxu0 %v20955_v19  ;;  %v20826_v19 = vcombine.high %v13811_v62, %v13815_v1 }
 0x851   : > { %15122 = vmatpush1.bf16.msra.mxu1 %v20957_v17  ;;  %15017 = vmatprep.subr.bf16.mxu0 %v20964_v40  ;;  %v13818_v17 = vld [vmem:[#allocation7 + $0x1850] sm:$0xff] }
 0x852   : > { %15003 = vmatmul.mubr.bf16.gmra.mrb[76].mxu0 %v26291_v22  ;;  %15123 = vmatprep.subr.bf16.mxu1 %v20966_v34  ;;  %v13822_v40 = vld [vmem:[#allocation7 + $0x1870] sm:$0xff]  ;;  %v13819_v34 = vld [vmem:[#allocation7 + $0x1858] sm:$0xff] }
 0x853   : > { %15109 = vmatmul.mubr.bf16.gmra.mrb[76].mxu1 %v26291_v22  ;;  %15045 = vmatprep.mubr.bf16.mxu0 %v26280_v36  ;;  %v20832_v24 = vcombine.high %v13818_v17, %v13822_v40  ;;  %v20831_v37 = vcombine.low %v13818_v17, %v13822_v40  ;;  %v20833_v9 = vcombine.low %v13819_v34, %v13823_v55 }
 0x854   : > { %15018 = vmatpush1.bf16.msra.mxu0 %v20963_v45  ;;  %15151 = vmatprep.mubr.bf16.mxu1 %v26280_v36  ;;  %v20834_v45 = vcombine.high %v13819_v34, %v13823_v55 }
 0x855   : > { %15124 = vmatpush1.bf16.msra.mxu1 %v20965_v27  ;;  %15019 = vmatprep.subr.bf16.mxu0 %v20972_v16  ;;  %v13826_v27 = vld [vmem:[#allocation7 + $0x1890] sm:$0xff] }
 0x856   : > { %15125 = vmatprep.subr.bf16.mxu1 %v20974_v11  ;;  %v13830_v16 = vld [vmem:[#allocation7 + $0x18b0] sm:$0xff]  ;;  %v13827_v11 = vld [vmem:[#allocation7 + $0x1898] sm:$0xff] }
 0x857   : > { %v20840_v51 = vcombine.high %v13826_v27, %v13830_v16  ;;  %v20841_v12 = vcombine.low %v13827_v11, %v13831_v48 }
 0x858   : > { %15020 = vmatpush1.bf16.msra.mxu0 %v20971_v0  ;;  %v20842_v0 = vcombine.high %v13827_v11, %v13831_v48 }
 0x859   : > { %15126 = vmatpush1.bf16.msra.mxu1 %v20973_v31  ;;  %15021 = vmatprep.subr.bf16.mxu0 %v20980_v61  ;;  %v13834_v31 = vld [vmem:[#allocation7 + $0x18d0] sm:$0xff] }
 0x85a   : > { %15127 = vmatprep.subr.bf16.mxu1 %v20982_v38  ;;  %v13838_v61 = vld [vmem:[#allocation7 + $0x18f0] sm:$0xff]  ;;  %v20839_v38 = vcombine.low %v13826_v27, %v13830_v16 }
 0x85b   : > { %v20848_v28 = vcombine.high %v13834_v31, %v13838_v61  ;;  %v20847_v5 = vcombine.low %v13834_v31, %v13838_v61 }
 0x85c   : > { %15022 = vmatpush1.bf16.msra.mxu0 %v20979_v15  ;;  %v13842_v15 = vld [vmem:[#allocation7 + $0x1910] sm:$0xff] }
 0x85d   : > { %15128 = vmatpush1.bf16.msra.mxu1 %v20981_v14  ;;  %15023 = vmatprep.subr.bf16.mxu0 %v20988_v8  ;;  %v13846_v14 = vld [vmem:[#allocation7 + $0x1930] sm:$0xff]  ;;  %v20850_v8 = vcombine.high %v13835_v56, %v13839_v46 }
 0x85e   : > { %15129 = vmatprep.subr.bf16.mxu1 %v20990_v10  ;;  %v13843_v10 = vld [vmem:[#allocation7 + $0x1918] sm:$0xff]  ;;  %v20856_v63 = vcombine.high %v13842_v15, %v13846_v14  ;;  %v20855_v33 = vcombine.low %v13842_v15, %v13846_v14  ;;  %v13890_v46 = vld [vmem:[#allocation7 + $0x1a90] sm:$0xff] }
 0x85f   : > { %v20857_v2 = vcombine.low %v13843_v10, %v13847_v50  ;;  %v13895_v15 = vld [vmem:[#allocation7 + $0x1ab8] sm:$0xff] }
 0x860   : > { %15024 = vmatpush1.bf16.msra.mxu0 %v20987_v30  ;;  %v20858_v30 = vcombine.high %v13843_v10, %v13847_v50 }
 0x861   : > { %15130 = vmatpush1.bf16.msra.mxu1 %v20989_v57  ;;  %15025 = vmatprep.subr.bf16.mxu0 %v20996_v52  ;;  %v13850_v57 = vld [vmem:[#allocation7 + $0x1950] sm:$0xff] }
 0x862   : > { %15131 = vmatprep.subr.bf16.mxu1 %v20998_v59  ;;  %v13854_v52 = vld [vmem:[#allocation7 + $0x1970] sm:$0xff]  ;;  %v13851_v59 = vld [vmem:[#allocation7 + $0x1958] sm:$0xff] }
 0x863   : > { %v20864_v26 = vcombine.high %v13850_v57, %v13854_v52  ;;  %v20865_v44 = vcombine.low %v13851_v59, %v13855_v39 }
 0x864   : > { %15026 = vmatpush1.bf16.msra.mxu0 %v20995_v25  ;;  %v20866_v25 = vcombine.high %v13851_v59, %v13855_v39 }
 0x865   : > { %15132 = vmatpush1.bf16.msra.mxu1 %v20997_v58  ;;  %15027 = vmatprep.subr.bf16.mxu0 %v21004_v32  ;;  %v13858_v58 = vld [vmem:[#allocation7 + $0x1990] sm:$0xff] }
 0x866   : > { %15133 = vmatprep.subr.bf16.mxu1 %v21006_v6  ;;  %v13862_v32 = vld [vmem:[#allocation7 + $0x19b0] sm:$0xff]  ;;  %v13859_v6 = vld [vmem:[#allocation7 + $0x1998] sm:$0xff] }
 0x867   : > { %v20872_v62 = vcombine.high %v13858_v58, %v13862_v32  ;;  %v20874_v1 = vcombine.high %v13859_v6, %v13863_v20  ;;  %v20871_v17 = vcombine.low %v13858_v58, %v13862_v32  ;;  %v20873_v40 = vcombine.low %v13859_v6, %v13863_v20 }
 0x868   : > { %15028 = vmatpush1.bf16.msra.mxu0 %v21003_v21  ;;  %v13866_v21 = vld [vmem:[#allocation7 + $0x19d0] sm:$0xff] }
 0x869   : > { %15134 = vmatpush1.bf16.msra.mxu1 %v21005_v18  ;;  %15172 = vmatprep.subr.bf16.mxu0 %v20824_v7  ;;  %v13870_v18 = vld [vmem:[#allocation7 + $0x19f0] sm:$0xff]  ;;  %v13867_v7 = vld [vmem:[#allocation7 + $0x19d8] sm:$0xff] }
 0x86a   : > { %15278 = vmatprep.subr.bf16.mxu1 %v20826_v19  ;;  %v13871_v19 = vld [vmem:[#allocation7 + $0x19f8] sm:$0xff]  ;;  %v20880_v34 = vcombine.high %v13866_v21, %v13870_v18  ;;  %v20879_v27 = vcombine.low %v13866_v21, %v13870_v18 }
 0x86b   : > { %15046 = vmatmul.mubr.bf16.vlgmr.msra.gmra.mrb[72].mxu0 %v26289_v29  ;;  %v20882_v55 = vcombine.high %v13867_v7, %v13871_v19  ;;  %v20881_v16 = vcombine.low %v13867_v7, %v13871_v19 }
 0x86c   : > { %15152 = vmatmul.mubr.bf16.vlgmr.msra.gmra.mrb[72].mxu1 %v26289_v29  ;;  %15173 = vmatpush1.bf16.msra.mxu0 %v20823_v13  ;;  %v13874_v13 = vld [vmem:[#allocation7 + $0x1a10] sm:$0xff] }
 0x86d   : > { %15279 = vmatpush1.bf16.msra.mxu1 %v20825_v60  ;;  %15174 = vmatprep.subr.bf16.mxu0 %v20832_v24  ;;  %v13878_v60 = vld [vmem:[#allocation7 + $0x1a30] sm:$0xff]  ;;  %v13875_v24 = vld [vmem:[#allocation7 + $0x1a18] sm:$0xff] }
 0x86e   : > { %15280 = vmatprep.subr.bf16.mxu1 %v20834_v45  ;;  %15055 = vmatprep.mubr.bf16.mxu0 %v26280_v36  ;;  %v13879_v45 = vld [vmem:[#allocation7 + $0x1a38] sm:$0xff]  ;;  %v20888_v11 = vcombine.high %v13874_v13, %v13878_v60  ;;  %v20887_v31 = vcombine.low %v13874_v13, %v13878_v60 }
 0x86f   : > { %15161 = vmatprep.mubr.bf16.mxu1 %v26280_v36  ;;  %v20890_v48 = vcombine.high %v13875_v24, %v13879_v45  ;;  %v20889_v61 = vcombine.low %v13875_v24, %v13879_v45 }
 0x870   : > { %15175 = vmatpush1.bf16.msra.mxu0 %v20831_v37  ;;  %v13882_v37 = vld [vmem:[#allocation7 + $0x1a50] sm:$0xff] }
 0x871   : > { %15281 = vmatpush1.bf16.msra.mxu1 %v20833_v9  ;;  %15176 = vmatprep.subr.bf16.mxu0 %v20840_v51  ;;  %v13886_v9 = vld [vmem:[#allocation7 + $0x1a70] sm:$0xff]  ;;  %v13883_v51 = vld [vmem:[#allocation7 + $0x1a58] sm:$0xff] }
 0x872   : > { %15282 = vmatprep.subr.bf16.mxu1 %v20842_v0  ;;  %v13887_v0 = vld [vmem:[#allocation7 + $0x1a78] sm:$0xff]  ;;  %v20895_v14 = vcombine.low %v13882_v37, %v13886_v9 }
 0x873   : > { %15056 = vmatmul.mubr.bf16.gmra.mrb[76].mxu0 %v26292_v35  ;;  %v20898_v56 = vcombine.high %v13883_v51, %v13887_v0 }
 0x874   : > { %15162 = vmatmul.mubr.bf16.gmra.mrb[76].mxu1 %v26292_v35  ;;  %15177 = vmatpush1.bf16.msra.mxu0 %v20839_v38  ;;  %v20896_v38 = vcombine.high %v13882_v37, %v13886_v9 }
 0x875   : > { %15204 = vmatprep.mubr.bf16.mxu0 %v26286_v42  ;;  %15283 = vmatpush1.bf16.msra.mxu1 %v20841_v12  ;;  %v13894_v12 = vld [vmem:[#allocation7 + $0x1ab0] sm:$0xff] }
 0x876   : > { %15310 = vmatprep.mubr.bf16.mxu1 %v26286_v42  ;;  %15178 = vmatprep.subr.bf16.mxu0 %v20848_v28  ;;  %v20863_v42 = vcombine.low %v13850_v57, %v13854_v52  ;;  %v13891_v28 = vld [vmem:[#allocation7 + $0x1a98] sm:$0xff]  ;;  %v20904_v10 = vcombine.high %v13890_v46, %v13894_v12  ;;  %v20903_v57 = vcombine.low %v13890_v46, %v13894_v12 }
 0x877   : > { %15284 = vmatprep.subr.bf16.mxu1 %v20850_v8  ;;  %v20897_v8 = vcombine.low %v13883_v51, %v13887_v0  ;;  %v20906_v50 = vcombine.high %v13891_v28, %v13895_v15  ;;  %v20905_v52 = vcombine.low %v13891_v28, %v13895_v15 }
 0x878   : > { %15179 = vmatpush1.bf16.msra.mxu0 %v20847_v5  ;;  %v13898_v5 = vld [vmem:[#allocation7 + $0x1ad0] sm:$0xff] }
 0x879   : > { %15285 = vmatpush1.bf16.msra.mxu1 %v20849_v47  ;;  %15180 = vmatprep.subr.bf16.mxu0 %v20856_v63  ;;  %v13902_v47 = vld [vmem:[#allocation7 + $0x1af0] sm:$0xff]  ;;  %v13899_v63 = vld [vmem:[#allocation7 + $0x1ad8] sm:$0xff] }
 0x87a   : > { %15286 = vmatprep.subr.bf16.mxu1 %v20858_v30  ;;  %v13903_v30 = vld [vmem:[#allocation7 + $0x1af8] sm:$0xff]  ;;  %v20912_v59 = vcombine.high %v13898_v5, %v13902_v47  ;;  %v20911_v58 = vcombine.low %v13898_v5, %v13902_v47 }
 0x87b   : > { %v20914_v39 = vcombine.high %v13899_v63, %v13903_v30  ;;  %v20913_v32 = vcombine.low %v13899_v63, %v13903_v30 }
 0x87c   : > { %15181 = vmatpush1.bf16.msra.mxu0 %v20855_v33  ;;  %v13906_v33 = vld [vmem:[#allocation7 + $0x1b10] sm:$0xff] }
 0x87d   : > { %15287 = vmatpush1.bf16.msra.mxu1 %v20857_v2  ;;  %15182 = vmatprep.subr.bf16.mxu0 %v20864_v26  ;;  %v13910_v2 = vld [vmem:[#allocation7 + $0x1b30] sm:$0xff]  ;;  %v13907_v26 = vld [vmem:[#allocation7 + $0x1b18] sm:$0xff] }
 0x87e   : > { %15288 = vmatprep.subr.bf16.mxu1 %v20866_v25  ;;  %v13911_v25 = vld [vmem:[#allocation7 + $0x1b38] sm:$0xff]  ;;  %v20920_v6 = vcombine.high %v13906_v33, %v13910_v2  ;;  %v20919_v21 = vcombine.low %v13906_v33, %v13910_v2 }
 0x87f   : > { %v20922_v20 = vcombine.high %v13907_v26, %v13911_v25  ;;  %v20921_v18 = vcombine.low %v13907_v26, %v13911_v25 }
 0x880   : > { %15183 = vmatpush1.bf16.msra.mxu0 %v20863_v42  ;;  %v13914_v42 = vld [vmem:[#allocation7 + $0x1b50] sm:$0xff] }
 0x881   : > { %15289 = vmatpush1.bf16.msra.mxu1 %v20865_v44  ;;  %15184 = vmatprep.subr.bf16.mxu0 %v20872_v62  ;;  %v13918_v44 = vld [vmem:[#allocation7 + $0x1b70] sm:$0xff]  ;;  %v13915_v62 = vld [vmem:[#allocation7 + $0x1b58] sm:$0xff] }
 0x882   : > { %15290 = vmatprep.subr.bf16.mxu1 %v20874_v1  ;;  %v13919_v1 = vld [vmem:[#allocation7 + $0x1b78] sm:$0xff]  ;;  %v20928_v7 = vcombine.high %v13914_v42, %v13918_v44  ;;  %v20927_v13 = vcombine.low %v13914_v42, %v13918_v44 }
 0x883   : > { %v20930_v19 = vcombine.high %v13915_v62, %v13919_v1  ;;  %v20929_v60 = vcombine.low %v13915_v62, %v13919_v1  ;;  %v13970_v62 = vld [vmem:[#allocation7 + $0x1d10] sm:$0xff] }
 0x884   : > { %15185 = vmatpush1.bf16.msra.mxu0 %v20871_v17  ;;  %v13922_v17 = vld [vmem:[#allocation7 + $0x1b90] sm:$0xff] }
 0x885   : > { %15291 = vmatpush1.bf16.msra.mxu1 %v20873_v40  ;;  %15186 = vmatprep.subr.bf16.mxu0 %v20880_v34  ;;  %v13926_v40 = vld [vmem:[#allocation7 + $0x1bb0] sm:$0xff]  ;;  %v13923_v34 = vld [vmem:[#allocation7 + $0x1b98] sm:$0xff] }
 0x886   : > { %15292 = vmatprep.subr.bf16.mxu1 %v20882_v55  ;;  %v13927_v55 = vld [vmem:[#allocation7 + $0x1bb8] sm:$0xff]  ;;  %v20936_v24 = vcombine.high %v13922_v17, %v13926_v40  ;;  %v20935_v37 = vcombine.low %v13922_v17, %v13926_v40  ;;  %v13974_v1 = vld [vmem:[#allocation7 + $0x1d30] sm:$0xff] }
 0x887   : > { %v20938_v45 = vcombine.high %v13923_v34, %v13927_v55  ;;  %v20937_v9 = vcombine.low %v13923_v34, %v13927_v55  ;;  %v20984_v17 = vcombine.high %v13970_v62, %v13974_v1  ;;  %v13978_v34 = vld [vmem:[#allocation7 + $0x1d50] sm:$0xff] }
 0x888   : > { %15187 = vmatpush1.bf16.msra.mxu0 %v20879_v27  ;;  %v13930_v27 = vld [vmem:[#allocation7 + $0x1bd0] sm:$0xff] }
 0x889   : > { %15293 = vmatpush1.bf16.msra.mxu1 %v20881_v16  ;;  %15188 = vmatprep.subr.bf16.mxu0 %v20888_v11  ;;  %v13934_v16 = vld [vmem:[#allocation7 + $0x1bf0] sm:$0xff]  ;;  %v13931_v11 = vld [vmem:[#allocation7 + $0x1bd8] sm:$0xff] }
 0x88a   : > { %15294 = vmatprep.subr.bf16.mxu1 %v20890_v48  ;;  %v13935_v48 = vld [vmem:[#allocation7 + $0x1bf8] sm:$0xff]  ;;  %v20944_v51 = vcombine.high %v13930_v27, %v13934_v16  ;;  %v20943_v46 = vcombine.low %v13930_v27, %v13934_v16  ;;  %v13982_v55 = vld [vmem:[#allocation7 + $0x1d70] sm:$0xff] }
 0x88b   : > { %v20946_v0 = vcombine.high %v13931_v11, %v13935_v48  ;;  %v20945_v12 = vcombine.low %v13931_v11, %v13935_v48  ;;  %v13986_v16 = vld [vmem:[#allocation7 + $0x1d90] sm:$0xff]  ;;  %v13987_v48 = vld [vmem:[#allocation7 + $0x1d98] sm:$0xff] }
 0x88c   : > { %15189 = vmatpush1.bf16.msra.mxu0 %v20887_v31  ;;  %v13938_v31 = vld [vmem:[#allocation7 + $0x1c10] sm:$0xff] }
 0x88d   : > { %15295 = vmatpush1.bf16.msra.mxu1 %v20889_v61  ;;  %15190 = vmatprep.subr.bf16.mxu0 %v20896_v38  ;;  %v13942_v61 = vld [vmem:[#allocation7 + $0x1c30] sm:$0xff]  ;;  %v13939_v38 = vld [vmem:[#allocation7 + $0x1c18] sm:$0xff] }
 0x88e   : > { %15296 = vmatprep.subr.bf16.mxu1 %v20898_v56  ;;  %v13943_v56 = vld [vmem:[#allocation7 + $0x1c38] sm:$0xff]  ;;  %v20952_v28 = vcombine.high %v13938_v31, %v13942_v61  ;;  %v20951_v5 = vcombine.low %v13938_v31, %v13942_v61  ;;  %v13990_v11 = vld [vmem:[#allocation7 + $0x1db0] sm:$0xff] }
 0x88f   : > { %v20954_v15 = vcombine.high %v13939_v38, %v13943_v56  ;;  %v20953_v47 = vcombine.low %v13939_v38, %v13943_v56  ;;  %v13994_v61 = vld [vmem:[#allocation7 + $0x1dd0] sm:$0xff]  ;;  %v13995_v56 = vld [vmem:[#allocation7 + $0x1dd8] sm:$0xff] }
 0x890   : > { %15191 = vmatpush1.bf16.msra.mxu0 %v20895_v14  ;;  %v13946_v14 = vld [vmem:[#allocation7 + $0x1c50] sm:$0xff] }
 0x891   : > { %15297 = vmatpush1.bf16.msra.mxu1 %v20897_v8  ;;  %15192 = vmatprep.subr.bf16.mxu0 %v20904_v10  ;;  %v13950_v8 = vld [vmem:[#allocation7 + $0x1c70] sm:$0xff]  ;;  %v13947_v10 = vld [vmem:[#allocation7 + $0x1c58] sm:$0xff] }
 0x892   : > { %15298 = vmatprep.subr.bf16.mxu1 %v20906_v50  ;;  %v13951_v50 = vld [vmem:[#allocation7 + $0x1c78] sm:$0xff]  ;;  %v20960_v63 = vcombine.high %v13946_v14, %v13950_v8  ;;  %v20959_v33 = vcombine.low %v13946_v14, %v13950_v8  ;;  %v13998_v38 = vld [vmem:[#allocation7 + $0x1df0] sm:$0xff]  ;;  %v15417_v8 = vld [vmem:[#allocation7 + $0x1e00] sm:$0xff] }
 0x893   : > { %v20962_v30 = vcombine.high %v13947_v10, %v13951_v50  ;;  %v20961_v2 = vcombine.low %v13947_v10, %v13951_v50  ;;  %v15421_v10 = vld [vmem:[#allocation7 + $0x1e20] sm:$0xff]  ;;  %v15418_v50 = vld [vmem:[#allocation7 + $0x1e08] sm:$0xff] }
 0x894   : > { %15193 = vmatpush1.bf16.msra.mxu0 %v20903_v57  ;;  %v13954_v57 = vld [vmem:[#allocation7 + $0x1c90] sm:$0xff] }
 0x895   : > { %15299 = vmatpush1.bf16.msra.mxu1 %v20905_v52  ;;  %15194 = vmatprep.subr.bf16.mxu0 %v20912_v59  ;;  %v13958_v52 = vld [vmem:[#allocation7 + $0x1cb0] sm:$0xff]  ;;  %v13955_v59 = vld [vmem:[#allocation7 + $0x1c98] sm:$0xff] }
 0x896   : > { %15300 = vmatprep.subr.bf16.mxu1 %v20914_v39  ;;  %v13959_v39 = vld [vmem:[#allocation7 + $0x1cb8] sm:$0xff]  ;;  %v20968_v26 = vcombine.high %v13954_v57, %v13958_v52 }
 0x897   : > { %v20970_v25 = vcombine.high %v13955_v59, %v13959_v39  ;;  %v20969_v42 = vcombine.low %v13955_v59, %v13959_v39  ;;  %v15429_v59 = vld [vmem:[#allocation7 + $0x1e60] sm:$0xff]  ;;  %v15426_v39 = vld [vmem:[#allocation7 + $0x1e48] sm:$0xff] }
 0x898   : > { %15195 = vmatpush1.bf16.msra.mxu0 %v20911_v58  ;;  %v13962_v58 = vld [vmem:[#allocation7 + $0x1cd0] sm:$0xff] }
 0x899   : > { %15301 = vmatpush1.bf16.msra.mxu1 %v20913_v32  ;;  %15196 = vmatprep.subr.bf16.mxu0 %v20920_v6  ;;  %v13966_v32 = vld [vmem:[#allocation7 + $0x1cf0] sm:$0xff]  ;;  %v13963_v6 = vld [vmem:[#allocation7 + $0x1cd8] sm:$0xff] }
 0x89a   : > { %15302 = vmatprep.subr.bf16.mxu1 %v20922_v20  ;;  %v13967_v20 = vld [vmem:[#allocation7 + $0x1cf8] sm:$0xff]  ;;  %v20976_v44 = vcombine.high %v13962_v58, %v13966_v32 }
 0x89c   : > { %15197 = vmatpush1.bf16.msra.mxu0 %v20919_v21  ;;  %v13971_v21 = vld [vmem:[#allocation7 + $0x1d18] sm:$0xff] }
 0x89d   : > { %15303 = vmatpush1.bf16.msra.mxu1 %v20921_v18  ;;  %15198 = vmatprep.subr.bf16.mxu0 %v20928_v7  ;;  %v13975_v18 = vld [vmem:[#allocation7 + $0x1d38] sm:$0xff]  ;;  %v20975_v7 = vcombine.low %v13962_v58, %v13966_v32  ;;  %v15433_v32 = vld [vmem:[#allocation7 + $0x1e80] sm:$0xff] }
 0x89e   : > { %15304 = vmatprep.subr.bf16.mxu1 %v20930_v19  ;;  %v20977_v19 = vcombine.low %v13963_v6, %v13967_v20  ;;  %v20986_v40 = vcombine.high %v13971_v21, %v13975_v18 }
 0x8a0   : > { %15199 = vmatpush1.bf16.msra.mxu0 %v20927_v13  ;;  %v13979_v13 = vld [vmem:[#allocation7 + $0x1d58] sm:$0xff] }
 0x8a1   : > { %15305 = vmatpush1.bf16.msra.mxu1 %v20929_v60  ;;  %15200 = vmatprep.subr.bf16.mxu0 %v20936_v24  ;;  %v13983_v60 = vld [vmem:[#allocation7 + $0x1d78] sm:$0xff]  ;;  %v20985_v24 = vcombine.low %v13971_v21, %v13975_v18  ;;  %v15445_v21 = vld [vmem:[#allocation7 + $0x1ee0] sm:$0xff] }
 0x8a2   : > { %15306 = vmatprep.subr.bf16.mxu1 %v20938_v45  ;;  %v20992_v45 = vcombine.high %v13978_v34, %v13982_v55  ;;  %v20994_v27 = vcombine.high %v13979_v13, %v13983_v60 }
 0x8a4   : > { %15201 = vmatpush1.bf16.msra.mxu0 %v20935_v37  ;;  %v13991_v37 = vld [vmem:[#allocation7 + $0x1db8] sm:$0xff] }
 0x8a5   : > { %15307 = vmatpush1.bf16.msra.mxu1 %v20937_v9  ;;  %15202 = vmatprep.subr.bf16.mxu0 %v20944_v51  ;;  %v20991_v9 = vcombine.low %v13978_v34, %v13982_v55  ;;  %v20993_v51 = vcombine.low %v13979_v13, %v13983_v60  ;;  %v21002_v31 = vcombine.high %v13987_v48, %v13991_v37  ;;  %v15453_v34 = vld [vmem:[#allocation7 + $0x1f20] sm:$0xff]  ;;  %v15450_v13 = vld [vmem:[#allocation7 + $0x1f08] sm:$0xff] }
 0x8a6   : > { %15308 = vmatprep.subr.bf16.mxu1 %v20946_v0  ;;  %v21000_v0 = vcombine.high %v13986_v16, %v13990_v11  ;;  %v15454_v60 = vld [vmem:[#allocation7 + $0x1f28] sm:$0xff] }
 0x8a8   : > { %15203 = vmatpush1.bf16.msra.mxu0 %v20943_v46  ;;  %v13999_v46 = vld [vmem:[#allocation7 + $0x1df8] sm:$0xff] }
 0x8a9   : > { %15309 = vmatpush1.bf16.msra.mxu1 %v20945_v12  ;;  %15225 = vmatprep.subr.bf16.mxu0 %v20952_v28  ;;  %v20999_v12 = vcombine.low %v13986_v16, %v13990_v11  ;;  %v21001_v28 = vcombine.low %v13987_v48, %v13991_v37  ;;  %v21010_v14 = vcombine.high %v13995_v56, %v13999_v46  ;;  %v15457_v16 = vld [vmem:[#allocation7 + $0x1f40] sm:$0xff]  ;;  %v15458_v48 = vld [vmem:[#allocation7 + $0x1f48] sm:$0xff] }
 0x8aa   : > { %15331 = vmatprep.subr.bf16.mxu1 %v20954_v15  ;;  %v21008_v15 = vcombine.high %v13994_v61, %v13998_v38  ;;  %v15461_v11 = vld [vmem:[#allocation7 + $0x1f60] sm:$0xff]  ;;  %v15462_v37 = vld [vmem:[#allocation7 + $0x1f68] sm:$0xff] }
 0x8ab   : > { %15205 = vmatmul.mubr.bf16.vlgmr.msra.gmra.mrb[80].mxu0 %v26287_v4 }
 0x8ac   : > { %15311 = vmatmul.mubr.bf16.vlgmr.msra.gmra.mrb[80].mxu1 %v26287_v4  ;;  %15214 = vmatprep.mubr.bf16.mxu0 %v26290_v23  ;;  %v20967_v4 = vcombine.low %v13954_v57, %v13958_v52  ;;  %v15425_v52 = vld [vmem:[#allocation7 + $0x1e40] sm:$0xff] }
 0x8ad   : > { %15226 = vmatpush1.bf16.msra.mxu0 %v20951_v5  ;;  %15320 = vmatprep.mubr.bf16.mxu1 %v26290_v23  ;;  %v20978_v23 = vcombine.high %v13963_v6, %v13967_v20  ;;  %v15422_v5 = vld [vmem:[#allocation7 + $0x1e28] sm:$0xff]  ;;  %v15437_v6 = vld [vmem:[#allocation7 + $0x1ea0] sm:$0xff] }
 0x8ae   : > { %15332 = vmatpush1.bf16.msra.mxu1 %v20953_v47  ;;  %15227 = vmatprep.subr.bf16.mxu0 %v20960_v63  ;;  %v21007_v47 = vcombine.low %v13994_v61, %v13998_v38  ;;  %v21009_v63 = vcombine.low %v13995_v56, %v13999_v46  ;;  %v21014_v57 = vcombine.high %v15418_v50, %v15422_v5  ;;  %v15434_v20 = vld [vmem:[#allocation7 + $0x1e88] sm:$0xff]  ;;  %v15469_v61 = vld [vmem:[#allocation7 + $0x1fa0] sm:$0xff] }
 0x8af   : > { %15333 = vmatprep.subr.bf16.mxu1 %v20962_v30  ;;  %v21012_v30 = vcombine.high %v15417_v8, %v15421_v10  ;;  %v21027_v18 = vcombine.low %v15433_v32, %v15437_v6  ;;  %v15466_v38 = vld [vmem:[#allocation7 + $0x1f88] sm:$0xff]  ;;  %v21051_v46 = vcombine.low %v15457_v16, %v15461_v11 }
 0x8b0   : > { %v15470_v56 = vld [vmem:[#allocation7 + $0x1fa8] sm:$0xff] }
 0x8b1   : > { %15228 = vmatpush1.bf16.msra.mxu0 %v20959_v33  ;;  %v15430_v33 = vld [vmem:[#allocation7 + $0x1e68] sm:$0xff] }
 0x8b2   : > { %15334 = vmatpush1.bf16.msra.mxu1 %v20961_v2  ;;  %15229 = vmatprep.subr.bf16.mxu0 %v20968_v26  ;;  %v21011_v2 = vcombine.low %v15417_v8, %v15421_v10  ;;  %v21013_v26 = vcombine.low %v15418_v50, %v15422_v5  ;;  %v21022_v58 = vcombine.high %v15426_v39, %v15430_v33  ;;  %v15477_v8 = vld [vmem:[#allocation7 + $0x1fe0] sm:$0xff]  ;;  %v15474_v10 = vld [vmem:[#allocation7 + $0x1fc8] sm:$0xff] }
 0x8b3   : > { %15215 = vmatmul.mubr.bf16.gmra.mrb[84].mxu0 %v26291_v22  ;;  %15335 = vmatprep.subr.bf16.mxu1 %v20970_v25  ;;  %v21020_v25 = vcombine.high %v15425_v52, %v15429_v59  ;;  %v15478_v50 = vld [vmem:[#allocation7 + $0x1fe8] sm:$0xff] }
 0x8b4   : > { %15321 = vmatmul.mubr.bf16.gmra.mrb[84].mxu1 %v26291_v22  ;;  %15257 = vmatprep.mubr.bf16.mxu0 %v26280_v36  ;;  %v20983_v22 = vcombine.low %v13970_v62, %v13974_v1  ;;  %v15441_v1 = vld [vmem:[#allocation7 + $0x1ec0] sm:$0xff] }
 0x8b5   : > { %15230 = vmatpush1.bf16.msra.mxu0 %v20967_v4  ;;  %15363 = vmatprep.mubr.bf16.mxu1 %v26280_v36  ;;  %v15438_v4 = vld [vmem:[#allocation7 + $0x1ea8] sm:$0xff] }
 0x8b6   : > { %15336 = vmatpush1.bf16.msra.mxu1 %v20969_v42  ;;  %15231 = vmatprep.subr.bf16.mxu0 %v20976_v44  ;;  %v21019_v42 = vcombine.low %v15425_v52, %v15429_v59  ;;  %v21021_v44 = vcombine.low %v15426_v39, %v15430_v33  ;;  %v21030_v62 = vcombine.high %v15434_v20, %v15438_v4  ;;  %v15485_v52 = vld [vmem:[#allocation7 + $0x2020] sm:$0xff]  ;;  %v15482_v59 = vld [vmem:[#allocation7 + $0x2008] sm:$0xff] }
 0x8b7   : > { %15337 = vmatprep.subr.bf16.mxu1 %v20978_v23  ;;  %v21028_v23 = vcombine.high %v15433_v32, %v15437_v6  ;;  %v15486_v39 = vld [vmem:[#allocation7 + $0x2028] sm:$0xff]  ;;  %v15493_v32 = vld [vmem:[#allocation7 + $0x2060] sm:$0xff] }
 0x8b8   : > { %v15490_v6 = vld [vmem:[#allocation7 + $0x2048] sm:$0xff] }
 0x8b9   : > { %15232 = vmatpush1.bf16.msra.mxu0 %v20975_v7  ;;  %v15442_v7 = vld [vmem:[#allocation7 + $0x1ec8] sm:$0xff] }
 0x8ba   : > { %15338 = vmatpush1.bf16.msra.mxu1 %v20977_v19  ;;  %15233 = vmatprep.subr.bf16.mxu0 %v20984_v17  ;;  %v15446_v19 = vld [vmem:[#allocation7 + $0x1ee8] sm:$0xff]  ;;  %v21036_v17 = vcombine.high %v15441_v1, %v15445_v21 }
 0x8bb   : > { %15339 = vmatprep.subr.bf16.mxu1 %v20986_v40  ;;  %v15449_v40 = vld [vmem:[#allocation7 + $0x1f00] sm:$0xff]  ;;  %v21038_v55 = vcombine.high %v15442_v7, %v15446_v19 }
 0x8bd   : > { %15234 = vmatpush1.bf16.msra.mxu0 %v20983_v22  ;;  %v21035_v22 = vcombine.low %v15441_v1, %v15445_v21  ;;  %v15501_v1 = vld [vmem:[#allocation7 + $0x20a0] sm:$0xff]  ;;  %v15498_v21 = vld [vmem:[#allocation7 + $0x2088] sm:$0xff] }
 0x8be   : > { %15340 = vmatpush1.bf16.msra.mxu1 %v20985_v24  ;;  %15235 = vmatprep.subr.bf16.mxu0 %v20992_v45  ;;  %v21037_v24 = vcombine.low %v15442_v7, %v15446_v19  ;;  %v21044_v45 = vcombine.high %v15449_v40, %v15453_v34 }
 0x8bf   : > { %15341 = vmatprep.subr.bf16.mxu1 %v20994_v27  ;;  %v21046_v27 = vcombine.high %v15450_v13, %v15454_v60 }
 0x8c1   : > { %15236 = vmatpush1.bf16.msra.mxu0 %v20991_v9  ;;  %v21043_v9 = vcombine.low %v15449_v40, %v15453_v34  ;;  %v15505_v40 = vld [vmem:[#allocation7 + $0x20c0] sm:$0xff] }
 0x8c2   : > { %15342 = vmatpush1.bf16.msra.mxu1 %v20993_v51  ;;  %15237 = vmatprep.subr.bf16.mxu0 %v21000_v0  ;;  %v21052_v51 = vcombine.high %v15457_v16, %v15461_v11  ;;  %v21054_v0 = vcombine.high %v15458_v48, %v15462_v37  ;;  %v15509_v34 = vld [vmem:[#allocation7 + $0x20e0] sm:$0xff]  ;;  %v15514_v11 = vld [vmem:[#allocation7 + $0x2108] sm:$0xff] }
 0x8c3   : > { %15343 = vmatprep.subr.bf16.mxu1 %v21002_v31  ;;  %v15465_v31 = vld [vmem:[#allocation7 + $0x1f80] sm:$0xff] }
 0x8c4   : > { %v21059_v5 = vcombine.low %v15465_v31, %v15469_v61  ;;  %v15517_v16 = vld [vmem:[#allocation7 + $0x2120] sm:$0xff] }
 0x8c5   : > { %15238 = vmatpush1.bf16.msra.mxu0 %v20999_v12  ;;  %v21053_v12 = vcombine.low %v15458_v48, %v15462_v37  ;;  %v15518_v48 = vld [vmem:[#allocation7 + $0x2128] sm:$0xff]  ;;  %v21099_v37 = vcombine.low %v15505_v40, %v15509_v34 }
 0x8c6   : > { %15344 = vmatpush1.bf16.msra.mxu1 %v21001_v28  ;;  %15239 = vmatprep.subr.bf16.mxu0 %v21008_v15  ;;  %v21060_v28 = vcombine.high %v15465_v31, %v15469_v61  ;;  %v21062_v15 = vcombine.high %v15466_v38, %v15470_v56  ;;  %v15525_v31 = vld [vmem:[#allocation7 + $0x2160] sm:$0xff]  ;;  %v15522_v61 = vld [vmem:[#allocation7 + $0x2148] sm:$0xff] }
 0x8c7   : > { %15345 = vmatprep.subr.bf16.mxu1 %v21010_v14  ;;  %v15473_v14 = vld [vmem:[#allocation7 + $0x1fc0] sm:$0xff] }
 0x8c8   : > { %v21067_v33 = vcombine.low %v15473_v14, %v15477_v8 }
 0x8c9   : > { %15240 = vmatpush1.bf16.msra.mxu0 %v21007_v47  ;;  %v21061_v47 = vcombine.low %v15466_v38, %v15470_v56  ;;  %v15526_v38 = vld [vmem:[#allocation7 + $0x2168] sm:$0xff] }
 0x8ca   : > { %15346 = vmatpush1.bf16.msra.mxu1 %v21009_v63  ;;  %16569 = vmatprep.subr.bf16.mxu0 %v21012_v30  ;;  %v21068_v63 = vcombine.high %v15473_v14, %v15477_v8  ;;  %v21070_v30 = vcombine.high %v15474_v10, %v15478_v50  ;;  %v15533_v14 = vld [vmem:[#allocation7 + $0x21a0] sm:$0xff]  ;;  %v15530_v8 = vld [vmem:[#allocation7 + $0x2188] sm:$0xff] }
 0x8cb   : > { %16675 = vmatprep.subr.bf16.mxu1 %v21014_v57  ;;  %v15481_v57 = vld [vmem:[#allocation7 + $0x2000] sm:$0xff] }
 0x8cc   : > { %15258 = vmatmul.mubr.bf16.vlgmr.msra.gmra.mrb[80].mxu0 %v26289_v29 }
 0x8cd   : > { %15364 = vmatmul.mubr.bf16.vlgmr.msra.gmra.mrb[80].mxu1 %v26289_v29  ;;  %16570 = vmatpush1.bf16.msra.mxu0 %v21011_v2  ;;  %v21029_v29 = vcombine.low %v15434_v20, %v15438_v4  ;;  %v21069_v2 = vcombine.low %v15474_v10, %v15478_v50  ;;  %v15494_v20 = vld [vmem:[#allocation7 + $0x2068] sm:$0xff]  ;;  %v21075_v4 = vcombine.low %v15481_v57, %v15485_v52 }
 0x8ce   : > { %16676 = vmatpush1.bf16.msra.mxu1 %v21013_v26  ;;  %16571 = vmatprep.subr.bf16.mxu0 %v21020_v25  ;;  %v21076_v26 = vcombine.high %v15481_v57, %v15485_v52  ;;  %v21078_v25 = vcombine.high %v15482_v59, %v15486_v39  ;;  %v21085_v19 = vcombine.low %v15490_v6, %v15494_v20  ;;  %v15534_v10 = vld [vmem:[#allocation7 + $0x21a8] sm:$0xff]  ;;  %v15541_v57 = vld [vmem:[#allocation7 + $0x21e0] sm:$0xff] }
 0x8cf   : > { %16677 = vmatprep.subr.bf16.mxu1 %v21022_v58  ;;  %15267 = vmatprep.mubr.bf16.mxu0 %v26280_v36  ;;  %v15489_v58 = vld [vmem:[#allocation7 + $0x2040] sm:$0xff]  ;;  %v15538_v52 = vld [vmem:[#allocation7 + $0x21c8] sm:$0xff] }
 0x8d0   : > { %15373 = vmatprep.mubr.bf16.mxu1 %v26280_v36  ;;  %v21083_v7 = vcombine.low %v15489_v58, %v15493_v32 }
 0x8d1   : > { %16572 = vmatpush1.bf16.msra.mxu0 %v21019_v42  ;;  %v21077_v42 = vcombine.low %v15482_v59, %v15486_v39  ;;  %v15542_v59 = vld [vmem:[#allocation7 + $0x21e8] sm:$0xff] }
 0x8d2   : > { %16678 = vmatpush1.bf16.msra.mxu1 %v21021_v44  ;;  %16573 = vmatprep.subr.bf16.mxu0 %v21028_v23  ;;  %v21084_v44 = vcombine.high %v15489_v58, %v15493_v32  ;;  %v21086_v23 = vcombine.high %v15490_v6, %v15494_v20  ;;  %v15549_v58 = vld [vmem:[#allocation7 + $0x2220] sm:$0xff]  ;;  %v15546_v32 = vld [vmem:[#allocation7 + $0x2208] sm:$0xff] }
 0x8d3   : > { %16679 = vmatprep.subr.bf16.mxu1 %v21030_v62  ;;  %v15497_v62 = vld [vmem:[#allocation7 + $0x2080] sm:$0xff]  ;;  %v15550_v6 = vld [vmem:[#allocation7 + $0x2228] sm:$0xff] }
 0x8d4   : > { %15268 = vmatmul.mubr.bf16.gmra.mrb[84].mxu0 %v26292_v35 }
 0x8d5   : > { %15374 = vmatmul.mubr.bf16.gmra.mrb[84].mxu1 %v26292_v35  ;;  %16574 = vmatpush1.bf16.msra.mxu0 %v21027_v18  ;;  %v21045_v35 = vcombine.low %v15450_v13, %v15454_v60  ;;  %v15502_v18 = vld [vmem:[#allocation7 + $0x20a8] sm:$0xff]  ;;  %v21091_v60 = vcombine.low %v15497_v62, %v15501_v1 }
 0x8d6   : > { %16601 = vmatprep.mubr.bf16.mxu0 %v25708_v41  ;;  %16680 = vmatpush1.bf16.msra.mxu1 %v21029_v29  ;;  %v21092_v29 = vcombine.high %v15497_v62, %v15501_v1  ;;  %v15510_v13 = vld [vmem:[#allocation7 + $0x20e8] sm:$0xff]  ;;  %v15557_v62 = vld [vmem:[#allocation7 + $0x2260] sm:$0xff] }
 0x8d7   : > { %16707 = vmatprep.mubr.bf16.mxu1 %v25708_v41  ;;  %16575 = vmatprep.subr.bf16.mxu0 %v21036_v17  ;;  %v21094_v17 = vcombine.high %v15498_v21, %v15502_v18  ;;  %v15554_v1 = vld [vmem:[#allocation7 + $0x2248] sm:$0xff] }
 0x8d8   : > { %16681 = vmatprep.subr.bf16.mxu1 %v21038_v55  ;;  %v15506_v55 = vld [vmem:[#allocation7 + $0x20c8] sm:$0xff] }
 0x8d9   : > { %16576 = vmatpush1.bf16.msra.mxu0 %v21035_v22  ;;  %v21093_v22 = vcombine.low %v15498_v21, %v15502_v18  ;;  %v15558_v21 = vld [vmem:[#allocation7 + $0x2268] sm:$0xff] }
 0x8da   : > { %16682 = vmatpush1.bf16.msra.mxu1 %v21037_v24  ;;  %16577 = vmatprep.subr.bf16.mxu0 %v21044_v45  ;;  %v21100_v24 = vcombine.high %v15505_v40, %v15509_v34  ;;  %v21102_v45 = vcombine.high %v15506_v55, %v15510_v13  ;;  %v15565_v40 = vld [vmem:[#allocation7 + $0x22a0] sm:$0xff]  ;;  %v15562_v34 = vld [vmem:[#allocation7 + $0x2288] sm:$0xff] }
 0x8db   : > { %16683 = vmatprep.subr.bf16.mxu1 %v21046_v27  ;;  %v15513_v27 = vld [vmem:[#allocation7 + $0x2100] sm:$0xff] }
 0x8dc   : > { %v21107_v56 = vcombine.low %v15513_v27, %v15517_v16 }
 0x8dd   : > { %16578 = vmatpush1.bf16.msra.mxu0 %v21043_v9  ;;  %v21101_v9 = vcombine.low %v15506_v55, %v15510_v13  ;;  %v15566_v55 = vld [vmem:[#allocation7 + $0x22a8] sm:$0xff] }
 0x8de   : > { %16684 = vmatpush1.bf16.msra.mxu1 %v21045_v35  ;;  %16579 = vmatprep.subr.bf16.mxu0 %v21052_v51  ;;  %v21108_v35 = vcombine.high %v15513_v27, %v15517_v16  ;;  %v21110_v51 = vcombine.high %v15514_v11, %v15518_v48  ;;  %v15573_v27 = vld [vmem:[#allocation7 + $0x22e0] sm:$0xff]  ;;  %v15570_v16 = vld [vmem:[#allocation7 + $0x22c8] sm:$0xff] }
 0x8df   : > { %16685 = vmatprep.subr.bf16.mxu1 %v21054_v0  ;;  %v15521_v0 = vld [vmem:[#allocation7 + $0x2140] sm:$0xff] }
 0x8e0   : > { %v21115_v50 = vcombine.low %v15521_v0, %v15525_v31 }
 0x8e1   : > { %16580 = vmatpush1.bf16.msra.mxu0 %v21051_v46  ;;  %v21109_v46 = vcombine.low %v15514_v11, %v15518_v48  ;;  %v15574_v11 = vld [vmem:[#allocation7 + $0x22e8] sm:$0xff] }
 0x8e2   : > { %16686 = vmatpush1.bf16.msra.mxu1 %v21053_v12  ;;  %16581 = vmatprep.subr.bf16.mxu0 %v21060_v28  ;;  %v21116_v12 = vcombine.high %v15521_v0, %v15525_v31  ;;  %v21118_v28 = vcombine.high %v15522_v61, %v15526_v38  ;;  %v15581_v0 = vld [vmem:[#allocation7 + $0x2320] sm:$0xff]  ;;  %v15578_v31 = vld [vmem:[#allocation7 + $0x2308] sm:$0xff] }
 0x8e3   : > { %16687 = vmatprep.subr.bf16.mxu1 %v21062_v15  ;;  %v15529_v15 = vld [vmem:[#allocation7 + $0x2180] sm:$0xff] }
 0x8e4   : > { %v21123_v39 = vcombine.low %v15529_v15, %v15533_v14 }
 0x8e5   : > { %16582 = vmatpush1.bf16.msra.mxu0 %v21059_v5  ;;  %v21117_v5 = vcombine.low %v15522_v61, %v15526_v38  ;;  %v15582_v61 = vld [vmem:[#allocation7 + $0x2328] sm:$0xff] }
 0x8e6   : > { %16688 = vmatpush1.bf16.msra.mxu1 %v21061_v47  ;;  %16583 = vmatprep.subr.bf16.mxu0 %v21068_v63  ;;  %v21124_v47 = vcombine.high %v15529_v15, %v15533_v14  ;;  %v21126_v63 = vcombine.high %v15530_v8, %v15534_v10  ;;  %v15589_v15 = vld [vmem:[#allocation7 + $0x2360] sm:$0xff]  ;;  %v15586_v14 = vld [vmem:[#allocation7 + $0x2348] sm:$0xff] }
 0x8e7   : > { %16689 = vmatprep.subr.bf16.mxu1 %v21070_v30  ;;  %v15537_v30 = vld [vmem:[#allocation7 + $0x21c0] sm:$0xff] }
 0x8e8   : > { %v21131_v20 = vcombine.low %v15537_v30, %v15541_v57 }
 0x8e9   : > { %16584 = vmatpush1.bf16.msra.mxu0 %v21067_v33  ;;  %v21125_v33 = vcombine.low %v15530_v8, %v15534_v10  ;;  %v15590_v8 = vld [vmem:[#allocation7 + $0x2368] sm:$0xff] }
 0x8ea   : > { %16690 = vmatpush1.bf16.msra.mxu1 %v21069_v2  ;;  %16585 = vmatprep.subr.bf16.mxu0 %v21076_v26  ;;  %v21132_v2 = vcombine.high %v15537_v30, %v15541_v57  ;;  %v21134_v26 = vcombine.high %v15538_v52, %v15542_v59  ;;  %v15597_v30 = vld [vmem:[#allocation7 + $0x23a0] sm:$0xff]  ;;  %v15594_v57 = vld [vmem:[#allocation7 + $0x2388] sm:$0xff] }
 0x8eb   : > { %16691 = vmatprep.subr.bf16.mxu1 %v21078_v25  ;;  %v15545_v25 = vld [vmem:[#allocation7 + $0x2200] sm:$0xff] }
 0x8ec   : > { %v21139_v18 = vcombine.low %v15545_v25, %v15549_v58 }
 0x8ed   : > { %16586 = vmatpush1.bf16.msra.mxu0 %v21075_v4  ;;  %v21133_v4 = vcombine.low %v15538_v52, %v15542_v59  ;;  %v15598_v52 = vld [vmem:[#allocation7 + $0x23a8] sm:$0xff] }
 0x8ee   : > { %16692 = vmatpush1.bf16.msra.mxu1 %v21077_v42  ;;  %16587 = vmatprep.subr.bf16.mxu0 %v21084_v44  ;;  %v21140_v42 = vcombine.high %v15545_v25, %v15549_v58  ;;  %v21142_v44 = vcombine.high %v15546_v32, %v15550_v6  ;;  %v15605_v25 = vld [vmem:[#allocation7 + $0x23e0] sm:$0xff]  ;;  %v15602_v58 = vld [vmem:[#allocation7 + $0x23c8] sm:$0xff] }
 0x8ef   : > { %16693 = vmatprep.subr.bf16.mxu1 %v21086_v23  ;;  %v15553_v23 = vld [vmem:[#allocation7 + $0x2240] sm:$0xff] }
 0x8f0   : > { %v21147_v13 = vcombine.low %v15553_v23, %v15557_v62 }
 0x8f1   : > { %16588 = vmatpush1.bf16.msra.mxu0 %v21083_v7  ;;  %v21141_v7 = vcombine.low %v15546_v32, %v15550_v6  ;;  %v15606_v32 = vld [vmem:[#allocation7 + $0x23e8] sm:$0xff] }
 0x8f2   : > { %16694 = vmatpush1.bf16.msra.mxu1 %v21085_v19  ;;  %16589 = vmatprep.subr.bf16.mxu0 %v21092_v29  ;;  %v21148_v19 = vcombine.high %v15553_v23, %v15557_v62  ;;  %v21150_v29 = vcombine.high %v15554_v1, %v15558_v21  ;;  %v15423_v23 = vld [vmem:[#allocation7 + $0x1e30] sm:$0xff]  ;;  %v15420_v62 = vld [vmem:[#allocation7 + $0x1e18] sm:$0xff] }
 0x8f3   : > { %16695 = vmatprep.subr.bf16.mxu1 %v21094_v17  ;;  %v15561_v17 = vld [vmem:[#allocation7 + $0x2280] sm:$0xff] }
 0x8f4   : > { %v21155_v48 = vcombine.low %v15561_v17, %v15565_v40 }
 0x8f5   : > { %16590 = vmatpush1.bf16.msra.mxu0 %v21091_v60  ;;  %v21149_v60 = vcombine.low %v15554_v1, %v15558_v21  ;;  %v15424_v1 = vld [vmem:[#allocation7 + $0x1e38] sm:$0xff] }
 0x8f6   : > { %16696 = vmatpush1.bf16.msra.mxu1 %v21093_v22  ;;  %16591 = vmatprep.subr.bf16.mxu0 %v21100_v24  ;;  %v21156_v22 = vcombine.high %v15561_v17, %v15565_v40  ;;  %v21158_v24 = vcombine.high %v15562_v34, %v15566_v55  ;;  %v15431_v17 = vld [vmem:[#allocation7 + $0x1e70] sm:$0xff]  ;;  %v15428_v40 = vld [vmem:[#allocation7 + $0x1e58] sm:$0xff] }
 0x8f7   : > { %16697 = vmatprep.subr.bf16.mxu1 %v21102_v45  ;;  %v15569_v45 = vld [vmem:[#allocation7 + $0x22c0] sm:$0xff] }
 0x8f8   : > { %v21163_v38 = vcombine.low %v15569_v45, %v15573_v27 }
 0x8f9   : > { %16592 = vmatpush1.bf16.msra.mxu0 %v21099_v37  ;;  %v21157_v37 = vcombine.low %v15562_v34, %v15566_v55  ;;  %v15432_v34 = vld [vmem:[#allocation7 + $0x1e78] sm:$0xff] }
 0x8fa   : > { %16698 = vmatpush1.bf16.msra.mxu1 %v21101_v9  ;;  %16593 = vmatprep.subr.bf16.mxu0 %v21108_v35  ;;  %v21164_v9 = vcombine.high %v15569_v45, %v15573_v27  ;;  %v21166_v35 = vcombine.high %v15570_v16, %v15574_v11  ;;  %v15439_v45 = vld [vmem:[#allocation7 + $0x1eb0] sm:$0xff]  ;;  %v15436_v27 = vld [vmem:[#allocation7 + $0x1e98] sm:$0xff] }
 0x8fb   : > { %16699 = vmatprep.subr.bf16.mxu1 %v21110_v51  ;;  %v15577_v51 = vld [vmem:[#allocation7 + $0x2300] sm:$0xff] }
 0x8fc   : > { %v21171_v10 = vcombine.low %v15577_v51, %v15581_v0 }
 0x8fd   : > { %16594 = vmatpush1.bf16.msra.mxu0 %v21107_v56  ;;  %v21165_v56 = vcombine.low %v15570_v16, %v15574_v11  ;;  %v15440_v16 = vld [vmem:[#allocation7 + $0x1eb8] sm:$0xff] }
 0x8fe   : > { %16700 = vmatpush1.bf16.msra.mxu1 %v21109_v46  ;;  %16595 = vmatprep.subr.bf16.mxu0 %v21116_v12  ;;  %v21172_v46 = vcombine.high %v15577_v51, %v15581_v0  ;;  %v21174_v12 = vcombine.high %v15578_v31, %v15582_v61  ;;  %v15447_v51 = vld [vmem:[#allocation7 + $0x1ef0] sm:$0xff] }
 0x8ff   : > { %16701 = vmatprep.subr.bf16.mxu1 %v21118_v28  ;;  %v15585_v28 = vld [vmem:[#allocation7 + $0x2340] sm:$0xff] }
 0x900   : > { %v21179_v59 = vcombine.low %v15585_v28, %v15589_v15 }
 0x901   : > { %16596 = vmatpush1.bf16.msra.mxu0 %v21115_v50  ;;  %v21173_v50 = vcombine.low %v15578_v31, %v15582_v61  ;;  %v15444_v31 = vld [vmem:[#allocation7 + $0x1ed8] sm:$0xff] }
 0x902   : > { %16702 = vmatpush1.bf16.msra.mxu1 %v21117_v5  ;;  %16597 = vmatprep.subr.bf16.mxu0 %v21124_v47  ;;  %v21180_v5 = vcombine.high %v15585_v28, %v15589_v15  ;;  %v21182_v47 = vcombine.high %v15586_v14, %v15590_v8  ;;  %v15448_v61 = vld [vmem:[#allocation7 + $0x1ef8] sm:$0xff] }
 0x903   : > { %16703 = vmatprep.subr.bf16.mxu1 %v21126_v63  ;;  %v15593_v63 = vld [vmem:[#allocation7 + $0x2380] sm:$0xff]  ;;  %v21042_v28 = vcombine.high %v15444_v31, %v15448_v61  ;;  %v15452_v15 = vld [vmem:[#allocation7 + $0x1f18] sm:$0xff] }
 0x904   : > { %v21187_v6 = vcombine.low %v15593_v63, %v15597_v30 }
 0x905   : > { %16598 = vmatpush1.bf16.msra.mxu0 %v21123_v39  ;;  %v21181_v39 = vcombine.low %v15586_v14, %v15590_v8  ;;  %v15456_v14 = vld [vmem:[#allocation7 + $0x1f38] sm:$0xff] }
 0x906   : > { %16704 = vmatpush1.bf16.msra.mxu1 %v21125_v33  ;;  %16599 = vmatprep.subr.bf16.mxu0 %v21132_v2  ;;  %v21188_v33 = vcombine.high %v15593_v63, %v15597_v30  ;;  %v21190_v2 = vcombine.high %v15594_v57, %v15598_v52  ;;  %v15463_v63 = vld [vmem:[#allocation7 + $0x1f70] sm:$0xff]  ;;  %v15460_v30 = vld [vmem:[#allocation7 + $0x1f58] sm:$0xff] }
 0x907   : > { %16705 = vmatprep.subr.bf16.mxu1 %v21134_v26  ;;  %v15601_v26 = vld [vmem:[#allocation7 + $0x23c0] sm:$0xff] }
 0x908   : > { %v21195_v21 = vcombine.low %v15601_v26, %v15605_v25 }
 0x909   : > { %16600 = vmatpush1.bf16.msra.mxu0 %v21131_v20  ;;  %v21189_v20 = vcombine.low %v15594_v57, %v15598_v52  ;;  %v15464_v57 = vld [vmem:[#allocation7 + $0x1f78] sm:$0xff] }
 0x90a   : > { %16706 = vmatpush1.bf16.msra.mxu1 %v21133_v4  ;;  %16622 = vmatprep.subr.bf16.mxu0 %v21140_v42  ;;  %v21196_v4 = vcombine.high %v15601_v26, %v15605_v25  ;;  %v21198_v42 = vcombine.high %v15602_v58, %v15606_v32  ;;  %v15471_v26 = vld [vmem:[#allocation7 + $0x1fb0] sm:$0xff]  ;;  %v15468_v25 = vld [vmem:[#allocation7 + $0x1f98] sm:$0xff] }
 0x90b   : > { %16728 = vmatprep.subr.bf16.mxu1 %v21142_v44  ;;  %v15419_v44 = vld [vmem:[#allocation7 + $0x1e10] sm:$0xff] }
 0x90c   : > { %16602 = vmatmul.mubr.bf16.vlgmr.msra.gmra.mrb[72].mxu0 %v25717_v3  ;;  %v21015_v55 = vcombine.low %v15419_v44, %v15423_v23 }
 0x90d   : > { %16708 = vmatmul.mubr.bf16.vlgmr.msra.gmra.mrb[72].mxu1 %v25717_v3  ;;  %16611 = vmatprep.mubr.bf16.mxu0 %v25753_v54 }
 0x90e   : > { %16623 = vmatpush1.bf16.msra.mxu0 %v21139_v18  ;;  %16717 = vmatprep.mubr.bf16.mxu1 %v25753_v54  ;;  %v21197_v18 = vcombine.low %v15602_v58, %v15606_v32  ;;  %v15472_v58 = vld [vmem:[#allocation7 + $0x1fb8] sm:$0xff]  ;;  %v21057_v32 = vcombine.low %v15460_v30, %v15464_v57 }
 0x90f   : > { %16729 = vmatpush1.bf16.msra.mxu1 %v21141_v7  ;;  %16624 = vmatprep.subr.bf16.mxu0 %v21148_v19  ;;  %v21016_v7 = vcombine.high %v15419_v44, %v15423_v23  ;;  %v21018_v19 = vcombine.high %v15420_v62, %v15424_v1  ;;  %v15476_v44 = vld [vmem:[#allocation7 + $0x1fd8] sm:$0xff] }
 0x910   : > { %16730 = vmatprep.subr.bf16.mxu1 %v21150_v29  ;;  %v15427_v29 = vld [vmem:[#allocation7 + $0x1e50] sm:$0xff]  ;;  %v15480_v23 = vld [vmem:[#allocation7 + $0x1ff8] sm:$0xff] }
 0x911   : > { %v21023_v11 = vcombine.low %v15427_v29, %v15431_v17 }
 0x912   : > { %16625 = vmatpush1.bf16.msra.mxu0 %v21147_v13  ;;  %v21017_v13 = vcombine.low %v15420_v62, %v15424_v1  ;;  %v21065_v1 = vcombine.low %v15468_v25, %v15472_v58 }
 0x913   : > { %16731 = vmatpush1.bf16.msra.mxu1 %v21149_v60  ;;  %16626 = vmatprep.subr.bf16.mxu0 %v21156_v22  ;;  %v21024_v60 = vcombine.high %v15427_v29, %v15431_v17  ;;  %v21026_v22 = vcombine.high %v15428_v40, %v15432_v34  ;;  %v15484_v29 = vld [vmem:[#allocation7 + $0x2018] sm:$0xff] }
 0x914   : > { %16612 = vmatmul.mubr.bf16.gmra.mrb[76].mxu0 %v25760_v53  ;;  %16732 = vmatprep.subr.bf16.mxu1 %v21158_v24  ;;  %v15435_v24 = vld [vmem:[#allocation7 + $0x1e90] sm:$0xff]  ;;  %v15488_v17 = vld [vmem:[#allocation7 + $0x2038] sm:$0xff] }
 0x915   : > { %16718 = vmatmul.mubr.bf16.gmra.mrb[76].mxu1 %v25760_v53  ;;  %16654 = vmatprep.mubr.bf16.mxu0 %v26280_v36  ;;  %v21031_v0 = vcombine.low %v15435_v24, %v15439_v45 }
 0x916   : > { %16627 = vmatpush1.bf16.msra.mxu0 %v21155_v48  ;;  %16760 = vmatprep.mubr.bf16.mxu1 %v26280_v36  ;;  %v21025_v48 = vcombine.low %v15428_v40, %v15432_v34  ;;  %v21073_v34 = vcombine.low %v15476_v44, %v15480_v23 }
 0x917   : > { %16733 = vmatpush1.bf16.msra.mxu1 %v21157_v37  ;;  %16628 = vmatprep.subr.bf16.mxu0 %v21164_v9  ;;  %v21032_v37 = vcombine.high %v15435_v24, %v15439_v45  ;;  %v21034_v9 = vcombine.high %v15436_v27, %v15440_v16  ;;  %v15492_v24 = vld [vmem:[#allocation7 + $0x2058] sm:$0xff] }
 0x918   : > { %16734 = vmatprep.subr.bf16.mxu1 %v21166_v35  ;;  %v15443_v35 = vld [vmem:[#allocation7 + $0x1ed0] sm:$0xff]  ;;  %v15496_v45 = vld [vmem:[#allocation7 + $0x2078] sm:$0xff] }
 0x919   : > { %v21039_v8 = vcombine.low %v15443_v35, %v15447_v51 }
 0x91a   : > { %16629 = vmatpush1.bf16.msra.mxu0 %v21163_v38  ;;  %v21033_v38 = vcombine.low %v15436_v27, %v15440_v16  ;;  %v21081_v16 = vcombine.low %v15484_v29, %v15488_v17 }
 0x91b   : > { %16735 = vmatpush1.bf16.msra.mxu1 %v21165_v56  ;;  %16630 = vmatprep.subr.bf16.mxu0 %v21172_v46  ;;  %v21040_v56 = vcombine.high %v15443_v35, %v15447_v51  ;;  %v15451_v46 = vld [vmem:[#allocation7 + $0x1f10] sm:$0xff]  ;;  %v15500_v35 = vld [vmem:[#allocation7 + $0x2098] sm:$0xff] }
 0x91c   : > { %16736 = vmatprep.subr.bf16.mxu1 %v21174_v12  ;;  %v15455_v12 = vld [vmem:[#allocation7 + $0x1f30] sm:$0xff]  ;;  %v15504_v51 = vld [vmem:[#allocation7 + $0x20b8] sm:$0xff] }
 0x91d   : > { %v21047_v52 = vcombine.low %v15451_v46, %v15455_v12 }
 0x91e   : > { %16631 = vmatpush1.bf16.msra.mxu0 %v21171_v10  ;;  %v21041_v10 = vcombine.low %v15444_v31, %v15448_v61  ;;  %v21089_v31 = vcombine.low %v15492_v24, %v15496_v45 }
 0x91f   : > { %16737 = vmatpush1.bf16.msra.mxu1 %v21173_v50  ;;  %16632 = vmatprep.subr.bf16.mxu0 %v21180_v5  ;;  %v21048_v50 = vcombine.high %v15451_v46, %v15455_v12  ;;  %v21050_v5 = vcombine.high %v15452_v15, %v15456_v14  ;;  %v15511_v46 = vld [vmem:[#allocation7 + $0x20f0] sm:$0xff]  ;;  %v15508_v12 = vld [vmem:[#allocation7 + $0x20d8] sm:$0xff] }
 0x920   : > { %16738 = vmatprep.subr.bf16.mxu1 %v21182_v47  ;;  %v15459_v47 = vld [vmem:[#allocation7 + $0x1f50] sm:$0xff] }
 0x922   : > { %16633 = vmatpush1.bf16.msra.mxu0 %v21179_v59  ;;  %v21049_v59 = vcombine.low %v15452_v15, %v15456_v14  ;;  %v21097_v14 = vcombine.low %v15500_v35, %v15504_v51 }
 0x923   : > { %16739 = vmatpush1.bf16.msra.mxu1 %v21181_v39  ;;  %16634 = vmatprep.subr.bf16.mxu0 %v21188_v33  ;;  %v21056_v39 = vcombine.high %v15459_v47, %v15463_v63  ;;  %v21058_v33 = vcombine.high %v15460_v30, %v15464_v57 }
 0x924   : > { %16740 = vmatprep.subr.bf16.mxu1 %v21190_v2  ;;  %v15467_v2 = vld [vmem:[#allocation7 + $0x1f90] sm:$0xff] }
 0x925   : > { %v21063_v62 = vcombine.low %v15467_v2, %v15471_v26 }
 0x926   : > { %16635 = vmatpush1.bf16.msra.mxu0 %v21187_v6  ;;  %v21064_v6 = vcombine.high %v15467_v2, %v15471_v26  ;;  %v15524_v2 = vld [vmem:[#allocation7 + $0x2158] sm:$0xff] }
 0x927   : > { %16741 = vmatpush1.bf16.msra.mxu1 %v21189_v20  ;;  %16636 = vmatprep.subr.bf16.mxu0 %v21196_v4  ;;  %v21066_v20 = vcombine.high %v15468_v25, %v15472_v58  ;;  %v15475_v4 = vld [vmem:[#allocation7 + $0x1fd0] sm:$0xff]  ;;  %v15528_v26 = vld [vmem:[#allocation7 + $0x2178] sm:$0xff] }
 0x928   : > { %16742 = vmatprep.subr.bf16.mxu1 %v21198_v42  ;;  %v15479_v42 = vld [vmem:[#allocation7 + $0x1ff0] sm:$0xff] }
 0x929   : > { %v21071_v40 = vcombine.low %v15475_v4, %v15479_v42 }
 0x92a   : > { %16637 = vmatpush1.bf16.msra.mxu0 %v21195_v21  ;;  %v21072_v21 = vcombine.high %v15475_v4, %v15479_v42  ;;  %v15532_v4 = vld [vmem:[#allocation7 + $0x2198] sm:$0xff] }
 0x92b   : > { %16743 = vmatpush1.bf16.msra.mxu1 %v21197_v18  ;;  %16781 = vmatprep.subr.bf16.mxu0 %v21016_v7  ;;  %v21074_v18 = vcombine.high %v15476_v44, %v15480_v23  ;;  %v15483_v7 = vld [vmem:[#allocation7 + $0x2010] sm:$0xff]  ;;  %v15536_v42 = vld [vmem:[#allocation7 + $0x21b8] sm:$0xff]  ;;  %v21121_v23 = vcombine.low %v15524_v2, %v15528_v26 }
 0x92c   : > { %16887 = vmatprep.subr.bf16.mxu1 %v21018_v19  ;;  %v15487_v19 = vld [vmem:[#allocation7 + $0x2030] sm:$0xff] }
 0x92d   : > { %16655 = vmatmul.mubr.bf16.vlgmr.msra.gmra.mrb[72].mxu0 %v25719_v49  ;;  %v21079_v27 = vcombine.low %v15483_v7, %v15487_v19 }
 0x92e   : > { %16761 = vmatmul.mubr.bf16.vlgmr.msra.gmra.mrb[72].mxu1 %v25719_v49  ;;  %16782 = vmatpush1.bf16.msra.mxu0 %v21015_v55  ;;  %v21080_v55 = vcombine.high %v15483_v7, %v15487_v19  ;;  %v15540_v7 = vld [vmem:[#allocation7 + $0x21d8] sm:$0xff] }
 0x92f   : > { %16888 = vmatpush1.bf16.msra.mxu1 %v21017_v13  ;;  %16783 = vmatprep.subr.bf16.mxu0 %v21024_v60  ;;  %v21082_v13 = vcombine.high %v15484_v29, %v15488_v17  ;;  %v15491_v60 = vld [vmem:[#allocation7 + $0x2050] sm:$0xff]  ;;  %v15544_v19 = vld [vmem:[#allocation7 + $0x21f8] sm:$0xff]  ;;  %v21129_v17 = vcombine.low %v15532_v4, %v15536_v42 }
 0x930   : > { %16889 = vmatprep.subr.bf16.mxu1 %v21026_v22  ;;  %16664 = vmatprep.mubr.bf16.mxu0 %v26280_v36  ;;  %v15495_v22 = vld [vmem:[#allocation7 + $0x2070] sm:$0xff] }
 0x931   : > { %16770 = vmatprep.mubr.bf16.mxu1 %v26280_v36 }
 0x932   : > { %16784 = vmatpush1.bf16.msra.mxu0 %v21023_v11  ;;  %v21088_v11 = vcombine.high %v15491_v60, %v15495_v22 }
 0x933   : > { %16890 = vmatpush1.bf16.msra.mxu1 %v21025_v48  ;;  %16785 = vmatprep.subr.bf16.mxu0 %v21032_v37  ;;  %v21090_v48 = vcombine.high %v15492_v24, %v15496_v45  ;;  %v15499_v37 = vld [vmem:[#allocation7 + $0x2090] sm:$0xff]  ;;  %v21137_v45 = vcombine.low %v15540_v7, %v15544_v19 }
 0x934   : > { %16891 = vmatprep.subr.bf16.mxu1 %v21034_v9  ;;  %v15503_v9 = vld [vmem:[#allocation7 + $0x20b0] sm:$0xff] }
 0x935   : > { %16665 = vmatmul.mubr.bf16.gmra.mrb[76].mxu0 %v25762_v43  ;;  %v21096_v61 = vcombine.high %v15499_v37, %v15503_v9  ;;  %v21095_v15 = vcombine.low %v15499_v37, %v15503_v9  ;;  %v15556_v37 = vld [vmem:[#allocation7 + $0x2258] sm:$0xff] }
 0x936   : > { %16771 = vmatmul.mubr.bf16.gmra.mrb[76].mxu1 %v25762_v43  ;;  %16786 = vmatpush1.bf16.msra.mxu0 %v21031_v0  ;;  %v21087_v0 = vcombine.low %v15491_v60, %v15495_v22  ;;  %v15548_v60 = vld [vmem:[#allocation7 + $0x2218] sm:$0xff] }
 0x937   : > { %16813 = vmatprep.mubr.bf16.mxu0 %v25708_v41  ;;  %16892 = vmatpush1.bf16.msra.mxu1 %v21033_v38  ;;  %v21098_v38 = vcombine.high %v15500_v35, %v15504_v51  ;;  %v15552_v22 = vld [vmem:[#allocation7 + $0x2238] sm:$0xff] }
 0x938   : > { %16919 = vmatprep.mubr.bf16.mxu1 %v25708_v41  ;;  %16787 = vmatprep.subr.bf16.mxu0 %v21040_v56  ;;  %v21055_v41 = vcombine.low %v15459_v47, %v15463_v63  ;;  %v15507_v56 = vld [vmem:[#allocation7 + $0x20d0] sm:$0xff]  ;;  %v15516_v47 = vld [vmem:[#allocation7 + $0x2118] sm:$0xff]  ;;  %v21145_v51 = vcombine.low %v15548_v60, %v15552_v22 }
 0x939   : > { %16893 = vmatprep.subr.bf16.mxu1 %v21042_v28  ;;  %v15512_v28 = vld [vmem:[#allocation7 + $0x20f8] sm:$0xff]  ;;  %v21103_v30 = vcombine.low %v15507_v56, %v15511_v46 }
 0x93a   : > { %16788 = vmatpush1.bf16.msra.mxu0 %v21039_v8  ;;  %v21104_v8 = vcombine.high %v15507_v56, %v15511_v46  ;;  %v15520_v63 = vld [vmem:[#allocation7 + $0x2138] sm:$0xff]  ;;  %v21105_v57 = vcombine.low %v15508_v12, %v15512_v28 }
 0x93b   : > { %16894 = vmatpush1.bf16.msra.mxu1 %v21041_v10  ;;  %16789 = vmatprep.subr.bf16.mxu0 %v21048_v50  ;;  %v21106_v10 = vcombine.high %v15508_v12, %v15512_v28  ;;  %v15515_v50 = vld [vmem:[#allocation7 + $0x2110] sm:$0xff]  ;;  %v21113_v58 = vcombine.low %v15516_v47, %v15520_v63  ;;  %v15560_v9 = vld [vmem:[#allocation7 + $0x2278] sm:$0xff] }
 0x93c   : > { %16895 = vmatprep.subr.bf16.mxu1 %v21050_v5  ;;  %v15519_v5 = vld [vmem:[#allocation7 + $0x2130] sm:$0xff]  ;;  %v15564_v56 = vld [vmem:[#allocation7 + $0x2298] sm:$0xff]  ;;  %v21153_v28 = vcombine.low %v15556_v37, %v15560_v9 }
 0x93d   : > { %v21111_v25 = vcombine.low %v15515_v50, %v15519_v5  ;;  %v15568_v46 = vld [vmem:[#allocation7 + $0x22b8] sm:$0xff] }
 0x93e   : > { %16790 = vmatpush1.bf16.msra.mxu0 %v21047_v52  ;;  %v21112_v52 = vcombine.high %v15515_v50, %v15519_v5  ;;  %v15572_v50 = vld [vmem:[#allocation7 + $0x22d8] sm:$0xff] }
 0x93f   : > { %16896 = vmatpush1.bf16.msra.mxu1 %v21049_v59  ;;  %16791 = vmatprep.subr.bf16.mxu0 %v21056_v39  ;;  %v21114_v59 = vcombine.high %v15516_v47, %v15520_v63  ;;  %v15523_v39 = vld [vmem:[#allocation7 + $0x2150] sm:$0xff]  ;;  %v15576_v5 = vld [vmem:[#allocation7 + $0x22f8] sm:$0xff]  ;;  %v21161_v47 = vcombine.low %v15564_v56, %v15568_v46 }
 0x940   : > { %16897 = vmatprep.subr.bf16.mxu1 %v21058_v33  ;;  %v15527_v33 = vld [vmem:[#allocation7 + $0x2170] sm:$0xff] }
 0x941   : > { %v21119_v44 = vcombine.low %v15523_v39, %v15527_v33 }
 0x942   : > { %16792 = vmatpush1.bf16.msra.mxu0 %v21055_v41  ;;  %v21120_v41 = vcombine.high %v15523_v39, %v15527_v33  ;;  %v21169_v33 = vcombine.low %v15572_v50, %v15576_v5 }
 0x943   : > { %16898 = vmatpush1.bf16.msra.mxu1 %v21057_v32  ;;  %16793 = vmatprep.subr.bf16.mxu0 %v21064_v6  ;;  %v21122_v32 = vcombine.high %v15524_v2, %v15528_v26  ;;  %v15531_v6 = vld [vmem:[#allocation7 + $0x2190] sm:$0xff] }
 0x944   : > { %16899 = vmatprep.subr.bf16.mxu1 %v21066_v20  ;;  %v15535_v20 = vld [vmem:[#allocation7 + $0x21b0] sm:$0xff] }
 0x945   : > { %v21127_v29 = vcombine.low %v15531_v6, %v15535_v20 }
 0x946   : > { %16794 = vmatpush1.bf16.msra.mxu0 %v21063_v62  ;;  %v21128_v62 = vcombine.high %v15531_v6, %v15535_v20 }
 0x947   : > { %16900 = vmatpush1.bf16.msra.mxu1 %v21065_v1  ;;  %16795 = vmatprep.subr.bf16.mxu0 %v21072_v21  ;;  %v21130_v1 = vcombine.high %v15532_v4, %v15536_v42  ;;  %v15539_v21 = vld [vmem:[#allocation7 + $0x21d0] sm:$0xff] }
 0x948   : > { %16901 = vmatprep.subr.bf16.mxu1 %v21074_v18  ;;  %v15543_v18 = vld [vmem:[#allocation7 + $0x21f0] sm:$0xff] }
 0x949   : > { %v21135_v24 = vcombine.low %v15539_v21, %v15543_v18  ;;  %v15595_v42 = vld [vmem:[#allocation7 + $0x2390] sm:$0xff] }
 0x94a   : > { %16796 = vmatpush1.bf16.msra.mxu0 %v21071_v40  ;;  %v21136_v40 = vcombine.high %v15539_v21, %v15543_v18 }
 0x94b   : > { %16902 = vmatpush1.bf16.msra.mxu1 %v21073_v34  ;;  %16797 = vmatprep.subr.bf16.mxu0 %v21080_v55  ;;  %v21138_v34 = vcombine.high %v15540_v7, %v15544_v19  ;;  %v15547_v55 = vld [vmem:[#allocation7 + $0x2210] sm:$0xff] }
 0x94c   : > { %16903 = vmatprep.subr.bf16.mxu1 %v21082_v13  ;;  %v15551_v13 = vld [vmem:[#allocation7 + $0x2230] sm:$0xff] }
 0x94d   : > { %v21143_v35 = vcombine.low %v15547_v55, %v15551_v13  ;;  %v15603_v19 = vld [vmem:[#allocation7 + $0x23d0] sm:$0xff] }
 0x94e   : > { %16798 = vmatpush1.bf16.msra.mxu0 %v21079_v27  ;;  %v21144_v27 = vcombine.high %v15547_v55, %v15551_v13 }
 0x94f   : > { %16904 = vmatpush1.bf16.msra.mxu1 %v21081_v16  ;;  %16799 = vmatprep.subr.bf16.mxu0 %v21088_v11  ;;  %v21146_v16 = vcombine.high %v15548_v60, %v15552_v22  ;;  %v15555_v11 = vld [vmem:[#allocation7 + $0x2250] sm:$0xff] }
 0x950   : > { %16905 = vmatprep.subr.bf16.mxu1 %v21090_v48  ;;  %v15559_v48 = vld [vmem:[#allocation7 + $0x2270] sm:$0xff] }
 0x951   : > { %v21151_v12 = vcombine.low %v15555_v11, %v15559_v48 }
 0x952   : > { %16800 = vmatpush1.bf16.msra.mxu0 %v21087_v0  ;;  %v21152_v0 = vcombine.high %v15555_v11, %v15559_v48  ;;  %v22971_v11 = vld [vmem:[#allocation10 + $0x20c] ss:$16 sps:$4 sm:$0xff]   ;;  %v22974_v48 = vld [vmem:[#allocation10 + $0x224] ss:$16 sps:$4 sm:$0xff]  }
 0x953   : > { %16906 = vmatpush1.bf16.msra.mxu1 %v21089_v31  ;;  %16801 = vmatprep.subr.bf16.mxu0 %v21096_v61  ;;  %v21154_v31 = vcombine.high %v15556_v37, %v15560_v9  ;;  %v15563_v61 = vld [vmem:[#allocation7 + $0x2290] sm:$0xff]  ;;  %v22972_v9 = vld [vmem:[#allocation10 + $0x220] ss:$16 sps:$4 sm:$0xff]  }
 0x954   : > { %16907 = vmatprep.subr.bf16.mxu1 %v21098_v38  ;;  %v15567_v38 = vld [vmem:[#allocation7 + $0x22b0] sm:$0xff] }
 0x955   : > { %v22977_v37 = vld [vmem:[#allocation10 + $0x22c] ss:$16 sps:$4 sm:$0xff]  }
 0x956   : > { %16802 = vmatpush1.bf16.msra.mxu0 %v21095_v15  ;;  %v21160_v15 = vcombine.high %v15563_v61, %v15567_v38 }
 0x957   : > { %16908 = vmatpush1.bf16.msra.mxu1 %v21097_v14  ;;  %16803 = vmatprep.subr.bf16.mxu0 %v21104_v8  ;;  %v21162_v14 = vcombine.high %v15564_v56, %v15568_v46  ;;  %v15571_v8 = vld [vmem:[#allocation7 + $0x22d0] sm:$0xff]  ;;  %v22992_v46 = vld [vmem:[#allocation10 + $0x284] ss:$16 sps:$4 sm:$0xff]  }
 0x958   : > { %16909 = vmatprep.subr.bf16.mxu1 %v21106_v10  ;;  %v15575_v10 = vld [vmem:[#allocation7 + $0x22f0] sm:$0xff] }
 0x959   : > { %v21168_v63 = vcombine.high %v15571_v8, %v15575_v10  ;;  %v21167_v39 = vcombine.low %v15571_v8, %v15575_v10  ;;  %v22987_v56 = vld [vmem:[#allocation10 + $0x268] ss:$16 sps:$4 sm:$0xff]   ;;  %v22996_v8 = vld [vmem:[#allocation10 + $0x2a0] ss:$16 sps:$4 sm:$0xff]  }
 0x95a   : > { %16804 = vmatpush1.bf16.msra.mxu0 %v21103_v30  ;;  %v15579_v30 = vld [vmem:[#allocation7 + $0x2310] sm:$0xff] }
 0x95b   : > { %16910 = vmatpush1.bf16.msra.mxu1 %v21105_v57  ;;  %16805 = vmatprep.subr.bf16.mxu0 %v21112_v52  ;;  %v15583_v57 = vld [vmem:[#allocation7 + $0x2330] sm:$0xff]  ;;  %v15580_v52 = vld [vmem:[#allocation7 + $0x2318] sm:$0xff] }
 0x95c   : > { %16911 = vmatprep.subr.bf16.mxu1 %v21114_v59  ;;  %v15584_v59 = vld [vmem:[#allocation7 + $0x2338] sm:$0xff]  ;;  %v21176_v2 = vcombine.high %v15579_v30, %v15583_v57  ;;  %v22999_v10 = vld [vmem:[#allocation10 + $0x2a8] ss:$16 sps:$4 sm:$0xff]  }
 0x95d   : > { %v21178_v26 = vcombine.high %v15580_v52, %v15584_v59  ;;  %v21177_v6 = vcombine.low %v15580_v52, %v15584_v59  ;;  %v23016_v52 = vld [vmem:[#allocation10 + $0x304] ss:$16 sps:$4 sm:$0xff]   ;;  %v23019_v59 = vld [vmem:[#allocation10 + $0x30c] ss:$16 sps:$4 sm:$0xff]  }
 0x95e   : > { %16806 = vmatpush1.bf16.msra.mxu0 %v21111_v25  ;;  %v15587_v25 = vld [vmem:[#allocation7 + $0x2350] sm:$0xff] }
 0x95f   : > { %16912 = vmatpush1.bf16.msra.mxu1 %v21113_v58  ;;  %16807 = vmatprep.subr.bf16.mxu0 %v21120_v41  ;;  %v15591_v58 = vld [vmem:[#allocation7 + $0x2370] sm:$0xff]  ;;  %v15588_v41 = vld [vmem:[#allocation7 + $0x2358] sm:$0xff] }
 0x960   : > { %16913 = vmatprep.subr.bf16.mxu1 %v21122_v32  ;;  %v15592_v32 = vld [vmem:[#allocation7 + $0x2378] sm:$0xff]  ;;  %v21184_v20 = vcombine.high %v15587_v25, %v15591_v58 }
 0x961   : > { %v21186_v4 = vcombine.high %v15588_v41, %v15592_v32  ;;  %v21185_v21 = vcombine.low %v15588_v41, %v15592_v32  ;;  %v23028_v41 = vld [vmem:[#allocation10 + $0x344] ss:$16 sps:$4 sm:$0xff]   ;;  %v23031_v32 = vld [vmem:[#allocation10 + $0x34c] ss:$16 sps:$4 sm:$0xff]  }
 0x962   : > { %16808 = vmatpush1.bf16.msra.mxu0 %v21119_v44  ;;  %v15599_v44 = vld [vmem:[#allocation7 + $0x23b0] sm:$0xff] }
 0x963   : > { %16914 = vmatpush1.bf16.msra.mxu1 %v21121_v23  ;;  %16809 = vmatprep.subr.bf16.mxu0 %v21128_v62  ;;  %v15596_v23 = vld [vmem:[#allocation7 + $0x2398] sm:$0xff]  ;;  %v21192_v18 = vcombine.high %v15595_v42, %v15599_v44 }
 0x964   : > { %16915 = vmatprep.subr.bf16.mxu1 %v21130_v1  ;;  %v15600_v62 = vld [vmem:[#allocation7 + $0x23b8] sm:$0xff]  ;;  %v21183_v1 = vcombine.low %v15587_v25, %v15591_v58  ;;  %v23023_v58 = vld [vmem:[#allocation10 + $0x328] ss:$16 sps:$4 sm:$0xff]  }
 0x965   : > { %v21194_v7 = vcombine.high %v15596_v23, %v15600_v62  ;;  %v21193_v55 = vcombine.low %v15596_v23, %v15600_v62  ;;  %v23020_v25 = vld [vmem:[#allocation10 + $0x320] ss:$16 sps:$4 sm:$0xff]   ;;  %v23040_v23 = vld [vmem:[#allocation10 + $0x384] ss:$16 sps:$4 sm:$0xff]   ;;  %v23043_v62 = vld [vmem:[#allocation10 + $0x38c] ss:$16 sps:$4 sm:$0xff]  }
 0x966   : > { %16810 = vmatpush1.bf16.msra.mxu0 %v21127_v29  ;;  %v15607_v29 = vld [vmem:[#allocation7 + $0x23f0] sm:$0xff] }
 0x967   : > { %16916 = vmatpush1.bf16.msra.mxu1 %v21129_v17  ;;  %16811 = vmatprep.subr.bf16.mxu0 %v21136_v40  ;;  %v15604_v17 = vld [vmem:[#allocation7 + $0x23d8] sm:$0xff]  ;;  %v21200_v13 = vcombine.high %v15603_v19, %v15607_v29  ;;  %v21199_v22 = vcombine.low %v15603_v19, %v15607_v29  ;;  %v23047_v29 = vld [vmem:[#allocation10 + $0x3a8] ss:$16 sps:$4 sm:$0xff]  }
 0x968   : > { %16917 = vmatprep.subr.bf16.mxu1 %v21138_v34  ;;  %v15608_v40 = vld [vmem:[#allocation7 + $0x23f8] sm:$0xff]  ;;  %v21191_v34 = vcombine.low %v15595_v42, %v15599_v44  ;;  %v23035_v44 = vld [vmem:[#allocation10 + $0x368] ss:$16 sps:$4 sm:$0xff]  }
 0x969   : > { %v21202_v60 = vcombine.high %v15604_v17, %v15608_v40  ;;  %v23032_v42 = vld [vmem:[#allocation10 + $0x360] ss:$16 sps:$4 sm:$0xff]  }
 0x96a   : > { %16812 = vmatpush1.bf16.msra.mxu0 %v21135_v24  ;;  %v21201_v24 = vcombine.low %v15604_v17, %v15608_v40  ;;  %v23044_v19 = vld [vmem:[#allocation10 + $0x3a0] ss:$16 sps:$4 sm:$0xff]   ;;  %v23052_v17 = vld [vmem:[#allocation10 + $0x3c4] ss:$16 sps:$4 sm:$0xff]   ;;  %v23055_v40 = vld [vmem:[#allocation10 + $0x3cc] ss:$16 sps:$4 sm:$0xff]  }
 0x96b   : > { %16918 = vmatpush1.bf16.msra.mxu1 %v21137_v45  ;;  %16834 = vmatprep.subr.bf16.mxu0 %v21144_v27  ;;  %v22966_v45 = vld [vmem:[#allocation10 + $0x200] ss:$16 sps:$4 sm:$0xff]   ;;  %v22968_v27 = vld [vmem:[#allocation10 + $0x204] ss:$16 sps:$4 sm:$0xff]  }
 0x96c   : > { %16940 = vmatprep.subr.bf16.mxu1 %v21146_v16  ;;  %v22969_v16 = vld [vmem:[#allocation10 + $0x208] ss:$16 sps:$4 sm:$0xff]  }
 0x96d   : > { %16814 = vmatmul.mubr.bf16.vlgmr.msra.gmra.mrb[80].mxu0 %v25717_v3 }
 0x96e   : > { %16920 = vmatmul.mubr.bf16.vlgmr.msra.gmra.mrb[80].mxu1 %v25717_v3  ;;  %16823 = vmatprep.mubr.bf16.mxu0 %v25753_v54  ;;  %v21159_v3 = vcombine.low %v15563_v61, %v15567_v38  ;;  %v22989_v61 = vld [vmem:[#allocation10 + $0x26c] ss:$16 sps:$4 sm:$0xff]   ;;  %v22984_v38 = vld [vmem:[#allocation10 + $0x260] ss:$16 sps:$4 sm:$0xff]  }
 0x96f   : > { %16835 = vmatpush1.bf16.msra.mxu0 %v21143_v35  ;;  %16929 = vmatprep.mubr.bf16.mxu1 %v25753_v54  ;;  %v21170_v54 = vcombine.high %v15572_v50, %v15576_v5  ;;  %v22975_v35 = vld [vmem:[#allocation10 + $0x228] ss:$16 sps:$4 sm:$0xff]   ;;  %v23004_v50 = vld [vmem:[#allocation10 + $0x2c4] ss:$16 sps:$4 sm:$0xff]   ;;  %v23007_v5 = vld [vmem:[#allocation10 + $0x2cc] ss:$16 sps:$4 sm:$0xff]  }
 0x970   : > { %16941 = vmatpush1.bf16.msra.mxu1 %v21145_v51  ;;  %16836 = vmatprep.subr.bf16.mxu0 %v21152_v0  ;;  %v22980_v51 = vld [vmem:[#allocation10 + $0x244] ss:$16 sps:$4 sm:$0xff]   ;;  %v22981_v0 = vld [vmem:[#allocation10 + $0x248] ss:$16 sps:$4 sm:$0xff]  }
 0x971   : > { %16942 = vmatprep.subr.bf16.mxu1 %v21154_v31  ;;  %v22986_v31 = vld [vmem:[#allocation10 + $0x264] ss:$16 sps:$4 sm:$0xff]  }
 0x973   : > { %16837 = vmatpush1.bf16.msra.mxu0 %v21151_v12  ;;  %v22995_v12 = vld [vmem:[#allocation10 + $0x28c] ss:$16 sps:$4 sm:$0xff]  }
 0x974   : > { %16943 = vmatpush1.bf16.msra.mxu1 %v21153_v28  ;;  %16838 = vmatprep.subr.bf16.mxu0 %v21160_v15  ;;  %v22990_v28 = vld [vmem:[#allocation10 + $0x280] ss:$16 sps:$4 sm:$0xff]   ;;  %v22998_v15 = vld [vmem:[#allocation10 + $0x2a4] ss:$16 sps:$4 sm:$0xff]  }
 0x975   : > { %16824 = vmatmul.mubr.bf16.gmra.mrb[84].mxu0 %v25760_v53  ;;  %16944 = vmatprep.subr.bf16.mxu1 %v21162_v14  ;;  %v23001_v14 = vld [vmem:[#allocation10 + $0x2ac] ss:$16 sps:$4 sm:$0xff]  }
 0x976   : > { %16930 = vmatmul.mubr.bf16.gmra.mrb[84].mxu1 %v25760_v53  ;;  %16866 = vmatprep.mubr.bf16.mxu0 %v26280_v36  ;;  %v21175_v53 = vcombine.low %v15579_v30, %v15583_v57  ;;  %v23008_v30 = vld [vmem:[#allocation10 + $0x2e0] ss:$16 sps:$4 sm:$0xff]   ;;  %v23011_v57 = vld [vmem:[#allocation10 + $0x2e8] ss:$16 sps:$4 sm:$0xff]  }
 0x977   : > { %16839 = vmatpush1.bf16.msra.mxu0 %v21159_v3  ;;  %16972 = vmatprep.mubr.bf16.mxu1 %v26280_v36  ;;  %v23002_v3 = vld [vmem:[#allocation10 + $0x2c0] ss:$16 sps:$4 sm:$0xff]  }
 0x978   : > { %16945 = vmatpush1.bf16.msra.mxu1 %v21161_v47  ;;  %16840 = vmatprep.subr.bf16.mxu0 %v21168_v63  ;;  %v23005_v47 = vld [vmem:[#allocation10 + $0x2c8] ss:$16 sps:$4 sm:$0xff]   ;;  %v23010_v63 = vld [vmem:[#allocation10 + $0x2e4] ss:$16 sps:$4 sm:$0xff]  }
 0x979   : > { %16946 = vmatprep.subr.bf16.mxu1 %v21170_v54  ;;  %v23013_v54 = vld [vmem:[#allocation10 + $0x2ec] ss:$16 sps:$4 sm:$0xff]  }
 0x97b   : > { %16841 = vmatpush1.bf16.msra.mxu0 %v21167_v39  ;;  %v23014_v39 = vld [vmem:[#allocation10 + $0x300] ss:$16 sps:$4 sm:$0xff]  }
 0x97c   : > { %16947 = vmatpush1.bf16.msra.mxu1 %v21169_v33  ;;  %16842 = vmatprep.subr.bf16.mxu0 %v21176_v2  ;;  %v23017_v33 = vld [vmem:[#allocation10 + $0x308] ss:$16 sps:$4 sm:$0xff]   ;;  %v23022_v2 = vld [vmem:[#allocation10 + $0x324] ss:$16 sps:$4 sm:$0xff]  }
 0x97d   : > { %16948 = vmatprep.subr.bf16.mxu1 %v21178_v26  ;;  %v23025_v26 = vld [vmem:[#allocation10 + $0x32c] ss:$16 sps:$4 sm:$0xff]  }
 0x97f   : > { %16843 = vmatpush1.bf16.msra.mxu0 %v21175_v53  ;;  %v23026_v53 = vld [vmem:[#allocation10 + $0x340] ss:$16 sps:$4 sm:$0xff]  }
 0x980   : > { %16949 = vmatpush1.bf16.msra.mxu1 %v21177_v6  ;;  %16844 = vmatprep.subr.bf16.mxu0 %v21184_v20  ;;  %v23029_v6 = vld [vmem:[#allocation10 + $0x348] ss:$16 sps:$4 sm:$0xff]   ;;  %v23034_v20 = vld [vmem:[#allocation10 + $0x364] ss:$16 sps:$4 sm:$0xff]  }
 0x981   : > { %16950 = vmatprep.subr.bf16.mxu1 %v21186_v4  ;;  %v23037_v4 = vld [vmem:[#allocation10 + $0x36c] ss:$16 sps:$4 sm:$0xff]  }
 0x983   : > { %16845 = vmatpush1.bf16.msra.mxu0 %v21183_v1  ;;  %v23038_v1 = vld [vmem:[#allocation10 + $0x380] ss:$16 sps:$4 sm:$0xff]  }
 0x984   : > { %16951 = vmatpush1.bf16.msra.mxu1 %v21185_v21  ;;  %16846 = vmatprep.subr.bf16.mxu0 %v21192_v18  ;;  %v23041_v21 = vld [vmem:[#allocation10 + $0x388] ss:$16 sps:$4 sm:$0xff]   ;;  %v23046_v18 = vld [vmem:[#allocation10 + $0x3a4] ss:$16 sps:$4 sm:$0xff]  }
 0x985   : > { %16952 = vmatprep.subr.bf16.mxu1 %v21194_v7  ;;  %v23049_v7 = vld [vmem:[#allocation10 + $0x3ac] ss:$16 sps:$4 sm:$0xff]  }
 0x987   : > { %16847 = vmatpush1.bf16.msra.mxu0 %v21191_v34  ;;  %v23050_v34 = vld [vmem:[#allocation10 + $0x3c0] ss:$16 sps:$4 sm:$0xff]  }
 0x988   : > { %16953 = vmatpush1.bf16.msra.mxu1 %v21193_v55  ;;  %16848 = vmatprep.subr.bf16.mxu0 %v21200_v13  ;;  %v23053_v55 = vld [vmem:[#allocation10 + $0x3c8] ss:$16 sps:$4 sm:$0xff]   ;;  %v23058_v13 = vld [vmem:[#allocation10 + $0x3e4] ss:$16 sps:$4 sm:$0xff]  }
 0x989   : > { %16954 = vmatprep.subr.bf16.mxu1 %v21202_v60  ;;  %v23061_v60 = vld [vmem:[#allocation10 + $0x3ec] ss:$16 sps:$4 sm:$0xff]  }
 0x98b   : > { %16849 = vmatpush1.bf16.msra.mxu0 %v21199_v22  ;;  %v23056_v22 = vld [vmem:[#allocation10 + $0x3e0] ss:$16 sps:$4 sm:$0xff]  }
 0x98c   : > { %16955 = vmatpush1.bf16.msra.mxu1 %v21201_v24  ;;  %17614 = vmatprep.subr.bf16.mxu0 %v22968_v27  ;;  %v23059_v24 = vld [vmem:[#allocation10 + $0x3e8] ss:$16 sps:$4 sm:$0xff]   ;;  %v23067_v27 = vld [vmem:[#allocation10 + $0xc] ss:$16 sps:$4 sm:$0xff]  }
 0x98d   : > { %17655 = vmatprep.subr.bf16.mxu1 %v22971_v11  ;;  %v26293_v11 = vld [vmem:[#allocation39_spill] sm:$0xff] }
 0x98e   : > { %16867 = vmatmul.mubr.bf16.vlgmr.msra.gmra.mrb[80].mxu0 %v25719_v49 }
 0x98f   : > { %16973 = vmatmul.mubr.bf16.vlgmr.msra.gmra.mrb[80].mxu1 %v25719_v49  ;;  %16876 = vmatprep.mubr.bf16.mxu0 %v26280_v36  ;;  %v22983_v49 = vld [vmem:[#allocation10 + $0x24c] ss:$16 sps:$4 sm:$0xff]  }
 0x990   : > { %16982 = vmatprep.mubr.bf16.mxu1 %v26280_v36  ;;  %17615 = vmatpush1.bf16.msra.mxu0 %v22966_v45  ;;  %v22978_v36 = vld [vmem:[#allocation10 + $0x240] ss:$16 sps:$4 sm:$0xff]   ;;  %v23064_v45 = vld [vmem:[#allocation10 + $0x4] ss:$16 sps:$4 sm:$0xff]  }
 0x991   : > { %17656 = vmatpush1.bf16.msra.mxu1 %v22969_v16  ;;  %17616 = vmatprep.subr.bf16.mxu0 %v22974_v48  ;;  %v26008_v16 = vld [vmem:[#allocation8] sm:$0xff] }
 0x992   : > { %17657 = vmatprep.subr.bf16.mxu1 %v22977_v37  ;;  %v17030_v48 = vrot.slane %v26008_v16, %v26293_v11  ;;  %v26294_v37 = vld [vmem:[#allocation44_spill] sm:$0xff] }
 0x994   : > { %17617 = vmatpush1.bf16.msra.mxu0 %v22972_v9  ;;  %v17038_v9 = vrot.slane %v26008_v16, %v26294_v37 }
 0x995   : > { %17658 = vmatpush1.bf16.msra.mxu1 %v22975_v35  ;;  %17618 = vmatprep.subr.bf16.mxu0 %v22980_v51  ;;  %v26295_v35 = vld [vmem:[#allocation43_spill] sm:$0xff] }
 0x996   : > { %16877 = vmatmul.mubr.bf16.gmra.mrb[84].mxu0 %v25762_v43  ;;  %17659 = vmatprep.subr.bf16.mxu1 %v22983_v49  ;;  %v17034_v51 = vrot.slane %v26008_v16, %v26295_v35  ;;  %v26296_v49 = vld [vmem:[#allocation40_spill] sm:$0xff] }
 0x997   : > { %16983 = vmatmul.mubr.bf16.gmra.mrb[84].mxu1 %v25762_v43  ;;  %v22993_v43 = vld [vmem:[#allocation10 + $0x288] ss:$16 sps:$4 sm:$0xff]  }
 0x998   : > { %17619 = vmatpush1.bf16.msra.mxu0 %v22978_v36  ;;  %v17042_v36 = vrot.slane %v26008_v16, %v26296_v49 }
 0x999   : > { %17660 = vmatpush1.bf16.msra.mxu1 %v22981_v0  ;;  %17620 = vmatprep.subr.bf16.mxu0 %v22986_v31 }
 0x99a   : > { %17661 = vmatprep.subr.bf16.mxu1 %v22989_v61 }
 0x99c   : > { %17621 = vmatpush1.bf16.msra.mxu0 %v22984_v38 }
 0x99d   : > { %17662 = vmatpush1.bf16.msra.mxu1 %v22987_v56  ;;  %17622 = vmatprep.subr.bf16.mxu0 %v22992_v46 }
 0x99e   : > { %17663 = vmatprep.subr.bf16.mxu1 %v22995_v12 }
 0x9a0   : > { %17623 = vmatpush1.bf16.msra.mxu0 %v22990_v28 }
 0x9a1   : > { %17664 = vmatpush1.bf16.msra.mxu1 %v22993_v43  ;;  %17624 = vmatprep.subr.bf16.mxu0 %v22998_v15 }
 0x9a2   : > { %17665 = vmatprep.subr.bf16.mxu1 %v23001_v14 }
 0x9a4   : > { %17625 = vmatpush1.bf16.msra.mxu0 %v22996_v8 }
 0x9a5   : > { %17666 = vmatpush1.bf16.msra.mxu1 %v22999_v10  ;;  %17626 = vmatprep.subr.bf16.mxu0 %v23004_v50 }
 0x9a6   : > { %17667 = vmatprep.subr.bf16.mxu1 %v23007_v5 }
 0x9a8   : > { %17627 = vmatpush1.bf16.msra.mxu0 %v23002_v3 }
 0x9a9   : > { %17668 = vmatpush1.bf16.msra.mxu1 %v23005_v47  ;;  %17628 = vmatprep.subr.bf16.mxu0 %v23010_v63 }
 0x9aa   : > { %17669 = vmatprep.subr.bf16.mxu1 %v23013_v54 }
 0x9ac   : > { %17629 = vmatpush1.bf16.msra.mxu0 %v23008_v30 }
 0x9ad   : > { %17670 = vmatpush1.bf16.msra.mxu1 %v23011_v57  ;;  %17630 = vmatprep.subr.bf16.mxu0 %v23016_v52 }
 0x9ae   : > { %17671 = vmatprep.subr.bf16.mxu1 %v23019_v59 }
 0x9b0   : > { %17631 = vmatpush1.bf16.msra.mxu0 %v23014_v39 }
 0x9b1   : > { %17672 = vmatpush1.bf16.msra.mxu1 %v23017_v33  ;;  %17632 = vmatprep.subr.bf16.mxu0 %v23022_v2 }
 0x9b2   : > { %17673 = vmatprep.subr.bf16.mxu1 %v23025_v26 }
 0x9b4   : > { %17633 = vmatpush1.bf16.msra.mxu0 %v23020_v25 }
 0x9b5   : > { %17674 = vmatpush1.bf16.msra.mxu1 %v23023_v58  ;;  %17634 = vmatprep.subr.bf16.mxu0 %v23028_v41 }
 0x9b6   : > { %17675 = vmatprep.subr.bf16.mxu1 %v23031_v32 }
 0x9b8   : > { %17635 = vmatpush1.bf16.msra.mxu0 %v23026_v53 }
 0x9b9   : > { %17676 = vmatpush1.bf16.msra.mxu1 %v23029_v6  ;;  %17636 = vmatprep.subr.bf16.mxu0 %v23034_v20 }
 0x9ba   : > { %17677 = vmatprep.subr.bf16.mxu1 %v23037_v4 }
 0x9bc   : > { %17637 = vmatpush1.bf16.msra.mxu0 %v23032_v42 }
 0x9bd   : > { %17678 = vmatpush1.bf16.msra.mxu1 %v23035_v44  ;;  %17638 = vmatprep.subr.bf16.mxu0 %v23040_v23 }
 0x9be   : > { %17679 = vmatprep.subr.bf16.mxu1 %v23043_v62 }
 0x9c0   : > { %17639 = vmatpush1.bf16.msra.mxu0 %v23038_v1 }
 0x9c1   : > { %17680 = vmatpush1.bf16.msra.mxu1 %v23041_v21  ;;  %17640 = vmatprep.subr.bf16.mxu0 %v23046_v18 }
 0x9c2   : > { %17681 = vmatprep.subr.bf16.mxu1 %v23049_v7 }
 0x9c4   : > { %17641 = vmatpush1.bf16.msra.mxu0 %v23044_v19 }
 0x9c5   : > { %17682 = vmatpush1.bf16.msra.mxu1 %v23047_v29  ;;  %17642 = vmatprep.subr.bf16.mxu0 %v23052_v17 }
 0x9c6   : > { %17683 = vmatprep.subr.bf16.mxu1 %v23055_v40 }
 0x9c8   : > { %17643 = vmatpush1.bf16.msra.mxu0 %v23050_v34 }
 0x9c9   : > { %17684 = vmatpush1.bf16.msra.mxu1 %v23053_v55  ;;  %17644 = vmatprep.subr.bf16.mxu0 %v23058_v13 }
 0x9ca   : > { %17685 = vmatprep.subr.bf16.mxu1 %v23061_v60 }
 0x9cc   : > { %17645 = vmatpush1.bf16.msra.mxu0 %v23056_v22 }
 0x9cd   : > { %17686 = vmatpush1.bf16.msra.mxu1 %v23059_v24  ;;  %18016 = vmatprep.subr.bf16.mxu0 %v23064_v45 }
 0x9ce   : > { %18057 = vmatprep.subr.bf16.mxu1 %v23067_v27 }
 0xa00   : > { %v16656_v0 = vpop.f32.mrb[72].mxu0 }
 0xa01   : > { %v17067_v31 = vadd.f32 %v17030_v48, %v16656_v0  ;;  %v16762_v61 = vpop.f32.mrb[72].mxu1  ;;  %v16658_v38 = vpop.f32.mrb[73].mxu0  ;;  %v26297_v0 = vld [vmem:[#allocation38_spill] sm:$0xff] }
 0xa02   : > { %v17069_v56 = vadd.f32 %v17038_v9, %v16762_v61  ;;  %v17068_v46 = vadd.f32 %v17034_v51, %v16658_v38  ;;  %v16764_v12 = vpop.f32.mrb[73].mxu1  ;;  %v16660_v28 = vpop.f32.mrb[74].mxu0 }
 0xa03   : > { %v17099_v43 = vmax.f32 %v17067_v31, 0.0  ;;  %v17070_v15 = vadd.f32 %v17042_v36, %v16764_v12  ;;  %v17075_v14 = vadd.f32 %v17030_v48, %v16660_v28  ;;  %v16766_v8 = vpop.f32.mrb[74].mxu1  ;;  %v16662_v10 = vpop.f32.mrb[75].mxu0  ;;  %v26298_v31 = vsub.s32 4, %v26297_v0 }
 0xa04   : > { %v17101_v50 = vmax.f32 %v17069_v56, 0.0  ;;  %v17100_v5 = vmax.f32 %v17068_v46, 0.0  ;;  %v17077_v3 = vadd.f32 %v17038_v9, %v16766_v8  ;;  %v17076_v47 = vadd.f32 %v17034_v51, %v16662_v10  ;;  %v16768_v63 = vpop.f32.mrb[75].mxu1 }
 0xa05   : > { %v17102_v54 = vmax.f32 %v17070_v15, 0.0  ;;  %v17107_v30 = vmax.f32 %v17075_v14, 0.0  ;;  %v17078_v57 = vadd.f32 %v17042_v36, %v16768_v63  ;;  %v26301_v56 = vsub.s32 7, %v26297_v0 }
 0xa06   : > { %v26018_v52 = vmax.f32 %v17099_v43, %v17101_v50  ;;  %v17109_v59 = vmax.f32 %v17077_v3, 0.0  ;;  %v17108_v39 = vmax.f32 %v17076_v47, 0.0 }
 0xa07   : > { %v26020_v33 = vmax.f32 %v17100_v5, %v17102_v54  ;;  %v17110_v2 = vmax.f32 %v17078_v57, 0.0  ;;  %v17058_v46 = vrot.slane %v26008_v16, %v26301_v56 }
 0xa08   : > { %v26022_v26 = vmax.f32 %v17107_v30, %v17109_v59  ;;  %v16666_v25 = vpop.f32.mrb[76].mxu0 }
 0xa09   : > { %v26024_v58 = vmax.f32 %v17108_v39, %v17110_v2  ;;  %v17083_v41 = vadd.f32 %v17030_v48, %v16666_v25  ;;  %v16772_v32 = vpop.f32.mrb[76].mxu1  ;;  %v16668_v53 = vpop.f32.mrb[77].mxu0 }
 0xa0a   : > { %v17085_v6 = vadd.f32 %v17038_v9, %v16772_v32  ;;  %v17084_v20 = vadd.f32 %v17034_v51, %v16668_v53  ;;  %v16774_v4 = vpop.f32.mrb[77].mxu1  ;;  %v16670_v42 = vpop.f32.mrb[78].mxu0 }
 0xa0b   : > { %v17115_v44 = vmax.f32 %v17083_v41, 0.0  ;;  %v17086_v23 = vadd.f32 %v17042_v36, %v16774_v4  ;;  %v17091_v62 = vadd.f32 %v17030_v48, %v16670_v42  ;;  %v16776_v1 = vpop.f32.mrb[78].mxu1  ;;  %v16672_v21 = vpop.f32.mrb[79].mxu0 }
 0xa0c   : > { %v17117_v18 = vmax.f32 %v17085_v6, 0.0  ;;  %v17116_v7 = vmax.f32 %v17084_v20, 0.0  ;;  %v17093_v19 = vadd.f32 %v17038_v9, %v16776_v1  ;;  %v17092_v29 = vadd.f32 %v17034_v51, %v16672_v21  ;;  %v16778_v17 = vpop.f32.mrb[79].mxu1 }
 0xa0d   : > { %v17118_v40 = vmax.f32 %v17086_v23, 0.0  ;;  %v17123_v34 = vmax.f32 %v17091_v62, 0.0  ;;  %v17094_v55 = vadd.f32 %v17042_v36, %v16778_v17  ;;  %v17046_v9 = vrot.slane %v26008_v16, %v26298_v31 }
 0xa0e   : > { %v26026_v13 = vmax.f32 %v17115_v44, %v17117_v18  ;;  %v17125_v60 = vmax.f32 %v17093_v19, 0.0  ;;  %v17124_v22 = vmax.f32 %v17092_v29, 0.0  ;;  %v26299_v51 = vsub.s32 6, %v26297_v0 }
 0xa0f   : > { %v26028_v24 = vmax.f32 %v17116_v7, %v17118_v40  ;;  %v17126_v45 = vmax.f32 %v17094_v55, 0.0  ;;  %v26300_v36 = vsub.s32 5, %v26297_v0 }
 0xa10   : > { %v26030_v27 = vmax.f32 %v17123_v34, %v17125_v60  ;;  %v17054_v61 = vrot.slane %v26008_v16, %v26299_v51 }
 0xa11   : > { %v26032_v48 = vmax.f32 %v17124_v22, %v17126_v45  ;;  %v17050_v38 = vrot.slane %v26008_v16, %v26300_v36 }
 0xa61   : > { %v16868_v12 = vpop.f32.mrb[80].mxu0 }
 0xa62   : > { %v17071_v28 = vadd.f32 %v17046_v9, %v16868_v12  ;;  %v16974_v43 = vpop.f32.mrb[80].mxu1  ;;  %v16870_v15 = vpop.f32.mrb[81].mxu0 }
 0xa63   : > { %v17073_v14 = vadd.f32 %v17054_v61, %v16974_v43  ;;  %v17072_v8 = vadd.f32 %v17050_v38, %v16870_v15  ;;  %v16976_v10 = vpop.f32.mrb[81].mxu1  ;;  %v16872_v50 = vpop.f32.mrb[82].mxu0 }
 0xa64   : > { %v17103_v5 = vmax.f32 %v17071_v28, 0.0  ;;  %v17074_v3 = vadd.f32 %v17058_v46, %v16976_v10  ;;  %v17079_v47 = vadd.f32 %v17046_v9, %v16872_v50  ;;  %v16978_v63 = vpop.f32.mrb[82].mxu1  ;;  %v16874_v54 = vpop.f32.mrb[83].mxu0 }
 0xa65   : > { %v17105_v30 = vmax.f32 %v17073_v14, 0.0  ;;  %v17104_v57 = vmax.f32 %v17072_v8, 0.0  ;;  %v17081_v59 = vadd.f32 %v17054_v61, %v16978_v63  ;;  %v17080_v39 = vadd.f32 %v17050_v38, %v16874_v54  ;;  %v16980_v2 = vpop.f32.mrb[83].mxu1 }
 0xa66   : > { %v17106_v25 = vmax.f32 %v17074_v3, 0.0  ;;  %v17111_v16 = vmax.f32 %v17079_v47, 0.0  ;;  %v17082_v41 = vadd.f32 %v17058_v46, %v16980_v2 }
 0xa67   : > { %v17139_v32 = vmax.f32 %v17103_v5, %v17105_v30  ;;  %v17113_v53 = vmax.f32 %v17081_v59, 0.0  ;;  %v17112_v6 = vmax.f32 %v17080_v39, 0.0  ;;  %v23062_v5 = vld [vmem:[#allocation10] ss:$16 sps:$4 sm:$0xff]   ;;  %v23070_v30 = vld [vmem:[#allocation10 + $0x24] ss:$16 sps:$4 sm:$0xff]  }
 0xa68   : > { %v17140_v20 = vmax.f32 %v17104_v57, %v17106_v25  ;;  %v17114_v4 = vmax.f32 %v17082_v41, 0.0  ;;  %v23068_v59 = vld [vmem:[#allocation10 + $0x20] ss:$16 sps:$4 sm:$0xff]   ;;  %v23071_v39 = vld [vmem:[#allocation10 + $0x28] ss:$16 sps:$4 sm:$0xff]  }
 0xa69   : > { %v17147_v42 = vmax.f32 %v26018_v52, %v17139_v32  ;;  %v17141_v44 = vmax.f32 %v17111_v16, %v17113_v53  ;;  %v16878_v23 = vpop.f32.mrb[84].mxu0  ;;  %v23079_v25 = vld [vmem:[#allocation10 + $0x4c] ss:$16 sps:$4 sm:$0xff]   ;;  %v23077_v41 = vld [vmem:[#allocation10 + $0x48] ss:$16 sps:$4 sm:$0xff]  }
 0xa6a   : > { %v17148_v62 = vmax.f32 %v26020_v33, %v17140_v20  ;;  %v17142_v1 = vmax.f32 %v17112_v6, %v17114_v4  ;;  %v17087_v21 = vadd.f32 %v17046_v9, %v16878_v23  ;;  %v16984_v18 = vpop.f32.mrb[84].mxu1  ;;  %v16880_v7 = vpop.f32.mrb[85].mxu0  ;;  %v23082_v32 = vld [vmem:[#allocation10 + $0x64] ss:$16 sps:$4 sm:$0xff]   ;;  %v23085_v53 = vld [vmem:[#allocation10 + $0x6c] ss:$16 sps:$4 sm:$0xff]  }
 0xa6b   : > { %v17149_v19 = vmax.f32 %v26022_v26, %v17141_v44  ;;  %v17089_v29 = vadd.f32 %v17054_v61, %v16984_v18  ;;  %v17088_v17 = vadd.f32 %v17050_v38, %v16880_v7  ;;  %v16986_v40 = vpop.f32.mrb[85].mxu1  ;;  %v16882_v34 = vpop.f32.mrb[86].mxu0  ;;  %v23080_v6 = vld [vmem:[#allocation10 + $0x60] ss:$16 sps:$4 sm:$0xff]   ;;  %v23088_v20 = vld [vmem:[#allocation10 + $0x84] ss:$16 sps:$4 sm:$0xff]  }
 0xa6c   : > { %v17150_v55 = vmax.f32 %v26024_v58, %v17142_v1  ;;  %v17119_v60 = vmax.f32 %v17087_v21, 0.0  ;;  %v17090_v22 = vadd.f32 %v17058_v46, %v16986_v40  ;;  %v17095_v45 = vadd.f32 %v17046_v9, %v16882_v34  ;;  %v16988_v52 = vpop.f32.mrb[86].mxu1  ;;  %v16884_v0 = vpop.f32.mrb[87].mxu0  ;;  %v23065_v9 = vld [vmem:[#allocation10 + $0x8] ss:$16 sps:$4 sm:$0xff]  }
 0xa6d   : > { %v26050_v31 = vpack.c.bf16 %v17149_v19, %v17147_v42  ;;  %v17121_v33 = vmax.f32 %v17089_v29, 0.0  ;;  %v17120_v51 = vmax.f32 %v17088_v17, 0.0  ;;  %v17097_v36 = vadd.f32 %v17054_v61, %v16988_v52  ;;  %v16990_v56 = vpop.f32.mrb[87].mxu1  ;;  %v23091_v4 = vld [vmem:[#allocation10 + $0x8c] ss:$16 sps:$4 sm:$0xff]  }
 0xa6e   : > { %v17156_v12 = vpack.c.bf16 %v17150_v55, %v17148_v62  ;;  %v17122_v28 = vmax.f32 %v17090_v22, 0.0  ;;  %v17127_v26 = vmax.f32 %v17095_v45, 0.0  ;;  %v17096_v43 = vadd.f32 %v17050_v38, %v16884_v0  ;;  %v23073_v38 = vld [vmem:[#allocation10 + $0x2c] ss:$16 sps:$4 sm:$0xff]   ;;  %v23086_v42 = vld [vmem:[#allocation10 + $0x80] ss:$16 sps:$4 sm:$0xff]  }
 0xa6f   : > { %v17143_v15 = vmax.f32 %v17119_v60, %v17121_v33  ;;  %v17129_v14 = vmax.f32 %v17097_v36, 0.0  ;;  %v17098_v8 = vadd.f32 %v17058_v46, %v16990_v56  ;;  %v17290_v3 = vrot.slane %v26050_v31, 4  ;;  %v23089_v44 = vld [vmem:[#allocation10 + $0x88] ss:$16 sps:$4 sm:$0xff]   ;;  %v23094_v23 = vld [vmem:[#allocation10 + $0xa4] ss:$16 sps:$4 sm:$0xff]  }
 0xa70   : > { %v17144_v10 = vmax.f32 %v17120_v51, %v17122_v28  ;;  %v17128_v58 = vmax.f32 %v17096_v43, 0.0  ;;  %v17291_v50 = vrot.slane %v17156_v12, 4  ;;  %v23097_v62 = vld [vmem:[#allocation10 + $0xac] ss:$16 sps:$4 sm:$0xff]   ;;  %v23092_v1 = vld [vmem:[#allocation10 + $0xa0] ss:$16 sps:$4 sm:$0xff]  }
 0xa71   : > { %v17151_v47 = vmax.f32 %v26026_v13, %v17143_v15  ;;  %v17145_v63 = vmax.f32 %v17127_v26, %v17129_v14  ;;  %v17130_v54 = vmax.f32 %v17098_v8, 0.0  ;;  %v23095_v21 = vld [vmem:[#allocation10 + $0xa8] ss:$16 sps:$4 sm:$0xff]   ;;  %v23100_v18 = vld [vmem:[#allocation10 + $0xc4] ss:$16 sps:$4 sm:$0xff]  }
 0xa72   : > { %v17152_v61 = vmax.f32 %v26028_v24, %v17144_v10  ;;  %17646 = vmatprep.mubr.bf16.mxu0 %v17291_v50  ;;  %17687 = vmatprep.mubr.bf16.mxu1 %v17291_v50  ;;  %v23076_v24 = vld [vmem:[#allocation10 + $0x44] ss:$16 sps:$4 sm:$0xff]   ;;  %v23103_v7 = vld [vmem:[#allocation10 + $0xcc] ss:$16 sps:$4 sm:$0xff]   ;;  %v23098_v19 = vld [vmem:[#allocation10 + $0xc0] ss:$16 sps:$4 sm:$0xff]  }
 0xa73   : > { %v17153_v57 = vmax.f32 %v26030_v27, %v17145_v63  ;;  %v17146_v46 = vmax.f32 %v17128_v58, %v17130_v54  ;;  %17647 = vmatmul.mubr.bf16.vlgmr.msra.gmra.mrb[88].mxu0 %v17290_v3  ;;  %17688 = vmatmul.mubr.bf16.vlgmr.msra.gmra.mrb[88].mxu1 %v17290_v3  ;;  %v23074_v27 = vld [vmem:[#allocation10 + $0x40] ss:$16 sps:$4 sm:$0xff]   ;;  %v23101_v29 = vld [vmem:[#allocation10 + $0xc8] ss:$16 sps:$4 sm:$0xff]   ;;  %v23106_v17 = vld [vmem:[#allocation10 + $0xe4] ss:$16 sps:$4 sm:$0xff]  }
 0xa74   : > { %18017 = vmatpush1.bf16.msra.mxu0 %v23062_v5  ;;  %18058 = vmatpush1.bf16.msra.mxu1 %v23065_v9  ;;  %v23109_v40 = vld [vmem:[#allocation10 + $0xec] ss:$16 sps:$4 sm:$0xff]   ;;  %v23104_v34 = vld [vmem:[#allocation10 + $0xe0] ss:$16 sps:$4 sm:$0xff]   ;;  %v23107_v55 = vld [vmem:[#allocation10 + $0xe8] ss:$16 sps:$4 sm:$0xff]  }
 0xa75   : > { %v26056_v2 = vpack.c.bf16 %v17153_v57, %v17151_v47  ;;  %v17154_v13 = vmax.f32 %v26032_v48, %v17146_v46  ;;  %18048 = vmatprep.mubr.bf16.mxu0 %v17156_v12  ;;  %18089 = vmatprep.mubr.bf16.mxu1 %v17156_v12  ;;  %v23083_v48 = vld [vmem:[#allocation10 + $0x68] ss:$16 sps:$4 sm:$0xff]   ;;  %v23112_v60 = vld [vmem:[#allocation10 + $0x104] ss:$16 sps:$4 sm:$0xff]   ;;  %v23115_v22 = vld [vmem:[#allocation10 + $0x10c] ss:$16 sps:$4 sm:$0xff]  }
 0xa76   : > { %18018 = vmatprep.subr.bf16.mxu0 %v23070_v30  ;;  %18059 = vmatprep.subr.bf16.mxu1 %v23073_v38  ;;  %v23110_v45 = vld [vmem:[#allocation10 + $0x100] ss:$16 sps:$4 sm:$0xff]   ;;  %v23113_v52 = vld [vmem:[#allocation10 + $0x108] ss:$16 sps:$4 sm:$0xff]   ;;  %v23118_v0 = vld [vmem:[#allocation10 + $0x124] ss:$16 sps:$4 sm:$0xff]  }
 0xa77   : > { %v26059_v16 = vpack.c.bf16 %v17154_v13, %v17152_v61  ;;  %v23121_v33 = vld [vmem:[#allocation10 + $0x12c] ss:$16 sps:$4 sm:$0xff]   ;;  %v23116_v51 = vld [vmem:[#allocation10 + $0x120] ss:$16 sps:$4 sm:$0xff]   ;;  %v23119_v36 = vld [vmem:[#allocation10 + $0x128] ss:$16 sps:$4 sm:$0xff]  }
 0xa78   : > { %18019 = vmatpush1.bf16.msra.mxu0 %v23068_v59  ;;  %18060 = vmatpush1.bf16.msra.mxu1 %v23071_v39  ;;  %v23124_v56 = vld [vmem:[#allocation10 + $0x144] ss:$16 sps:$4 sm:$0xff]   ;;  %v23127_v12 = vld [vmem:[#allocation10 + $0x14c] ss:$16 sps:$4 sm:$0xff]   ;;  %v23122_v28 = vld [vmem:[#allocation10 + $0x140] ss:$16 sps:$4 sm:$0xff]  }
 0xa79   : > { %18020 = vmatprep.subr.bf16.mxu0 %v23076_v24  ;;  %18061 = vmatprep.subr.bf16.mxu1 %v23079_v25  ;;  %v23125_v26 = vld [vmem:[#allocation10 + $0x148] ss:$16 sps:$4 sm:$0xff]   ;;  %v23130_v43 = vld [vmem:[#allocation10 + $0x164] ss:$16 sps:$4 sm:$0xff]   ;;  %v23133_v15 = vld [vmem:[#allocation10 + $0x16c] ss:$16 sps:$4 sm:$0xff]  }
 0xa7a   : > { %v23128_v14 = vld [vmem:[#allocation10 + $0x160] ss:$16 sps:$4 sm:$0xff]   ;;  %v23131_v8 = vld [vmem:[#allocation10 + $0x168] ss:$16 sps:$4 sm:$0xff]   ;;  %v23136_v10 = vld [vmem:[#allocation10 + $0x184] ss:$16 sps:$4 sm:$0xff]  }
 0xa7b   : > { %v23139_v58 = vld [vmem:[#allocation10 + $0x18c] ss:$16 sps:$4 sm:$0xff]   ;;  %v23134_v50 = vld [vmem:[#allocation10 + $0x180] ss:$16 sps:$4 sm:$0xff]   ;;  %v23137_v5 = vld [vmem:[#allocation10 + $0x188] ss:$16 sps:$4 sm:$0xff]  }
 0xa7c   : > { %18021 = vmatpush1.bf16.msra.mxu0 %v23074_v27  ;;  %18062 = vmatpush1.bf16.msra.mxu1 %v23077_v41  ;;  %v23142_v9 = vld [vmem:[#allocation10 + $0x1a4] ss:$16 sps:$4 sm:$0xff]   ;;  %v23145_v3 = vld [vmem:[#allocation10 + $0x1ac] ss:$16 sps:$4 sm:$0xff]   ;;  %v23140_v47 = vld [vmem:[#allocation10 + $0x1a0] ss:$16 sps:$4 sm:$0xff]  }
 0xa7d   : > { %18022 = vmatprep.subr.bf16.mxu0 %v23082_v32  ;;  %18063 = vmatprep.subr.bf16.mxu1 %v23085_v53  ;;  %v23143_v63 = vld [vmem:[#allocation10 + $0x1a8] ss:$16 sps:$4 sm:$0xff]   ;;  %v23148_v54 = vld [vmem:[#allocation10 + $0x1c4] ss:$16 sps:$4 sm:$0xff]   ;;  %v23151_v61 = vld [vmem:[#allocation10 + $0x1cc] ss:$16 sps:$4 sm:$0xff]  }
 0xa7e   : > { %v23146_v30 = vld [vmem:[#allocation10 + $0x1c0] ss:$16 sps:$4 sm:$0xff]   ;;  %v23149_v38 = vld [vmem:[#allocation10 + $0x1c8] ss:$16 sps:$4 sm:$0xff]   ;;  %v23154_v57 = vld [vmem:[#allocation10 + $0x1e4] ss:$16 sps:$4 sm:$0xff]  }
 0xa7f   : > { %v23157_v46 = vld [vmem:[#allocation10 + $0x1ec] ss:$16 sps:$4 sm:$0xff]   ;;  %v23152_v59 = vld [vmem:[#allocation10 + $0x1e0] ss:$16 sps:$4 sm:$0xff]   ;;  %v23155_v39 = vld [vmem:[#allocation10 + $0x1e8] ss:$16 sps:$4 sm:$0xff]  }
 0xa80   : > { %18023 = vmatpush1.bf16.msra.mxu0 %v23080_v6  ;;  %18064 = vmatpush1.bf16.msra.mxu1 %v23083_v48  ;;  %v23160_v13 = vld [vmem:[#allocation10 + $0x404] ss:$16 sps:$4 sm:$0xff]   ;;  %v23163_v24 = vld [vmem:[#allocation10 + $0x40c] ss:$16 sps:$4 sm:$0xff]   ;;  %v23158_v25 = vld [vmem:[#allocation10 + $0x400] ss:$16 sps:$4 sm:$0xff]  }
 0xa81   : > { %18024 = vmatprep.subr.bf16.mxu0 %v23088_v20  ;;  %18065 = vmatprep.subr.bf16.mxu1 %v23091_v4  ;;  %v23161_v27 = vld [vmem:[#allocation10 + $0x408] ss:$16 sps:$4 sm:$0xff]   ;;  %v23166_v41 = vld [vmem:[#allocation10 + $0x424] ss:$16 sps:$4 sm:$0xff]   ;;  %v23169_v32 = vld [vmem:[#allocation10 + $0x42c] ss:$16 sps:$4 sm:$0xff]  }
 0xa82   : > { %v23164_v53 = vld [vmem:[#allocation10 + $0x420] ss:$16 sps:$4 sm:$0xff]   ;;  %v23167_v6 = vld [vmem:[#allocation10 + $0x428] ss:$16 sps:$4 sm:$0xff]   ;;  %v23172_v48 = vld [vmem:[#allocation10 + $0x444] ss:$16 sps:$4 sm:$0xff]  }
 0xa83   : > { %v23175_v20 = vld [vmem:[#allocation10 + $0x44c] ss:$16 sps:$4 sm:$0xff]   ;;  %v23170_v4 = vld [vmem:[#allocation10 + $0x440] ss:$16 sps:$4 sm:$0xff]  }
 0xa84   : > { %18025 = vmatpush1.bf16.msra.mxu0 %v23086_v42  ;;  %18066 = vmatpush1.bf16.msra.mxu1 %v23089_v44  ;;  %v23173_v42 = vld [vmem:[#allocation10 + $0x448] ss:$16 sps:$4 sm:$0xff]   ;;  %v23178_v44 = vld [vmem:[#allocation10 + $0x464] ss:$16 sps:$4 sm:$0xff]  }
 0xa85   : > { %18026 = vmatprep.subr.bf16.mxu0 %v23094_v23  ;;  %18067 = vmatprep.subr.bf16.mxu1 %v23097_v62  ;;  %v23176_v23 = vld [vmem:[#allocation10 + $0x460] ss:$16 sps:$4 sm:$0xff]   ;;  %v23179_v62 = vld [vmem:[#allocation10 + $0x468] ss:$16 sps:$4 sm:$0xff]  }
 0xa88   : > { %18027 = vmatpush1.bf16.msra.mxu0 %v23092_v1  ;;  %18068 = vmatpush1.bf16.msra.mxu1 %v23095_v21  ;;  %v23184_v1 = vld [vmem:[#allocation10 + $0x484] ss:$16 sps:$4 sm:$0xff]   ;;  %v23187_v21 = vld [vmem:[#allocation10 + $0x48c] ss:$16 sps:$4 sm:$0xff]  }
 0xa89   : > { %18028 = vmatprep.subr.bf16.mxu0 %v23100_v18  ;;  %18069 = vmatprep.subr.bf16.mxu1 %v23103_v7  ;;  %v23182_v18 = vld [vmem:[#allocation10 + $0x480] ss:$16 sps:$4 sm:$0xff]   ;;  %v23185_v7 = vld [vmem:[#allocation10 + $0x488] ss:$16 sps:$4 sm:$0xff]  }
 0xa8c   : > { %18029 = vmatpush1.bf16.msra.mxu0 %v23098_v19  ;;  %18070 = vmatpush1.bf16.msra.mxu1 %v23101_v29  ;;  %v23190_v19 = vld [vmem:[#allocation10 + $0x4a4] ss:$16 sps:$4 sm:$0xff]   ;;  %v23193_v29 = vld [vmem:[#allocation10 + $0x4ac] ss:$16 sps:$4 sm:$0xff]  }
 0xa8d   : > { %18030 = vmatprep.subr.bf16.mxu0 %v23106_v17  ;;  %18071 = vmatprep.subr.bf16.mxu1 %v23109_v40  ;;  %v23188_v17 = vld [vmem:[#allocation10 + $0x4a0] ss:$16 sps:$4 sm:$0xff]   ;;  %v23191_v40 = vld [vmem:[#allocation10 + $0x4a8] ss:$16 sps:$4 sm:$0xff]  }
 0xa90   : > { %18031 = vmatpush1.bf16.msra.mxu0 %v23104_v34  ;;  %18072 = vmatpush1.bf16.msra.mxu1 %v23107_v55  ;;  %v23196_v34 = vld [vmem:[#allocation10 + $0x4c4] ss:$16 sps:$4 sm:$0xff]   ;;  %v23199_v55 = vld [vmem:[#allocation10 + $0x4cc] ss:$16 sps:$4 sm:$0xff]  }
 0xa91   : > { %18032 = vmatprep.subr.bf16.mxu0 %v23112_v60  ;;  %18073 = vmatprep.subr.bf16.mxu1 %v23115_v22  ;;  %v23194_v60 = vld [vmem:[#allocation10 + $0x4c0] ss:$16 sps:$4 sm:$0xff]   ;;  %v23197_v22 = vld [vmem:[#allocation10 + $0x4c8] ss:$16 sps:$4 sm:$0xff]  }
 0xa94   : > { %18033 = vmatpush1.bf16.msra.mxu0 %v23110_v45  ;;  %18074 = vmatpush1.bf16.msra.mxu1 %v23113_v52  ;;  %v23202_v45 = vld [vmem:[#allocation10 + $0x4e4] ss:$16 sps:$4 sm:$0xff]   ;;  %v23205_v52 = vld [vmem:[#allocation10 + $0x4ec] ss:$16 sps:$4 sm:$0xff]  }
 0xa95   : > { %18034 = vmatprep.subr.bf16.mxu0 %v23118_v0  ;;  %18075 = vmatprep.subr.bf16.mxu1 %v23121_v33  ;;  %v23200_v0 = vld [vmem:[#allocation10 + $0x4e0] ss:$16 sps:$4 sm:$0xff]   ;;  %v23203_v33 = vld [vmem:[#allocation10 + $0x4e8] ss:$16 sps:$4 sm:$0xff]  }
 0xa98   : > { %18035 = vmatpush1.bf16.msra.mxu0 %v23116_v51  ;;  %18076 = vmatpush1.bf16.msra.mxu1 %v23119_v36  ;;  %v23208_v51 = vld [vmem:[#allocation10 + $0x504] ss:$16 sps:$4 sm:$0xff]   ;;  %v23211_v36 = vld [vmem:[#allocation10 + $0x50c] ss:$16 sps:$4 sm:$0xff]  }
 0xa99   : > { %18036 = vmatprep.subr.bf16.mxu0 %v23124_v56  ;;  %18077 = vmatprep.subr.bf16.mxu1 %v23127_v12  ;;  %v23206_v56 = vld [vmem:[#allocation10 + $0x500] ss:$16 sps:$4 sm:$0xff]   ;;  %v23209_v12 = vld [vmem:[#allocation10 + $0x508] ss:$16 sps:$4 sm:$0xff]  }
 0xa9c   : > { %18037 = vmatpush1.bf16.msra.mxu0 %v23122_v28  ;;  %18078 = vmatpush1.bf16.msra.mxu1 %v23125_v26  ;;  %v23214_v28 = vld [vmem:[#allocation10 + $0x524] ss:$16 sps:$4 sm:$0xff]   ;;  %v23217_v26 = vld [vmem:[#allocation10 + $0x52c] ss:$16 sps:$4 sm:$0xff]  }
 0xa9d   : > { %18038 = vmatprep.subr.bf16.mxu0 %v23130_v43  ;;  %18079 = vmatprep.subr.bf16.mxu1 %v23133_v15  ;;  %v23212_v43 = vld [vmem:[#allocation10 + $0x520] ss:$16 sps:$4 sm:$0xff]   ;;  %v23215_v15 = vld [vmem:[#allocation10 + $0x528] ss:$16 sps:$4 sm:$0xff]  }
 0xaa0   : > { %18039 = vmatpush1.bf16.msra.mxu0 %v23128_v14  ;;  %18080 = vmatpush1.bf16.msra.mxu1 %v23131_v8  ;;  %v23220_v14 = vld [vmem:[#allocation10 + $0x544] ss:$16 sps:$4 sm:$0xff]   ;;  %v23223_v8 = vld [vmem:[#allocation10 + $0x54c] ss:$16 sps:$4 sm:$0xff]  }
 0xaa1   : > { %18040 = vmatprep.subr.bf16.mxu0 %v23136_v10  ;;  %18081 = vmatprep.subr.bf16.mxu1 %v23139_v58  ;;  %v23218_v10 = vld [vmem:[#allocation10 + $0x540] ss:$16 sps:$4 sm:$0xff]   ;;  %v23221_v58 = vld [vmem:[#allocation10 + $0x548] ss:$16 sps:$4 sm:$0xff]  }
 0xaa4   : > { %18041 = vmatpush1.bf16.msra.mxu0 %v23134_v50  ;;  %18082 = vmatpush1.bf16.msra.mxu1 %v23137_v5  ;;  %v23226_v50 = vld [vmem:[#allocation10 + $0x564] ss:$16 sps:$4 sm:$0xff]   ;;  %v23229_v5 = vld [vmem:[#allocation10 + $0x56c] ss:$16 sps:$4 sm:$0xff]  }
 0xaa5   : > { %18042 = vmatprep.subr.bf16.mxu0 %v23142_v9  ;;  %18083 = vmatprep.subr.bf16.mxu1 %v23145_v3  ;;  %v23224_v9 = vld [vmem:[#allocation10 + $0x560] ss:$16 sps:$4 sm:$0xff]   ;;  %v23227_v3 = vld [vmem:[#allocation10 + $0x568] ss:$16 sps:$4 sm:$0xff]  }
 0xaa8   : > { %18043 = vmatpush1.bf16.msra.mxu0 %v23140_v47  ;;  %18084 = vmatpush1.bf16.msra.mxu1 %v23143_v63  ;;  %v23232_v47 = vld [vmem:[#allocation10 + $0x584] ss:$16 sps:$4 sm:$0xff]   ;;  %v23235_v63 = vld [vmem:[#allocation10 + $0x58c] ss:$16 sps:$4 sm:$0xff]  }
 0xaa9   : > { %18044 = vmatprep.subr.bf16.mxu0 %v23148_v54  ;;  %18085 = vmatprep.subr.bf16.mxu1 %v23151_v61  ;;  %v23230_v54 = vld [vmem:[#allocation10 + $0x580] ss:$16 sps:$4 sm:$0xff]   ;;  %v23233_v61 = vld [vmem:[#allocation10 + $0x588] ss:$16 sps:$4 sm:$0xff]  }
 0xaac   : > { %18045 = vmatpush1.bf16.msra.mxu0 %v23146_v30  ;;  %18086 = vmatpush1.bf16.msra.mxu1 %v23149_v38  ;;  %v23238_v30 = vld [vmem:[#allocation10 + $0x5a4] ss:$16 sps:$4 sm:$0xff]   ;;  %v23241_v38 = vld [vmem:[#allocation10 + $0x5ac] ss:$16 sps:$4 sm:$0xff]  }
 0xaad   : > { %18046 = vmatprep.subr.bf16.mxu0 %v23154_v57  ;;  %18087 = vmatprep.subr.bf16.mxu1 %v23157_v46  ;;  %v23236_v57 = vld [vmem:[#allocation10 + $0x5a0] ss:$16 sps:$4 sm:$0xff]   ;;  %v23239_v46 = vld [vmem:[#allocation10 + $0x5a8] ss:$16 sps:$4 sm:$0xff]  }
 0xab0   : > { %18047 = vmatpush1.bf16.msra.mxu0 %v23152_v59  ;;  %18088 = vmatpush1.bf16.msra.mxu1 %v23155_v39  ;;  %v23244_v59 = vld [vmem:[#allocation10 + $0x5c4] ss:$16 sps:$4 sm:$0xff]   ;;  %v23247_v39 = vld [vmem:[#allocation10 + $0x5cc] ss:$16 sps:$4 sm:$0xff]  }
 0xab1   : > { %18483 = vmatprep.subr.bf16.mxu0 %v23160_v13  ;;  %18524 = vmatprep.subr.bf16.mxu1 %v23163_v24  ;;  %v23242_v13 = vld [vmem:[#allocation10 + $0x5c0] ss:$16 sps:$4 sm:$0xff]   ;;  %v23245_v24 = vld [vmem:[#allocation10 + $0x5c8] ss:$16 sps:$4 sm:$0xff]  }
 0xab3   : > { %18049 = vmatmul.mubr.bf16.vlgmr.msra.gmra.mrb[92].mxu0 %v26050_v31  ;;  %18090 = vmatmul.mubr.bf16.vlgmr.msra.gmra.mrb[92].mxu1 %v26050_v31  ;;  %v23181_v31 = vld [vmem:[#allocation10 + $0x46c] ss:$16 sps:$4 sm:$0xff]  }
 0xab4   : > { %18484 = vmatpush1.bf16.msra.mxu0 %v23158_v25  ;;  %18515 = vmatprep.mubr.bf16.mxu0 %v26059_v16  ;;  %v23250_v25 = vld [vmem:[#allocation10 + $0x5e4] ss:$16 sps:$4 sm:$0xff]  }
 0xab5   : > { %18525 = vmatpush1.bf16.msra.mxu1 %v23161_v27  ;;  %18556 = vmatprep.mubr.bf16.mxu1 %v26059_v16  ;;  %v23253_v27 = vld [vmem:[#allocation10 + $0x5ec] ss:$16 sps:$4 sm:$0xff]  }
 0xab6   : > { %18485 = vmatprep.subr.bf16.mxu0 %v23166_v41  ;;  %18526 = vmatprep.subr.bf16.mxu1 %v23169_v32  ;;  %v23248_v41 = vld [vmem:[#allocation10 + $0x5e0] ss:$16 sps:$4 sm:$0xff]   ;;  %v23251_v32 = vld [vmem:[#allocation10 + $0x5e8] ss:$16 sps:$4 sm:$0xff]  }
 0xab8   : > { %18486 = vmatpush1.bf16.msra.mxu0 %v23164_v53  ;;  %v23256_v53 = vld [vmem:[#allocation10 + $0x604] ss:$16 sps:$4 sm:$0xff]  }
 0xab9   : > { %18527 = vmatpush1.bf16.msra.mxu1 %v23167_v6  ;;  %18487 = vmatprep.subr.bf16.mxu0 %v23172_v48  ;;  %v23259_v6 = vld [vmem:[#allocation10 + $0x60c] ss:$16 sps:$4 sm:$0xff]   ;;  %v23254_v48 = vld [vmem:[#allocation10 + $0x600] ss:$16 sps:$4 sm:$0xff]  }
 0xaba   : > { %18528 = vmatprep.subr.bf16.mxu1 %v23175_v20  ;;  %v23257_v20 = vld [vmem:[#allocation10 + $0x608] ss:$16 sps:$4 sm:$0xff]  }
 0xabc   : > { %18488 = vmatpush1.bf16.msra.mxu0 %v23170_v4  ;;  %v23262_v4 = vld [vmem:[#allocation10 + $0x624] ss:$16 sps:$4 sm:$0xff]  }
 0xabd   : > { %18529 = vmatpush1.bf16.msra.mxu1 %v23173_v42  ;;  %18489 = vmatprep.subr.bf16.mxu0 %v23178_v44  ;;  %v18637_v42 = vrot.slane %v26059_v16, 4  ;;  %v23265_v44 = vld [vmem:[#allocation10 + $0x62c] ss:$16 sps:$4 sm:$0xff]  }
 0xabe   : > { %18530 = vmatprep.subr.bf16.mxu1 %v23181_v31  ;;  %v23260_v31 = vld [vmem:[#allocation10 + $0x620] ss:$16 sps:$4 sm:$0xff]   ;;  %v23277_v16 = vld [vmem:[#allocation10 + $0x66c] ss:$16 sps:$4 sm:$0xff]  }
 0xac0   : > { %18490 = vmatpush1.bf16.msra.mxu0 %v23176_v23  ;;  %v23263_v23 = vld [vmem:[#allocation10 + $0x628] ss:$16 sps:$4 sm:$0xff]  }
 0xac1   : > { %18531 = vmatpush1.bf16.msra.mxu1 %v23179_v62  ;;  %18491 = vmatprep.subr.bf16.mxu0 %v23184_v1  ;;  %v23268_v62 = vld [vmem:[#allocation10 + $0x644] ss:$16 sps:$4 sm:$0xff]   ;;  %v23271_v1 = vld [vmem:[#allocation10 + $0x64c] ss:$16 sps:$4 sm:$0xff]  }
 0xac2   : > { %18532 = vmatprep.subr.bf16.mxu1 %v23187_v21  ;;  %v23266_v21 = vld [vmem:[#allocation10 + $0x640] ss:$16 sps:$4 sm:$0xff]  }
 0xac4   : > { %18492 = vmatpush1.bf16.msra.mxu0 %v23182_v18  ;;  %v23269_v18 = vld [vmem:[#allocation10 + $0x648] ss:$16 sps:$4 sm:$0xff]  }
 0xac5   : > { %18533 = vmatpush1.bf16.msra.mxu1 %v23185_v7  ;;  %18493 = vmatprep.subr.bf16.mxu0 %v23190_v19  ;;  %v23274_v7 = vld [vmem:[#allocation10 + $0x664] ss:$16 sps:$4 sm:$0xff]   ;;  %v23272_v19 = vld [vmem:[#allocation10 + $0x660] ss:$16 sps:$4 sm:$0xff]  }
 0xac6   : > { %18534 = vmatprep.subr.bf16.mxu1 %v23193_v29  ;;  %v23275_v29 = vld [vmem:[#allocation10 + $0x668] ss:$16 sps:$4 sm:$0xff]  }
 0xac8   : > { %18494 = vmatpush1.bf16.msra.mxu0 %v23188_v17  ;;  %v23280_v17 = vld [vmem:[#allocation10 + $0x684] ss:$16 sps:$4 sm:$0xff]  }
 0xac9   : > { %18535 = vmatpush1.bf16.msra.mxu1 %v23191_v40  ;;  %18495 = vmatprep.subr.bf16.mxu0 %v23196_v34  ;;  %v23283_v40 = vld [vmem:[#allocation10 + $0x68c] ss:$16 sps:$4 sm:$0xff]   ;;  %v23278_v34 = vld [vmem:[#allocation10 + $0x680] ss:$16 sps:$4 sm:$0xff]  }
 0xaca   : > { %18536 = vmatprep.subr.bf16.mxu1 %v23199_v55  ;;  %v23281_v55 = vld [vmem:[#allocation10 + $0x688] ss:$16 sps:$4 sm:$0xff]  }
 0xacc   : > { %18496 = vmatpush1.bf16.msra.mxu0 %v23194_v60  ;;  %v23286_v60 = vld [vmem:[#allocation10 + $0x6a4] ss:$16 sps:$4 sm:$0xff]  }
 0xacd   : > { %18537 = vmatpush1.bf16.msra.mxu1 %v23197_v22  ;;  %18497 = vmatprep.subr.bf16.mxu0 %v23202_v45  ;;  %v23289_v22 = vld [vmem:[#allocation10 + $0x6ac] ss:$16 sps:$4 sm:$0xff]   ;;  %v23284_v45 = vld [vmem:[#allocation10 + $0x6a0] ss:$16 sps:$4 sm:$0xff]  }
 0xace   : > { %18538 = vmatprep.subr.bf16.mxu1 %v23205_v52  ;;  %v23287_v52 = vld [vmem:[#allocation10 + $0x6a8] ss:$16 sps:$4 sm:$0xff]  }
 0xad0   : > { %18498 = vmatpush1.bf16.msra.mxu0 %v23200_v0  ;;  %v23292_v0 = vld [vmem:[#allocation10 + $0x6c4] ss:$16 sps:$4 sm:$0xff]  }
 0xad1   : > { %18539 = vmatpush1.bf16.msra.mxu1 %v23203_v33  ;;  %18499 = vmatprep.subr.bf16.mxu0 %v23208_v51  ;;  %v23295_v33 = vld [vmem:[#allocation10 + $0x6cc] ss:$16 sps:$4 sm:$0xff]   ;;  %v23290_v51 = vld [vmem:[#allocation10 + $0x6c0] ss:$16 sps:$4 sm:$0xff]  }
 0xad2   : > { %18540 = vmatprep.subr.bf16.mxu1 %v23211_v36  ;;  %v23293_v36 = vld [vmem:[#allocation10 + $0x6c8] ss:$16 sps:$4 sm:$0xff]  }
 0xad4   : > { %18500 = vmatpush1.bf16.msra.mxu0 %v23206_v56  ;;  %v23298_v56 = vld [vmem:[#allocation10 + $0x6e4] ss:$16 sps:$4 sm:$0xff]  }
 0xad5   : > { %18541 = vmatpush1.bf16.msra.mxu1 %v23209_v12  ;;  %18501 = vmatprep.subr.bf16.mxu0 %v23214_v28  ;;  %v23301_v12 = vld [vmem:[#allocation10 + $0x6ec] ss:$16 sps:$4 sm:$0xff]   ;;  %v23296_v28 = vld [vmem:[#allocation10 + $0x6e0] ss:$16 sps:$4 sm:$0xff]  }
 0xad6   : > { %18542 = vmatprep.subr.bf16.mxu1 %v23217_v26  ;;  %v23299_v26 = vld [vmem:[#allocation10 + $0x6e8] ss:$16 sps:$4 sm:$0xff]  }
 0xad8   : > { %18502 = vmatpush1.bf16.msra.mxu0 %v23212_v43  ;;  %v23304_v43 = vld [vmem:[#allocation10 + $0x704] ss:$16 sps:$4 sm:$0xff]  }
 0xad9   : > { %18543 = vmatpush1.bf16.msra.mxu1 %v23215_v15  ;;  %18503 = vmatprep.subr.bf16.mxu0 %v23220_v14  ;;  %v23307_v15 = vld [vmem:[#allocation10 + $0x70c] ss:$16 sps:$4 sm:$0xff]   ;;  %v23302_v14 = vld [vmem:[#allocation10 + $0x700] ss:$16 sps:$4 sm:$0xff]  }
 0xada   : > { %18544 = vmatprep.subr.bf16.mxu1 %v23223_v8  ;;  %v23305_v8 = vld [vmem:[#allocation10 + $0x708] ss:$16 sps:$4 sm:$0xff]  }
 0xadc   : > { %18504 = vmatpush1.bf16.msra.mxu0 %v23218_v10  ;;  %v23310_v10 = vld [vmem:[#allocation10 + $0x724] ss:$16 sps:$4 sm:$0xff]  }
 0xadd   : > { %18545 = vmatpush1.bf16.msra.mxu1 %v23221_v58  ;;  %18505 = vmatprep.subr.bf16.mxu0 %v23226_v50  ;;  %v23313_v58 = vld [vmem:[#allocation10 + $0x72c] ss:$16 sps:$4 sm:$0xff]   ;;  %v23308_v50 = vld [vmem:[#allocation10 + $0x720] ss:$16 sps:$4 sm:$0xff]  }
 0xade   : > { %18546 = vmatprep.subr.bf16.mxu1 %v23229_v5  ;;  %v23311_v5 = vld [vmem:[#allocation10 + $0x728] ss:$16 sps:$4 sm:$0xff]  }
 0xae0   : > { %18506 = vmatpush1.bf16.msra.mxu0 %v23224_v9  ;;  %v23316_v9 = vld [vmem:[#allocation10 + $0x744] ss:$16 sps:$4 sm:$0xff]  }
 0xae1   : > { %18547 = vmatpush1.bf16.msra.mxu1 %v23227_v3  ;;  %18507 = vmatprep.subr.bf16.mxu0 %v23232_v47  ;;  %v23319_v3 = vld [vmem:[#allocation10 + $0x74c] ss:$16 sps:$4 sm:$0xff]   ;;  %v23314_v47 = vld [vmem:[#allocation10 + $0x740] ss:$16 sps:$4 sm:$0xff]  }
 0xae2   : > { %18548 = vmatprep.subr.bf16.mxu1 %v23235_v63  ;;  %v23317_v63 = vld [vmem:[#allocation10 + $0x748] ss:$16 sps:$4 sm:$0xff]  }
 0xae4   : > { %18508 = vmatpush1.bf16.msra.mxu0 %v23230_v54  ;;  %v23322_v54 = vld [vmem:[#allocation10 + $0x764] ss:$16 sps:$4 sm:$0xff]  }
 0xae5   : > { %18549 = vmatpush1.bf16.msra.mxu1 %v23233_v61  ;;  %18509 = vmatprep.subr.bf16.mxu0 %v23238_v30  ;;  %v23325_v61 = vld [vmem:[#allocation10 + $0x76c] ss:$16 sps:$4 sm:$0xff]   ;;  %v23320_v30 = vld [vmem:[#allocation10 + $0x760] ss:$16 sps:$4 sm:$0xff]  }
 0xae6   : > { %18550 = vmatprep.subr.bf16.mxu1 %v23241_v38  ;;  %v23323_v38 = vld [vmem:[#allocation10 + $0x768] ss:$16 sps:$4 sm:$0xff]  }
 0xae8   : > { %18510 = vmatpush1.bf16.msra.mxu0 %v23236_v57  ;;  %v23328_v57 = vld [vmem:[#allocation10 + $0x784] ss:$16 sps:$4 sm:$0xff]  }
 0xae9   : > { %18551 = vmatpush1.bf16.msra.mxu1 %v23239_v46  ;;  %18511 = vmatprep.subr.bf16.mxu0 %v23244_v59  ;;  %v23331_v46 = vld [vmem:[#allocation10 + $0x78c] ss:$16 sps:$4 sm:$0xff]   ;;  %v23326_v59 = vld [vmem:[#allocation10 + $0x780] ss:$16 sps:$4 sm:$0xff]  }
 0xaea   : > { %18552 = vmatprep.subr.bf16.mxu1 %v23247_v39  ;;  %v23329_v39 = vld [vmem:[#allocation10 + $0x788] ss:$16 sps:$4 sm:$0xff]  }
 0xaec   : > { %18512 = vmatpush1.bf16.msra.mxu0 %v23242_v13  ;;  %v23334_v13 = vld [vmem:[#allocation10 + $0x7a4] ss:$16 sps:$4 sm:$0xff]  }
 0xaed   : > { %18553 = vmatpush1.bf16.msra.mxu1 %v23245_v24  ;;  %18513 = vmatprep.subr.bf16.mxu0 %v23250_v25  ;;  %v23337_v24 = vld [vmem:[#allocation10 + $0x7ac] ss:$16 sps:$4 sm:$0xff]   ;;  %v23332_v25 = vld [vmem:[#allocation10 + $0x7a0] ss:$16 sps:$4 sm:$0xff]  }
 0xaee   : > { %18554 = vmatprep.subr.bf16.mxu1 %v23253_v27  ;;  %v23335_v27 = vld [vmem:[#allocation10 + $0x7a8] ss:$16 sps:$4 sm:$0xff]  }
 0xaf0   : > { %18514 = vmatpush1.bf16.msra.mxu0 %v23248_v41  ;;  %v23340_v41 = vld [vmem:[#allocation10 + $0x7c4] ss:$16 sps:$4 sm:$0xff]  }
 0xaf1   : > { %18555 = vmatpush1.bf16.msra.mxu1 %v23251_v32  ;;  %18960 = vmatprep.subr.bf16.mxu0 %v23256_v53  ;;  %v23343_v32 = vld [vmem:[#allocation10 + $0x7cc] ss:$16 sps:$4 sm:$0xff]   ;;  %v23338_v53 = vld [vmem:[#allocation10 + $0x7c0] ss:$16 sps:$4 sm:$0xff]  }
 0xaf2   : > { %19001 = vmatprep.subr.bf16.mxu1 %v23259_v6  ;;  %v23341_v6 = vld [vmem:[#allocation10 + $0x7c8] ss:$16 sps:$4 sm:$0xff]  }
 0xaf3   : > { %18516 = vmatmul.mubr.bf16.vlgmr.msra.gmra.mrb[96].mxu0 %v26056_v2 }
 0xaf4   : > { %18557 = vmatmul.mubr.bf16.vlgmr.msra.gmra.mrb[96].mxu1 %v26056_v2  ;;  %18961 = vmatpush1.bf16.msra.mxu0 %v23254_v48  ;;  %v23346_v48 = vld [vmem:[#allocation10 + $0x7e4] ss:$16 sps:$4 sm:$0xff]  }
 0xaf5   : > { %18992 = vmatprep.mubr.bf16.mxu0 %v18637_v42  ;;  %19002 = vmatpush1.bf16.msra.mxu1 %v23257_v20  ;;  %v23349_v20 = vld [vmem:[#allocation10 + $0x7ec] ss:$16 sps:$4 sm:$0xff]  }
 0xaf6   : > { %19033 = vmatprep.mubr.bf16.mxu1 %v18637_v42  ;;  %18962 = vmatprep.subr.bf16.mxu0 %v23262_v4  ;;  %v23344_v4 = vld [vmem:[#allocation10 + $0x7e0] ss:$16 sps:$4 sm:$0xff]   ;;  %v23347_v42 = vld [vmem:[#allocation10 + $0x7e8] ss:$16 sps:$4 sm:$0xff]  }
 0xaf7   : > { %19003 = vmatprep.subr.bf16.mxu1 %v23265_v44  ;;  %v18636_v44 = vrot.slane %v26056_v2, 4  ;;  %v23356_v2 = vld [vmem:[#allocation13 + $0x8] sm:$0xff]  }
 0xaf8   : > { %18963 = vmatpush1.bf16.msra.mxu0 %v23260_v31 }
 0xaf9   : > { %19004 = vmatpush1.bf16.msra.mxu1 %v23263_v23  ;;  %18964 = vmatprep.subr.bf16.mxu0 %v23268_v62 }
 0xafa   : > { %19005 = vmatprep.subr.bf16.mxu1 %v23271_v1 }
 0xafc   : > { %18965 = vmatpush1.bf16.msra.mxu0 %v23266_v21 }
 0xafd   : > { %19006 = vmatpush1.bf16.msra.mxu1 %v23269_v18  ;;  %18966 = vmatprep.subr.bf16.mxu0 %v23274_v7 }
 0xafe   : > { %19007 = vmatprep.subr.bf16.mxu1 %v23277_v16 }
 0xb00   : > { %18967 = vmatpush1.bf16.msra.mxu0 %v23272_v19  ;;  %v23350_v19 = vld [vmem:[#allocation13 + $0x40] sm:$0xff]  }
 0xb01   : > { %19008 = vmatpush1.bf16.msra.mxu1 %v23275_v29  ;;  %18968 = vmatprep.subr.bf16.mxu0 %v23280_v17  ;;  %v23351_v29 = vld [vmem:[#allocation13 + $0xc0] sm:$0xff]  }
 0xb02   : > { %19009 = vmatprep.subr.bf16.mxu1 %v23283_v40  ;;  %v23352_v17 = vld [vmem:[#allocation13] sm:$0xff]  }
 0xb03   : > { %v23353_v40 = vld [vmem:[#allocation13 + $0x80] sm:$0xff]  }
 0xb04   : > { %18969 = vmatpush1.bf16.msra.mxu0 %v23278_v34  ;;  %v23354_v34 = vld [vmem:[#allocation13 + $0x48] sm:$0xff]  }
 0xb05   : > { %19010 = vmatpush1.bf16.msra.mxu1 %v23281_v55  ;;  %18970 = vmatprep.subr.bf16.mxu0 %v23286_v60  ;;  %v23355_v55 = vld [vmem:[#allocation13 + $0xc8] sm:$0xff]  }
 0xb06   : > { %19011 = vmatprep.subr.bf16.mxu1 %v23289_v22  ;;  %v23357_v60 = vld [vmem:[#allocation13 + $0x88] sm:$0xff]   ;;  %v23358_v22 = vld [vmem:[#allocation13 + $0x50] sm:$0xff]  }
 0xb08   : > { %18971 = vmatpush1.bf16.msra.mxu0 %v23284_v45  ;;  %v23359_v45 = vld [vmem:[#allocation13 + $0xd0] sm:$0xff]  }
 0xb09   : > { %19012 = vmatpush1.bf16.msra.mxu1 %v23287_v52  ;;  %18972 = vmatprep.subr.bf16.mxu0 %v23292_v0  ;;  %v23360_v52 = vld [vmem:[#allocation13 + $0x10] sm:$0xff]  }
 0xb0a   : > { %19013 = vmatprep.subr.bf16.mxu1 %v23295_v33  ;;  %v23361_v0 = vld [vmem:[#allocation13 + $0x90] sm:$0xff]   ;;  %v23362_v33 = vld [vmem:[#allocation13 + $0x58] sm:$0xff]  }
 0xb0c   : > { %18973 = vmatpush1.bf16.msra.mxu0 %v23290_v51  ;;  %v23363_v51 = vld [vmem:[#allocation13 + $0xd8] sm:$0xff]  }
 0xb0d   : > { %19014 = vmatpush1.bf16.msra.mxu1 %v23293_v36  ;;  %18974 = vmatprep.subr.bf16.mxu0 %v23298_v56  ;;  %v23364_v36 = vld [vmem:[#allocation13 + $0x18] sm:$0xff]  }
 0xb0e   : > { %19015 = vmatprep.subr.bf16.mxu1 %v23301_v12  ;;  %v23365_v56 = vld [vmem:[#allocation13 + $0x98] sm:$0xff]   ;;  %v23366_v12 = vld [vmem:[#allocation13 + $0x60] sm:$0xff]  }
 0xb10   : > { %18975 = vmatpush1.bf16.msra.mxu0 %v23296_v28  ;;  %v23367_v28 = vld [vmem:[#allocation13 + $0xe0] sm:$0xff]  }
 0xb11   : > { %19016 = vmatpush1.bf16.msra.mxu1 %v23299_v26  ;;  %18976 = vmatprep.subr.bf16.mxu0 %v23304_v43  ;;  %v23368_v26 = vld [vmem:[#allocation13 + $0x20] sm:$0xff]  }
 0xb12   : > { %19017 = vmatprep.subr.bf16.mxu1 %v23307_v15  ;;  %v23369_v43 = vld [vmem:[#allocation13 + $0xa0] sm:$0xff]   ;;  %v23370_v15 = vld [vmem:[#allocation13 + $0x68] sm:$0xff]  }
 0xb14   : > { %18977 = vmatpush1.bf16.msra.mxu0 %v23302_v14  ;;  %v23371_v14 = vld [vmem:[#allocation13 + $0xe8] sm:$0xff]  }
 0xb15   : > { %19018 = vmatpush1.bf16.msra.mxu1 %v23305_v8  ;;  %18978 = vmatprep.subr.bf16.mxu0 %v23310_v10 }
 0xb16   : > { %19019 = vmatprep.subr.bf16.mxu1 %v23313_v58  ;;  %v23372_v58 = vld [vmem:[#allocation13 + $0x28] sm:$0xff]  }
 0xb18   : > { %18979 = vmatpush1.bf16.msra.mxu0 %v23308_v50  ;;  %v23373_v50 = vld [vmem:[#allocation13 + $0xa8] sm:$0xff]  }
 0xb19   : > { %19020 = vmatpush1.bf16.msra.mxu1 %v23311_v5  ;;  %18980 = vmatprep.subr.bf16.mxu0 %v23316_v9 }
 0xb1a   : > { %19021 = vmatprep.subr.bf16.mxu1 %v23319_v3 }
 0xb1c   : > { %18981 = vmatpush1.bf16.msra.mxu0 %v23314_v47 }
 0xb1d   : > { %19022 = vmatpush1.bf16.msra.mxu1 %v23317_v63  ;;  %18982 = vmatprep.subr.bf16.mxu0 %v23322_v54 }
 0xb1e   : > { %19023 = vmatprep.subr.bf16.mxu1 %v23325_v61 }
 0xb20   : > { %18983 = vmatpush1.bf16.msra.mxu0 %v23320_v30 }
 0xb21   : > { %19024 = vmatpush1.bf16.msra.mxu1 %v23323_v38  ;;  %18984 = vmatprep.subr.bf16.mxu0 %v23328_v57 }
 0xb22   : > { %19025 = vmatprep.subr.bf16.mxu1 %v23331_v46  ;;  %v23374_v46 = vld [vmem:[#allocation13 + $0x70] sm:$0xff]  }
 0xb24   : > { %18985 = vmatpush1.bf16.msra.mxu0 %v23326_v59  ;;  %v23375_v59 = vld [vmem:[#allocation13 + $0xf0] sm:$0xff]  }
 0xb25   : > { %19026 = vmatpush1.bf16.msra.mxu1 %v23329_v39  ;;  %18986 = vmatprep.subr.bf16.mxu0 %v23334_v13  ;;  %v23376_v39 = vld [vmem:[#allocation13 + $0x30] sm:$0xff]  }
 0xb26   : > { %19027 = vmatprep.subr.bf16.mxu1 %v23337_v24  ;;  %v23377_v13 = vld [vmem:[#allocation13 + $0xb0] sm:$0xff]   ;;  %v23378_v24 = vld [vmem:[#allocation13 + $0x78] sm:$0xff]  }
 0xb28   : > { %18987 = vmatpush1.bf16.msra.mxu0 %v23332_v25  ;;  %v23379_v25 = vld [vmem:[#allocation13 + $0xf8] sm:$0xff]  }
 0xb29   : > { %19028 = vmatpush1.bf16.msra.mxu1 %v23335_v27  ;;  %18988 = vmatprep.subr.bf16.mxu0 %v23340_v41  ;;  %v23380_v27 = vld [vmem:[#allocation13 + $0x38] sm:$0xff]  }
 0xb2a   : > { %19029 = vmatprep.subr.bf16.mxu1 %v23343_v32  ;;  %v23381_v41 = vld [vmem:[#allocation13 + $0xb8] sm:$0xff]  }
 0xb2c   : > { %18989 = vmatpush1.bf16.msra.mxu0 %v23338_v53 }
 0xb2d   : > { %19030 = vmatpush1.bf16.msra.mxu1 %v23341_v6  ;;  %18990 = vmatprep.subr.bf16.mxu0 %v23346_v48 }
 0xb2e   : > { %19031 = vmatprep.subr.bf16.mxu1 %v23349_v20 }
 0xb30   : > { %18991 = vmatpush1.bf16.msra.mxu0 %v23344_v4 }
 0xb31   : > { %19032 = vmatpush1.bf16.msra.mxu1 %v23347_v42  ;;  %21494 = vmatprep.subr.bf16.mxu0 %v23350_v19 }
 0xb32   : > { %21516 = vmatprep.subr.bf16.mxu1 %v23351_v29 }
 0xb33   : > { %18993 = vmatmul.mubr.bf16.vlgmr.msra.gmra.mrb[100].mxu0 %v18636_v44 }
 0xb34   : > { %19034 = vmatmul.mubr.bf16.vlgmr.msra.gmra.mrb[100].mxu1 %v18636_v44  ;;  %21495 = vmatpush3.bf16.msra.mxu0 %v23352_v17 }
 0xb35   : > { %21517 = vmatpush3.bf16.msra.mxu1 %v23353_v40  ;;  %21496 = vmatprep.subr.bf16.mxu0 %v23354_v34 }
 0xb36   : > { %21518 = vmatprep.subr.bf16.mxu1 %v23355_v55 }
 0xb38   : > { %21497 = vmatpush3.bf16.msra.mxu0 %v23356_v2 }
 0xb39   : > { %21519 = vmatpush3.bf16.msra.mxu1 %v23357_v60  ;;  %21498 = vmatprep.subr.bf16.mxu0 %v23358_v22 }
 0xb3a   : > { %21520 = vmatprep.subr.bf16.mxu1 %v23359_v45 }
 0xb3c   : > { %21499 = vmatpush3.bf16.msra.mxu0 %v23360_v52 }
 0xb3d   : > { %21521 = vmatpush3.bf16.msra.mxu1 %v23361_v0  ;;  %21500 = vmatprep.subr.bf16.mxu0 %v23362_v33 }
 0xb3e   : > { %21522 = vmatprep.subr.bf16.mxu1 %v23363_v51 }
 0xb40   : > { %21501 = vmatpush3.bf16.msra.mxu0 %v23364_v36 }
 0xb41   : > { %21523 = vmatpush3.bf16.msra.mxu1 %v23365_v56  ;;  %21502 = vmatprep.subr.bf16.mxu0 %v23366_v12 }
 0xb42   : > { %21524 = vmatprep.subr.bf16.mxu1 %v23367_v28 }
 0xb44   : > { %21503 = vmatpush3.bf16.msra.mxu0 %v23368_v26 }
 0xb45   : > { %21525 = vmatpush3.bf16.msra.mxu1 %v23369_v43  ;;  %21504 = vmatprep.subr.bf16.mxu0 %v23370_v15 }
 0xb46   : > { %v17648_v31 = vpop.f32.mrb[88].mxu0  ;;  %v17689_v23 = vpop.f32.mrb[88].mxu1  ;;  %21526 = vmatprep.subr.bf16.mxu1 %v23371_v14 }
 0xb47   : > { %v17650_v62 = vpop.f32.mrb[89].mxu0  ;;  %v17691_v1 = vpop.f32.mrb[89].mxu1 }
 0xb48   : > { %v17652_v21 = vpop.f32.mrb[90].mxu0  ;;  %v17693_v18 = vpop.f32.mrb[90].mxu1  ;;  %21505 = vmatpush3.bf16.msra.mxu0 %v23372_v58 }
 0xb49   : > { %v17653_v7 = vpop.f32.mrb[91].mxu0  ;;  %v17694_v16 = vpop.f32.mrb[91].mxu1  ;;  %21527 = vmatpush3.bf16.msra.mxu1 %v23373_v50  ;;  %21506 = vmatprep.subr.bf16.mxu0 %v23374_v46  ;;  %v19046_v21 = vld [vmem:[#allocation11] sm:$0xf] }
 0xb4a   : > { %21528 = vmatprep.subr.bf16.mxu1 %v23375_v59  ;;  %v19051_v18 = vrot.slane %v19046_v21, %v26293_v11  ;;  %v19059_v16 = vrot.slane %v19046_v21, %v26294_v37  ;;  %v19055_v19 = vrot.slane %v19046_v21, %v26295_v35  ;;  %v19063_v34 = vrot.slane %v19046_v21, %v26296_v49 }
 0xb4c   : > { %21507 = vmatpush3.bf16.msra.mxu0 %v23376_v39 }
 0xb4d   : > { %21529 = vmatpush3.bf16.msra.mxu1 %v23377_v13  ;;  %21508 = vmatprep.subr.bf16.mxu0 %v23378_v24 }
 0xb4e   : > { %21530 = vmatprep.subr.bf16.mxu1 %v23379_v25 }
 0xb50   : > { %21509 = vmatpush3.bf16.msra.mxu0 %v23380_v27 }
 0xb51   : > { %21531 = vmatpush3.bf16.msra.mxu1 %v23381_v41 }
 0xb86   : > { %v18050_v8 = vpop.f32.mrb[92].mxu0  ;;  %v18091_v10 = vpop.f32.mrb[92].mxu1 }
 0xb87   : > { %v18051_v5 = vadd.f32 %v18050_v8, %v17648_v31  ;;  %v18092_v9 = vadd.f32 %v18091_v10, %v17689_v23  ;;  %v18052_v3 = vpop.f32.mrb[93].mxu0  ;;  %v18093_v47 = vpop.f32.mrb[93].mxu1  ;;  %v21459_v10 = vld [vmem:[#allocation14] ss:$0 sm:$0xff] }
 0xb88   : > { %v18053_v63 = vadd.f32 %v18052_v3, %v17650_v62  ;;  %v18094_v54 = vadd.f32 %v18093_v47, %v17691_v1  ;;  %v18054_v61 = vpop.f32.mrb[94].mxu0  ;;  %v18095_v30 = vpop.f32.mrb[94].mxu1 }
 0xb89   : > { %v18055_v38 = vpop.f32.mrb[95].mxu0  ;;  %v18096_v57 = vpop.f32.mrb[95].mxu1 }
 0xbc6   : > { %v18517_v32 = vpop.f32.mrb[96].mxu0 }
 0xbc7   : > { %v18565_v53 = vadd.f32 %v18517_v32, %v18051_v5  ;;  %v18558_v6 = vpop.f32.mrb[96].mxu1  ;;  %v18519_v48 = vpop.f32.mrb[97].mxu0 }
 0xbc8   : > { %v18567_v20 = vadd.f32 %v18558_v6, %v18092_v9  ;;  %v18566_v4 = vadd.f32 %v18519_v48, %v18053_v63  ;;  %v18560_v42 = vpop.f32.mrb[97].mxu1  ;;  %v18521_v44 = vpop.f32.mrb[98].mxu0 }
 0xbc9   : > { %v18568_v31 = vadd.f32 %v18560_v42, %v18094_v54  ;;  %v18562_v23 = vpop.f32.mrb[98].mxu1  ;;  %v18522_v62 = vpop.f32.mrb[99].mxu0 }
 0xbca   : > { %v18563_v1 = vpop.f32.mrb[99].mxu1 }
 0xc06   : > { %v18994_v7 = vpop.f32.mrb[100].mxu0 }
 0xc07   : > { %v19042_v29 = vadd.f32 %v18994_v7, %v18565_v53  ;;  %v19035_v17 = vpop.f32.mrb[100].mxu1  ;;  %v18996_v40 = vpop.f32.mrb[101].mxu0 }
 0xc08   : > { %v19044_v55 = vadd.f32 %v19035_v17, %v18567_v20  ;;  %v19043_v2 = vadd.f32 %v18996_v40, %v18566_v4  ;;  %v19037_v60 = vpop.f32.mrb[101].mxu1  ;;  %v18998_v22 = vpop.f32.mrb[102].mxu0 }
 0xc09   : > { %v19068_v45 = vadd.f32 %v19051_v18, %v19042_v29  ;;  %v19045_v52 = vadd.f32 %v19037_v60, %v18568_v31  ;;  %v19039_v0 = vpop.f32.mrb[102].mxu1  ;;  %v18999_v33 = vpop.f32.mrb[103].mxu0 }
 0xc0a   : > { %v19070_v51 = vadd.f32 %v19059_v16, %v19044_v55  ;;  %v19069_v11 = vadd.f32 %v19055_v19, %v19043_v2  ;;  %v19040_v36 = vpop.f32.mrb[103].mxu1 }
 0xc0b   : > { %v19072_v56 = vmax.f32 %v19068_v45, 0.0  ;;  %v19071_v37 = vadd.f32 %v19063_v34, %v19045_v52 }
 0xc0c   : > { %v19074_v12 = vmax.f32 %v19070_v51, 0.0  ;;  %v19073_v35 = vmax.f32 %v19069_v11, 0.0 }
 0xc0d   : > { %v19075_v28 = vmax.f32 %v19071_v37, 0.0  ;;  %v19076_v43 = vpack.c.bf16 %v19072_v56, %v19072_v56 }
 0xc0e   : > { %v19077_v26 = vpack.c.bf16 %v19073_v35, %v19073_v35  ;;  %v19078_v49 = vpack.c.bf16 %v19074_v12, %v19074_v12 }
 0xc0f   : > { %v19079_v15 = vpack.c.bf16 %v19075_v28, %v19075_v28 }
 0xc10   : > { %19375 = vmatprep.mubr.bf16.mxu0 %v19077_v26 }
 0xc11   : > { %19415 = vmatprep.mubr.bf16.mxu1 %v19079_v15  ;;  %19376 = vmatmul.mubr.bf16.vlgmr.msra.gmra.mrb[104].mxu0 %v19076_v43 }
 0xc12   : > { %19416 = vmatmul.mubr.bf16.vlgmr.msra.gmra.mrb[104].mxu1 %v19078_v49 }
 0xce4   : > { %v21510_v14 = vpop.f32.mrb[104].mxu0 }
 0xce5   : > { %v21532_v8 = vpop.f32.mrb[104].mxu1  ;;  %v21511_v58 = vpop.f32.mrb[105].mxu0 }
 0xce6   : > { %v21512_v50 = vadd.f32 %v21511_v58, %v21510_v14  ;;  %v21533_v5 = vpop.f32.mrb[105].mxu1  ;;  %v21513_v9 = vpop.f32.mrb[106].mxu0 }
 0xce7   : > { %v21534_v3 = vadd.f32 %v21533_v5, %v21532_v8  ;;  %v21535_v47 = vpop.f32.mrb[106].mxu1  ;;  %v21514_v63 = vpop.f32.mrb[107].mxu0 }
 0xce8   : > { %v19378_v54 = vadd.f32 %v21512_v50, %v21459_v10  ;;  %v21536_v61 = vpop.f32.mrb[107].mxu1 }
 0xcea   : > { %v19418_v30 = vadd.f32 %v21534_v3, %v19378_v54 }
 0xcec   : > { %19423 = vmax.xlane.f32.xlu0 %v19418_v30 }
 0xd79   : > { %v19424_v38 = vpop.xlane.xlu0 %19423 }
 0xd7a   : > { %v19425_v57 = vsub.f32 %v19418_v30, %v19424_v38 }
 0xd7c   : > { %v19426_v46 = vmul.f32 1.442695, %v19425_v57 }
 0xd7e   : > { %23382 = vpow2.f32 %v19426_v46 }
 0xd88   : > { %v23383_v59 = vpop.eup %23382 }
 0xd89   : > { %19428 = vadd.xlane.f32.xlu0 %v23383_v59 }
 0xe16   : > { %v19429_v39 = vpop.xlane.xlu0 %19428 }
 0xe17   : > { %23384 = vlog2.f32 %v19429_v39 }
 0xe21   : > { %v23385_v13 = vpop.eup %23384 }
 0xe22   : > { %v19431_v24 = vmul.f32 0.6931472, %v23385_v13 }
 0xe24   : > { %v19432_v25 = vsub.f32 %v19425_v57, %v19431_v24 }
 0xe26   : > { %19433 = vst [vmem:[%s588_s27] sm:$0xff] %v19432_v25 }
 0xe27 PF: > { %s26302_s14 = sld [smem:[#allocation21_spill]]  ;;  %p21_p10 = scmp.ge.s32.totalorder %s23860_s13, 4  }
 0xe28   : > { %s26303_s30 = smov %s23768_s10  ;;  %s26305_s11 = smov %s23860_s13 }
 0xe29   :  { %23 = sbr.rel (!%p21_p10) target bundleno = 9 (0x9), region = 178 }
 0xe2d   : > { %s26304_s10 = smov %s26302_s14 }
 0xe30   :  { %19453 = vsyncpa [#allocation4], 1 }
 0xe31   :  { %19455 = vsyncpa [#allocation4 + $0x1], 1 }
 0xe32   :  { %19456 = vsyncpa [#allocation6], 1 }
 0xe33   :  { %19457 = vsyncpa [#allocation9], 1 }
 0xe34   :  { %19458 = vsyncpa [#allocation12], 1 }
 0xe35   :  { %19459 = vsyncpa [#allocation15], 1 }

</bundles_post_ra>
